<compile_context>
chip_gen: v5e
topology: v5e:2x2
jax: 0.10.0
libtpu: 0.0.40
codegen_flags: <defaults>
</compile_context>

<pallas_src>
import functools

import jax
import jax.numpy as jnp
from jax.experimental import pallas as pl
from jax.experimental.pallas import tpu as pltpu

_EPS = 1e-5
_S = 8          # channels per Res2Net scale (32 / scales=4)


def _bn_relu(z, gamma, beta):
    # training-mode BatchNorm2d over the N*H*W rows, per channel; biased variance,
    # two-pass (centered) so there is no catastrophic cancellation; then ReLU.
    mean = jnp.mean(z, axis=0, keepdims=True)
    zc = z - mean
    var = jnp.mean(zc * zc, axis=0, keepdims=True)
    return jnp.maximum(zc * jax.lax.rsqrt(var + _EPS) * gamma + beta, 0.0)


# ---------------------------------------------------------------------------------
# Pallas kernel
# ---------------------------------------------------------------------------------
def _res2block_kernel(x_ref, w_in_ref, g_in_ref, be_in_ref,
                      w_brn_ref, g_brn_ref, be_brn_ref,
                      w_h_ref, w_c_ref, g_out_ref, be_out_ref,
                      o_ref, hp_ref, *, H, W):
    f32, bf16 = jnp.float32, jnp.bfloat16
    N, C, HW = x_ref.shape
    P = N * HW

    # NCHW slab -> channels-last rows: one in-VMEM transpose (XLU), no HBM relayout.
    x2 = jnp.transpose(x_ref[...], (0, 2, 1)).reshape(P, C)              # [P, 32] f32

    # inconv: 1x1 conv == channel matmul (bf16 MXU operands, f32 acc) + BN + ReLU.
    h = _bn_relu(jnp.dot(x2.astype(bf16), w_in_ref[...],
                         preferred_element_type=f32),
                 g_in_ref[...], be_in_ref[...])                          # [P, 32] f32
    h16 = h.astype(bf16)

    # Zero-padded (pad=1) branch-input buffer, cast to bf16 BEFORE the relayout.
    # Channels 0:24 of the (permuted) h are xs1|xs2|xs3.  Untouched columns of the
    # zeroed scratch are the zero padding (its W axis is sublane-aligned).
    hp_ref[...] = jnp.zeros_like(hp_ref)
    hp_ref[:, 1:H + 1, 1:W + 1, :] = h16[:, :3 * _S].reshape(N, H, W, 3 * _S)

    # im2col: 9 taps x 24 channels -> [P, 216]; the block-diagonal weight applies
    # conv1 / conv2 / conv2 to the three 8-channel groups in ONE MXU matmul.
    taps = [hp_ref[:, dy:dy + H, dx:dx + W, :]
            for dy in range(3) for dx in range(3)]
    patch = jnp.concatenate(taps, axis=-1).reshape(P, 9 * 3 * _S)        # [P, 216] bf16
    # Joint BN over the 24 disjoint branch channels == the three separate torch BN calls.
    c = _bn_relu(jnp.dot(patch, w_brn_ref[...], preferred_element_type=f32),
                 g_brn_ref[...], be_brn_ref[...])                        # [P, 24] f32

    # outconv with the y0 gather + prefix sums + channel concat folded into weights.
    z = (jnp.dot(h16, w_h_ref[...], preferred_element_type=f32)
         + jnp.dot(c.astype(bf16), w_c_ref[...], preferred_element_type=f32))
    z = _bn_relu(z, g_out_ref[...], be_out_ref[...])
    out2 = z + x2                                                        # residual, f32

    # channels-last -> NCHW slab [N, 32, H*W]: lane-dense (256-lane) store.
    o_ref[...] = jnp.transpose(out2.reshape(N, HW, C), (0, 2, 1)).astype(o_ref.dtype)


def res2block_pallas(x_nchw, prepared):
    N, C, H, W = x_nchw.shape
    x_flat = x_nchw.reshape(N, C, H * W).astype(jnp.float32)             # free reshape
    w_pad = ((W + 2 + 7) // 8) * 8                                       # sublane-aligned pad width
    n_in = 1 + len(prepared)
    # TODO(synk): for large N/H/W, add a grid over batch / H-row bands (1-row halo) with
    # a two-pass BN (stats kernel then normalize kernel), mark the band axis "parallel"
    # for v7x's 2 TensorCores, and size blocks against v7x's 64 MiB physical VMEM.
    out_flat = pl.pallas_call(
        functools.partial(_res2block_kernel, H=H, W=W),
        out_shape=jax.ShapeDtypeStruct((N, C, H * W), jnp.float32),
        in_specs=[pl.BlockSpec(memory_space=pltpu.MemorySpace.VMEM)] * n_in,
        out_specs=pl.BlockSpec(memory_space=pltpu.MemorySpace.VMEM),
        scratch_shapes=[pltpu.VMEM((N, H + 2, w_pad, 3 * _S), jnp.bfloat16)],
    )(x_flat, *prepared)
    return out_flat.reshape(N, C, H, W)


# ---------------------------------------------------------------------------------
# One-time parameter packing (outside the kernel)
# ---------------------------------------------------------------------------------
def _prepare_params(params):
    (w_in, b_in, g_in, be_in, w1, b1, g1, be1, w2, b2, g2, be2,
     w_out, b_out, g_out, be_out) = params
    s = w1.shape[-1]
    # Conv biases are a per-channel constant added right before a training-mode BN,
    # so they cancel exactly against the batch mean -> drop them from the kernel.
    del b_in, b1, b2, b_out

    # Permute inconv OUTPUT channels: branch inputs xs1|xs2|xs3 (orig 8:32) -> lanes
    # 0:24, y0 (orig 0:8) -> lanes 24:32.  Pure pre-packing change.
    perm = jnp.concatenate([jnp.arange(s, 4 * s), jnp.arange(0, s)])
    w_in_p, g_in_p, be_in_p = w_in[:, perm], g_in[:, perm], be_in[:, perm]

    # Block-diagonalise conv1 / conv2 / conv2 into one [9*24, 24] im2col weight,
    # rows tap-major to match the kernel's patch layout.
    zero = jnp.zeros((s, s), jnp.float32)
    taps = []
    for dy in range(3):
        for dx in range(3):
            blk = jnp.concatenate([
                jnp.concatenate([w1[dy, dx], zero, zero], axis=1),
                jnp.concatenate([zero, w2[dy, dx], zero], axis=1),
                jnp.concatenate([zero, zero, w2[dy, dx]], axis=1),
            ], axis=0)                                   # [24, 24]
            taps.append(blk)
    w_brn = jnp.concatenate(taps, axis=0)                # [216, 24]
    g_brn = jnp.concatenate([g1, g2, g2], axis=-1)
    be_brn = jnp.concatenate([be1, be2, be2], axis=-1)

    # Fold the torch forward's y0 gather, prefix sums and channel concat into w_out:
    #   y1=c1, y2=c1+c2, y3=c1+c2+c3
    #   z = y0@W0 + c1@(W1+W2+W3) + c2@(W2+W3) + c3@W3
    W0, W1, W2, W3 = (w_out[i * s:(i + 1) * s] for i in range(4))
    w_h = jnp.concatenate([jnp.zeros((3 * s, 4 * s), jnp.float32), W0], axis=0)   # [32, 32]
    w_c = jnp.concatenate([W1 + W2 + W3, W2 + W3, W3], axis=0)                    # [24, 32]

    bf = jnp.bfloat16
    return (w_in_p.astype(bf), g_in_p, be_in_p,
            w_brn.astype(bf), g_brn, be_brn,
            w_h.astype(bf), w_c.astype(bf), g_out, be_out)


def init_params(key, in_channel=32, scales=4):
    out_hidden = 32
    s = out_hidden // scales

    def nrm(k, shape, scale=0.1):
        return (scale * jax.random.normal(k, shape)).astype(jnp.float32)

    ks = jax.random.split(key, 16)
    w_in = nrm(ks[0], (in_channel, out_hidden))            # 1x1 conv as [Cin, Cout]
    b_in = nrm(ks[1], (1, out_hidden))
    g_in = (1.0 + nrm(ks[2], (1, out_hidden))).astype(jnp.float32)
    be_in = nrm(ks[3], (1, out_hidden))

    w1 = nrm(ks[4], (3, 3, s, s))                          # 3x3 conv as [kh, kw, Cin, Cout]
    b1 = nrm(ks[5], (1, s))
    g1 = (1.0 + nrm(ks[6], (1, s))).astype(jnp.float32)
    be1 = nrm(ks[7], (1, s))

    w2 = nrm(ks[8], (3, 3, s, s))
    b2 = nrm(ks[9], (1, s))
    g2 = (1.0 + nrm(ks[10], (1, s))).astype(jnp.float32)
    be2 = nrm(ks[11], (1, s))

    w_out = nrm(ks[12], (out_hidden, out_hidden))
    b_out = nrm(ks[13], (1, out_hidden))
    g_out = (1.0 + nrm(ks[14], (1, out_hidden))).astype(jnp.float32)
    be_out = nrm(ks[15], (1, out_hidden))

    # TODO(synk): the module also defines self.conv3, but forward() never calls it, so
    # its parameters are intentionally not created here.
    return (w_in, b_in, g_in, be_in, w1, b1, g1, be1, w2, b2, g2, be2,
            w_out, b_out, g_out, be_out)


# ---------------------------------------------------------------------------------
# Pure-JAX torch-literal reference (raw / un-packed params, per-branch BNs, biases).
# It uses the same bf16-operand / f32-accumulate matmul precision as the kernel, so
# the check validates the lowering AND the weight packing — not f32 torch parity.
# ---------------------------------------------------------------------------------
def _conv3x3_ref(x, w, b):
    N, H, W, Cin = x.shape
    xp = jnp.pad(x, ((0, 0), (1, 1), (1, 1), (0, 0)))
    taps = [xp[:, dy:dy + H, dx:dx + W, :] for dy in range(3) for dx in range(3)]
    patch = jnp.concatenate(taps, axis=-1).reshape(N * H * W, 9 * Cin)
    return jnp.dot(patch.astype(jnp.bfloat16), w.reshape(9 * Cin, -1).astype(jnp.bfloat16),
                   preferred_element_type=jnp.float32) + b


def res2block_ref(x_nchw, raw):
    (w_in, b_in, g_in, be_in, w1, b1, g1, be1, w2, b2, g2, be2,
     w_out, b_out, g_out, be_out) = raw
    bf = jnp.bfloat16
    x = jnp.transpose(x_nchw, (0, 2, 3, 1)).astype(jnp.float32)        # NHWC
    N, H, W, C = x.shape
    P = N * H * W
    h = jnp.dot(x.reshape(P, C).astype(bf), w_in.astype(bf),
                preferred_element_type=jnp.float32) + b_in
    h = _bn_relu(h, g_in, be_in).reshape(N, H, W, 32)
    xs = [h[..., i * _S:(i + 1) * _S] for i in range(4)]
    y1 = _bn_relu(_conv3x3_ref(xs[1], w1, b1), g1, be1)
    y2 = _bn_relu(_conv3x3_ref(xs[2], w2, b2), g2, be2) + y1
    y3 = _bn_relu(_conv3x3_ref(xs[3], w2, b2), g2, be2) + y2           # forward uses conv2, not conv3
    y = jnp.concatenate([xs[0].reshape(P, _S), y1, y2, y3], axis=-1)
    z = jnp.dot(y.astype(bf), w_out.astype(bf),
                preferred_element_type=jnp.float32) + b_out
    z = _bn_relu(z, g_out, be_out)
    out = z + x.reshape(P, C)
    return jnp.transpose(out.reshape(N, H, W, C), (0, 3, 1, 2))


if __name__ == "__main__":
    key = jax.random.PRNGKey(0)
    kx, kp = jax.random.split(key)
    # in_channel must equal 32 for the residual `y + input` to type-check (as in PyTorch).
    x = jax.random.normal(kx, (2, 32, 16, 16), jnp.float32)            # NCHW, like PyTorch
    raw_params = init_params(kp, in_channel=32, scales=4)
    prepared = _prepare_params(raw_params)

    out = jax.block_until_ready(res2block_pallas(x, prepared))

    ref = res2block_ref(x, raw_params)
    assert out.shape == x.shape and out.dtype == jnp.float32
    # bf16 MXU operands + folded-weight rounding => small drift vs the literal form.
    assert float(jnp.max(jnp.abs(out - ref))) < 5e-2

    print("KERNEL_OK")
</pallas_src>

<mosaic_0001>
module attributes {stable_mosaic.version = 11 : i64} {
  func.func @_res2block_kernel(%arg0: memref<2x32x256xf32, #tpu.memory_space<vmem>>, %arg1: memref<32x32xbf16, #tpu.memory_space<vmem>>, %arg2: memref<1x32xf32, #tpu.memory_space<vmem>>, %arg3: memref<1x32xf32, #tpu.memory_space<vmem>>, %arg4: memref<216x24xbf16, #tpu.memory_space<vmem>>, %arg5: memref<1x24xf32, #tpu.memory_space<vmem>>, %arg6: memref<1x24xf32, #tpu.memory_space<vmem>>, %arg7: memref<32x32xbf16, #tpu.memory_space<vmem>>, %arg8: memref<24x32xbf16, #tpu.memory_space<vmem>>, %arg9: memref<1x32xf32, #tpu.memory_space<vmem>>, %arg10: memref<1x32xf32, #tpu.memory_space<vmem>>, %arg11: memref<2x32x256xf32, #tpu.memory_space<vmem>>, %arg12: memref<2x18x24x24xbf16, #tpu.memory_space<vmem>>) attributes {dimension_semantics = [], scalar_prefetch = 0 : i64, scratch_operands = 1 : i64, tpu.core_type = #tpu.core_type<tc>} {
    %c0 = arith.constant 0 : index
    %c0_0 = arith.constant 0 : index
    %c0_1 = arith.constant 0 : index
    %0 = vector.load %arg0[%c0, %c0_0, %c0_1] : memref<2x32x256xf32, #tpu.memory_space<vmem>>, vector<2x32x256xf32>
    %1 = tpu.transpose %0, [0, 2, 1] : vector<2x32x256xf32> -> vector<2x256x32xf32>
    %2 = vector.shape_cast %1 : vector<2x256x32xf32> to vector<512x32xf32>
    %3 = arith.truncf %2 : vector<512x32xf32> to vector<512x32xbf16>
    %c0_2 = arith.constant 0 : index
    %c0_3 = arith.constant 0 : index
    %4 = vector.load %arg1[%c0_2, %c0_3] : memref<32x32xbf16, #tpu.memory_space<vmem>>, vector<32x32xbf16>
    %cst = arith.constant dense<0.000000e+00> : vector<512x32xf32>
    %5 = tpu.matmul %3, %4, %cst {dimension_numbers = #tpu.dot_dimension_numbers<[1], [0], [0], [1], [0, 0, 1, 1], [], []>} : vector<512x32xbf16>, vector<32x32xbf16>, vector<512x32xf32> -> vector<512x32xf32>
    %c0_4 = arith.constant 0 : index
    %c0_5 = arith.constant 0 : index
    %6 = vector.load %arg2[%c0_4, %c0_5] : memref<1x32xf32, #tpu.memory_space<vmem>>, vector<1x32xf32>
    %c0_6 = arith.constant 0 : index
    %c0_7 = arith.constant 0 : index
    %7 = vector.load %arg3[%c0_6, %c0_7] : memref<1x32xf32, #tpu.memory_space<vmem>>, vector<1x32xf32>
    %cst_8 = arith.constant dense<0.000000e+00> : vector<32xf32>
    %8 = vector.multi_reduction <add>, %5, %cst_8 [0] : vector<512x32xf32> to vector<32xf32>
    %9 = vector.shape_cast %8 : vector<32xf32> to vector<1x32xf32>
    %cst_9 = arith.constant 5.120000e+02 : f32
    %10 = vector.broadcast %cst_9 : f32 to vector<1x32xf32>
    %11 = arith.divf %9, %10 : vector<1x32xf32>
    %12 = vector.broadcast %11 : vector<1x32xf32> to vector<512x32xf32>
    %13 = arith.subf %5, %12 : vector<512x32xf32>
    %14 = arith.mulf %13, %13 : vector<512x32xf32>
    %cst_10 = arith.constant dense<0.000000e+00> : vector<32xf32>
    %15 = vector.multi_reduction <add>, %14, %cst_10 [0] : vector<512x32xf32> to vector<32xf32>
    %16 = vector.shape_cast %15 : vector<32xf32> to vector<1x32xf32>
    %cst_11 = arith.constant 5.120000e+02 : f32
    %17 = vector.broadcast %cst_11 : f32 to vector<1x32xf32>
    %18 = arith.divf %16, %17 : vector<1x32xf32>
    %cst_12 = arith.constant 9.99999974E-6 : f32
    %19 = vector.broadcast %cst_12 : f32 to vector<1x32xf32>
    %20 = arith.addf %18, %19 : vector<1x32xf32>
    %21 = math.rsqrt %20 : vector<1x32xf32>
    %22 = vector.broadcast %21 : vector<1x32xf32> to vector<512x32xf32>
    %23 = arith.mulf %13, %22 : vector<512x32xf32>
    %24 = vector.broadcast %6 : vector<1x32xf32> to vector<512x32xf32>
    %25 = arith.mulf %23, %24 : vector<512x32xf32>
    %26 = vector.broadcast %7 : vector<1x32xf32> to vector<512x32xf32>
    %27 = arith.addf %25, %26 : vector<512x32xf32>
    %cst_13 = arith.constant 0.000000e+00 : f32
    %28 = vector.broadcast %cst_13 : f32 to vector<512x32xf32>
    %29 = arith.maximumf %27, %28 : vector<512x32xf32>
    %30 = arith.truncf %29 : vector<512x32xf32> to vector<512x32xbf16>
    %cst_14 = arith.constant 0.000000e+00 : bf16
    %31 = vector.broadcast %cst_14 : bf16 to vector<2x18x24x24xbf16>
    %c0_15 = arith.constant 0 : index
    %c0_16 = arith.constant 0 : index
    %c0_17 = arith.constant 0 : index
    %c0_18 = arith.constant 0 : index
    %32 = vector.load %arg12[%c0_15, %c0_16, %c0_17, %c0_18] : memref<2x18x24x24xbf16, #tpu.memory_space<vmem>>, vector<2x18x24x24xbf16>
    tpu.vector_store %arg12[%c0_15, %c0_16, %c0_17, %c0_18], %31 {strides = array<i32>} : memref<2x18x24x24xbf16, #tpu.memory_space<vmem>>, vector<2x18x24x24xbf16>,
    %33 = vector.extract_strided_slice %30 {offsets = [0, 0], sizes = [512, 24], strides = [1, 1]} : vector<512x32xbf16> to vector<512x24xbf16>
    %34 = vector.shape_cast %33 : vector<512x24xbf16> to vector<2x16x16x24xbf16>
    %c0_19 = arith.constant 0 : index
    %c1 = arith.constant 1 : index
    %c1_20 = arith.constant 1 : index
    %c0_21 = arith.constant 0 : index
    %35 = vector.load %arg12[%c0_19, %c1, %c1_20, %c0_21] : memref<2x18x24x24xbf16, #tpu.memory_space<vmem>>, vector<2x16x16x24xbf16>
    tpu.vector_store %arg12[%c0_19, %c1, %c1_20, %c0_21], %34 {strides = array<i32>} : memref<2x18x24x24xbf16, #tpu.memory_space<vmem>>, vector<2x16x16x24xbf16>,
    %c0_22 = arith.constant 0 : index
    %c0_23 = arith.constant 0 : index
    %c0_24 = arith.constant 0 : index
    %c0_25 = arith.constant 0 : index
    %36 = vector.load %arg12[%c0_22, %c0_23, %c0_24, %c0_25] : memref<2x18x24x24xbf16, #tpu.memory_space<vmem>>, vector<2x16x16x24xbf16>
    %c0_26 = arith.constant 0 : index
    %c0_27 = arith.constant 0 : index
    %c1_28 = arith.constant 1 : index
    %c0_29 = arith.constant 0 : index
    %37 = vector.load %arg12[%c0_26, %c0_27, %c1_28, %c0_29] : memref<2x18x24x24xbf16, #tpu.memory_space<vmem>>, vector<2x16x16x24xbf16>
    %c0_30 = arith.constant 0 : index
    %c0_31 = arith.constant 0 : index
    %c2 = arith.constant 2 : index
    %c0_32 = arith.constant 0 : index
    %38 = vector.load %arg12[%c0_30, %c0_31, %c2, %c0_32] : memref<2x18x24x24xbf16, #tpu.memory_space<vmem>>, vector<2x16x16x24xbf16>
    %c0_33 = arith.constant 0 : index
    %c1_34 = arith.constant 1 : index
    %c0_35 = arith.constant 0 : index
    %c0_36 = arith.constant 0 : index
    %39 = vector.load %arg12[%c0_33, %c1_34, %c0_35, %c0_36] : memref<2x18x24x24xbf16, #tpu.memory_space<vmem>>, vector<2x16x16x24xbf16>
    %c0_37 = arith.constant 0 : index
    %c1_38 = arith.constant 1 : index
    %c1_39 = arith.constant 1 : index
    %c0_40 = arith.constant 0 : index
    %40 = vector.load %arg12[%c0_37, %c1_38, %c1_39, %c0_40] : memref<2x18x24x24xbf16, #tpu.memory_space<vmem>>, vector<2x16x16x24xbf16>
    %c0_41 = arith.constant 0 : index
    %c1_42 = arith.constant 1 : index
    %c2_43 = arith.constant 2 : index
    %c0_44 = arith.constant 0 : index
    %41 = vector.load %arg12[%c0_41, %c1_42, %c2_43, %c0_44] : memref<2x18x24x24xbf16, #tpu.memory_space<vmem>>, vector<2x16x16x24xbf16>
    %c0_45 = arith.constant 0 : index
    %c2_46 = arith.constant 2 : index
    %c0_47 = arith.constant 0 : index
    %c0_48 = arith.constant 0 : index
    %42 = vector.load %arg12[%c0_45, %c2_46, %c0_47, %c0_48] : memref<2x18x24x24xbf16, #tpu.memory_space<vmem>>, vector<2x16x16x24xbf16>
    %c0_49 = arith.constant 0 : index
    %c2_50 = arith.constant 2 : index
    %c1_51 = arith.constant 1 : index
    %c0_52 = arith.constant 0 : index
    %43 = vector.load %arg12[%c0_49, %c2_50, %c1_51, %c0_52] : memref<2x18x24x24xbf16, #tpu.memory_space<vmem>>, vector<2x16x16x24xbf16>
    %c0_53 = arith.constant 0 : index
    %c2_54 = arith.constant 2 : index
    %c2_55 = arith.constant 2 : index
    %c0_56 = arith.constant 0 : index
    %44 = vector.load %arg12[%c0_53, %c2_54, %c2_55, %c0_56] : memref<2x18x24x24xbf16, #tpu.memory_space<vmem>>, vector<2x16x16x24xbf16>
    %45 = tpu.concatenate %36, %37, %38, %39, %40, %41, %42, %43, %44 in 3 : vector<2x16x16x24xbf16>, vector<2x16x16x24xbf16>, vector<2x16x16x24xbf16>, vector<2x16x16x24xbf16>, vector<2x16x16x24xbf16>, vector<2x16x16x24xbf16>, vector<2x16x16x24xbf16>, vector<2x16x16x24xbf16>, vector<2x16x16x24xbf16> -> vector<2x16x16x216xbf16>
    %46 = vector.shape_cast %45 : vector<2x16x16x216xbf16> to vector<512x216xbf16>
    %c0_57 = arith.constant 0 : index
    %c0_58 = arith.constant 0 : index
    %47 = vector.load %arg4[%c0_57, %c0_58] : memref<216x24xbf16, #tpu.memory_space<vmem>>, vector<216x24xbf16>
    %cst_59 = arith.constant dense<0.000000e+00> : vector<512x24xf32>
    %48 = tpu.matmul %46, %47, %cst_59 {dimension_numbers = #tpu.dot_dimension_numbers<[1], [0], [0], [1], [0, 0, 1, 1], [], []>} : vector<512x216xbf16>, vector<216x24xbf16>, vector<512x24xf32> -> vector<512x24xf32>
    %c0_60 = arith.constant 0 : index
    %c0_61 = arith.constant 0 : index
    %49 = vector.load %arg5[%c0_60, %c0_61] : memref<1x24xf32, #tpu.memory_space<vmem>>, vector<1x24xf32>
    %c0_62 = arith.constant 0 : index
    %c0_63 = arith.constant 0 : index
    %50 = vector.load %arg6[%c0_62, %c0_63] : memref<1x24xf32, #tpu.memory_space<vmem>>, vector<1x24xf32>
    %cst_64 = arith.constant dense<0.000000e+00> : vector<24xf32>
    %51 = vector.multi_reduction <add>, %48, %cst_64 [0] : vector<512x24xf32> to vector<24xf32>
    %52 = vector.shape_cast %51 : vector<24xf32> to vector<1x24xf32>
    %cst_65 = arith.constant 5.120000e+02 : f32
    %53 = vector.broadcast %cst_65 : f32 to vector<1x24xf32>
    %54 = arith.divf %52, %53 : vector<1x24xf32>
    %55 = vector.broadcast %54 : vector<1x24xf32> to vector<512x24xf32>
    %56 = arith.subf %48, %55 : vector<512x24xf32>
    %57 = arith.mulf %56, %56 : vector<512x24xf32>
    %cst_66 = arith.constant dense<0.000000e+00> : vector<24xf32>
    %58 = vector.multi_reduction <add>, %57, %cst_66 [0] : vector<512x24xf32> to vector<24xf32>
    %59 = vector.shape_cast %58 : vector<24xf32> to vector<1x24xf32>
    %cst_67 = arith.constant 5.120000e+02 : f32
    %60 = vector.broadcast %cst_67 : f32 to vector<1x24xf32>
    %61 = arith.divf %59, %60 : vector<1x24xf32>
    %cst_68 = arith.constant 9.99999974E-6 : f32
    %62 = vector.broadcast %cst_68 : f32 to vector<1x24xf32>
    %63 = arith.addf %61, %62 : vector<1x24xf32>
    %64 = math.rsqrt %63 : vector<1x24xf32>
    %65 = vector.broadcast %64 : vector<1x24xf32> to vector<512x24xf32>
    %66 = arith.mulf %56, %65 : vector<512x24xf32>
    %67 = vector.broadcast %49 : vector<1x24xf32> to vector<512x24xf32>
    %68 = arith.mulf %66, %67 : vector<512x24xf32>
    %69 = vector.broadcast %50 : vector<1x24xf32> to vector<512x24xf32>
    %70 = arith.addf %68, %69 : vector<512x24xf32>
    %cst_69 = arith.constant 0.000000e+00 : f32
    %71 = vector.broadcast %cst_69 : f32 to vector<512x24xf32>
    %72 = arith.maximumf %70, %71 : vector<512x24xf32>
    %c0_70 = arith.constant 0 : index
    %c0_71 = arith.constant 0 : index
    %73 = vector.load %arg7[%c0_70, %c0_71] : memref<32x32xbf16, #tpu.memory_space<vmem>>, vector<32x32xbf16>
    %cst_72 = arith.constant dense<0.000000e+00> : vector<512x32xf32>
    %74 = tpu.matmul %30, %73, %cst_72 {dimension_numbers = #tpu.dot_dimension_numbers<[1], [0], [0], [1], [0, 0, 1, 1], [], []>} : vector<512x32xbf16>, vector<32x32xbf16>, vector<512x32xf32> -> vector<512x32xf32>
    %75 = arith.truncf %72 : vector<512x24xf32> to vector<512x24xbf16>
    %c0_73 = arith.constant 0 : index
    %c0_74 = arith.constant 0 : index
    %76 = vector.load %arg8[%c0_73, %c0_74] : memref<24x32xbf16, #tpu.memory_space<vmem>>, vector<24x32xbf16>
    %cst_75 = arith.constant dense<0.000000e+00> : vector<512x32xf32>
    %77 = tpu.matmul %75, %76, %cst_75 {dimension_numbers = #tpu.dot_dimension_numbers<[1], [0], [0], [1], [0, 0, 1, 1], [], []>} : vector<512x24xbf16>, vector<24x32xbf16>, vector<512x32xf32> -> vector<512x32xf32>
    %78 = arith.addf %74, %77 : vector<512x32xf32>
    %c0_76 = arith.constant 0 : index
    %c0_77 = arith.constant 0 : index
    %79 = vector.load %arg9[%c0_76, %c0_77] : memref<1x32xf32, #tpu.memory_space<vmem>>, vector<1x32xf32>
    %c0_78 = arith.constant 0 : index
    %c0_79 = arith.constant 0 : index
    %80 = vector.load %arg10[%c0_78, %c0_79] : memref<1x32xf32, #tpu.memory_space<vmem>>, vector<1x32xf32>
    %cst_80 = arith.constant dense<0.000000e+00> : vector<32xf32>
    %81 = vector.multi_reduction <add>, %78, %cst_80 [0] : vector<512x32xf32> to vector<32xf32>
    %82 = vector.shape_cast %81 : vector<32xf32> to vector<1x32xf32>
    %cst_81 = arith.constant 5.120000e+02 : f32
    %83 = vector.broadcast %cst_81 : f32 to vector<1x32xf32>
    %84 = arith.divf %82, %83 : vector<1x32xf32>
    %85 = vector.broadcast %84 : vector<1x32xf32> to vector<512x32xf32>
    %86 = arith.subf %78, %85 : vector<512x32xf32>
    %87 = arith.mulf %86, %86 : vector<512x32xf32>
    %cst_82 = arith.constant dense<0.000000e+00> : vector<32xf32>
    %88 = vector.multi_reduction <add>, %87, %cst_82 [0] : vector<512x32xf32> to vector<32xf32>
    %89 = vector.shape_cast %88 : vector<32xf32> to vector<1x32xf32>
    %cst_83 = arith.constant 5.120000e+02 : f32
    %90 = vector.broadcast %cst_83 : f32 to vector<1x32xf32>
    %91 = arith.divf %89, %90 : vector<1x32xf32>
    %cst_84 = arith.constant 9.99999974E-6 : f32
    %92 = vector.broadcast %cst_84 : f32 to vector<1x32xf32>
    %93 = arith.addf %91, %92 : vector<1x32xf32>
    %94 = math.rsqrt %93 : vector<1x32xf32>
    %95 = vector.broadcast %94 : vector<1x32xf32> to vector<512x32xf32>
    %96 = arith.mulf %86, %95 : vector<512x32xf32>
    %97 = vector.broadcast %79 : vector<1x32xf32> to vector<512x32xf32>
    %98 = arith.mulf %96, %97 : vector<512x32xf32>
    %99 = vector.broadcast %80 : vector<1x32xf32> to vector<512x32xf32>
    %100 = arith.addf %98, %99 : vector<512x32xf32>
    %cst_85 = arith.constant 0.000000e+00 : f32
    %101 = vector.broadcast %cst_85 : f32 to vector<512x32xf32>
    %102 = arith.maximumf %100, %101 : vector<512x32xf32>
    %103 = arith.addf %102, %2 : vector<512x32xf32>
    %104 = vector.shape_cast %103 : vector<512x32xf32> to vector<2x256x32xf32>
    %105 = tpu.transpose %104, [0, 2, 1] : vector<2x256x32xf32> -> vector<2x32x256xf32>
    %c0_86 = arith.constant 0 : index
    %c0_87 = arith.constant 0 : index
    %c0_88 = arith.constant 0 : index
    %106 = vector.load %arg11[%c0_86, %c0_87, %c0_88] : memref<2x32x256xf32, #tpu.memory_space<vmem>>, vector<2x32x256xf32>
    tpu.vector_store %arg11[%c0_86, %c0_87, %c0_88], %105 {strides = array<i32>} : memref<2x32x256xf32, #tpu.memory_space<vmem>>, vector<2x32x256xf32>,
    return
  }
}

</mosaic_0001>

<bundles_post_ra>
// kernel: tpu_custom_call.1
= control target key start
LH: loop header
LB: loop body
LE: loop exit
PB: predicated region body
PF: predicated region fallthrough
CT: control target
= control target key end

     0   :  { %16 = vsyncpa [#allocation4], 0  ;;  %s18308_s0 = inlined_call_operand.vmem [shape: f32[2,32,256], index: 0, kind: input, shape index: {}]   ;;  %s18309_s1 = inlined_call_operand.hbm [shape: bf16[32,32], index: 1, kind: input, shape index: {}]   ;;  %s18310_s2 = inlined_call_operand.vmem [shape: f32[1,32], index: 2, kind: input, shape index: {}]   ;;  %s18311_s3 = inlined_call_operand.vmem [shape: f32[1,32], index: 3, kind: input, shape index: {}]   ;;  %s18312_s4 = inlined_call_operand.vmem [shape: bf16[216,24], index: 4, kind: input, shape index: {}]   ;;  %s18313_s5 = inlined_call_operand.vmem [shape: f32[1,24], index: 5, kind: input, shape index: {}]   ;;  %s18314_s6 = inlined_call_operand.vmem [shape: f32[1,24], index: 6, kind: input, shape index: {}]   ;;  %s18315_s7 = inlined_call_operand.hbm [shape: bf16[32,32], index: 7, kind: input, shape index: {}]   ;;  %s18316_s8 = inlined_call_operand.hbm [shape: bf16[24,32], index: 8, kind: input, shape index: {}]   ;;  %s18317_s9 = inlined_call_operand.vmem [shape: f32[1,32], index: 9, kind: input, shape index: {}]   ;;  %s18318_s10 = inlined_call_operand.vmem [shape: f32[1,32], index: 10, kind: input, shape index: {}]   ;;  %s18319_s11 = inlined_call_operand.hbm [shape: f32[2,32,256], index: 11, kind: output, shape index: {}]  }
   0x1   :  { %17 = vsyncpa [#allocation7], 0 }
   0x2   :  { %18 = vsyncpa [#allocation5], 0  ;;  %s48_s19 = sshll.u32 %s18315_s7, 4  ;;  %s9941_s20 = smov [#allocation6]   ;;  %s49_s19 = int_to_ptr.hbm [resolvable:$true] %s48_s19 }
   0x3   :  { %s50_s21 = sshll.u32 %s9941_s20, 4  ;;  %s25_s24 = sshll.u32 %s18309_s1, 4  ;;  %s51_s21 = int_to_ptr.vmem [resolvable:$true] %s50_s21  ;;  %s26_s24 = int_to_ptr.hbm [resolvable:$true] %s25_s24 }
   0x4   :  { %s9942_s25 = smov 64   ;;  %s9943_s26 = smov 4  }
   0x5   :  { %56 = dma.hbm_to_vmem [thread:$0]  %s49_s19, 256, %s51_s21, [#allocation7], %s9942_s25, %s9942_s25, %s9943_s26  }
   0x6   :  { %s9944_s27 = smov [#allocation3]   ;;  %s61_s7 = sshll.u32 %s18316_s8, 4  ;;  %s62_s7 = int_to_ptr.hbm [resolvable:$true] %s61_s7 }
   0x7   :  { %s27_s28 = sshll.u32 %s9944_s27, 4  ;;  %s9945_s12 = smov [#allocation8]   ;;  %s28_s28 = int_to_ptr.vmem [resolvable:$true] %s27_s28 }
   0x8   :  { %33 = dma.hbm_to_vmem [thread:$0]  %s26_s24, 256, %s28_s28, [#allocation4], %s9942_s25, %s9942_s25, %s9943_s26  }
   0x9   :  { %s63_s13 = sshll.u32 %s9945_s12, 4  ;;  %s64_s13 = int_to_ptr.vmem [resolvable:$true] %s63_s13 }
   0xa   :  { %69 = dma.hbm_to_vmem [thread:$0]  %s62_s7, 192, %s64_s13, [#allocation7], %s9942_s25, %s9942_s25, %s9943_s26  }
   0xb   :  { %9905 = dma.done.wait [#allocation4], 256  }
   0xc   :  { %9906 = vsyncadd [#allocation4], 4294967040 }
   0xd   :  { %9907 = dma.done.wait [#allocation7], 448  }
   0xe   :  { %9908 = vsyncadd [#allocation7], 4294966848  ;;  %v88_v0 = vld [vmem:[%s18308_s0 + $0x8] sm:$0xff]  ;;  %v87_v1 = vld [vmem:[%s18308_s0] sm:$0xff]  ;;  %vm279_vm0 = vcmask 261120   ;;  %vm1287_vm1 = vcmask 191488  }
   0xf   :  { %135 = vxpose.xlu1.b32.start [1/4] (short) %v88_v0, 128  ;;  %103 = vxpose.xlu0.b32.start [1/4] (short) %v87_v1, 128  ;;  %v95_v2 = vld [vmem:[%s18308_s0 + $0x40] sm:$0xff]  ;;  %v90_v3 = vld [vmem:[%s18308_s0 + $0x18] sm:$0xff]  ;;  %v89_v4 = vld [vmem:[%s18308_s0 + $0x10] sm:$0xff]  ;;  %vm1396_vm6 = vsmask.f32 256  ;;  %vm2047_vm8 = vcmask 188416  }
  0x10   :  { %167 = vxpose.xlu2.b32.start [1/4] (short) %v95_v2, 128  ;;  %v97_v5 = vld [vmem:[%s18308_s0 + $0x50] sm:$0xff]  ;;  %v92_v6 = vld [vmem:[%s18308_s0 + $0x28] sm:$0xff]  ;;  %v91_v7 = vld [vmem:[%s18308_s0 + $0x20] sm:$0xff]  ;;  %vm1397_vm7 = vsmask.f32 4368  ;;  %vm3455_vm13 = vcmask 1046528  }
  0x11   :  { %v99_v8 = vld [vmem:[%s18308_s0 + $0x60] sm:$0xff]  ;;  %v94_v9 = vld [vmem:[%s18308_s0 + $0x38] sm:$0xff]  ;;  %v93_v10 = vld [vmem:[%s18308_s0 + $0x30] sm:$0xff]  ;;  %vm2041_vm11 = vsmask.f32 7938  ;;  %s9950_s27 = smov 72  }
  0x12   :  { %v101_v11 = vld [vmem:[%s18308_s0 + $0x70] sm:$0xff]  ;;  %v96_v12 = vld [vmem:[%s18308_s0 + $0x48] sm:$0xff]  ;;  %v9255_v13 = vld [vmem:[#allocation3 + $0x8] sm:$0xff]  ;;  %vm2910_vm14 = vsmask.f32 7424  ;;  %s9951_s28 = smov 16  }
  0x13   :  { %v98_v14 = vld [vmem:[%s18308_s0 + $0x58] sm:$0xff]  ;;  %382 = vmatpush.bf16.msra.mxu0 %v9255_v13  ;;  %v9254_v15 = vld [vmem:[#allocation3] sm:$0xff]  ;;  %9654 = vmatpush.bf16.msra.mxu1 %v9255_v13  ;;  %v100_v16 = vld [vmem:[%s18308_s0 + $0x68] sm:$0xff]  ;;  %s9952_s29 = smov 120   ;;  %s9953_s30 = smov 40   ;;  %vm6389_vm15 = vcmask 1043456  }
  0x14   :  { %9655 = vmatpush.bf16.msra.mxu2 %v9255_v13  ;;  %9656 = vmatpush.bf16.msra.mxu3 %v9255_v13  ;;  %v102_v17 = vld [vmem:[%s18308_s0 + $0x78] sm:$0xff]  ;;  %vm11379_vm9 = vmor %vm1396_vm6, %vm1397_vm7  ;;  %s9954_s7 = smov 96   ;;  %vm5794_vm7 = vcmask 588800   ;;  %s9956_s22 = smov 256  }
  0x15   :  { %vm11395_vm10 = vmand %vm2047_vm8, %vm1396_vm6  ;;  %vm5729_vm6 = vcmask 392192   ;;  %vm5859_vm8 = vcmask 785408  }
  0x16   :  { %vm11959_vm12 = vmand %vm1287_vm1, %vm2041_vm11 }
  0x17   :  { %136 = vxpose.xlu1.b32.cont [2/4] (short) %v90_v3, 128  ;;  %104 = vxpose.xlu0.b32.cont [2/4] (short) %v89_v4, 128 }
  0x18   :  { %168 = vxpose.xlu2.b32.cont [2/4] (short) %v97_v5, 128  ;;  %383 = vmatpush.bf16.msra.mxu0 %v9254_v15 }
  0x19   :  { %9657 = vmatpush.bf16.msra.mxu1 %v9254_v15  ;;  %9658 = vmatpush.bf16.msra.mxu2 %v9254_v15 }
  0x1a   :  { %9659 = vmatpush.bf16.msra.mxu3 %v9254_v15 }
  0x1f   :  { %137 = vxpose.xlu1.b32.cont [3/4] (short) %v92_v6, 128  ;;  %105 = vxpose.xlu0.b32.cont [3/4] (short) %v91_v7, 128 }
  0x20   :  { %169 = vxpose.xlu2.b32.cont [3/4] (short) %v99_v8, 128 }
  0x27   :  { %138 = vxpose.xlu1.b32.end [4/4] (short) %v94_v9, 128  ;;  %106 = vxpose.xlu0.b32.end [4/4] (short) %v93_v10, 128  ;;  %v9946_v10 = vmov 0  }
  0x28   :  { %170 = vxpose.xlu2.b32.end [4/4] (short) %v101_v11, 128  ;;  %1291 = vst.msk [vmem:[#allocation2 + $0xc] sm:$0xf] %vm1287_vm1, %v9946_v10 }
  0x29   :  { %1288 = vst.msk [vmem:[#allocation2] sm:$0xf] %vm1287_vm1, %v9946_v10 }
  0x2a   :  { %1289 = vst.msk [vmem:[#allocation2 + $0x4] sm:$0xf] %vm1287_vm1, %v9946_v10 }
  0x2b   :  { %1290 = vst.msk [vmem:[#allocation2 + $0x8] sm:$0xf] %vm1287_vm1, %v9946_v10 }
  0x2c   :  { %1292 = vst.msk [vmem:[#allocation2 + $0x10] sm:$0xf] %vm1287_vm1, %v9946_v10 }
  0x2d   :  { %1293 = vst.msk [vmem:[#allocation2 + $0x14] sm:$0xf] %vm1287_vm1, %v9946_v10 }
  0x2e   :  { %1294 = vst.msk [vmem:[#allocation2 + $0x18] sm:$0xf] %vm1287_vm1, %v9946_v10 }
  0x2f   :  { %1295 = vst.msk [vmem:[#allocation2 + $0x1c] sm:$0xf] %vm1287_vm1, %v9946_v10 }
  0x30   :  { %1296 = vst.msk [vmem:[#allocation2 + $0x20] sm:$0xf] %vm1287_vm1, %v9946_v10 }
  0x31   :  { %1297 = vst.msk [vmem:[#allocation2 + $0x24] sm:$0xf] %vm1287_vm1, %v9946_v10 }
  0x32   :  { %1298 = vst.msk [vmem:[#allocation2 + $0x28] sm:$0xf] %vm1287_vm1, %v9946_v10 }
  0x33   :  { %1299 = vst.msk [vmem:[#allocation2 + $0x2c] sm:$0xf] %vm1287_vm1, %v9946_v10 }
  0x34   :  { %1300 = vst.msk [vmem:[#allocation2 + $0x30] sm:$0xf] %vm1287_vm1, %v9946_v10 }
  0x35   :  { %1301 = vst.msk [vmem:[#allocation2 + $0x34] sm:$0xf] %vm1287_vm1, %v9946_v10 }
  0x36   :  { %1302 = vst.msk [vmem:[#allocation2 + $0x38] sm:$0xf] %vm1287_vm1, %v9946_v10 }
  0x37   :  { %1303 = vst.msk [vmem:[#allocation2 + $0x3c] sm:$0xf] %vm1287_vm1, %v9946_v10 }
  0x38   :  { %1304 = vst.msk [vmem:[#allocation2 + $0x40] sm:$0xf] %vm1287_vm1, %v9946_v10 }
  0x39   :  { %1305 = vst.msk [vmem:[#allocation2 + $0x44] sm:$0xf] %vm1287_vm1, %v9946_v10 }
  0x3a   :  { %1306 = vst.msk [vmem:[#allocation2 + $0x48] sm:$0xf] %vm1287_vm1, %v9946_v10 }
  0x3b   :  { %1307 = vst.msk [vmem:[#allocation2 + $0x4c] sm:$0xf] %vm1287_vm1, %v9946_v10 }
  0x3c   :  { %1308 = vst.msk [vmem:[#allocation2 + $0x50] sm:$0xf] %vm1287_vm1, %v9946_v10 }
  0x3d   :  { %1309 = vst.msk [vmem:[#allocation2 + $0x54] sm:$0xf] %vm1287_vm1, %v9946_v10 }
  0x3e   :  { %1310 = vst.msk [vmem:[#allocation2 + $0x58] sm:$0xf] %vm1287_vm1, %v9946_v10 }
  0x3f   :  { %1311 = vst.msk [vmem:[#allocation2 + $0x5c] sm:$0xf] %vm1287_vm1, %v9946_v10 }
  0x40   :  { %1312 = vst.msk [vmem:[#allocation2 + $0x60] sm:$0xf] %vm1287_vm1, %v9946_v10 }
  0x41   :  { %1313 = vst.msk [vmem:[#allocation2 + $0x64] sm:$0xf] %vm1287_vm1, %v9946_v10 }
  0x42   :  { %1314 = vst.msk [vmem:[#allocation2 + $0x68] sm:$0xf] %vm1287_vm1, %v9946_v10 }
  0x43   :  { %1315 = vst.msk [vmem:[#allocation2 + $0x6c] sm:$0xf] %vm1287_vm1, %v9946_v10 }
  0x44   :  { %1316 = vst.msk [vmem:[#allocation2 + $0x70] sm:$0xf] %vm1287_vm1, %v9946_v10 }
  0x45   :  { %1317 = vst.msk [vmem:[#allocation2 + $0x74] sm:$0xf] %vm1287_vm1, %v9946_v10 }
  0x46   :  { %1318 = vst.msk [vmem:[#allocation2 + $0x78] sm:$0xf] %vm1287_vm1, %v9946_v10 }
  0x47   :  { %1319 = vst.msk [vmem:[#allocation2 + $0x7c] sm:$0xf] %vm1287_vm1, %v9946_v10 }
  0x48   :  { %1320 = vst.msk [vmem:[#allocation2 + $0x80] sm:$0xf] %vm1287_vm1, %v9946_v10 }
  0x49   :  { %1321 = vst.msk [vmem:[#allocation2 + $0x84] sm:$0xf] %vm1287_vm1, %v9946_v10 }
  0x4a   :  { %1322 = vst.msk [vmem:[#allocation2 + $0x88] sm:$0xf] %vm1287_vm1, %v9946_v10 }
  0x4b   :  { %1323 = vst.msk [vmem:[#allocation2 + $0x8c] sm:$0xf] %vm1287_vm1, %v9946_v10 }
  0x4c   :  { %1324 = vst.msk [vmem:[#allocation2 + $0x90] sm:$0xf] %vm1287_vm1, %v9946_v10 }
  0x4d   :  { %1325 = vst.msk [vmem:[#allocation2 + $0x94] sm:$0xf] %vm1287_vm1, %v9946_v10 }
  0x4e   :  { %1326 = vst.msk [vmem:[#allocation2 + $0x98] sm:$0xf] %vm1287_vm1, %v9946_v10 }
  0x4f   :  { %1327 = vst.msk [vmem:[#allocation2 + $0x9c] sm:$0xf] %vm1287_vm1, %v9946_v10 }
  0x50   :  { %1328 = vst.msk [vmem:[#allocation2 + $0xa0] sm:$0xf] %vm1287_vm1, %v9946_v10 }
  0x51   :  { %1329 = vst.msk [vmem:[#allocation2 + $0xa4] sm:$0xf] %vm1287_vm1, %v9946_v10 }
  0x52   :  { %1330 = vst.msk [vmem:[#allocation2 + $0xa8] sm:$0xf] %vm1287_vm1, %v9946_v10 }
  0x53   :  { %1331 = vst.msk [vmem:[#allocation2 + $0xac] sm:$0xf] %vm1287_vm1, %v9946_v10 }
  0x54   :  { %1332 = vst.msk [vmem:[#allocation2 + $0xb0] sm:$0xf] %vm1287_vm1, %v9946_v10 }
  0x55   :  { %1333 = vst.msk [vmem:[#allocation2 + $0xb4] sm:$0xf] %vm1287_vm1, %v9946_v10 }
  0x56   :  { %1334 = vst.msk [vmem:[#allocation2 + $0xb8] sm:$0xf] %vm1287_vm1, %v9946_v10 }
  0x57   :  { %1335 = vst.msk [vmem:[#allocation2 + $0xbc] sm:$0xf] %vm1287_vm1, %v9946_v10 }
  0x58   :  { %1336 = vst.msk [vmem:[#allocation2 + $0xc0] sm:$0xf] %vm1287_vm1, %v9946_v10 }
  0x59   :  { %1337 = vst.msk [vmem:[#allocation2 + $0xc4] sm:$0xf] %vm1287_vm1, %v9946_v10 }
  0x5a   :  { %1338 = vst.msk [vmem:[#allocation2 + $0xc8] sm:$0xf] %vm1287_vm1, %v9946_v10 }
  0x5b   :  { %1339 = vst.msk [vmem:[#allocation2 + $0xcc] sm:$0xf] %vm1287_vm1, %v9946_v10 }
  0x5c   :  { %1340 = vst.msk [vmem:[#allocation2 + $0xd0] sm:$0xf] %vm1287_vm1, %v9946_v10 }
  0x5d   :  { %1341 = vst.msk [vmem:[#allocation2 + $0xd4] sm:$0xf] %vm1287_vm1, %v9946_v10 }
  0x5e   :  { %1342 = vst.msk [vmem:[#allocation2 + $0xd8] sm:$0xf] %vm1287_vm1, %v9946_v10 }
  0x5f   :  { %1343 = vst.msk [vmem:[#allocation2 + $0xdc] sm:$0xf] %vm1287_vm1, %v9946_v10 }
  0x60   :  { %1344 = vst.msk [vmem:[#allocation2 + $0xe0] sm:$0xf] %vm1287_vm1, %v9946_v10 }
  0x61   :  { %1345 = vst.msk [vmem:[#allocation2 + $0xe4] sm:$0xf] %vm1287_vm1, %v9946_v10 }
  0x62   :  { %1346 = vst.msk [vmem:[#allocation2 + $0xe8] sm:$0xf] %vm1287_vm1, %v9946_v10 }
  0x63   :  { %1347 = vst.msk [vmem:[#allocation2 + $0xec] sm:$0xf] %vm1287_vm1, %v9946_v10 }
  0x64   :  { %1348 = vst.msk [vmem:[#allocation2 + $0xf0] sm:$0xf] %vm1287_vm1, %v9946_v10 }
  0x65   :  { %1349 = vst.msk [vmem:[#allocation2 + $0xf4] sm:$0xf] %vm1287_vm1, %v9946_v10 }
  0x66   :  { %1350 = vst.msk [vmem:[#allocation2 + $0xf8] sm:$0xf] %vm1287_vm1, %v9946_v10 }
  0x67   :  { %1351 = vst.msk [vmem:[#allocation2 + $0xfc] sm:$0xf] %vm1287_vm1, %v9946_v10 }
  0x68   :  { %1352 = vst.msk [vmem:[#allocation2 + $0x100] sm:$0xf] %vm1287_vm1, %v9946_v10 }
  0x69   :  { %1353 = vst.msk [vmem:[#allocation2 + $0x104] sm:$0xf] %vm1287_vm1, %v9946_v10 }
  0x6a   :  { %1354 = vst.msk [vmem:[#allocation2 + $0x108] sm:$0xf] %vm1287_vm1, %v9946_v10 }
  0x6b   :  { %1355 = vst.msk [vmem:[#allocation2 + $0x10c] sm:$0xf] %vm1287_vm1, %v9946_v10 }
  0x6c   :  { %1356 = vst.msk [vmem:[#allocation2 + $0x110] sm:$0xf] %vm1287_vm1, %v9946_v10 }
  0x6d   :  { %1357 = vst.msk [vmem:[#allocation2 + $0x114] sm:$0xf] %vm1287_vm1, %v9946_v10 }
  0x6e   :  { %1358 = vst.msk [vmem:[#allocation2 + $0x118] sm:$0xf] %vm1287_vm1, %v9946_v10 }
  0x6f   :  { %1359 = vst.msk [vmem:[#allocation2 + $0x11c] sm:$0xf] %vm1287_vm1, %v9946_v10 }
  0x70   :  { %1360 = vst.msk [vmem:[#allocation2 + $0x120] sm:$0xf] %vm1287_vm1, %v9946_v10 }
  0x71   :  { %1361 = vst.msk [vmem:[#allocation2 + $0x124] sm:$0xf] %vm1287_vm1, %v9946_v10 }
  0x72   :  { %1362 = vst.msk [vmem:[#allocation2 + $0x128] sm:$0xf] %vm1287_vm1, %v9946_v10 }
  0x73   :  { %1363 = vst.msk [vmem:[#allocation2 + $0x12c] sm:$0xf] %vm1287_vm1, %v9946_v10 }
  0x74   :  { %1364 = vst.msk [vmem:[#allocation2 + $0x130] sm:$0xf] %vm1287_vm1, %v9946_v10 }
  0x75   :  { %1365 = vst.msk [vmem:[#allocation2 + $0x134] sm:$0xf] %vm1287_vm1, %v9946_v10 }
  0x76   :  { %1366 = vst.msk [vmem:[#allocation2 + $0x138] sm:$0xf] %vm1287_vm1, %v9946_v10 }
  0x77   :  { %1367 = vst.msk [vmem:[#allocation2 + $0x13c] sm:$0xf] %vm1287_vm1, %v9946_v10 }
  0x78   :  { %1368 = vst.msk [vmem:[#allocation2 + $0x140] sm:$0xf] %vm1287_vm1, %v9946_v10 }
  0x79   :  { %1369 = vst.msk [vmem:[#allocation2 + $0x144] sm:$0xf] %vm1287_vm1, %v9946_v10 }
  0x7a   :  { %1370 = vst.msk [vmem:[#allocation2 + $0x148] sm:$0xf] %vm1287_vm1, %v9946_v10 }
  0x7b   :  { %1371 = vst.msk [vmem:[#allocation2 + $0x14c] sm:$0xf] %vm1287_vm1, %v9946_v10 }
  0x7c   :  { %1372 = vst.msk [vmem:[#allocation2 + $0x150] sm:$0xf] %vm1287_vm1, %v9946_v10 }
  0x7d   :  { %1373 = vst.msk [vmem:[#allocation2 + $0x154] sm:$0xf] %vm1287_vm1, %v9946_v10 }
  0x7e   :  { %1374 = vst.msk [vmem:[#allocation2 + $0x158] sm:$0xf] %vm1287_vm1, %v9946_v10 }
  0x7f   :  { %1375 = vst.msk [vmem:[#allocation2 + $0x15c] sm:$0xf] %vm1287_vm1, %v9946_v10 }
  0x80   :  { %1376 = vst.msk [vmem:[#allocation2 + $0x160] sm:$0xf] %vm1287_vm1, %v9946_v10 }
  0x81   :  { %1377 = vst.msk [vmem:[#allocation2 + $0x164] sm:$0xf] %vm1287_vm1, %v9946_v10 }
  0x82   :  { %1378 = vst.msk [vmem:[#allocation2 + $0x168] sm:$0xf] %vm1287_vm1, %v9946_v10 }
  0x83   :  { %1379 = vst.msk [vmem:[#allocation2 + $0x16c] sm:$0xf] %vm1287_vm1, %v9946_v10 }
  0x84   :  { %1380 = vst.msk [vmem:[#allocation2 + $0x170] sm:$0xf] %vm1287_vm1, %v9946_v10 }
  0x85   :  { %1381 = vst.msk [vmem:[#allocation2 + $0x174] sm:$0xf] %vm1287_vm1, %v9946_v10 }
  0x86   :  { %1382 = vst.msk [vmem:[#allocation2 + $0x178] sm:$0xf] %vm1287_vm1, %v9946_v10 }
  0x87   :  { %1383 = vst.msk [vmem:[#allocation2 + $0x17c] sm:$0xf] %vm1287_vm1, %v9946_v10 }
  0x88   :  { %1384 = vst.msk [vmem:[#allocation2 + $0x180] sm:$0xf] %vm1287_vm1, %v9946_v10 }
  0x89   :  { %1385 = vst.msk [vmem:[#allocation2 + $0x184] sm:$0xf] %vm1287_vm1, %v9946_v10 }
  0x8a   :  { %1386 = vst.msk [vmem:[#allocation2 + $0x188] sm:$0xf] %vm1287_vm1, %v9946_v10 }
  0x8b   :  { %1387 = vst.msk [vmem:[#allocation2 + $0x18c] sm:$0xf] %vm1287_vm1, %v9946_v10 }
  0x8c   :  { %1388 = vst.msk [vmem:[#allocation2 + $0x190] sm:$0xf] %vm1287_vm1, %v9946_v10 }
  0x8d   :  { %1389 = vst.msk [vmem:[#allocation2 + $0x194] sm:$0xf] %vm1287_vm1, %v9946_v10 }
  0x8e   :  { %1390 = vst.msk [vmem:[#allocation2 + $0x198] sm:$0xf] %vm1287_vm1, %v9946_v10 }
  0x8f   :  { %199 = vxpose.xlu0.b32.start [1/4] (short) %v96_v12, 128  ;;  %1391 = vst.msk [vmem:[#allocation2 + $0x19c] sm:$0xf] %vm1287_vm1, %v9946_v10 }
  0x90   :  { %1392 = vst.msk [vmem:[#allocation2 + $0x1a0] sm:$0xf] %vm1287_vm1, %v9946_v10 }
  0x91   :  { %1393 = vst.msk [vmem:[#allocation2 + $0x1a4] sm:$0xf] %vm1287_vm1, %v9946_v10 }
  0x92   :  { %1394 = vst.msk [vmem:[#allocation2 + $0x1a8] sm:$0xf] %vm1287_vm1, %v9946_v10 }
  0x93   :  { %1395 = vst.msk [vmem:[#allocation2 + $0x1ac] sm:$0xf] %vm1287_vm1, %v9946_v10 }
  0x97   :  { %200 = vxpose.xlu0.b32.cont [2/4] (short) %v98_v14, 128 }
  0x9f   :  { %201 = vxpose.xlu0.b32.cont [3/4] (short) %v100_v16, 128 }
  0xa7   :  { %202 = vxpose.xlu0.b32.end [4/4] (short) %v102_v17, 128 }
  0xa9   :  { %v10080_v18 = vpop.trf.xlu2 }
  0xaa   :  { %18742 = vst [vmem:[#allocation13_spill] sm:$0xff] %v10080_v18 }
  0xb1   :  { %v10082_v19 = vpop.trf.xlu2 }
  0xb2   :  { %18743 = vst [vmem:[#allocation14_spill] sm:$0xff] %v10082_v19 }
  0xb3   :  { %v10084_v20 = vpop.trf.xlu1  ;;  %v10086_v21 = vpop.trf.xlu0 }
  0xb4   :  { %18744 = vst [vmem:[#allocation15_spill] sm:$0xff] %v10084_v20 }
  0xb5   :  { %18745 = vst [vmem:[#allocation16_spill] sm:$0xff] %v10086_v21 }
  0xb9   :  { %v10088_v22 = vpop.trf.xlu2 }
  0xba   :  { %18746 = vst [vmem:[#allocation17_spill] sm:$0xff] %v10088_v22 }
  0xbb   :  { %v10090_v23 = vpop.trf.xlu1  ;;  %v10092_v24 = vpop.trf.xlu0 }
  0xbc   :  { %18747 = vst [vmem:[#allocation18_spill] sm:$0xff] %v10090_v23  ;;  %v231_v25 = vpack.c.bf16 %v10092_v24, %v10086_v21 }
  0xbd   :  { %18748 = vst [vmem:[#allocation19_spill] sm:$0xff] %v10092_v24 }
  0xbe   :  { %9062 = vmatmul.msk.bf16.vlgmr.msra.gmra.mxu0 %vm279_vm0, %v231_v25 }
  0xc1   :  { %v10097_v26 = vpop.trf.xlu2 }
  0xc2   :  { %18749 = vst [vmem:[#allocation20_spill] sm:$0xff] %v10097_v26 }
  0xc3   :  { %v10099_v27 = vpop.trf.xlu1  ;;  %v10101_v28 = vpop.trf.xlu0 }
  0xc4   :  { %18750 = vst [vmem:[#allocation21_spill] sm:$0xff] %v10099_v27 }
  0xc5   :  { %18751 = vst [vmem:[#allocation22_spill] sm:$0xff] %v10101_v28 }
  0xc9   :  { %v10103_v29 = vpop.trf.xlu2 }
  0xca   :  { %18752 = vst [vmem:[#allocation23_spill] sm:$0xff] %v10103_v29 }
  0xcb   :  { %v10105_v30 = vpop.trf.xlu1  ;;  %v10107_v31 = vpop.trf.xlu0 }
  0xcc   :  { %18753 = vst [vmem:[#allocation24_spill] sm:$0xff] %v10105_v30  ;;  %v240_v32 = vpack.c.bf16 %v10105_v30, %v10099_v27  ;;  %v232_v33 = vpack.c.bf16 %v10107_v31, %v10101_v28 }
  0xcd   :  { %18754 = vst [vmem:[#allocation25_spill] sm:$0xff] %v10107_v31 }
  0xce   :  { %9063 = vmatmul.msk.bf16.gmra.mxu0 %vm279_vm0, %v232_v33  ;;  %9071 = vmatmul.msk.bf16.vlgmr.msra.gmra.mxu1 %vm279_vm0, %v240_v32 }
  0xd1   :  { %v10115_v34 = vpop.trf.xlu2 }
  0xd2   :  { %18755 = vst [vmem:[#allocation26_spill] sm:$0xff] %v10115_v34 }
  0xd3   :  { %v10117_v35 = vpop.trf.xlu1  ;;  %v10119_v36 = vpop.trf.xlu0 }
  0xd4   :  { %18756 = vst [vmem:[#allocation27_spill] sm:$0xff] %v10117_v35 }
  0xd5   :  { %18757 = vst [vmem:[#allocation28_spill] sm:$0xff] %v10119_v36 }
  0xd9   :  { %v10121_v37 = vpop.trf.xlu2 }
  0xda   :  { %18758 = vst [vmem:[#allocation29_spill] sm:$0xff] %v10121_v37 }
  0xdb   :  { %v10123_v38 = vpop.trf.xlu1  ;;  %v10125_v39 = vpop.trf.xlu0 }
  0xdc   :  { %18759 = vst [vmem:[#allocation30_spill] sm:$0xff] %v10123_v38  ;;  %v241_v40 = vpack.c.bf16 %v10123_v38, %v10117_v35  ;;  %v233_v41 = vpack.c.bf16 %v10125_v39, %v10119_v36 }
  0xdd   :  { %18760 = vst [vmem:[#allocation31_spill] sm:$0xff] %v10125_v39 }
  0xde   :  { %9064 = vmatmul.msk.bf16.gmra.mxu0 %vm279_vm0, %v233_v41  ;;  %9072 = vmatmul.msk.bf16.gmra.mxu1 %vm279_vm0, %v241_v40  ;;  %v239_v41 = vpack.c.bf16 %v10090_v23, %v10084_v20 }
  0xe1   :  { %v10133_v42 = vpop.trf.xlu2 }
  0xe2   :  { %18761 = vst [vmem:[#allocation32_spill] sm:$0xff] %v10133_v42 }
  0xe3   :  { %v10135_v43 = vpop.trf.xlu1  ;;  %v10137_v44 = vpop.trf.xlu0 }
  0xe4   :  { %18762 = vst [vmem:[#allocation33_spill] sm:$0xff] %v10135_v43 }
  0xe5   :  { %18763 = vst [vmem:[#allocation34_spill] sm:$0xff] %v10137_v44 }
  0xe9   :  { %v10139_v45 = vpop.trf.xlu2 }
  0xea   :  { %18764 = vst [vmem:[#allocation35_spill] sm:$0xff] %v10139_v45 }
  0xeb   :  { %v10141_v46 = vpop.trf.xlu1  ;;  %v10143_v47 = vpop.trf.xlu0 }
  0xec   :  { %18765 = vst [vmem:[#allocation36_spill] sm:$0xff] %v10141_v46  ;;  %v242_v48 = vpack.c.bf16 %v10141_v46, %v10135_v43  ;;  %v234_v49 = vpack.c.bf16 %v10143_v47, %v10137_v44 }
  0xed   :  { %18766 = vst [vmem:[#allocation37_spill] sm:$0xff] %v10143_v47 }
  0xee   :  { %9065 = vmatmul.msk.bf16.gmra.mxu0 %vm279_vm0, %v234_v49  ;;  %9073 = vmatmul.msk.bf16.gmra.mxu1 %vm279_vm0, %v242_v48  ;;  %v247_v48 = vpack.c.bf16 %v10082_v19, %v10080_v18 }
  0xf1   :  { %v10151_v50 = vpop.trf.xlu2 }
  0xf2   :  { %18767 = vst [vmem:[#allocation38_spill] sm:$0xff] %v10151_v50 }
  0xf3   :  { %v10153_v51 = vpop.trf.xlu1  ;;  %v10155_v52 = vpop.trf.xlu0 }
  0xf4   :  { %18768 = vst [vmem:[#allocation39_spill] sm:$0xff] %v10153_v51 }
  0xf5   :  { %18769 = vst [vmem:[#allocation40_spill] sm:$0xff] %v10155_v52 }
  0xf9   :  { %v10157_v53 = vpop.trf.xlu2 }
  0xfa   :  { %18770 = vst [vmem:[#allocation41_spill] sm:$0xff] %v10157_v53 }
  0xfb   :  { %v10159_v54 = vpop.trf.xlu1  ;;  %v10161_v55 = vpop.trf.xlu0 }
  0xfc   :  { %18771 = vst [vmem:[#allocation42_spill] sm:$0xff] %v10159_v54  ;;  %v243_v56 = vpack.c.bf16 %v10159_v54, %v10153_v51  ;;  %v235_v57 = vpack.c.bf16 %v10161_v55, %v10155_v52 }
  0xfd   :  { %18772 = vst [vmem:[#allocation43_spill] sm:$0xff] %v10161_v55 }
  0xfe   :  { %9066 = vmatmul.msk.bf16.gmra.mxu0 %vm279_vm0, %v235_v57  ;;  %9074 = vmatmul.msk.bf16.gmra.mxu1 %vm279_vm0, %v243_v56 }
 0x101   :  { %v10169_v58 = vpop.trf.xlu2 }
 0x102   :  { %18773 = vst [vmem:[#allocation44_spill] sm:$0xff] %v10169_v58 }
 0x103   :  { %v10171_v59 = vpop.trf.xlu1  ;;  %v10173_v60 = vpop.trf.xlu0 }
 0x104   :  { %18774 = vst [vmem:[#allocation45_spill] sm:$0xff] %v10171_v59 }
 0x105   :  { %18775 = vst [vmem:[#allocation46_spill] sm:$0xff] %v10173_v60 }
 0x109   :  { %v10175_v61 = vpop.trf.xlu2 }
 0x10a   :  { %18776 = vst [vmem:[#allocation47_spill] sm:$0xff] %v10175_v61 }
 0x10b   :  { %v10177_v62 = vpop.trf.xlu1  ;;  %v10179_v63 = vpop.trf.xlu0 }
 0x10c   :  { %18777 = vst [vmem:[#allocation48_spill] sm:$0xff] %v10177_v62  ;;  %v244_v0 = vpack.c.bf16 %v10177_v62, %v10171_v59  ;;  %v236_v1 = vpack.c.bf16 %v10179_v63, %v10173_v60 }
 0x10d   :  { %18778 = vst [vmem:[#allocation49_spill] sm:$0xff] %v10179_v63 }
 0x10e   :  { %9067 = vmatmul.msk.bf16.gmra.mxu0 %vm279_vm0, %v236_v1  ;;  %9075 = vmatmul.msk.bf16.gmra.mxu1 %vm279_vm0, %v244_v0  ;;  %v248_v1 = vpack.c.bf16 %v10097_v26, %v10088_v22 }
 0x111   :  { %v10187_v2 = vpop.trf.xlu2 }
 0x112   :  { %18779 = vst [vmem:[#allocation50_spill] sm:$0xff] %v10187_v2 }
 0x113   :  { %v10189_v3 = vpop.trf.xlu1  ;;  %v10191_v4 = vpop.trf.xlu0 }
 0x114   :  { %18780 = vst [vmem:[#allocation51_spill] sm:$0xff] %v10189_v3 }
 0x115   :  { %18781 = vst [vmem:[#allocation52_spill] sm:$0xff] %v10191_v4 }
 0x119   :  { %v10193_v5 = vpop.trf.xlu2 }
 0x11a   :  { %18782 = vst [vmem:[#allocation53_spill] sm:$0xff] %v10193_v5 }
 0x11b   :  { %v10195_v6 = vpop.trf.xlu1  ;;  %v10197_v7 = vpop.trf.xlu0 }
 0x11c   :  { %18783 = vst [vmem:[#allocation54_spill] sm:$0xff] %v10195_v6  ;;  %v245_v8 = vpack.c.bf16 %v10195_v6, %v10189_v3  ;;  %v237_v9 = vpack.c.bf16 %v10197_v7, %v10191_v4 }
 0x11d   :  { %18784 = vst [vmem:[#allocation55_spill] sm:$0xff] %v10197_v7 }
 0x11e   :  { %9068 = vmatmul.msk.bf16.gmra.mxu0 %vm279_vm0, %v237_v9  ;;  %9076 = vmatmul.msk.bf16.gmra.mxu1 %vm279_vm0, %v245_v8 }
 0x121   :  { %v10213_v11 = vpop.trf.xlu2 }
 0x122   :  { %18785 = vst [vmem:[#allocation56_spill] sm:$0xff] %v10213_v11  ;;  %v254_v12 = vpack.c.bf16 %v10213_v11, %v10193_v5 }
 0x123   :  { %v10221_v13 = vpop.trf.xlu1  ;;  %v10223_v14 = vpop.trf.xlu0 }
 0x124   :  { %18786 = vst [vmem:[#allocation57_spill] sm:$0xff] %v10221_v13  ;;  %9085 = vmatmul.msk.bf16.vlgmr.msra.gmra.mxu3 %vm279_vm0, %v254_v12 }
 0x125   :  { %18787 = vst [vmem:[#allocation58_spill] sm:$0xff] %v10223_v14 }
 0x12b   :  { %v10242_v15 = vpop.trf.xlu1  ;;  %v10244_v16 = vpop.trf.xlu0 }
 0x12c   :  { %18788 = vst [vmem:[#allocation59_spill] sm:$0xff] %v10242_v15  ;;  %v246_v17 = vpack.c.bf16 %v10242_v15, %v10221_v13  ;;  %v238_v25 = vpack.c.bf16 %v10244_v16, %v10223_v14  ;;  %v253_v13 = vpack.c.bf16 %v10187_v2, %v10175_v61 }
 0x12d   :  { %18789 = vst [vmem:[#allocation60_spill] sm:$0xff] %v10244_v16 }
 0x12e   :  { %9069 = vmatmul.msk.bf16.gmra.mxu0 %vm279_vm0, %v238_v25  ;;  %9077 = vmatmul.msk.bf16.vlgmr.msra.gmra.mxu2 %vm279_vm0, %v246_v17 }
 0x133   :  { %v10268_v32 = vpop.trf.xlu0 }
 0x134   :  { %18790 = vst [vmem:[#allocation61_spill] sm:$0xff] %v10268_v32 }
 0x13b   :  { %v10286_v33 = vpop.f32.mrf.mxu0  ;;  %v10290_v40 = vpop.trf.xlu0 }
 0x13c   :  { %18791 = vst [vmem:[#allocation62_spill] sm:$0xff] %v10290_v40  ;;  %v255_v49 = vpack.c.bf16 %v10290_v40, %v10268_v32  ;;  %v252_v40 = vpack.c.bf16 %v10169_v58, %v10157_v53  ;;  %v547_v6 = vsel %vm279_vm0, %v10286_v33, 0.0 }
 0x13e   :  { %9070 = vmatmul.msk.bf16.gmra.mxu0 %vm279_vm0, %v239_v41  ;;  %9078 = vmatmul.msk.bf16.gmra.mxu2 %vm279_vm0, %v247_v48  ;;  %v249_v41 = vpack.c.bf16 %v10115_v34, %v10103_v29 }
 0x13f   :  { %9086 = vmatmul.msk.bf16.gmra.mxu3 %vm279_vm0, %v255_v49 }
 0x143   :  { %v10317_v56 = vpop.f32.mrf.mxu0  ;;  %v10319_v57 = vpop.trf.xlu0 }
 0x144   :  { %18792 = vst [vmem:[#allocation63_spill] sm:$0xff] %v10319_v57  ;;  %v548_v2 = vsel %vm279_vm0, %v10317_v56, 0.0 }
 0x14b   :  { %v10337_v0 = vpop.f32.mrf.mxu0  ;;  %v10343_v8 = vpop.trf.xlu0 }
 0x14c   :  { %18793 = vst [vmem:[#allocation64_spill] sm:$0xff] %v10343_v8  ;;  %v256_v9 = vpack.c.bf16 %v10343_v8, %v10319_v57  ;;  %v550_v4 = vsel %vm279_vm0, %v10337_v0, 0.0 }
 0x14e   :  { %9079 = vmatmul.msk.bf16.gmra.mxu2 %vm279_vm0, %v248_v1 }
 0x14f   :  { %9087 = vmatmul.msk.bf16.gmra.mxu3 %vm279_vm0, %v256_v9 }
 0x153   :  { %v10363_v12 = vpop.f32.mrf.mxu0  ;;  %v10367_v17 = vpop.trf.xlu0 }
 0x154   :  { %18794 = vst [vmem:[#allocation65_spill] sm:$0xff] %v10367_v17 }
 0x15b   :  { %v10383_v25 = vpop.f32.mrf.mxu0  ;;  %v10389_v48 = vpop.trf.xlu0 }
 0x15c   :  { %18795 = vst [vmem:[#allocation66_spill] sm:$0xff] %v10389_v48  ;;  %v257_v49 = vpack.c.bf16 %v10389_v48, %v10367_v17  ;;  %v554_v63 = vsel %vm279_vm0, %v10383_v25, 0.0 }
 0x15e   :  { %9080 = vmatmul.msk.bf16.gmra.mxu2 %vm279_vm0, %v249_v41 }
 0x15f   :  { %9088 = vmatmul.msk.bf16.gmra.mxu3 %vm279_vm0, %v257_v49  ;;  %v250_v49 = vpack.c.bf16 %v10133_v42, %v10121_v37 }
 0x163   :  { %v10409_v1 = vpop.f32.mrf.mxu0  ;;  %v10413_v9 = vpop.trf.xlu0 }
 0x164   :  { %18796 = vst [vmem:[#allocation67_spill] sm:$0xff] %v10413_v9 }
 0x16b   :  { %v10429_v41 = vpop.f32.mrf.mxu0  ;;  %v10435_v48 = vpop.trf.xlu0 }
 0x16c   :  { %18797 = vst [vmem:[#allocation68_spill] sm:$0xff] %v10435_v48  ;;  %v258_v17 = vpack.c.bf16 %v10435_v48, %v10413_v9  ;;  %v251_v9 = vpack.c.bf16 %v10151_v50, %v10139_v45 }
 0x16e   :  { %9081 = vmatmul.msk.bf16.gmra.mxu2 %vm279_vm0, %v250_v49 }
 0x16f   :  { %9089 = vmatmul.msk.bf16.gmra.mxu3 %vm279_vm0, %v258_v17 }
 0x173   :  { %v10455_v48 = vpop.f32.mrf.mxu0  ;;  %v10459_v49 = vpop.trf.xlu0 }
 0x174   :  { %18798 = vst [vmem:[#allocation69_spill] sm:$0xff] %v10459_v49 }
 0x17b   :  { %v10475_v17 = vpop.f32.mrf.mxu0  ;;  %v10481_v8 = vpop.trf.xlu0 }
 0x17c   :  { %18799 = vst [vmem:[#allocation70_spill] sm:$0xff] %v10481_v8  ;;  %v259_v57 = vpack.c.bf16 %v10481_v8, %v10459_v49 }
 0x17e   :  { %9082 = vmatmul.msk.bf16.gmra.mxu2 %vm279_vm0, %v251_v9 }
 0x17f   :  { %9090 = vmatmul.msk.bf16.gmra.mxu3 %vm279_vm0, %v259_v57  ;;  %v10515_v57 = vpop.f32.mrf.mxu1 }
 0x183   :  { %v10501_v8 = vpop.f32.mrf.mxu0  ;;  %v10505_v9 = vpop.trf.xlu0 }
 0x184   :  { %18800 = vst [vmem:[#allocation71_spill] sm:$0xff] %v10505_v9 }
 0x187   :  { %v10527_v15 = vpop.f32.mrf.mxu1 }
 0x18b   :  { %v10517_v49 = vpop.f32.mrf.mxu0  ;;  %v10521_v32 = vpop.trf.xlu0 }
 0x18c   :  { %18801 = vst [vmem:[#allocation72_spill] sm:$0xff] %v10521_v32  ;;  %v260_v16 = vpack.c.bf16 %v10521_v32, %v10505_v9 }
 0x18e   :  { %9083 = vmatmul.msk.bf16.gmra.mxu2 %vm279_vm0, %v252_v40 }
 0x18f   :  { %9091 = vmatmul.msk.bf16.gmra.mxu3 %vm279_vm0, %v260_v16  ;;  %v10539_v7 = vpop.f32.mrf.mxu1 }
 0x193   :  { %v10529_v11 = vpop.f32.mrf.mxu0  ;;  %v10531_v10 = vpop.trf.xlu0 }
 0x194   :  { %18802 = vst [vmem:[#allocation73_spill] sm:$0xff] %v10531_v10 }
 0x197   :  { %v10549_v9 = vpop.f32.mrf.mxu1 }
 0x19b   :  { %v10533_v14 = vpop.f32.mrf.mxu0  ;;  %v10537_v5 = vpop.trf.xlu0 }
 0x19c   :  { %18803 = vst [vmem:[#allocation74_spill] sm:$0xff] %v10537_v5  ;;  %v261_v40 = vpack.c.bf16 %v10537_v5, %v10531_v10  ;;  %v549_v5 = vadd.f32 %v548_v2, %v547_v6  ;;  %v556_v2 = vsel %vm279_vm0, %v10409_v1, 0.0 }
 0x19e   :  { %9084 = vmatmul.msk.bf16.gmra.mxu2 %vm279_vm0, %v253_v13  ;;  %v552_v13 = vsel %vm279_vm0, %v10363_v12, 0.0  ;;  %v551_v3 = vadd.f32 %v550_v4, %v549_v5  ;;  %v558_v4 = vsel %vm279_vm0, %v10429_v41, 0.0 }
 0x19f   :  { %9092 = vmatmul.msk.bf16.gmra.mxu3 %vm279_vm0, %v261_v40  ;;  %v10572_v60 = vpop.f32.mrf.mxu1 }
 0x1a0   :  { %v553_v58 = vadd.f32 %v552_v13, %v551_v3  ;;  %v590_v39 = vsel %vm279_vm0, %v10572_v60, 0.0 }
 0x1a2   :  { %v555_v6 = vadd.f32 %v554_v63, %v553_v58  ;;  %v564_v58 = vsel %vm279_vm0, %v10501_v8, 0.0 }
 0x1a3   :  { %v10545_v16 = vpop.f32.mrf.mxu0  ;;  %v10547_v32 = vpop.trf.xlu0 }
 0x1a4   :  { %18804 = vst [vmem:[#allocation75_spill] sm:$0xff] %v10547_v32  ;;  %v557_v5 = vadd.f32 %v556_v2, %v555_v6  ;;  %v566_v2 = vsel %vm279_vm0, %v10517_v49, 0.0 }
 0x1a6   :  { %v559_v3 = vadd.f32 %v558_v4, %v557_v5  ;;  %v568_v4 = vsel %vm279_vm0, %v10529_v11, 0.0  ;;  %v570_v5 = vsel %vm279_vm0, %v10533_v14, 0.0 }
 0x1a7   :  { %v10567_v62 = vpop.f32.mrf.mxu3  ;;  %v10592_v6 = vpop.f32.mrf.mxu1 }
 0x1a8   :  { %18806 = vst [vmem:[#allocation77_spill] sm:$0xff] %v10567_v62 }
 0x1ab   :  { %v10557_v10 = vpop.f32.mrf.mxu0  ;;  %v10561_v40 = vpop.trf.xlu0 }
 0x1ac   :  { %18805 = vst [vmem:[#allocation76_spill] sm:$0xff] %v10561_v40  ;;  %v262_v61 = vpack.c.bf16 %v10561_v40, %v10547_v32  ;;  %v560_v32 = vsel %vm279_vm0, %v10455_v48, 0.0  ;;  %v574_v51 = vsel %vm279_vm0, %v10557_v10, 0.0 }
 0x1ad   :  { %v561_v13 = vadd.f32 %v560_v32, %v559_v3 }
 0x1af   :  { %9093 = vmatmul.msk.bf16.gmra.mxu3 %vm279_vm0, %v262_v61  ;;  %v562_v61 = vsel %vm279_vm0, %v10475_v17, 0.0  ;;  %v10586_v63 = vpop.f32.mrf.mxu3 }
 0x1b0   :  { %v563_v53 = vadd.f32 %v562_v61, %v561_v13  ;;  %v572_v61 = vsel %vm279_vm0, %v10545_v16, 0.0 }
 0x1b1   :  { %v10574_v59 = vpop.f32.mrf.mxu2 }
 0x1b2   :  { %v565_v54 = vadd.f32 %v564_v58, %v563_v53  ;;  %v606_v22 = vsel %vm279_vm0, %v10574_v59, 0.0 }
 0x1b3   :  { %v10578_v40 = vpop.f32.mrf.mxu0 }
 0x1b4   :  { %v567_v32 = vadd.f32 %v566_v2, %v565_v54  ;;  %v576_v45 = vsel %vm279_vm0, %v10578_v40, 0.0  ;;  %v10610_v54 = vpop.f32.mrf.mxu1 }
 0x1b5   :  { %v594_v36 = vsel %vm279_vm0, %v10610_v54, 0.0 }
 0x1b6   :  { %v569_v3 = vadd.f32 %v568_v4, %v567_v32 }
 0x1b8   :  { %v571_v13 = vadd.f32 %v570_v5, %v569_v3 }
 0x1b9   :  { %v10588_v55 = vpop.f32.mrf.mxu2 }
 0x1ba   :  { %v573_v58 = vadd.f32 %v572_v61, %v571_v13  ;;  %v582_v13 = vsel %vm279_vm0, %v10515_v57, 0.0 }
 0x1bb   :  { %v10594_v50 = vpop.f32.mrf.mxu0 }
 0x1bc   :  { %v575_v2 = vadd.f32 %v574_v51, %v573_v58  ;;  %v578_v4 = vsel %vm279_vm0, %v10594_v50, 0.0  ;;  %v10624_v44 = vpop.f32.mrf.mxu1 }
 0x1be   :  { %v577_v32 = vadd.f32 %v576_v45, %v575_v2  ;;  %v584_v45 = vsel %vm279_vm0, %v10527_v15, 0.0 }
 0x1c0   :  { %v579_v3 = vadd.f32 %v578_v4, %v577_v32  ;;  %v586_v4 = vsel %vm279_vm0, %v10539_v7, 0.0 }
 0x1c1   :  { %v10602_v52 = vpop.f32.mrf.mxu2 }
 0x1c2   :  { %18807 = vst [vmem:[#allocation78_spill] sm:$0xff] %v10602_v52  ;;  %v10606_v53 = vpop.f32.mrf.mxu3 }
 0x1c3   :  { %v10612_v47 = vpop.f32.mrf.mxu0 }
 0x1c4   :  { %v580_v5 = vsel %vm279_vm0, %v10612_v47, 0.0  ;;  %v10634_v37 = vpop.f32.mrf.mxu1 }
 0x1c5   :  { %v581_v61 = vadd.f32 %v580_v5, %v579_v3  ;;  %v588_v3 = vsel %vm279_vm0, %v10549_v9, 0.0  ;;  %v598_v31 = vsel %vm279_vm0, %v10634_v37, 0.0 }
 0x1c7   :  { %v583_v51 = vadd.f32 %v582_v13, %v581_v61 }
 0x1c9   :  { %v10618_v46 = vpop.f32.mrf.mxu2  ;;  %v585_v43 = vadd.f32 %v584_v45, %v583_v51  ;;  %v592_v51 = vsel %vm279_vm0, %v10592_v6, 0.0 }
 0x1ca   :  { %18808 = vst [vmem:[#allocation79_spill] sm:$0xff] %v10618_v46  ;;  %v10620_v42 = vpop.f32.mrf.mxu3 }
 0x1cb   :  { %v587_v32 = vadd.f32 %v586_v4, %v585_v43 }
 0x1cc   :  { %v10650_v45 = vpop.f32.mrf.mxu1 }
 0x1cd   :  { %v589_v13 = vadd.f32 %v588_v3, %v587_v32  ;;  %v596_v32 = vsel %vm279_vm0, %v10624_v44, 0.0 }
 0x1cf   :  { %v591_v38 = vadd.f32 %v590_v39, %v589_v13 }
 0x1d1   :  { %v10626_v58 = vpop.f32.mrf.mxu2  ;;  %v593_v4 = vadd.f32 %v592_v51, %v591_v38  ;;  %v600_v38 = vsel %vm279_vm0, %v10650_v45, 0.0 }
 0x1d2   :  { %18809 = vst [vmem:[#allocation80_spill] sm:$0xff] %v10626_v58  ;;  %v10630_v2 = vpop.f32.mrf.mxu3 }
 0x1d3   :  { %v595_v35 = vadd.f32 %v594_v36, %v593_v4 }
 0x1d4   :  { %v10660_v13 = vpop.f32.mrf.mxu1 }
 0x1d5   :  { %v597_v3 = vadd.f32 %v596_v32, %v595_v35  ;;  %v602_v4 = vsel %vm279_vm0, %v10660_v13, 0.0 }
 0x1d7   :  { %v599_v30 = vadd.f32 %v598_v31, %v597_v3 }
 0x1d9   :  { %v10636_v5 = vpop.f32.mrf.mxu2  ;;  %v601_v51 = vadd.f32 %v600_v38, %v599_v30  ;;  %v608_v30 = vsel %vm279_vm0, %v10588_v55, 0.0 }
 0x1da   :  { %18810 = vst [vmem:[#allocation81_spill] sm:$0xff] %v10636_v5  ;;  %v10640_v61 = vpop.f32.mrf.mxu3 }
 0x1db   :  { %18811 = vst [vmem:[#allocation82_spill] sm:$0xff] %v10640_v61  ;;  %v603_v35 = vadd.f32 %v602_v4, %v601_v51  ;;  %v610_v51 = vsel %vm279_vm0, %v10602_v52, 0.0 }
 0x1dc   :  { %v10672_v28 = vpop.f32.mrf.mxu1 }
 0x1dd   :  { %v604_v27 = vsel %vm279_vm0, %v10672_v28, 0.0 }
 0x1de   :  { %v605_v31 = vadd.f32 %v604_v27, %v603_v35  ;;  %v612_v27 = vsel %vm279_vm0, %v10618_v46, 0.0 }
 0x1e0   :  { %v607_v24 = vadd.f32 %v606_v22, %v605_v31  ;;  %v614_v22 = vsel %vm279_vm0, %v10626_v58, 0.0 }
 0x1e1   :  { %v10644_v34 = vpop.f32.mrf.mxu2 }
 0x1e2   :  { %18812 = vst [vmem:[#allocation83_spill] sm:$0xff] %v10644_v34  ;;  %v10648_v43 = vpop.f32.mrf.mxu3  ;;  %v609_v38 = vadd.f32 %v608_v30, %v607_v24  ;;  %v616_v24 = vsel %vm279_vm0, %v10636_v5, 0.0 }
 0x1e4   :  { %v611_v4 = vadd.f32 %v610_v51, %v609_v38  ;;  %v618_v38 = vsel %vm279_vm0, %v10644_v34, 0.0 }
 0x1e6   :  { %v613_v35 = vadd.f32 %v612_v27, %v611_v4 }
 0x1e8   :  { %v615_v31 = vadd.f32 %v614_v22, %v613_v35 }
 0x1e9   :  { %v10654_v29 = vpop.f32.mrf.mxu2 }
 0x1ea   :  { %18813 = vst [vmem:[#allocation84_spill] sm:$0xff] %v10654_v29  ;;  %v10658_v39 = vpop.f32.mrf.mxu3  ;;  %v617_v30 = vadd.f32 %v616_v24, %v615_v31  ;;  %v620_v4 = vsel %vm279_vm0, %v10654_v29, 0.0 }
 0x1ec   :  { %v619_v51 = vadd.f32 %v618_v38, %v617_v30 }
 0x1ee   :  { %v621_v35 = vadd.f32 %v620_v4, %v619_v51 }
 0x1f1   :  { %v10664_v26 = vpop.f32.mrf.mxu2 }
 0x1f2   :  { %18814 = vst [vmem:[#allocation85_spill] sm:$0xff] %v10664_v26  ;;  %v10668_v36 = vpop.f32.mrf.mxu3  ;;  %v622_v27 = vsel %vm279_vm0, %v10664_v26, 0.0 }
 0x1f3   :  { %18815 = vst [vmem:[#allocation86_spill] sm:$0xff] %v10668_v36  ;;  %v623_v5 = vadd.f32 %v622_v27, %v621_v35 }
 0x1f9   :  { %v10674_v32 = vpop.f32.mrf.mxu2 }
 0x1fa   :  { %v10678_v3 = vpop.f32.mrf.mxu3  ;;  %v624_v22 = vsel %vm279_vm0, %v10674_v32, 0.0 }
 0x1fb   :  { %18816 = vst [vmem:[#allocation87_spill] sm:$0xff] %v10678_v3  ;;  %v625_v24 = vadd.f32 %v624_v22, %v623_v5 }
 0x201   :  { %v10682_v23 = vpop.f32.mrf.mxu2 }
 0x202   :  { %v10686_v19 = vpop.f32.mrf.mxu3  ;;  %v626_v31 = vsel %vm279_vm0, %v10682_v23, 0.0 }
 0x203   :  { %18817 = vst [vmem:[#allocation88_spill] sm:$0xff] %v10686_v19  ;;  %v627_v38 = vadd.f32 %v626_v31, %v625_v24 }
 0x209   :  { %v10690_v21 = vpop.f32.mrf.mxu2 }
 0x20a   :  { %v10696_v20 = vpop.f32.mrf.mxu3  ;;  %v628_v30 = vsel %vm279_vm0, %v10690_v21, 0.0 }
 0x20b   :  { %18818 = vst [vmem:[#allocation89_spill] sm:$0xff] %v10696_v20  ;;  %v629_v58 = vadd.f32 %v628_v30, %v627_v38  ;;  %v638_v30 = vsel %vm279_vm0, %v10567_v62, 0.0  ;;  %v648_v62 = vsel %vm279_vm0, %v10640_v61, 0.0 }
 0x211   :  { %v10698_v18 = vpop.f32.mrf.mxu2 }
 0x212   :  { %18819 = vst [vmem:[#allocation90_spill] sm:$0xff] %v10698_v18  ;;  %v10704_v52 = vpop.f32.mrf.mxu3  ;;  %v630_v29 = vsel %vm279_vm0, %v10698_v18, 0.0 }
 0x213   :  { %18820 = vst [vmem:[#allocation91_spill] sm:$0xff] %v10704_v52  ;;  %v631_v4 = vadd.f32 %v630_v29, %v629_v58  ;;  %v640_v29 = vsel %vm279_vm0, %v10586_v63, 0.0 }
 0x219   :  { %v10706_v46 = vpop.f32.mrf.mxu2 }
 0x21a   :  { %v10722_v26 = vpop.f32.mrf.mxu3  ;;  %v632_v51 = vsel %vm279_vm0, %v10706_v46, 0.0 }
 0x21b   :  { %18821 = vst [vmem:[#allocation92_spill] sm:$0xff] %v10722_v26  ;;  %v633_v5 = vadd.f32 %v632_v51, %v631_v4  ;;  %v642_v51 = vsel %vm279_vm0, %v10606_v53, 0.0 }
 0x221   :  { %v10718_v34 = vpop.f32.mrf.mxu2 }
 0x222   :  { %v634_v27 = vsel %vm279_vm0, %v10718_v34, 0.0  ;;  %v10734_v38 = vpop.f32.mrf.mxu3 }
 0x223   :  { %v635_v35 = vadd.f32 %v634_v27, %v633_v5  ;;  %18822 = vst [vmem:[#allocation93_spill] sm:$0xff] %v10734_v38  ;;  %v644_v27 = vsel %vm279_vm0, %v10620_v42, 0.0 }
 0x229   :  { %v10728_v22 = vpop.f32.mrf.mxu2 }
 0x22a   :  { %v636_v31 = vsel %vm279_vm0, %v10728_v22, 0.0 }
 0x22b   :  { %v637_v24 = vadd.f32 %v636_v31, %v635_v35  ;;  %v646_v35 = vsel %vm279_vm0, %v10630_v2, 0.0 }
 0x22d   :  { %v639_v18 = vadd.f32 %v638_v30, %v637_v24  ;;  %v10746_v30 = vpop.f32.mrf.mxu3 }
 0x22e   :  { %18823 = vst [vmem:[#allocation94_spill] sm:$0xff] %v10746_v30 }
 0x22f   :  { %v641_v58 = vadd.f32 %v640_v29, %v639_v18  ;;  %v650_v18 = vsel %vm279_vm0, %v10648_v43, 0.0 }
 0x231   :  { %v643_v4 = vadd.f32 %v642_v51, %v641_v58  ;;  %v652_v58 = vsel %vm279_vm0, %v10658_v39, 0.0 }
 0x233   :  { %v645_v5 = vadd.f32 %v644_v27, %v643_v4  ;;  %v654_v4 = vsel %vm279_vm0, %v10668_v36, 0.0 }
 0x235   :  { %v647_v31 = vadd.f32 %v646_v35, %v645_v5  ;;  %v656_v5 = vsel %vm279_vm0, %v10678_v3, 0.0  ;;  %v540_v61 = vpop.f32.mrf.mxu3 }
 0x237   :  { %v649_v24 = vadd.f32 %v648_v62, %v647_v31  ;;  %v658_v62 = vsel %vm279_vm0, %v10686_v19, 0.0 }
 0x239   :  { %v651_v29 = vadd.f32 %v650_v18, %v649_v24  ;;  %v660_v24 = vsel %vm279_vm0, %v10696_v20, 0.0 }
 0x23b   :  { %v653_v51 = vadd.f32 %v652_v58, %v651_v29  ;;  %v662_v29 = vsel %vm279_vm0, %v10704_v52, 0.0 }
 0x23d   :  { %v655_v27 = vadd.f32 %v654_v4, %v653_v51  ;;  %v664_v51 = vsel %vm279_vm0, %v10722_v26, 0.0  ;;  %v10768_v19 = vpop.f32.mrf.mxu3 }
 0x23f   :  { %v657_v35 = vadd.f32 %v656_v5, %v655_v27  ;;  %v666_v27 = vsel %vm279_vm0, %v10734_v38, 0.0 }
 0x241   :  { %v659_v31 = vadd.f32 %v658_v62, %v657_v35  ;;  %v668_v35 = vsel %vm279_vm0, %v10746_v30, 0.0 }
 0x243   :  { %v661_v18 = vadd.f32 %v660_v24, %v659_v31  ;;  %v670_v31 = vsel %vm279_vm0, %v540_v61, 0.0 }
 0x245   :  { %v663_v58 = vadd.f32 %v662_v29, %v661_v18  ;;  %v672_v18 = vsel %vm279_vm0, %v10768_v19, 0.0  ;;  %v9947_v29 = vmov 512.0  }
 0x246   :  { %9687 = vrcp.f32 %v9947_v29 }
 0x247   :  { %v665_v4 = vadd.f32 %v664_v51, %v663_v58 }
 0x249   :  { %v667_v5 = vadd.f32 %v666_v27, %v665_v4 }
 0x24b   :  { %v669_v62 = vadd.f32 %v668_v35, %v667_v5 }
 0x24c   :  { %v9688_v51 = vpop.eup %9687 }
 0x24d   :  { %v671_v24 = vadd.f32 %v670_v31, %v669_v62  ;;  %v681_v38 = vmul.f32 512.0, %v9688_v51  ;;  %vm685_vm2 = vweird.f32 %v9688_v51 }
 0x24f   :  { %v673_v26 = vadd.f32 %v672_v18, %v671_v24  ;;  %v682_v27 = vsub.f32 1.0, %v681_v38 }
 0x251   :  { %v674_v58 = vrot.slane %v673_v26, 4  ;;  %v683_v30 = vmul.f32 %v9688_v51, %v682_v27 }
 0x253   :  { %v675_v52 = vadd.f32 %v674_v58, %v673_v26  ;;  %v684_v35 = vadd.f32 %v9688_v51, %v683_v30 }
 0x255   :  { %v676_v4 = vrot.slane %v675_v52, 2  ;;  %v10773_v36 = vsel %vm685_vm2, %v9688_v51, %v684_v35  ;;  %vm6021_vm2 = vcmask 130048  }
 0x256   :  { %18824 = vst [vmem:[#allocation95_spill] sm:$0xff] %v10773_v36 }
 0x257   :  { %v677_v20 = vadd.f32 %v676_v4, %v675_v52 }
 0x259   :  { %v678_v5 = vrot.slane %v677_v20, 1 }
 0x25b   :  { %v679_v3 = vadd.f32 %v678_v5, %v677_v20 }
 0x25d   :  { %v10776_v62 = vmul.f32 %v10773_v36, %v679_v3 }
 0x25f   :  { %v10779_v31 = vsub.f32 %v540_v61, %v10776_v62  ;;  %v10783_v26 = vsub.f32 %v10286_v33, %v10776_v62  ;;  %v10787_v52 = vsub.f32 %v10317_v56, %v10776_v62  ;;  %v10791_v38 = vsub.f32 %v10337_v0, %v10776_v62 }
 0x260   :  { %v10795_v20 = vsub.f32 %v10363_v12, %v10776_v62  ;;  %v10803_v33 = vsub.f32 %v10383_v25, %v10776_v62  ;;  %v10809_v0 = vsub.f32 %v10409_v1, %v10776_v62  ;;  %v10817_v29 = vsub.f32 %v10429_v41, %v10776_v62 }
 0x261   :  { %v752_v61 = vmul.f32 %v10783_v26, %v10783_v26  ;;  %v753_v3 = vmul.f32 %v10787_v52, %v10787_v52  ;;  %v754_v56 = vmul.f32 %v10791_v38, %v10791_v38  ;;  %v10824_v1 = vsub.f32 %v10455_v48, %v10776_v62 }
 0x262   :  { %v755_v12 = vmul.f32 %v10795_v20, %v10795_v20  ;;  %v756_v25 = vmul.f32 %v10803_v33, %v10803_v33  ;;  %v757_v4 = vmul.f32 %v10809_v0, %v10809_v0  ;;  %v10831_v41 = vsub.f32 %v10475_v17, %v10776_v62 }
 0x263   :  { %v816_v30 = vsel %vm279_vm0, %v752_v61, 0.0  ;;  %v817_v24 = vsel %vm279_vm0, %v753_v3, 0.0  ;;  %v819_v58 = vsel %vm279_vm0, %v754_v56, 0.0  ;;  %v758_v35 = vmul.f32 %v10817_v29, %v10817_v29 }
 0x264   :  { %v818_v18 = vadd.f32 %v817_v24, %v816_v30  ;;  %v821_v27 = vsel %vm279_vm0, %v755_v12, 0.0  ;;  %v823_v61 = vsel %vm279_vm0, %v756_v25, 0.0  ;;  %v10838_v48 = vsub.f32 %v10501_v8, %v10776_v62 }
 0x265   :  { %v759_v56 = vmul.f32 %v10824_v1, %v10824_v1  ;;  %v825_v12 = vsel %vm279_vm0, %v757_v4, 0.0  ;;  %v10845_v17 = vsub.f32 %v10517_v49, %v10776_v62  ;;  %v760_v24 = vmul.f32 %v10831_v41, %v10831_v41 }
 0x266   :  { %v820_v51 = vadd.f32 %v819_v58, %v818_v18  ;;  %v827_v18 = vsel %vm279_vm0, %v758_v35, 0.0  ;;  %v10852_v8 = vsub.f32 %v10529_v11, %v10776_v62  ;;  %v761_v58 = vmul.f32 %v10838_v48, %v10838_v48 }
 0x267   :  { %v10859_v49 = vsub.f32 %v10533_v14, %v10776_v62  ;;  %v10866_v11 = vsub.f32 %v10545_v16, %v10776_v62  ;;  %v10873_v14 = vsub.f32 %v10557_v10, %v10776_v62  ;;  %v10880_v16 = vsub.f32 %v10578_v40, %v10776_v62 }
 0x268   :  { %v822_v5 = vadd.f32 %v821_v27, %v820_v51  ;;  %v829_v51 = vsel %vm279_vm0, %v759_v56, 0.0  ;;  %v762_v27 = vmul.f32 %v10845_v17, %v10845_v17  ;;  %v10887_v10 = vsub.f32 %v10594_v50, %v10776_v62 }
 0x269   :  { %v10894_v40 = vsub.f32 %v10612_v47, %v10776_v62  ;;  %v10901_v50 = vsub.f32 %v10515_v57, %v10776_v62  ;;  %v10908_v47 = vsub.f32 %v10527_v15, %v10776_v62  ;;  %v10915_v57 = vsub.f32 %v10539_v7, %v10776_v62 }
 0x26a   :  { %v824_v3 = vadd.f32 %v823_v61, %v822_v5  ;;  %v831_v5 = vsel %vm279_vm0, %v760_v24, 0.0  ;;  %v763_v61 = vmul.f32 %v10852_v8, %v10852_v8  ;;  %v10922_v15 = vsub.f32 %v10549_v9, %v10776_v62 }
 0x26b   :  { %v10929_v7 = vsub.f32 %v10572_v60, %v10776_v62  ;;  %v10936_v9 = vsub.f32 %v10592_v6, %v10776_v62  ;;  %v10943_v60 = vsub.f32 %v10610_v54, %v10776_v62  ;;  %v10950_v6 = vsub.f32 %v10624_v44, %v10776_v62 }
 0x26c   :  { %v826_v30 = vadd.f32 %v825_v12, %v824_v3  ;;  %v833_v3 = vsel %vm279_vm0, %v761_v58, 0.0  ;;  %v764_v12 = vmul.f32 %v10859_v49, %v10859_v49  ;;  %v10957_v54 = vsub.f32 %v10634_v37, %v10776_v62 }
 0x26d   :  { %v10964_v44 = vsub.f32 %v10650_v45, %v10776_v62  ;;  %v10971_v37 = vsub.f32 %v10660_v13, %v10776_v62  ;;  %v10978_v45 = vsub.f32 %v10672_v28, %v10776_v62  ;;  %v10985_v13 = vsub.f32 %v10574_v59, %v10776_v62 }
 0x26e   :  { %v828_v25 = vadd.f32 %v827_v18, %v826_v30  ;;  %v835_v30 = vsel %vm279_vm0, %v762_v27, 0.0  ;;  %v765_v18 = vmul.f32 %v10866_v11, %v10866_v11  ;;  %v10992_v28 = vsub.f32 %v10588_v55, %v10776_v62 }
 0x270   :  { %v830_v4 = vadd.f32 %v829_v51, %v828_v25  ;;  %v837_v25 = vsel %vm279_vm0, %v763_v61, 0.0  ;;  %v766_v51 = vmul.f32 %v10873_v14, %v10873_v14 }
 0x272   :  { %v832_v35 = vadd.f32 %v831_v5, %v830_v4  ;;  %v839_v4 = vsel %vm279_vm0, %v764_v12, 0.0  ;;  %v767_v5 = vmul.f32 %v10880_v16, %v10880_v16 }
 0x274   :  { %v834_v56 = vadd.f32 %v833_v3, %v832_v35  ;;  %v841_v35 = vsel %vm279_vm0, %v765_v18, 0.0  ;;  %v768_v3 = vmul.f32 %v10887_v10, %v10887_v10 }
 0x276   :  { %v836_v24 = vadd.f32 %v835_v30, %v834_v56  ;;  %v843_v56 = vsel %vm279_vm0, %v766_v51, 0.0  ;;  %v769_v30 = vmul.f32 %v10894_v40, %v10894_v40 }
 0x278   :  { %v838_v58 = vadd.f32 %v837_v25, %v836_v24  ;;  %v845_v24 = vsel %vm279_vm0, %v767_v5, 0.0  ;;  %v770_v25 = vmul.f32 %v10901_v50, %v10901_v50 }
 0x27a   :  { %v840_v27 = vadd.f32 %v839_v4, %v838_v58  ;;  %v847_v58 = vsel %vm279_vm0, %v768_v3, 0.0  ;;  %v771_v4 = vmul.f32 %v10908_v47, %v10908_v47 }
 0x27c   :  { %v842_v61 = vadd.f32 %v841_v35, %v840_v27  ;;  %v849_v27 = vsel %vm279_vm0, %v769_v30, 0.0  ;;  %v772_v35 = vmul.f32 %v10915_v57, %v10915_v57 }
 0x27e   :  { %v844_v12 = vadd.f32 %v843_v56, %v842_v61  ;;  %v851_v61 = vsel %vm279_vm0, %v770_v25, 0.0  ;;  %v773_v56 = vmul.f32 %v10922_v15, %v10922_v15 }
 0x280   :  { %v846_v18 = vadd.f32 %v845_v24, %v844_v12  ;;  %v853_v12 = vsel %vm279_vm0, %v771_v4, 0.0  ;;  %v774_v24 = vmul.f32 %v10929_v7, %v10929_v7 }
 0x282   :  { %v848_v51 = vadd.f32 %v847_v58, %v846_v18  ;;  %v855_v18 = vsel %vm279_vm0, %v772_v35, 0.0  ;;  %v775_v58 = vmul.f32 %v10936_v9, %v10936_v9 }
 0x284   :  { %v850_v5 = vadd.f32 %v849_v27, %v848_v51  ;;  %v857_v51 = vsel %vm279_vm0, %v773_v56, 0.0  ;;  %v776_v27 = vmul.f32 %v10943_v60, %v10943_v60 }
 0x286   :  { %v852_v3 = vadd.f32 %v851_v61, %v850_v5  ;;  %v859_v5 = vsel %vm279_vm0, %v774_v24, 0.0  ;;  %v777_v61 = vmul.f32 %v10950_v6, %v10950_v6 }
 0x288   :  { %v854_v30 = vadd.f32 %v853_v12, %v852_v3  ;;  %v861_v3 = vsel %vm279_vm0, %v775_v58, 0.0  ;;  %v778_v12 = vmul.f32 %v10957_v54, %v10957_v54 }
 0x28a   :  { %v856_v25 = vadd.f32 %v855_v18, %v854_v30  ;;  %v863_v30 = vsel %vm279_vm0, %v776_v27, 0.0  ;;  %v779_v18 = vmul.f32 %v10964_v44, %v10964_v44 }
 0x28c   :  { %v858_v4 = vadd.f32 %v857_v51, %v856_v25  ;;  %v865_v25 = vsel %vm279_vm0, %v777_v61, 0.0  ;;  %v780_v51 = vmul.f32 %v10971_v37, %v10971_v37 }
 0x28e   :  { %v860_v35 = vadd.f32 %v859_v5, %v858_v4  ;;  %v867_v4 = vsel %vm279_vm0, %v778_v12, 0.0  ;;  %v781_v5 = vmul.f32 %v10978_v45, %v10978_v45  ;;  %v871_v12 = vsel %vm279_vm0, %v780_v51, 0.0 }
 0x290   :  { %v862_v56 = vadd.f32 %v861_v3, %v860_v35  ;;  %v869_v35 = vsel %vm279_vm0, %v779_v18, 0.0  ;;  %v18825_v3 = vld [vmem:[#allocation78_spill] sm:$0xff]  ;;  %v873_v18 = vsel %vm279_vm0, %v781_v5, 0.0 }
 0x291   :  { %v10999_v59 = vsub.f32 %v18825_v3, %v10776_v62  ;;  %v18831_v3 = vld [vmem:[#allocation81_spill] sm:$0xff] }
 0x292   :  { %v864_v24 = vadd.f32 %v863_v30, %v862_v56  ;;  %v782_v56 = vmul.f32 %v10985_v13, %v10985_v13 }
 0x293   :  { %18826 = vst [vmem:[#allocation78_spill] sm:$0xff] %v10999_v59 }
 0x294   :  { %v866_v58 = vadd.f32 %v865_v25, %v864_v24  ;;  %v18827_v24 = vld [vmem:[#allocation79_spill] sm:$0xff]  ;;  %v783_v25 = vmul.f32 %v10992_v28, %v10992_v28  ;;  %v875_v51 = vsel %vm279_vm0, %v782_v56, 0.0 }
 0x295   :  { %v11006_v55 = vsub.f32 %v18827_v24, %v10776_v62 }
 0x296   :  { %v868_v27 = vadd.f32 %v867_v4, %v866_v58  ;;  %v18829_v4 = vld [vmem:[#allocation80_spill] sm:$0xff]  ;;  %v877_v5 = vsel %vm279_vm0, %v783_v25, 0.0 }
 0x297   :  { %18828 = vst [vmem:[#allocation79_spill] sm:$0xff] %v11006_v55  ;;  %v785_v24 = vmul.f32 %v11006_v55, %v11006_v55 }
 0x298   :  { %v870_v61 = vadd.f32 %v869_v35, %v868_v27  ;;  %v11013_v27 = vsub.f32 %v18829_v4, %v10776_v62  ;;  %v784_v35 = vmul.f32 %v10999_v59, %v10999_v59 }
 0x299   :  { %v881_v25 = vsel %vm279_vm0, %v785_v24, 0.0 }
 0x29a   :  { %v872_v30 = vadd.f32 %v871_v12, %v870_v61  ;;  %18830 = vst [vmem:[#allocation80_spill] sm:$0xff] %v11013_v27  ;;  %v11020_v12 = vsub.f32 %v18831_v3, %v10776_v62  ;;  %v786_v59 = vmul.f32 %v11013_v27, %v11013_v27  ;;  %v879_v56 = vsel %vm279_vm0, %v784_v35, 0.0 }
 0x29c   :  { %v874_v58 = vadd.f32 %v873_v18, %v872_v30  ;;  %v18832_v18 = vld [vmem:[#allocation83_spill] sm:$0xff]  ;;  %v787_v55 = vmul.f32 %v11020_v12, %v11020_v12  ;;  %v883_v35 = vsel %vm279_vm0, %v786_v59, 0.0 }
 0x29d   :  { %v11027_v4 = vsub.f32 %v18832_v18, %v10776_v62 }
 0x29e   :  { %v876_v61 = vadd.f32 %v875_v51, %v874_v58  ;;  %v18833_v51 = vld [vmem:[#allocation84_spill] sm:$0xff]  ;;  %v885_v24 = vsel %vm279_vm0, %v787_v55, 0.0 }
 0x29f   :  { %v11034_v3 = vsub.f32 %v18833_v51, %v10776_v62  ;;  %v788_v27 = vmul.f32 %v11027_v4, %v11027_v4 }
 0x2a0   :  { %v878_v30 = vadd.f32 %v877_v5, %v876_v61  ;;  %v18834_v5 = vld [vmem:[#allocation85_spill] sm:$0xff] }
 0x2a1   :  { %v11041_v18 = vsub.f32 %v18834_v5, %v10776_v62  ;;  %v789_v51 = vmul.f32 %v11034_v3, %v11034_v3  ;;  %v887_v59 = vsel %vm279_vm0, %v788_v27, 0.0 }
 0x2a2   :  { %v880_v58 = vadd.f32 %v879_v56, %v878_v30  ;;  %v11048_v56 = vsub.f32 %v10674_v32, %v10776_v62  ;;  %v11062_v32 = vsub.f32 %v10690_v21, %v10776_v62  ;;  %v11076_v21 = vsub.f32 %v10706_v46, %v10776_v62 }
 0x2a3   :  { %18835 = vst [vmem:[#allocation81_spill] sm:$0xff] %v11041_v18  ;;  %v790_v5 = vmul.f32 %v11041_v18, %v11041_v18  ;;  %v889_v55 = vsel %vm279_vm0, %v789_v51, 0.0  ;;  %v11090_v46 = vsub.f32 %v10728_v22, %v10776_v62  ;;  %v11104_v22 = vsub.f32 %v10586_v63, %v10776_v62 }
 0x2a4   :  { %v882_v61 = vadd.f32 %v881_v25, %v880_v58  ;;  %v11055_v25 = vsub.f32 %v10682_v23, %v10776_v62  ;;  %v11118_v63 = vsub.f32 %v10620_v42, %v10776_v62 }
 0x2a5   :  { %v891_v27 = vsel %vm279_vm0, %v790_v5, 0.0  ;;  %18840 = vst [vmem:[#allocation85_spill] sm:$0xff] %v11104_v22 }
 0x2a6   :  { %v884_v30 = vadd.f32 %v883_v35, %v882_v61  ;;  %v791_v35 = vmul.f32 %v11048_v56, %v11048_v56  ;;  %v792_v18 = vmul.f32 %v11055_v25, %v11055_v25 }
 0x2a8   :  { %v886_v58 = vadd.f32 %v885_v24, %v884_v30  ;;  %v18836_v24 = vld [vmem:[#allocation90_spill] sm:$0xff]  ;;  %v893_v51 = vsel %vm279_vm0, %v791_v35, 0.0  ;;  %v895_v5 = vsel %vm279_vm0, %v792_v18, 0.0 }
 0x2a9   :  { %v11069_v23 = vsub.f32 %v18836_v24, %v10776_v62 }
 0x2aa   :  { %v888_v61 = vadd.f32 %v887_v59, %v886_v58  ;;  %v793_v59 = vmul.f32 %v11062_v32, %v11062_v32 }
 0x2ab   :  { %18837 = vst [vmem:[#allocation83_spill] sm:$0xff] %v11069_v23  ;;  %v794_v24 = vmul.f32 %v11069_v23, %v11069_v23 }
 0x2ac   :  { %v890_v30 = vadd.f32 %v889_v55, %v888_v61  ;;  %v11083_v55 = vsub.f32 %v10718_v34, %v10776_v62  ;;  %v897_v35 = vsel %vm279_vm0, %v793_v59, 0.0 }
 0x2ad   :  { %v899_v18 = vsel %vm279_vm0, %v794_v24, 0.0 }
 0x2ae   :  { %v892_v58 = vadd.f32 %v891_v27, %v890_v30  ;;  %v795_v27 = vmul.f32 %v11076_v21, %v11076_v21  ;;  %v796_v23 = vmul.f32 %v11083_v55, %v11083_v55 }
 0x2b0   :  { %v894_v61 = vadd.f32 %v893_v51, %v892_v58  ;;  %v18838_v51 = vld [vmem:[#allocation77_spill] sm:$0xff]  ;;  %v901_v59 = vsel %vm279_vm0, %v795_v27, 0.0  ;;  %v903_v24 = vsel %vm279_vm0, %v796_v23, 0.0 }
 0x2b1   :  { %v11097_v34 = vsub.f32 %v18838_v51, %v10776_v62  ;;  %18842 = vst [vmem:[#allocation77_spill] sm:$0xff] %v11118_v63 }
 0x2b2   :  { %v896_v30 = vadd.f32 %v895_v5, %v894_v61  ;;  %v797_v5 = vmul.f32 %v11090_v46, %v11090_v46 }
 0x2b3   :  { %18839 = vst [vmem:[#allocation84_spill] sm:$0xff] %v11097_v34  ;;  %v798_v51 = vmul.f32 %v11097_v34, %v11097_v34 }
 0x2b4   :  { %v898_v58 = vadd.f32 %v897_v35, %v896_v30  ;;  %v11111_v35 = vsub.f32 %v10606_v53, %v10776_v62  ;;  %v905_v27 = vsel %vm279_vm0, %v797_v5, 0.0  ;;  %v11125_v53 = vsub.f32 %v10630_v2, %v10776_v62 }
 0x2b5   :  { %v907_v23 = vsel %vm279_vm0, %v798_v51, 0.0  ;;  %v11139_v2 = vsub.f32 %v10648_v43, %v10776_v62 }
 0x2b6   :  { %v900_v61 = vadd.f32 %v899_v18, %v898_v58  ;;  %18841 = vst [vmem:[#allocation90_spill] sm:$0xff] %v11111_v35  ;;  %v799_v18 = vmul.f32 %v11104_v22, %v11104_v22  ;;  %v801_v22 = vmul.f32 %v11118_v63, %v11118_v63 }
 0x2b7   :  { %18843 = vst [vmem:[#allocation96_spill] sm:$0xff] %v11125_v53 }
 0x2b8   :  { %v902_v30 = vadd.f32 %v901_v59, %v900_v61  ;;  %v800_v59 = vmul.f32 %v11111_v35, %v11111_v35  ;;  %v909_v5 = vsel %vm279_vm0, %v799_v18, 0.0  ;;  %18846 = vst [vmem:[#allocation97_spill] sm:$0xff] %v11139_v2  ;;  %v913_v18 = vsel %vm279_vm0, %v801_v22, 0.0 }
 0x2ba   :  { %v904_v58 = vadd.f32 %v903_v24, %v902_v30  ;;  %v18844_v24 = vld [vmem:[#allocation82_spill] sm:$0xff]  ;;  %v911_v51 = vsel %vm279_vm0, %v800_v59, 0.0 }
 0x2bb   :  { %v11132_v42 = vsub.f32 %v18844_v24, %v10776_v62 }
 0x2bc   :  { %v906_v61 = vadd.f32 %v905_v27, %v904_v58  ;;  %v802_v27 = vmul.f32 %v11125_v53, %v11125_v53  ;;  %v804_v53 = vmul.f32 %v11139_v2, %v11139_v2 }
 0x2bd   :  { %18845 = vst [vmem:[#allocation82_spill] sm:$0xff] %v11132_v42  ;;  %v803_v24 = vmul.f32 %v11132_v42, %v11132_v42 }
 0x2be   :  { %v908_v30 = vadd.f32 %v907_v23, %v906_v61  ;;  %v11146_v23 = vsub.f32 %v10658_v39, %v10776_v62  ;;  %v915_v59 = vsel %vm279_vm0, %v802_v27, 0.0  ;;  %v919_v27 = vsel %vm279_vm0, %v804_v53, 0.0 }
 0x2bf   :  { %v917_v22 = vsel %vm279_vm0, %v803_v24, 0.0 }
 0x2c0   :  { %v910_v58 = vadd.f32 %v909_v5, %v908_v30  ;;  %18847 = vst [vmem:[#allocation98_spill] sm:$0xff] %v11146_v23  ;;  %v18848_v5 = vld [vmem:[#allocation86_spill] sm:$0xff]  ;;  %v805_v42 = vmul.f32 %v11146_v23, %v11146_v23 }
 0x2c1   :  { %v11153_v43 = vsub.f32 %v18848_v5, %v10776_v62 }
 0x2c2   :  { %v912_v61 = vadd.f32 %v911_v51, %v910_v58  ;;  %v18850_v51 = vld [vmem:[#allocation87_spill] sm:$0xff]  ;;  %v921_v24 = vsel %vm279_vm0, %v805_v42, 0.0 }
 0x2c3   :  { %18849 = vst [vmem:[#allocation86_spill] sm:$0xff] %v11153_v43  ;;  %v11160_v39 = vsub.f32 %v18850_v51, %v10776_v62  ;;  %v806_v2 = vmul.f32 %v11153_v43, %v11153_v43 }
 0x2c4   :  { %v914_v30 = vadd.f32 %v913_v18, %v912_v61  ;;  %v18852_v18 = vld [vmem:[#allocation88_spill] sm:$0xff] }
 0x2c5   :  { %18851 = vst [vmem:[#allocation87_spill] sm:$0xff] %v11160_v39  ;;  %v11167_v5 = vsub.f32 %v18852_v18, %v10776_v62  ;;  %v807_v23 = vmul.f32 %v11160_v39, %v11160_v39  ;;  %v923_v53 = vsel %vm279_vm0, %v806_v2, 0.0 }
 0x2c6   :  { %v916_v58 = vadd.f32 %v915_v59, %v914_v30  ;;  %v18854_v59 = vld [vmem:[#allocation89_spill] sm:$0xff] }
 0x2c7   :  { %18853 = vst [vmem:[#allocation88_spill] sm:$0xff] %v11167_v5  ;;  %v11174_v51 = vsub.f32 %v18854_v59, %v10776_v62  ;;  %v808_v43 = vmul.f32 %v11167_v5, %v11167_v5  ;;  %v925_v42 = vsel %vm279_vm0, %v807_v23, 0.0 }
 0x2c8   :  { %v918_v61 = vadd.f32 %v917_v22, %v916_v58  ;;  %v18856_v22 = vld [vmem:[#allocation91_spill] sm:$0xff] }
 0x2c9   :  { %18855 = vst [vmem:[#allocation89_spill] sm:$0xff] %v11174_v51  ;;  %v11181_v18 = vsub.f32 %v18856_v22, %v10776_v62  ;;  %v809_v39 = vmul.f32 %v11174_v51, %v11174_v51  ;;  %v927_v2 = vsel %vm279_vm0, %v808_v43, 0.0  ;;  %v751_v43 = vsub.f32 %v10768_v19, %v10776_v62 }
 0x2ca   :  { %v920_v30 = vadd.f32 %v919_v27, %v918_v61  ;;  %v18858_v27 = vld [vmem:[#allocation92_spill] sm:$0xff] }
 0x2cb   :  { %18857 = vst [vmem:[#allocation91_spill] sm:$0xff] %v11181_v18  ;;  %v11188_v59 = vsub.f32 %v18858_v27, %v10776_v62  ;;  %v810_v5 = vmul.f32 %v11181_v18, %v11181_v18  ;;  %v929_v23 = vsel %vm279_vm0, %v809_v39, 0.0 }
 0x2cc   :  { %v922_v58 = vadd.f32 %v921_v24, %v920_v30  ;;  %v18860_v24 = vld [vmem:[#allocation93_spill] sm:$0xff] }
 0x2cd   :  { %18859 = vst [vmem:[#allocation92_spill] sm:$0xff] %v11188_v59  ;;  %v11195_v22 = vsub.f32 %v18860_v24, %v10776_v62  ;;  %v811_v51 = vmul.f32 %v11188_v59, %v11188_v59  ;;  %v931_v24 = vsel %vm279_vm0, %v810_v5, 0.0  ;;  %v814_v59 = vmul.f32 %v10779_v31, %v10779_v31 }
 0x2ce   :  { %v924_v61 = vadd.f32 %v923_v53, %v922_v58  ;;  %v18862_v53 = vld [vmem:[#allocation94_spill] sm:$0xff] }
 0x2cf   :  { %18861 = vst [vmem:[#allocation93_spill] sm:$0xff] %v11195_v22  ;;  %v11202_v27 = vsub.f32 %v18862_v53, %v10776_v62 }
 0x2d0   :  { %v926_v30 = vadd.f32 %v925_v42, %v924_v61  ;;  %v812_v42 = vmul.f32 %v11195_v22, %v11195_v22 }
 0x2d1   :  { %18863 = vst [vmem:[#allocation94_spill] sm:$0xff] %v11202_v27 }
 0x2d2   :  { %v928_v58 = vadd.f32 %v927_v2, %v926_v30  ;;  %v813_v30 = vmul.f32 %v11202_v27, %v11202_v27  ;;  %v933_v2 = vsel %vm279_vm0, %v811_v51, 0.0  ;;  %v935_v39 = vsel %vm279_vm0, %v812_v42, 0.0 }
 0x2d4   :  { %v930_v61 = vadd.f32 %v929_v23, %v928_v58  ;;  %v815_v23 = vmul.f32 %v751_v43, %v751_v43  ;;  %v937_v22 = vsel %vm279_vm0, %v813_v30, 0.0  ;;  %v9270_v30 = vld [vmem:[#allocation6 + $0x8] sm:$0xff] }
 0x2d5   :  { %7992 = vmatpush.bf16.msrb.mxu0 %v9270_v30 }
 0x2d6   :  { %v932_v63 = vadd.f32 %v931_v24, %v930_v61  ;;  %v939_v61 = vsel %vm279_vm0, %v814_v59, 0.0  ;;  %v941_v19 = vsel %vm279_vm0, %v815_v23, 0.0 }
 0x2d8   :  { %v934_v53 = vadd.f32 %v933_v2, %v932_v63 }
 0x2da   :  { %v936_v58 = vadd.f32 %v935_v39, %v934_v53 }
 0x2dc   :  { %v938_v5 = vadd.f32 %v937_v22, %v936_v58 }
 0x2de   :  { %v940_v24 = vadd.f32 %v939_v61, %v938_v5 }
 0x2e0   :  { %v942_v62 = vadd.f32 %v941_v19, %v940_v24 }
 0x2e2   :  { %v943_v27 = vrot.slane %v942_v62, 4 }
 0x2e4   :  { %v944_v18 = vadd.f32 %v943_v27, %v942_v62 }
 0x2e6   :  { %v945_v51 = vrot.slane %v944_v18, 2 }
 0x2e8   :  { %v946_v63 = vadd.f32 %v945_v51, %v944_v18  ;;  %v11225_v18 = vld [vmem:[%s18310_s2] ss:$0 sm:$0xff]  ;;  %s9948_s2 = smov 48  }
 0x2ea   :  { %v947_v2 = vrot.slane %v946_v63, 1 }
 0x2ec   :  { %v948_v35 = vadd.f32 %v947_v2, %v946_v63 }
 0x2ee   :  { %v949_v34 = vmul.f32 %v948_v35, %v10773_v36  ;;  %v18876_v36 = vld [vmem:[#allocation81_spill] sm:$0xff] }
 0x2f0   :  { %v950_v42 = vadd.f32 1e-05, %v949_v34  ;;  %v11232_v34 = vld [vmem:[%s18311_s3] ss:$0 sm:$0xff]  ;;  %s9949_s3 = smov 24  }
 0x2f1   :  { %18864 = vst [vmem:[#allocation99_spill] sm:$0xff] %v11232_v34 }
 0x2f2   :  { %9689 = vrsqrt.f32 %v950_v42  ;;  %vm957_vm4 = vweird.f32 %v950_v42 }
 0x2f8   :  { %v9690_v53 = vpop.eup %9689 }
 0x2f9   :  { %v952_v39 = vmul.f32 %v9690_v53, %v950_v42  ;;  %vm958_vm3 = vweird.f32 %v9690_v53  ;;  %v9269_v42 = vld [vmem:[#allocation6] sm:$0xff] }
 0x2fa   :  { %vm959_vm5 = vmor %vm957_vm4, %vm958_vm3  ;;  %7993 = vmatpush.bf16.msrb.mxu0 %v9269_v42  ;;  %v18872_v42 = vmov 0  ;;  %vm6151_vm3 = vcmask 523264   ;;  %vm6324_vm4 = vcmask 719872  }
 0x2fb   :  { %v953_v22 = vmul.f32 %v9690_v53, %v952_v39  ;;  %v18873_v42 = vsel %vm11395_vm10, 4294967295, %v18872_v42 }
 0x2fd   :  { %v954_v59 = vmul.f32 0.5, %v953_v22 }
 0x2ff   :  { %v955_v58 = vsub.f32 1.5, %v954_v59 }
 0x301   :  { %v956_v23 = vmul.f32 %v9690_v53, %v955_v58 }
 0x303   :  { %v11227_v27 = vsel %vm959_vm5, %v9690_v53, %v956_v23  ;;  %vm5664_vm5 = vcmask 195584  }
 0x304   :  { %v1023_v35 = vmul.f32 %v11227_v27, %v10779_v31  ;;  %v1024_v5 = vmul.f32 %v11227_v27, %v751_v43  ;;  %v11239_v61 = vmul.f32 %v11227_v27, %v10783_v26  ;;  %v11243_v24 = vmul.f32 %v11227_v27, %v10787_v52 }
 0x305   :  { %v11247_v19 = vmul.f32 %v11227_v27, %v10791_v38  ;;  %v11251_v62 = vmul.f32 %v11227_v27, %v10795_v20  ;;  %v11255_v31 = vmul.f32 %v11227_v27, %v10803_v33  ;;  %v11259_v26 = vmul.f32 %v11227_v27, %v10809_v0 }
 0x306   :  { %v1090_v52 = vmul.f32 %v11225_v18, %v1023_v35  ;;  %v1091_v43 = vmul.f32 %v11225_v18, %v1024_v5  ;;  %v11265_v38 = vmul.f32 %v11227_v27, %v10817_v29  ;;  %v11269_v20 = vmul.f32 %v11227_v27, %v10824_v1 }
 0x307   :  { %v11273_v33 = vmul.f32 %v11227_v27, %v10831_v41  ;;  %v11277_v0 = vmul.f32 %v11227_v27, %v10838_v48  ;;  %v11281_v51 = vmul.f32 %v11227_v27, %v10845_v17  ;;  %v11285_v29 = vmul.f32 %v11227_v27, %v10852_v8 }
 0x308   :  { %v1157_v63 = vadd.f32 %v11232_v34, %v1090_v52  ;;  %v1158_v1 = vadd.f32 %v11232_v34, %v1091_v43  ;;  %v11291_v41 = vmul.f32 %v11227_v27, %v10859_v49  ;;  %v11295_v48 = vmul.f32 %v11227_v27, %v10866_v11  ;;  %v18888_v34 = vld [vmem:[#allocation98_spill] sm:$0xff] }
 0x309   :  { %v11299_v17 = vmul.f32 %v11227_v27, %v10873_v14  ;;  %v11303_v8 = vmul.f32 %v11227_v27, %v10880_v16  ;;  %v11307_v2 = vmul.f32 %v11227_v27, %v10887_v10  ;;  %v11311_v49 = vmul.f32 %v11227_v27, %v10894_v40 }
 0x30a   :  { %v1221_v53 = vmax.f32 %v1157_v63, 0.0  ;;  %v1222_v11 = vmax.f32 %v1158_v1, 0.0  ;;  %v11315_v39 = vmul.f32 %v11227_v27, %v10901_v50  ;;  %v11319_v14 = vmul.f32 %v11227_v27, %v10908_v47  ;;  %v18870_v63 = vld [vmem:[#allocation79_spill] sm:$0xff]  ;;  %v18871_v1 = vld [vmem:[#allocation80_spill] sm:$0xff] }
 0x30b   :  { %v11323_v16 = vmul.f32 %v11227_v27, %v10915_v57  ;;  %v11327_v10 = vmul.f32 %v11227_v27, %v10922_v15  ;;  %v11331_v40 = vmul.f32 %v11227_v27, %v10929_v7  ;;  %v11335_v50 = vmul.f32 %v11227_v27, %v10936_v9  ;;  %18874 = vst [vmem:[#allocation79_spill] sm:$0xff] %v18873_v42  ;;  %v18884_v42 = vld [vmem:[#allocation82_spill] sm:$0xff] }
 0x30c   :  { %v11337_v30 = vpack.c.bf16 %v1221_v53, %v1221_v53  ;;  %v1286_v47 = vpack.c.bf16 %v1222_v11, %v1222_v11  ;;  %v11341_v57 = vmul.f32 %v11227_v27, %v10943_v60  ;;  %v11345_v15 = vmul.f32 %v11227_v27, %v10950_v6  ;;  %v2266_v53 = vld [vmem:[#allocation2 + $0x1a0] sm:$0x1] }
 0x30d   :  { %v11349_v7 = vmul.f32 %v11227_v27, %v10957_v54  ;;  %v11353_v9 = vmul.f32 %v11227_v27, %v10964_v44  ;;  %v11357_v22 = vmul.f32 %v11227_v27, %v10971_v37  ;;  %v11361_v60 = vmul.f32 %v11227_v27, %v10978_v45  ;;  %v18865_v37 = vld [vmem:[#allocation78_spill] sm:$0xff] }
 0x30e   :  { %v1927_v59 = vshrl.u32 %v11337_v30, 16  ;;  %v1935_v6 = vshrl.u32 %v1286_v47, 16  ;;  %v1938_v58 = vshll.u32 %v1286_v47, 16  ;;  %v7844_v23 = vunpack.c.l.b16 %v11337_v30 }
 0x30f   :  { %v7845_v54 = vunpack.c.l.b16 %v1286_v47  ;;  %v11367_v35 = vmul.f32 %v11227_v27, %v10985_v13  ;;  %v11371_v44 = vmul.f32 %v11227_v27, %v10992_v28  ;;  %v11375_v5 = vmul.f32 %v11227_v27, %v18865_v37 }
 0x310   :  { %v18866_v45 = vmov 0  ;;  %v11383_v52 = vrot.slane %v1927_v59, 7  ;;  %v1937_v43 = vrot.slane %v1935_v6, 7  ;;  %v11387_v13 = vmul.f32 %v11227_v27, %v18870_v63 }
 0x311   :  { %v18867_v45 = vsel %vm11379_vm9, 4294967295, %v18866_v45  ;;  %v11391_v28 = vmul.f32 %v11227_v27, %v18871_v1  ;;  %v11399_v11 = vpack.c.b16 %v7845_v54, %v7844_v23  ;;  %v11403_v47 = vmul.f32 %v11227_v27, %v11020_v12  ;;  %v18877_v54 = vld [vmem:[#allocation83_spill] sm:$0xff] }
 0x312   :  { %18868 = vst [vmem:[#allocation78_spill] sm:$0xff] %v18867_v45  ;;  %v11407_v59 = vmul.f32 %v11227_v27, %v11027_v4  ;;  %v11411_v6 = vmul.f32 %v11227_v27, %v11034_v3  ;;  %v1933_v37 = vrot.slane %v11383_v52, 4  ;;  %v1940_v63 = vor.u32 %v1938_v58, %v1937_v43  ;;  %v18886_v45 = vld [vmem:[#allocation97_spill] sm:$0xff] }
 0x313   :  { %18869 = vst [vmem:[#allocation100_spill] sm:$0xff] %v11383_v52  ;;  %v1942_v1 = vrot.slane %v1937_v43, 4  ;;  %v11416_v23 = vmul.f32 %v11227_v27, %v18876_v36  ;;  %v11420_v12 = vmul.f32 %v11227_v27, %v11048_v56  ;;  %v11424_v4 = vmul.f32 %v11227_v27, %v11055_v25  ;;  %v18892_v52 = vld [vmem:[#allocation87_spill] sm:$0xff] }
 0x314   :  { %18875 = vst [vmem:[#allocation80_spill] sm:$0xff] %v11399_v11  ;;  %v11428_v3 = vmul.f32 %v11227_v27, %v11062_v32  ;;  %v11432_v58 = vmul.f32 %v11227_v27, %v18877_v54  ;;  %v1941_v36 = vsel %vm11379_vm9, %v1933_v37, %v1940_v63  ;;  %v11440_v56 = vmul.f32 %v11227_v27, %v11076_v21  ;;  %v18878_v54 = vld [vmem:[#allocation84_spill] sm:$0xff]  ;;  %v18879_v63 = vld [vmem:[#allocation85_spill] sm:$0xff]  ;;  %v18880_v21 = vld [vmem:[#allocation90_spill] sm:$0xff] }
 0x315   :  { %v2267_v43 = vsel %vm11395_vm10, %v1942_v1, %v2266_v53  ;;  %v11444_v25 = vmul.f32 %v11227_v27, %v11083_v55  ;;  %2265 = vst.msk [vmem:[#allocation2 + $0x19c] sm:$0xf] %vm1287_vm1, %v1941_v36  ;;  %v11449_v32 = vmul.f32 %v11227_v27, %v11090_v46  ;;  %v11453_v37 = vmul.f32 %v11227_v27, %v18878_v54  ;;  %v18881_v55 = vld [vmem:[#allocation77_spill] sm:$0xff]  ;;  %v18882_v11 = vld [vmem:[#allocation96_spill] sm:$0xff] }
 0x316   :  { %v11457_v53 = vmul.f32 %v11227_v27, %v18879_v63  ;;  %v11461_v1 = vmul.f32 %v11227_v27, %v18880_v21  ;;  %2268 = vst [vmem:[#allocation2 + $0x1a0] sm:$0x1] %v2267_v43  ;;  %v11465_v36 = vmul.f32 %v11227_v27, %v18881_v55  ;;  %v11469_v46 = vmul.f32 %v11227_v27, %v18882_v11  ;;  %v18890_v43 = vld [vmem:[#allocation86_spill] sm:$0xff] }
 0x317   :  { %v11473_v54 = vmul.f32 %v11227_v27, %v18884_v42  ;;  %v11477_v63 = vmul.f32 %v11227_v27, %v18886_v45  ;;  %v11481_v21 = vmul.f32 %v11227_v27, %v18888_v34  ;;  %v11485_v55 = vmul.f32 %v11227_v27, %v18890_v43 }
 0x318   :  { %18883 = vst [vmem:[#allocation81_spill] sm:$0xff] %v11469_v46  ;;  %v11489_v11 = vmul.f32 %v11227_v27, %v18892_v52  ;;  %v18894_v46 = vld [vmem:[#allocation88_spill] sm:$0xff] }
 0x319   :  { %18885 = vst [vmem:[#allocation83_spill] sm:$0xff] %v11473_v54  ;;  %v11493_v42 = vmul.f32 %v11227_v27, %v18894_v46  ;;  %v18896_v54 = vld [vmem:[#allocation89_spill] sm:$0xff] }
 0x31a   :  { %18887 = vst [vmem:[#allocation84_spill] sm:$0xff] %v11477_v63  ;;  %v11497_v45 = vmul.f32 %v11227_v27, %v18896_v54  ;;  %v18897_v63 = vld [vmem:[#allocation91_spill] sm:$0xff]  ;;  %v11518_v54 = vmul.f32 %v11225_v18, %v11239_v61  ;;  %v11538_v61 = vmul.f32 %v11225_v18, %v11259_v26  ;;  %v11558_v26 = vmul.f32 %v11225_v18, %v11281_v51 }
 0x31b   :  { %18889 = vst [vmem:[#allocation85_spill] sm:$0xff] %v11481_v21  ;;  %v11501_v34 = vmul.f32 %v11227_v27, %v18897_v63  ;;  %v18898_v21 = vld [vmem:[#allocation92_spill] sm:$0xff]  ;;  %v11522_v63 = vmul.f32 %v11225_v18, %v11243_v24  ;;  %v11542_v24 = vmul.f32 %v11225_v18, %v11265_v38  ;;  %v11562_v38 = vmul.f32 %v11225_v18, %v11285_v29 }
 0x31c   :  { %18891 = vst [vmem:[#allocation90_spill] sm:$0xff] %v11485_v55  ;;  %v11505_v43 = vmul.f32 %v11227_v27, %v18898_v21  ;;  %v18899_v55 = vld [vmem:[#allocation93_spill] sm:$0xff]  ;;  %v11526_v21 = vmul.f32 %v11225_v18, %v11247_v19  ;;  %v11546_v19 = vmul.f32 %v11225_v18, %v11269_v20  ;;  %v11566_v20 = vmul.f32 %v11225_v18, %v11291_v41 }
 0x31d   :  { %18893 = vst [vmem:[#allocation77_spill] sm:$0xff] %v11489_v11  ;;  %v11509_v52 = vmul.f32 %v11227_v27, %v18899_v55  ;;  %v18900_v11 = vld [vmem:[#allocation94_spill] sm:$0xff]  ;;  %v11530_v55 = vmul.f32 %v11225_v18, %v11251_v62  ;;  %v11550_v62 = vmul.f32 %v11225_v18, %v11273_v33  ;;  %v11570_v33 = vmul.f32 %v11225_v18, %v11295_v48 }
 0x31e   :  { %18895 = vst [vmem:[#allocation96_spill] sm:$0xff] %v11493_v42  ;;  %v11513_v46 = vmul.f32 %v11227_v27, %v18900_v11  ;;  %v11534_v27 = vmul.f32 %v11225_v18, %v11255_v31  ;;  %v11554_v31 = vmul.f32 %v11225_v18, %v11277_v0  ;;  %v11574_v0 = vmul.f32 %v11225_v18, %v11299_v17 }
 0x31f   :  { %v11578_v51 = vmul.f32 %v11225_v18, %v11303_v8  ;;  %v11582_v29 = vmul.f32 %v11225_v18, %v11307_v2  ;;  %v11586_v41 = vmul.f32 %v11225_v18, %v11311_v49  ;;  %v11590_v48 = vmul.f32 %v11225_v18, %v11315_v39  ;;  %v18905_v11 = vld [vmem:[#allocation81_spill] sm:$0xff] }
 0x320   :  { %v11594_v17 = vmul.f32 %v11225_v18, %v11319_v14  ;;  %v11598_v8 = vmul.f32 %v11225_v18, %v11323_v16  ;;  %v11602_v2 = vmul.f32 %v11225_v18, %v11327_v10  ;;  %v11606_v49 = vmul.f32 %v11225_v18, %v11331_v40  ;;  %v18907_v42 = vld [vmem:[#allocation83_spill] sm:$0xff] }
 0x321   :  { %v11610_v39 = vmul.f32 %v11225_v18, %v11335_v50  ;;  %v11614_v14 = vmul.f32 %v11225_v18, %v11341_v57  ;;  %v11618_v16 = vmul.f32 %v11225_v18, %v11345_v15  ;;  %v11622_v10 = vmul.f32 %v11225_v18, %v11349_v7 }
 0x322   :  { %v11626_v40 = vmul.f32 %v11225_v18, %v11353_v9  ;;  %v11630_v50 = vmul.f32 %v11225_v18, %v11357_v22  ;;  %v11634_v57 = vmul.f32 %v11225_v18, %v11361_v60  ;;  %v11638_v15 = vmul.f32 %v11225_v18, %v11367_v35 }
 0x323   :  { %v11642_v7 = vmul.f32 %v11225_v18, %v11371_v44  ;;  %v11646_v9 = vmul.f32 %v11225_v18, %v11375_v5  ;;  %v11650_v22 = vmul.f32 %v11225_v18, %v11387_v13  ;;  %v11654_v60 = vmul.f32 %v11225_v18, %v11391_v28 }
 0x324   :  { %v11658_v35 = vmul.f32 %v11225_v18, %v11403_v47  ;;  %v11662_v44 = vmul.f32 %v11225_v18, %v11407_v59  ;;  %v11666_v5 = vmul.f32 %v11225_v18, %v11411_v6  ;;  %v11670_v13 = vmul.f32 %v11225_v18, %v11416_v23 }
 0x325   :  { %v11674_v28 = vmul.f32 %v11225_v18, %v11420_v12  ;;  %v11678_v47 = vmul.f32 %v11225_v18, %v11424_v4  ;;  %v11682_v59 = vmul.f32 %v11225_v18, %v11428_v3  ;;  %v11686_v6 = vmul.f32 %v11225_v18, %v11432_v58 }
 0x326   :  { %v11690_v23 = vmul.f32 %v11225_v18, %v11440_v56  ;;  %v11694_v12 = vmul.f32 %v11225_v18, %v11444_v25  ;;  %v11698_v4 = vmul.f32 %v11225_v18, %v11449_v32  ;;  %v11702_v3 = vmul.f32 %v11225_v18, %v11453_v37 }
 0x327   :  { %v11706_v58 = vmul.f32 %v11225_v18, %v11457_v53  ;;  %v11710_v56 = vmul.f32 %v11225_v18, %v11461_v1  ;;  %v11714_v25 = vmul.f32 %v11225_v18, %v11465_v36  ;;  %v11718_v32 = vmul.f32 %v11225_v18, %v18905_v11 }
 0x328   :  { %18901 = vst [vmem:[#allocation82_spill] sm:$0xff] %v11702_v3  ;;  %v11722_v37 = vmul.f32 %v11225_v18, %v18907_v42  ;;  %v18908_v3 = vld [vmem:[#allocation84_spill] sm:$0xff] }
 0x329   :  { %18902 = vst [vmem:[#allocation97_spill] sm:$0xff] %v11706_v58  ;;  %v11726_v53 = vmul.f32 %v11225_v18, %v18908_v3  ;;  %v18909_v58 = vld [vmem:[#allocation85_spill] sm:$0xff]  ;;  %v11746_v3 = vmul.f32 %v11225_v18, %v11497_v45  ;;  %v18917_v45 = vshll.u32 %v11337_v30, 16 }
 0x32a   :  { %18903 = vst [vmem:[#allocation98_spill] sm:$0xff] %v11710_v56  ;;  %v11730_v1 = vmul.f32 %v11225_v18, %v18909_v58  ;;  %v18910_v56 = vld [vmem:[#allocation90_spill] sm:$0xff]  ;;  %v11750_v58 = vmul.f32 %v11225_v18, %v11501_v34  ;;  %v18918_v34 = vld [vmem:[#allocation99_spill] sm:$0xff] }
 0x32b   :  { %18904 = vst [vmem:[#allocation86_spill] sm:$0xff] %v11714_v25  ;;  %v11734_v36 = vmul.f32 %v11225_v18, %v18910_v56  ;;  %v18911_v25 = vld [vmem:[#allocation77_spill] sm:$0xff]  ;;  %v11754_v56 = vmul.f32 %v11225_v18, %v11505_v43  ;;  %v11775_v43 = vadd.f32 %v18918_v34, %v11522_v63  ;;  %v11787_v30 = vadd.f32 %v18918_v34, %v11534_v27 }
 0x32c   :  { %18906 = vst [vmem:[#allocation87_spill] sm:$0xff] %v11718_v32  ;;  %v11738_v11 = vmul.f32 %v11225_v18, %v18911_v25  ;;  %v18912_v32 = vld [vmem:[#allocation96_spill] sm:$0xff]  ;;  %v11758_v25 = vmul.f32 %v11225_v18, %v11509_v52  ;;  %v11779_v52 = vadd.f32 %v18918_v34, %v11526_v21  ;;  %v11799_v63 = vadd.f32 %v18918_v34, %v11546_v19 }
 0x32d   :  { %v11742_v42 = vmul.f32 %v11225_v18, %v18912_v32  ;;  %18914 = vst [vmem:[#allocation89_spill] sm:$0xff] %v11746_v3  ;;  %v11762_v32 = vmul.f32 %v11225_v18, %v11513_v46  ;;  %v11783_v18 = vadd.f32 %v18918_v34, %v11530_v55  ;;  %v11791_v46 = vadd.f32 %v18918_v34, %v11538_v61 }
 0x32e   :  { %18915 = vst [vmem:[#allocation91_spill] sm:$0xff] %v11750_v58  ;;  %v11771_v58 = vadd.f32 %v18918_v34, %v11518_v54  ;;  %v11795_v54 = vadd.f32 %v18918_v34, %v11542_v24  ;;  %v11803_v21 = vadd.f32 %v18918_v34, %v11550_v62  ;;  %v11807_v55 = vadd.f32 %v18918_v34, %v11554_v31 }
 0x32f   :  { %18913 = vst [vmem:[#allocation88_spill] sm:$0xff] %v11742_v42  ;;  %v18916_v42 = vld [vmem:[#allocation100_spill] sm:$0xff]  ;;  %v11811_v27 = vadd.f32 %v18918_v34, %v11558_v26  ;;  %v11815_v61 = vadd.f32 %v18918_v34, %v11562_v38  ;;  %v11819_v24 = vadd.f32 %v18918_v34, %v11566_v20  ;;  %v11823_v19 = vadd.f32 %v18918_v34, %v11570_v33 }
 0x330   :  { %v11767_v3 = vor.u32 %v18917_v45, %v18916_v42  ;;  %18919 = vst [vmem:[#allocation92_spill] sm:$0xff] %v11791_v46  ;;  %v11827_v62 = vadd.f32 %v18918_v34, %v11574_v0  ;;  %v11831_v31 = vadd.f32 %v18918_v34, %v11578_v51  ;;  %v11835_v26 = vadd.f32 %v18918_v34, %v11582_v29  ;;  %v18929_v42 = vld [vmem:[#allocation97_spill] sm:$0xff] }
 0x331   :  { %v11839_v38 = vadd.f32 %v18918_v34, %v11586_v41  ;;  %v11843_v20 = vadd.f32 %v18918_v34, %v11590_v48  ;;  %v11847_v33 = vadd.f32 %v18918_v34, %v11594_v17  ;;  %v11851_v0 = vadd.f32 %v18918_v34, %v11598_v8 }
 0x332   :  { %v11855_v51 = vadd.f32 %v18918_v34, %v11602_v2  ;;  %v11859_v29 = vadd.f32 %v18918_v34, %v11606_v49  ;;  %v11863_v41 = vadd.f32 %v18918_v34, %v11610_v39  ;;  %v11867_v48 = vadd.f32 %v18918_v34, %v11614_v14 }
 0x333   :  { %v11871_v17 = vadd.f32 %v18918_v34, %v11618_v16  ;;  %v11875_v8 = vadd.f32 %v18918_v34, %v11622_v10  ;;  %v11879_v2 = vadd.f32 %v18918_v34, %v11626_v40  ;;  %v11883_v49 = vadd.f32 %v18918_v34, %v11630_v50 }
 0x334   :  { %v11887_v39 = vadd.f32 %v18918_v34, %v11634_v57  ;;  %v11891_v14 = vadd.f32 %v18918_v34, %v11638_v15  ;;  %v11895_v16 = vadd.f32 %v18918_v34, %v11642_v7  ;;  %v11899_v10 = vadd.f32 %v18918_v34, %v11646_v9 }
 0x335   :  { %v11903_v40 = vadd.f32 %v18918_v34, %v11650_v22  ;;  %v11907_v50 = vadd.f32 %v18918_v34, %v11654_v60  ;;  %v11911_v57 = vadd.f32 %v18918_v34, %v11658_v35  ;;  %v11915_v15 = vadd.f32 %v18918_v34, %v11662_v44 }
 0x336   :  { %v11919_v7 = vadd.f32 %v18918_v34, %v11666_v5  ;;  %v11923_v9 = vadd.f32 %v18918_v34, %v11670_v13  ;;  %v11927_v22 = vadd.f32 %v18918_v34, %v11674_v28  ;;  %v11931_v60 = vadd.f32 %v18918_v34, %v11678_v47  ;;  %v18925_v47 = vld [vmem:[#allocation82_spill] sm:$0xff] }
 0x337   :  { %v11935_v35 = vadd.f32 %v18918_v34, %v11682_v59  ;;  %v11939_v44 = vadd.f32 %v18918_v34, %v11686_v6  ;;  %v11943_v5 = vadd.f32 %v18918_v34, %v11690_v23  ;;  %v11947_v13 = vadd.f32 %v18918_v34, %v11694_v12  ;;  %v2262_v23 = vld [vmem:[#allocation2 + $0x198] sm:$0xf]  ;;  %v18931_v12 = vld [vmem:[#allocation98_spill] sm:$0xff] }
 0x338   :  { %18920 = vst [vmem:[#allocation93_spill] sm:$0xff] %v11919_v7  ;;  %v11951_v28 = vadd.f32 %v18918_v34, %v11698_v4  ;;  %v11955_v59 = vadd.f32 %v18918_v34, %v18925_v47  ;;  %v11965_v45 = vadd.f32 %v18918_v34, %v18929_v42  ;;  %v18933_v4 = vld [vmem:[#allocation86_spill] sm:$0xff]  ;;  %v18934_v47 = vld [vmem:[#allocation87_spill] sm:$0xff]  ;;  %v11985_v42 = vadd.f32 %v18918_v34, %v11726_v53 }
 0x339   :  { %18921 = vst [vmem:[#allocation94_spill] sm:$0xff] %v11923_v9 }
 0x33a   :  { %18922 = vst [vmem:[#allocation81_spill] sm:$0xff] %v11943_v5  ;;  %v11981_v5 = vadd.f32 %v18918_v34, %v11722_v37 }
 0x33b   :  { %18923 = vst [vmem:[#allocation83_spill] sm:$0xff] %v11947_v13  ;;  %v11969_v13 = vadd.f32 %v18918_v34, %v18931_v12  ;;  %v11989_v12 = vadd.f32 %v18918_v34, %v11730_v1 }
 0x33c   :  { %18924 = vst [vmem:[#allocation84_spill] sm:$0xff] %v11951_v28  ;;  %v11973_v28 = vadd.f32 %v18918_v34, %v18933_v4  ;;  %v11993_v4 = vadd.f32 %v18918_v34, %v11734_v36  ;;  %v12013_v36 = vadd.f32 %v18918_v34, %v11754_v56 }
 0x33d   :  { %18926 = vst [vmem:[#allocation85_spill] sm:$0xff] %v11955_v59  ;;  %v11977_v59 = vadd.f32 %v18918_v34, %v18934_v47  ;;  %v11997_v47 = vadd.f32 %v18918_v34, %v11738_v11  ;;  %v12017_v11 = vadd.f32 %v18918_v34, %v11758_v25 }
 0x33e   :  { %18930 = vst [vmem:[#allocation90_spill] sm:$0xff] %v11965_v45 }
 0x33f   :  { %18932 = vst [vmem:[#allocation77_spill] sm:$0xff] %v11969_v13  ;;  %v18977_v13 = vmax.f32 %v11803_v21, 0.0  ;;  %v18983_v21 = vmax.f32 %v11819_v24, 0.0 }
 0x340   :  { %18935 = vst [vmem:[#allocation96_spill] sm:$0xff] %v11977_v59  ;;  %v18941_v59 = vld [vmem:[#allocation88_spill] sm:$0xff] }
 0x341   :  { %18936 = vst [vmem:[#allocation100_spill] sm:$0xff] %v11981_v5  ;;  %v12001_v37 = vadd.f32 %v18918_v34, %v18941_v59  ;;  %v18943_v5 = vld [vmem:[#allocation89_spill] sm:$0xff]  ;;  %v12021_v59 = vadd.f32 %v18918_v34, %v11762_v32  ;;  %v2333_v32 = vld [vmem:[#allocation2 + $0x8] sm:$0x1] }
 0x342   :  { %18937 = vst [vmem:[#allocation99_spill] sm:$0xff] %v11985_v42  ;;  %v12005_v53 = vadd.f32 %v18918_v34, %v18943_v5  ;;  %v18945_v42 = vld [vmem:[#allocation91_spill] sm:$0xff]  ;;  %v2263_v5 = vsel %vm11959_vm12, %v11767_v3, %v2262_v23 }
 0x343   :  { %18938 = vst [vmem:[#allocation82_spill] sm:$0xff] %v11989_v12  ;;  %v12009_v1 = vadd.f32 %v18918_v34, %v18945_v42  ;;  %v1160_v42 = vmax.f32 %v11775_v43, 0.0  ;;  %v9510_v34 = vld [vmem:[#allocation2] sm:$0xf0]  ;;  %v18956_v7 = vld [vmem:[#allocation84_spill] sm:$0xff]  ;;  %v18973_v12 = vmax.f32 %v11787_v30, 0.0 }
 0x344   :  { %18939 = vst [vmem:[#allocation97_spill] sm:$0xff] %v11993_v4  ;;  %v18978_v30 = vmax.f32 %v11807_v55, 0.0 }
 0x345   :  { %18940 = vst [vmem:[#allocation98_spill] sm:$0xff] %v11997_v47  ;;  %v12028_v56 = vpack.c.bf16 %v1160_v42, %v1160_v42 }
 0x346   :  { %18942 = vst [vmem:[#allocation86_spill] sm:$0xff] %v12001_v37  ;;  %v2846_v37 = vunpack.c.l.b16 %v2333_v32 }
 0x347   :  { %18944 = vst [vmem:[#allocation87_spill] sm:$0xff] %v12005_v53  ;;  %v1159_v53 = vmax.f32 %v11771_v58, 0.0  ;;  %v7783_v25 = vunpack.c.l.b16 %v12028_v56 }
 0x348   :  { %18946 = vst [vmem:[#allocation88_spill] sm:$0xff] %v12009_v1  ;;  %v2878_v3 = vpack.c.b16 %v2846_v37, %v2846_v37 }
 0x349   :  { %18947 = vst [vmem:[#allocation89_spill] sm:$0xff] %v12013_v36  ;;  %v1223_v1 = vpack.c.bf16 %v1159_v53, %v1159_v53 }
 0x34a   :  { %18948 = vst [vmem:[#allocation91_spill] sm:$0xff] %v12017_v11  ;;  %v3457_v23 = vrot.slane %v2878_v3, 1  ;;  %v2919_v4 = vshll.u32 %v2878_v3, 16 }
 0x34b   :  { %18949 = vst [vmem:[#allocation101_spill] sm:$0xff] %v12021_v59  ;;  %v7782_v36 = vunpack.c.l.b16 %v1223_v1  ;;  %v9511_v59 = vld [vmem:[#allocation2] sm:$0xe]  ;;  %v1400_v53 = vshrl.u32 %v1223_v1, 16  ;;  %v1403_v42 = vshll.u32 %v1223_v1, 16  ;;  %v1178_v1 = vmax.f32 %v11847_v33, 0.0 }
 0x34c   :  { %2264 = vst [vmem:[#allocation2 + $0x198] sm:$0xf] %v2263_v5  ;;  %v9512_v47 = vor.u32 %v9511_v59, %v9510_v34  ;;  %v9273_v5 = vld [vmem:[#allocation2] sm:$0xff]   ;;  %v2921_v59 = vrot.slane %v2919_v4, 1 }
 0x34d   :  { %v7846_v11 = vpack.c.b16 %v7783_v25, %v7782_v36  ;;  %v12034_v36 = vrot.slane %v1400_v53, 7  ;;  %v2914_v25 = vshll.u32 %v9273_v5, 16  ;;  %v12059_v4 = vpack.c.bf16 %v1178_v1, %v1178_v1 }
 0x34e   :  { %v3456_v58 = vrot.slane %v9512_v47, 1  ;;  %v18963_v53 = vmax.f32 %v11779_v52, 0.0  ;;  %v12154_v52 = vpack.c.bf16 %v18977_v13, %v18977_v13  ;;  %v12174_v13 = vpack.c.bf16 %v18983_v21, %v18983_v21 }
 0x34f   :  { %9222 = vmatmul.msk.bf16.vlgmr.msrb.gmra.mxu0 %vm279_vm0, %v7846_v11  ;;  %v2912_v11 = vshrl.u32 %v9273_v5, 16  ;;  %v12037_v32 = vor.u32 %v1403_v42, %v12034_v36  ;;  %v2916_v37 = vrot.slane %v2914_v25, 1  ;;  %18951 = vst [vmem:[#allocation103_spill] sm:$0xff] %v12059_v4  ;;  %v1406_v33 = vrot.slane %v12034_v36, 4  ;;  %v18968_v36 = vld [vmem:[#allocation87_spill] sm:$0xff]  ;;  %v18969_v9 = vld [vmem:[#allocation88_spill] sm:$0xff] }
 0x350   :  { %v3458_v43 = vsel %vm3455_vm13, %v3456_v58, %v3457_v23  ;;  %v1177_v58 = vmax.f32 %v11843_v20, 0.0  ;;  %v1408_v23 = vshrl.u32 %v12028_v56, 16  ;;  %v1564_v1 = vshll.u32 %v12059_v4, 16 }
 0x351   :  { %3552 = vrot.lane.b32.xlu2 %v3458_v43, %s9948_s2  ;;  %v2917_v47 = vor.u32 %v2916_v37, %v2912_v11  ;;  %v2108_v43 = vld [vmem:[#allocation2 + $0x78] sm:$0xf]  ;;  %v18971_v42 = vld [vmem:[#allocation91_spill] sm:$0xff]  ;;  %v18990_v21 = vmax.f32 %v11835_v26, 0.0  ;;  %v18998_v26 = vmax.f32 %v11859_v29, 0.0 }
 0x352   :  { %v12061_v5 = vrot.slane %v1408_v23, 7 }
 0x353   :  { %v2922_v34 = vsel %vm2910_vm14, %v2917_v47, %v2921_v59  ;;  %v1561_v59 = vshrl.u32 %v12059_v4, 16  ;;  %v18954_v47 = vld [vmem:[#allocation81_spill] sm:$0xff] }
 0x354   :  { %3295 = vrot.lane.b32.xlu1 %v2922_v34, %s9949_s3  ;;  %v12057_v34 = vpack.c.bf16 %v1177_v58, %v1177_v58  ;;  %v1411_v58 = vshll.u32 %v12028_v56, 16  ;;  %v1415_v29 = vrot.slane %v12061_v5, 4 }
 0x355   :  { %v12092_v3 = vrot.slane %v1561_v59, 7  ;;  %v18955_v59 = vld [vmem:[#allocation83_spill] sm:$0xff] }
 0x356   :  { %18950 = vst [vmem:[#allocation102_spill] sm:$0xff] %v12057_v34  ;;  %v1413_v25 = vor.u32 %v1411_v58, %v12061_v5  ;;  %v1553_v37 = vshrl.u32 %v12057_v34, 16  ;;  %v1556_v56 = vshll.u32 %v12057_v34, 16  ;;  %v18959_v34 = vld [vmem:[#allocation100_spill] sm:$0xff]  ;;  %v18972_v58 = vld [vmem:[#allocation101_spill] sm:$0xff]  ;;  %v19010_v5 = vmax.f32 %v11883_v49, 0.0 }
 0x357   :  { %18952 = vst [vmem:[#allocation104_spill] sm:$0xff] %v12092_v3  ;;  %v19018_v49 = vmax.f32 %v11899_v10, 0.0  ;;  %v19024_v10 = vmax.f32 %v11911_v57, 0.0  ;;  %v19029_v57 = vld [vmem:[#allocation93_spill] sm:$0xff] }
 0x358   :  { %v1555_v23 = vrot.slane %v1553_v37, 7  ;;  %v1414_v20 = vsel %vm11379_vm9, %v1406_v33, %v1413_v25  ;;  %v1566_v37 = vor.u32 %v1564_v1, %v12092_v3  ;;  %v18957_v25 = vld [vmem:[#allocation85_spill] sm:$0xff]  ;;  %v18960_v3 = vld [vmem:[#allocation99_spill] sm:$0xff]  ;;  %v12196_v33 = vpack.c.bf16 %v18990_v21, %v18990_v21 }
 0x359   :  { %2046 = vst.msk [vmem:[#allocation2 + $0x10] sm:$0xf] %vm1287_vm1, %v1414_v20  ;;  %v18970_v1 = vld [vmem:[#allocation89_spill] sm:$0xff]  ;;  %v12216_v21 = vpack.c.bf16 %v18998_v26, %v18998_v26  ;;  %v2043_v26 = vld [vmem:[#allocation2 + $0xc] sm:$0xf] }
 0x35a   :  { %v1558_v46 = vor.u32 %v1556_v56, %v1555_v23  ;;  %v1559_v4 = vrot.slane %v1555_v23, 4  ;;  %v18958_v56 = vld [vmem:[#allocation96_spill] sm:$0xff] }
 0x35b   :  { %18999 = vst [vmem:[#allocation91_spill] sm:$0xff] %v12216_v21  ;;  %v2049_v21 = vld [vmem:[#allocation2 + $0x14] sm:$0x1] }
 0x35c   :  { %v1567_v20 = vsel %vm11379_vm9, %v1559_v4, %v1566_v37  ;;  %v2109_v23 = vsel %vm11959_vm12, %v1558_v46, %v2108_v43  ;;  %v12122_v4 = vpack.c.bf16 %v18963_v53, %v18963_v53  ;;  %v18965_v46 = vmax.f32 %v11783_v18, 0.0  ;;  %v18967_v37 = vld [vmem:[#allocation86_spill] sm:$0xff] }
 0x35d   :  { %2110 = vst [vmem:[#allocation2 + $0x78] sm:$0xf] %v2109_v23  ;;  %v12139_v18 = vpack.c.bf16 %v18973_v12, %v18973_v12  ;;  %v18975_v23 = vmax.f32 %v11799_v63, 0.0  ;;  %v12159_v12 = vpack.c.bf16 %v18978_v30, %v18978_v30  ;;  %v18981_v63 = vmax.f32 %v11815_v61, 0.0 }
 0x35e   :  { %18964 = vst [vmem:[#allocation78_spill] sm:$0xff] %v12122_v4  ;;  %v12127_v43 = vpack.c.bf16 %v18965_v46, %v18965_v46  ;;  %v18974_v46 = vmax.f32 %v11795_v54, 0.0  ;;  %v18980_v54 = vmax.f32 %v11811_v27, 0.0  ;;  %v1417_v55 = vshrl.u32 %v12122_v4, 16 }
 0x35f   :  { %2111 = vst.msk [vmem:[#allocation2 + $0x7c] sm:$0xf] %vm1287_vm1, %v1567_v20  ;;  %v12149_v45 = vpack.c.bf16 %v18975_v23, %v18975_v23  ;;  %v12169_v23 = vpack.c.bf16 %v18981_v63, %v18981_v63  ;;  %v18984_v53 = vmax.f32 %v11823_v19, 0.0  ;;  %v18988_v63 = vmax.f32 %v11831_v31, 0.0 }
 0x360   :  { %18966 = vst [vmem:[#allocation81_spill] sm:$0xff] %v12127_v43  ;;  %v12144_v20 = vpack.c.bf16 %v18974_v46, %v18974_v46  ;;  %v12164_v46 = vpack.c.bf16 %v18980_v54, %v18980_v54  ;;  %v1425_v30 = vshrl.u32 %v12127_v43, 16  ;;  %v18986_v54 = vmax.f32 %v11827_v62, 0.0 }
 0x361   :  { %18976 = vst [vmem:[#allocation83_spill] sm:$0xff] %v12149_v45  ;;  %v12181_v27 = vpack.c.bf16 %v18984_v53, %v18984_v53  ;;  %v12191_v24 = vpack.c.bf16 %v18988_v63, %v18988_v63  ;;  %v18992_v19 = vmax.f32 %v11839_v38, 0.0  ;;  %v18994_v62 = vmax.f32 %v11851_v0, 0.0 }
 0x362   :  { %18979 = vst [vmem:[#allocation84_spill] sm:$0xff] %v12159_v12  ;;  %v12186_v61 = vpack.c.bf16 %v18986_v54, %v18986_v54  ;;  %v18996_v31 = vmax.f32 %v11855_v51, 0.0  ;;  %v19000_v38 = vmax.f32 %v11863_v41, 0.0  ;;  %v19002_v0 = vmax.f32 %v11867_v48, 0.0 }
 0x363   :  { %18982 = vst [vmem:[#allocation85_spill] sm:$0xff] %v12169_v23  ;;  %v12201_v53 = vpack.c.bf16 %v18992_v19, %v18992_v19  ;;  %v12206_v54 = vpack.c.bf16 %v18994_v62, %v18994_v62  ;;  %v19004_v51 = vmax.f32 %v11871_v17, 0.0  ;;  %v19006_v41 = vmax.f32 %v11875_v8, 0.0 }
 0x364   :  { %18985 = vst [vmem:[#allocation96_spill] sm:$0xff] %v12181_v27  ;;  %v12211_v63 = vpack.c.bf16 %v18996_v31, %v18996_v31  ;;  %v12221_v19 = vpack.c.bf16 %v19000_v38, %v19000_v38  ;;  %v12226_v62 = vpack.c.bf16 %v19002_v0, %v19002_v0  ;;  %v19008_v48 = vmax.f32 %v11879_v2, 0.0 }
 0x365   :  { %18987 = vst [vmem:[#allocation100_spill] sm:$0xff] %v12186_v61  ;;  %v12231_v31 = vpack.c.bf16 %v19004_v51, %v19004_v51  ;;  %v12237_v38 = vpack.c.bf16 %v19006_v41, %v19006_v41  ;;  %v1419_v17 = vrot.slane %v1417_v55, 7  ;;  %v12245_v51 = vrot.slane %v1425_v30, 7 }
 0x366   :  { %18989 = vst [vmem:[#allocation99_spill] sm:$0xff] %v12191_v24  ;;  %v12242_v0 = vpack.c.bf16 %v19008_v48, %v19008_v48  ;;  %v19012_v8 = vmax.f32 %v11887_v39, 0.0  ;;  %v19014_v2 = vmax.f32 %v11891_v14, 0.0  ;;  %v12270_v30 = vpack.c.bf16 %v19018_v49, %v19018_v49 }
 0x367   :  { %18991 = vst [vmem:[#allocation86_spill] sm:$0xff] %v12196_v33  ;;  %v19020_v39 = vmax.f32 %v11903_v40, 0.0  ;;  %v1420_v14 = vshll.u32 %v12122_v4, 16  ;;  %v12287_v49 = vpack.c.bf16 %v19024_v10, %v19024_v10  ;;  %v2044_v40 = vsel %vm11959_vm12, %v12037_v32, %v2043_v26 }
 0x368   :  { %18993 = vst [vmem:[#allocation87_spill] sm:$0xff] %v12201_v53  ;;  %v12255_v41 = vpack.c.bf16 %v19012_v8, %v19012_v8  ;;  %v12260_v48 = vpack.c.bf16 %v19014_v2, %v19014_v2  ;;  %v1428_v8 = vshll.u32 %v12127_v43, 16  ;;  %v2052_v2 = vld [vmem:[#allocation2 + $0x18] sm:$0xf]  ;;  %v2050_v4 = vsel %vm11395_vm10, %v1415_v29, %v2049_v21 }
 0x369   :  { %18995 = vst [vmem:[#allocation88_spill] sm:$0xff] %v12206_v54  ;;  %v19027_v43 = vmax.f32 %v11915_v15, 0.0  ;;  %v19030_v10 = vmax.f32 %v19029_v57, 0.0  ;;  %v19035_v15 = vmax.f32 %v11927_v22, 0.0  ;;  %v19037_v21 = vmax.f32 %v11931_v60, 0.0 }
 0x36a   :  { %18997 = vst [vmem:[#allocation89_spill] sm:$0xff] %v12211_v63  ;;  %v9483_v63 = vld [vmem:[#allocation2 + $0x78] sm:$0xff]  }
 0x36b   :  { %19001 = vst [vmem:[#allocation101_spill] sm:$0xff] %v12221_v19  ;;  %3794 = vrot.lane.b32.xlu0 %v9483_v63, %s9950_s27  ;;  %v19016_v63 = vmax.f32 %v11895_v16, 0.0  ;;  %v19022_v16 = vmax.f32 %v11907_v50, 0.0  ;;  %v1422_v50 = vor.u32 %v1420_v14, %v1419_v17  ;;  %v12318_v29 = vpack.c.bf16 %v19037_v21, %v19037_v21 }
 0x36c   :  { %19003 = vst [vmem:[#allocation105_spill] sm:$0xff] %v12226_v62 }
 0x36d   :  { %19005 = vst [vmem:[#allocation106_spill] sm:$0xff] %v12231_v31  ;;  %v12250_v31 = vpack.c.bf16 %v19010_v5, %v19010_v5  ;;  %v12265_v55 = vpack.c.bf16 %v19016_v63, %v19016_v63  ;;  %v12275_v5 = vpack.c.bf16 %v19020_v39, %v19020_v39  ;;  %v12282_v63 = vpack.c.bf16 %v19022_v16, %v19022_v16 }
 0x36e   :  { %19007 = vst [vmem:[#allocation107_spill] sm:$0xff] %v12237_v38  ;;  %v1423_v16 = vrot.slane %v1419_v17, 4  ;;  %v19039_v17 = vmax.f32 %v11935_v35, 0.0  ;;  %v2053_v60 = vsel %vm11959_vm12, %v1422_v50, %v2052_v2  ;;  %v19045_v35 = vmax.f32 %v18955_v59, 0.0  ;;  %v19054_v59 = vld [vmem:[#allocation77_spill] sm:$0xff] }
 0x36f   :  { %19009 = vst [vmem:[#allocation108_spill] sm:$0xff] %v12242_v0 }
 0x370   :  { %19011 = vst [vmem:[#allocation109_spill] sm:$0xff] %v12250_v31  ;;  %v12323_v14 = vpack.c.bf16 %v19039_v17, %v19039_v17  ;;  %v12342_v57 = vpack.c.bf16 %v19045_v35, %v19045_v35 }
 0x371   :  { %19013 = vst [vmem:[#allocation110_spill] sm:$0xff] %v12255_v41 }
 0x372   :  { %19015 = vst [vmem:[#allocation111_spill] sm:$0xff] %v12260_v48 }
 0x373   :  { %19017 = vst [vmem:[#allocation112_spill] sm:$0xff] %v12265_v55  ;;  %v2066_v55 = vld [vmem:[#allocation2 + $0x30] sm:$0xf] }
 0x374   :  { %19019 = vst [vmem:[#allocation113_spill] sm:$0xff] %v12270_v30  ;;  %v19032_v30 = vld [vmem:[#allocation94_spill] sm:$0xff] }
 0x375   :  { %19021 = vst [vmem:[#allocation114_spill] sm:$0xff] %v12275_v5  ;;  %v12297_v5 = vpack.c.bf16 %v19027_v43, %v19027_v43  ;;  %v19033_v32 = vmax.f32 %v19032_v30, 0.0  ;;  %v12313_v43 = vpack.c.bf16 %v19035_v15, %v19035_v15  ;;  %v19041_v30 = vmax.f32 %v11939_v44, 0.0 }
 0x376   :  { %19023 = vst [vmem:[#allocation115_spill] sm:$0xff] %v12282_v63  ;;  %v1430_v63 = vor.u32 %v1428_v8, %v12245_v51  ;;  %v19047_v44 = vmax.f32 %v18956_v7, 0.0  ;;  %v19057_v7 = vmax.f32 %v11973_v28, 0.0  ;;  %v19065_v28 = vld [vmem:[#allocation82_spill] sm:$0xff] }
 0x377   :  { %19025 = vst [vmem:[#allocation116_spill] sm:$0xff] %v12287_v49  ;;  %v12303_v49 = vpack.c.bf16 %v19030_v10, %v19030_v10  ;;  %v12308_v26 = vpack.c.bf16 %v19033_v32, %v19033_v32  ;;  %v12328_v8 = vpack.c.bf16 %v19041_v30, %v19041_v30  ;;  %v19055_v32 = vmax.f32 %v19054_v59, 0.0 }
 0x378   :  { %19028 = vst [vmem:[#allocation79_spill] sm:$0xff] %v12297_v5  ;;  %v1431_v22 = vsel %vm11379_vm9, %v1423_v16, %v1430_v63  ;;  %v12347_v10 = vpack.c.bf16 %v19047_v44, %v19047_v44  ;;  %v19049_v63 = vmax.f32 %v18957_v25, 0.0  ;;  %v12367_v21 = vpack.c.bf16 %v19057_v7, %v19057_v7 }
 0x379   :  { %2045 = vst [vmem:[#allocation2 + $0xc] sm:$0xf] %v2044_v40  ;;  %v19043_v40 = vmax.f32 %v18954_v47, 0.0  ;;  %v19051_v47 = vld [vmem:[#allocation90_spill] sm:$0xff]  ;;  %v12362_v15 = vpack.c.bf16 %v19055_v32, %v19055_v32  ;;  %v19059_v25 = vmax.f32 %v18958_v56, 0.0  ;;  %v19061_v30 = vmax.f32 %v18959_v34, 0.0 }
 0x37a   :  { %19031 = vst [vmem:[#allocation93_spill] sm:$0xff] %v12303_v49  ;;  %v12352_v16 = vpack.c.bf16 %v19049_v63, %v19049_v63  ;;  %v19052_v2 = vmax.f32 %v19051_v47, 0.0  ;;  %v19066_v44 = vmax.f32 %v19065_v28, 0.0  ;;  %v19068_v56 = vld [vmem:[#allocation97_spill] sm:$0xff]  ;;  %v19076_v7 = vmax.f32 %v18968_v36, 0.0 }
 0x37b   :  { %19034 = vst [vmem:[#allocation94_spill] sm:$0xff] %v12308_v26  ;;  %v12372_v17 = vpack.c.bf16 %v19059_v25, %v19059_v25  ;;  %v19069_v47 = vmax.f32 %v19068_v56, 0.0  ;;  %v19080_v28 = vmax.f32 %v18970_v1, 0.0  ;;  %v19084_v36 = vmax.f32 %v18972_v58, 0.0 }
 0x37c   :  { %19036 = vst [vmem:[#allocation117_spill] sm:$0xff] %v12313_v43  ;;  %v12357_v50 = vpack.c.bf16 %v19052_v2, %v19052_v2  ;;  %v12388_v63 = vpack.c.bf16 %v19066_v44, %v19066_v44  ;;  %v12408_v25 = vpack.c.bf16 %v19076_v7, %v19076_v7  ;;  %v1468_v7 = vshrl.u32 %v12154_v52, 16 }
 0x37d   :  { %19038 = vst [vmem:[#allocation118_spill] sm:$0xff] %v12318_v29  ;;  %v12393_v2 = vpack.c.bf16 %v19069_v47, %v19069_v47  ;;  %v12418_v44 = vpack.c.bf16 %v19080_v28, %v19080_v28  ;;  %v12428_v47 = vpack.c.bf16 %v19084_v36, %v19084_v36  ;;  %v1476_v58 = vshrl.u32 %v12159_v12, 16 }
 0x37e   :  { %2051 = vst [vmem:[#allocation2 + $0x14] sm:$0x1] %v2050_v4  ;;  %v12337_v4 = vpack.c.bf16 %v19043_v40, %v19043_v40  ;;  %v19063_v40 = vmax.f32 %v18960_v3, 0.0  ;;  %v19074_v3 = vmax.f32 %v18967_v37, 0.0  ;;  %v19082_v37 = vmax.f32 %v18971_v42, 0.0 }
 0x37f   :  { %19040 = vst [vmem:[#allocation119_spill] sm:$0xff] %v12323_v14  ;;  %v1536_v42 = vshrl.u32 %v12196_v33, 16  ;;  %v2112_v33 = vld [vmem:[#allocation2 + $0x80] sm:$0x1] }
 0x380   :  { %19042 = vst [vmem:[#allocation120_spill] sm:$0xff] %v12328_v8  ;;  %v12383_v35 = vpack.c.bf16 %v19063_v40, %v19063_v40  ;;  %v12403_v32 = vpack.c.bf16 %v19074_v3, %v19074_v3  ;;  %v12423_v56 = vpack.c.bf16 %v19082_v37, %v19082_v37  ;;  %v1459_v3 = vshrl.u32 %v12149_v45, 16 }
 0x381   :  { %19044 = vst [vmem:[#allocation121_spill] sm:$0xff] %v12337_v4  ;;  %v1485_v37 = vshrl.u32 %v12164_v46, 16 }
 0x382   :  { %19046 = vst [vmem:[#allocation122_spill] sm:$0xff] %v12342_v57  ;;  %v12489_v28 = vrot.slane %v1459_v3, 7 }
 0x383   :  { %19048 = vst [vmem:[#allocation123_spill] sm:$0xff] %v12347_v10 }
 0x384   :  { %19050 = vst [vmem:[#allocation124_spill] sm:$0xff] %v12352_v16 }
 0x385   :  { %2054 = vst [vmem:[#allocation2 + $0x18] sm:$0xf] %v2053_v60  ;;  %v12378_v60 = vpack.c.bf16 %v19061_v30, %v19061_v30  ;;  %v19078_v30 = vmax.f32 %v18969_v9, 0.0  ;;  %v1502_v9 = vshrl.u32 %v12174_v13, 16 }
 0x386   :  { %19053 = vst [vmem:[#allocation90_spill] sm:$0xff] %v12357_v50 }
 0x387   :  { %19056 = vst [vmem:[#allocation77_spill] sm:$0xff] %v12362_v15  ;;  %v12413_v40 = vpack.c.bf16 %v19078_v30, %v19078_v30  ;;  %v12502_v30 = vrot.slane %v1502_v9, 7 }
 0x388   :  { %19058 = vst [vmem:[#allocation125_spill] sm:$0xff] %v12367_v21 }
 0x389   :  { %19060 = vst [vmem:[#allocation126_spill] sm:$0xff] %v12372_v17  ;;  %v1508_v31 = vrot.slane %v12502_v30, 4 }
 0x38a   :  { %2055 = vst.msk [vmem:[#allocation2 + $0x1c] sm:$0xf] %vm1287_vm1, %v1431_v22  ;;  %v19071_v22 = vld [vmem:[#allocation98_spill] sm:$0xff] }
 0x38b   :  { %19062 = vst [vmem:[#allocation127_spill] sm:$0xff] %v12378_v60  ;;  %v19072_v34 = vmax.f32 %v19071_v22, 0.0  ;;  %v1493_v22 = vshrl.u32 %v12169_v23, 16  ;;  %v12497_v60 = vrot.slane %v1485_v37, 7 }
 0x38c   :  { %19064 = vst [vmem:[#allocation128_spill] sm:$0xff] %v12383_v35  ;;  %v19087_v35 = vld [vmem:[#allocation91_spill] sm:$0xff] }
 0x38d   :  { %19067 = vst [vmem:[#allocation82_spill] sm:$0xff] %v12388_v63  ;;  %v12398_v59 = vpack.c.bf16 %v19072_v34, %v19072_v34  ;;  %v1451_v34 = vshrl.u32 %v12144_v20, 16  ;;  %v12493_v63 = vrot.slane %v1476_v58, 7  ;;  %v12499_v1 = vrot.slane %v1493_v22, 7 }
 0x38e   :  { %19070 = vst [vmem:[#allocation97_spill] sm:$0xff] %v12393_v2  ;;  %v12491_v2 = vrot.slane %v1468_v7, 7  ;;  %v12510_v7 = vrot.slane %v1536_v42, 7  ;;  %v19094_v22 = vshll.u32 %v12149_v45, 16 }
 0x38f   :  { %19073 = vst [vmem:[#allocation98_spill] sm:$0xff] %v12398_v59  ;;  %v19086_v59 = vld [vmem:[#allocation89_spill] sm:$0xff]  ;;  %v1453_v17 = vrot.slane %v1451_v34, 7 }
 0x390   :  { %19075 = vst [vmem:[#allocation129_spill] sm:$0xff] %v12403_v32  ;;  %v1464_v41 = vor.u32 %v19094_v22, %v12489_v28  ;;  %v1474_v9 = vrot.slane %v12491_v2, 4  ;;  %v1542_v45 = vrot.slane %v12510_v7, 4  ;;  %v19100_v22 = vshll.u32 %v12201_v53, 16 }
 0x391   :  { %19077 = vst [vmem:[#allocation130_spill] sm:$0xff] %v12408_v25  ;;  %v1544_v25 = vshrl.u32 %v12201_v53, 16  ;;  %v1457_v37 = vrot.slane %v1453_v17, 4  ;;  %v2059_v53 = vld [vmem:[#allocation2 + $0x24] sm:$0xf] }
 0x392   :  { %19079 = vst [vmem:[#allocation131_spill] sm:$0xff] %v12413_v40  ;;  %v1527_v40 = vshrl.u32 %v12191_v24, 16 }
 0x393   :  { %19081 = vst [vmem:[#allocation132_spill] sm:$0xff] %v12418_v44  ;;  %v1519_v44 = vshrl.u32 %v12186_v61, 16  ;;  %v12512_v58 = vrot.slane %v1544_v25, 7  ;;  %v1491_v25 = vrot.slane %v12497_v60, 4 }
 0x394   :  { %19083 = vst [vmem:[#allocation133_spill] sm:$0xff] %v12423_v56  ;;  %v9401_v56 = vld [vmem:[#allocation2 + $0x18] sm:$0xff]   ;;  %v12508_v3 = vrot.slane %v1527_v40, 7  ;;  %v19098_v40 = vshrl.u32 %v12139_v18, 16 }
 0x395   :  { %19085 = vst [vmem:[#allocation134_spill] sm:$0xff] %v12428_v47  ;;  %v1510_v47 = vshrl.u32 %v12181_v27, 16  ;;  %4800 = vrot.lane.b32.xlu2 %v9401_v56, %s9951_s28  ;;  %3778 = vrot.lane.b32.xlu1 %v9401_v56, %s9950_s27  ;;  %v12506_v34 = vrot.slane %v1519_v44, 7  ;;  %v19093_v56 = vld [vmem:[#allocation104_spill] sm:$0xff]  ;;  %v1549_v26 = vor.u32 %v19100_v22, %v12512_v58  ;;  %v2056_v22 = vld [vmem:[#allocation2 + $0x20] sm:$0x1] }
 0x396   :  { %v1568_v36 = vrot.slane %v19093_v56, 4  ;;  %v19096_v56 = vshll.u32 %v12169_v23, 16  ;;  %v12536_v0 = vrot.slane %v19098_v40, 7  ;;  %v19099_v23 = vshll.u32 %v12191_v24, 16  ;;  %v19131_v49 = vld [vmem:[#allocation97_spill] sm:$0xff] }
 0x397   :  { %v12504_v32 = vrot.slane %v1510_v47, 7  ;;  %v19095_v47 = vshll.u32 %v12159_v12, 16  ;;  %v1525_v42 = vrot.slane %v12506_v34, 4 }
 0x398   :  { %v1498_v5 = vor.u32 %v19096_v56, %v12499_v1  ;;  %v1532_v56 = vor.u32 %v19099_v23, %v12508_v3 }
 0x399   :  { %v1481_v44 = vor.u32 %v19095_v47, %v12493_v63  ;;  %v19097_v47 = vshll.u32 %v12181_v27, 16  ;;  %v2113_v27 = vsel %vm11395_vm10, %v1568_v36, %v2112_v33  ;;  %v2073_v36 = vld [vmem:[#allocation2 + $0x3c] sm:$0xf] }
 0x39a   :  { %v1499_v38 = vsel %vm11379_vm9, %v1491_v25, %v1498_v5  ;;  %2114 = vst [vmem:[#allocation2 + $0x80] sm:$0x1] %v2113_v27  ;;  %v19101_v27 = vshll.u32 %v12139_v18, 16  ;;  %v19102_v25 = vshll.u32 %v12144_v20, 16  ;;  %v1533_v33 = vsel %vm11379_vm9, %v1525_v42, %v1532_v56 }
 0x39b   :  { %v1515_v12 = vor.u32 %v19097_v47, %v12504_v32  ;;  %v1465_v47 = vsel %vm11379_vm9, %v1457_v37, %v1464_v41  ;;  %v1482_v40 = vsel %vm11379_vm9, %v1474_v9, %v1481_v44  ;;  %v2070_v9 = vld [vmem:[#allocation2 + $0x38] sm:$0x1]  ;;  %v1432_v44 = vrot.slane %v12245_v51, 4  ;;  %2083 = vst.msk [vmem:[#allocation2 + $0x4c] sm:$0xf] %vm1287_vm1, %v1499_v38 }
 0x39c   :  { %2069 = vst.msk [vmem:[#allocation2 + $0x34] sm:$0xf] %vm1287_vm1, %v1465_v47  ;;  %v1439_v5 = vor.u32 %v19101_v27, %v12536_v0  ;;  %v1456_v24 = vor.u32 %v19102_v25, %v1453_v17  ;;  %v1466_v47 = vrot.slane %v12489_v28, 4  ;;  %v1550_v51 = vsel %vm11379_vm9, %v1542_v45, %v1549_v26  ;;  %v2077_v27 = vld [vmem:[#allocation2 + $0x44] sm:$0x1] }
 0x39d   :  { %v1516_v37 = vsel %vm11379_vm9, %v1508_v31, %v1515_v12  ;;  %2076 = vst.msk [vmem:[#allocation2 + $0x40] sm:$0xf] %vm1287_vm1, %v1482_v40  ;;  %v19103_v56 = vshll.u32 %v12154_v52, 16  ;;  %v1483_v38 = vrot.slane %v12493_v63, 4  ;;  %v2080_v26 = vld [vmem:[#allocation2 + $0x48] sm:$0xf] }
 0x39e   :  { %2090 = vst.msk [vmem:[#allocation2 + $0x58] sm:$0xf] %vm1287_vm1, %v1516_v37  ;;  %v2084_v25 = vld [vmem:[#allocation2 + $0x50] sm:$0x1]  ;;  %v19104_v42 = vshll.u32 %v12164_v46, 16  ;;  %v2060_v37 = vsel %vm11959_vm12, %v1439_v5, %v2059_v53  ;;  %v1500_v28 = vrot.slane %v12499_v1, 4 }
 0x39f   :  { %v1473_v40 = vor.u32 %v19103_v56, %v12491_v2  ;;  %2097 = vst.msk [vmem:[#allocation2 + $0x64] sm:$0xf] %vm1287_vm1, %v1533_v33  ;;  %v2057_v2 = vsel %vm11395_vm10, %v1432_v44, %v2056_v22  ;;  %v2067_v56 = vsel %vm11959_vm12, %v1456_v24, %v2066_v55  ;;  %v2087_v63 = vld [vmem:[#allocation2 + $0x54] sm:$0xf]  ;;  %v2091_v22 = vld [vmem:[#allocation2 + $0x5c] sm:$0x1] }
 0x3a0   :  { %v1490_v17 = vor.u32 %v19104_v42, %v12497_v60  ;;  %2104 = vst.msk [vmem:[#allocation2 + $0x70] sm:$0xf] %vm1287_vm1, %v1550_v51  ;;  %v2071_v60 = vsel %vm11395_vm10, %v1466_v47, %v2070_v9  ;;  %v19105_v24 = vshll.u32 %v12174_v13, 16  ;;  %v2094_v51 = vld [vmem:[#allocation2 + $0x60] sm:$0xf]  ;;  %v1517_v9 = vrot.slane %v12504_v32, 4 }
 0x3a1   :  { %2058 = vst [vmem:[#allocation2 + $0x20] sm:$0x1] %v2057_v2  ;;  %v2074_v5 = vsel %vm11959_vm12, %v1473_v40, %v2073_v36  ;;  %v2078_v47 = vsel %vm11395_vm10, %v1483_v38, %v2077_v27  ;;  %v2098_v2 = vld [vmem:[#allocation2 + $0x68] sm:$0x1]  ;;  %v19107_v36 = vshll.u32 %v12186_v61, 16  ;;  %v19108_v42 = vshrl.u32 %v19086_v59, 16 }
 0x3a2   :  { %v1507_v55 = vor.u32 %v19105_v24, %v12502_v30  ;;  %2061 = vst [vmem:[#allocation2 + $0x24] sm:$0xf] %v2060_v37  ;;  %v19106_v30 = vshrl.u32 %v12206_v54, 16  ;;  %v2081_v37 = vsel %vm11959_vm12, %v1490_v17, %v2080_v26  ;;  %v1534_v38 = vrot.slane %v12508_v3, 4  ;;  %v19109_v45 = vld [vmem:[#allocation126_spill] sm:$0xff]  ;;  %v19116_v32 = vld [vmem:[#allocation128_spill] sm:$0xff] }
 0x3a3   :  { %2068 = vst [vmem:[#allocation2 + $0x30] sm:$0xf] %v2067_v56  ;;  %v1524_v40 = vor.u32 %v19107_v36, %v12506_v34  ;;  %v1580_v27 = vrot.slane %v19108_v42, 7  ;;  %v2085_v56 = vsel %vm11395_vm10, %v1500_v28, %v2084_v25  ;;  %v19110_v36 = vld [vmem:[#allocation86_spill] sm:$0xff]  ;;  %v19112_v42 = vld [vmem:[#allocation127_spill] sm:$0xff]  ;;  %v19113_v3 = vshrl.u32 %v19087_v35, 16 }
 0x3a4   :  { %v1572_v24 = vrot.slane %v19106_v30, 7  ;;  %2072 = vst [vmem:[#allocation2 + $0x38] sm:$0x1] %v2071_v60  ;;  %v2101_v30 = vld [vmem:[#allocation2 + $0x6c] sm:$0xf]  ;;  %v19111_v17 = vshll.u32 %v19110_v36, 16  ;;  %v2088_v60 = vsel %vm11959_vm12, %v1507_v55, %v2087_v63  ;;  %v2092_v28 = vsel %vm11395_vm10, %v1517_v9, %v2091_v22 }
 0x3a5   :  { %2075 = vst [vmem:[#allocation2 + $0x3c] sm:$0xf] %v2074_v5  ;;  %v1589_v1 = vrot.slane %v19113_v3, 7  ;;  %v1551_v25 = vrot.slane %v12512_v58, 4  ;;  %v2105_v5 = vld [vmem:[#allocation2 + $0x74] sm:$0x1] }
 0x3a6   :  { %v1541_v26 = vor.u32 %v19111_v17, %v12510_v7  ;;  %2079 = vst [vmem:[#allocation2 + $0x44] sm:$0x1] %v2078_v47  ;;  %v19114_v7 = vshrl.u32 %v12221_v19, 16  ;;  %v19115_v63 = vshll.u32 %v12206_v54, 16  ;;  %v2095_v47 = vsel %vm11959_vm12, %v1524_v40, %v2094_v51  ;;  %v2115_v3 = vld [vmem:[#allocation2 + $0x84] sm:$0xf] }
 0x3a7   :  { %2082 = vst [vmem:[#allocation2 + $0x48] sm:$0xf] %v2081_v37  ;;  %v1576_v53 = vrot.slane %v1572_v24, 4  ;;  %v19117_v22 = vshll.u32 %v19086_v59, 16  ;;  %v2099_v37 = vsel %vm11395_vm10, %v1534_v38, %v2098_v2  ;;  %v19118_v34 = vshrl.u32 %v12226_v62, 16  ;;  %v19120_v58 = vld [vmem:[#allocation106_spill] sm:$0xff] }
 0x3a8   :  { %v1597_v17 = vrot.slane %v19114_v7, 7  ;;  %v1575_v55 = vor.u32 %v19115_v63, %v1572_v24  ;;  %2086 = vst [vmem:[#allocation2 + $0x50] sm:$0x1] %v2085_v56  ;;  %v1585_v44 = vrot.slane %v1580_v27, 4  ;;  %v2102_v51 = vsel %vm11959_vm12, %v1541_v26, %v2101_v30  ;;  %v2119_v40 = vld [vmem:[#allocation2 + $0x8c] sm:$0x1] }
 0x3a9   :  { %v1583_v9 = vor.u32 %v19117_v22, %v1580_v27  ;;  %2089 = vst [vmem:[#allocation2 + $0x54] sm:$0xf] %v2088_v60  ;;  %v1606_v63 = vrot.slane %v19118_v34, 7  ;;  %v19119_v56 = vld [vmem:[#allocation82_spill] sm:$0xff]  ;;  %v19121_v33 = vshrl.u32 %v19120_v58, 16  ;;  %v19122_v31 = vshll.u32 %v19087_v35, 16 }
 0x3aa   :  { %2093 = vst [vmem:[#allocation2 + $0x5c] sm:$0x1] %v2092_v28  ;;  %v2106_v38 = vsel %vm11395_vm10, %v1551_v25, %v2105_v5  ;;  %v2122_v60 = vld [vmem:[#allocation2 + $0x90] sm:$0xf]  ;;  %v1593_v34 = vrot.slane %v1589_v1, 4  ;;  %v19123_v30 = vshll.u32 %v12221_v19, 16  ;;  %v2116_v28 = vsel %vm11959_vm12, %v1575_v55, %v2115_v3 }
 0x3ab   :  { %v1614_v22 = vrot.slane %v19121_v33, 7  ;;  %v1592_v2 = vor.u32 %v19122_v31, %v1589_v1  ;;  %2096 = vst [vmem:[#allocation2 + $0x60] sm:$0xf] %v2095_v47  ;;  %v19124_v7 = vld [vmem:[#allocation107_spill] sm:$0xff]  ;;  %v19126_v12 = vld [vmem:[#allocation108_spill] sm:$0xff]  ;;  %v1602_v23 = vrot.slane %v1597_v17, 4  ;;  %v1584_v25 = vsel %vm11379_vm9, %v1576_v53, %v1583_v9 }
 0x3ac   :  { %v1600_v26 = vor.u32 %v19123_v30, %v1597_v17  ;;  %2100 = vst [vmem:[#allocation2 + $0x68] sm:$0x1] %v2099_v37  ;;  %v19125_v33 = vshrl.u32 %v19124_v7, 16  ;;  %v19127_v31 = vshrl.u32 %v19126_v12, 16  ;;  %v2126_v5 = vld [vmem:[#allocation2 + $0x98] sm:$0x1]  ;;  %v2120_v30 = vsel %vm11395_vm10, %v1585_v44, %v2119_v40 }
 0x3ad   :  { %2103 = vst [vmem:[#allocation2 + $0x6c] sm:$0xf] %v2102_v51  ;;  %v19128_v1 = vshll.u32 %v12226_v62, 16  ;;  %v19129_v55 = vld [vmem:[#allocation78_spill] sm:$0xff]  ;;  %v19130_v37 = vld [vmem:[#allocation81_spill] sm:$0xff]  ;;  %v1610_v17 = vrot.slane %v1606_v63, 4  ;;  %v2123_v9 = vsel %vm11959_vm12, %v1592_v2, %v2122_v60  ;;  %v2127_v60 = vsel %vm11395_vm10, %v1602_v23, %v2126_v5 }
 0x3ae   :  { %v1623_v24 = vrot.slane %v19125_v33, 7  ;;  %v1631_v41 = vrot.slane %v19127_v31, 7  ;;  %v7784_v3 = vunpack.c.l.b16 %v19129_v55  ;;  %v7785_v27 = vunpack.c.l.b16 %v19130_v37  ;;  %2107 = vst [vmem:[#allocation2 + $0x74] sm:$0x1] %v2106_v38  ;;  %v2129_v33 = vld [vmem:[#allocation2 + $0x9c] sm:$0xf] }
 0x3af   :  { %v1609_v47 = vor.u32 %v19128_v1, %v1606_v63  ;;  %v19132_v19 = vshll.u32 %v19120_v58, 16  ;;  %2117 = vst [vmem:[#allocation2 + $0x84] sm:$0xf] %v2116_v28  ;;  %v19133_v51 = vld [vmem:[#allocation109_spill] sm:$0xff]  ;;  %v1619_v44 = vrot.slane %v1614_v22, 4  ;;  %v1601_v40 = vsel %vm11379_vm9, %v1593_v34, %v1600_v26  ;;  %v19135_v37 = vld [vmem:[#allocation110_spill] sm:$0xff] }
 0x3b0   :  { %v19134_v1 = vshrl.u32 %v19133_v51, 16  ;;  %v7847_v55 = vpack.c.b16 %v7785_v27, %v7784_v3  ;;  %2118 = vst.msk [vmem:[#allocation2 + $0x88] sm:$0xf] %vm1287_vm1, %v1584_v25  ;;  %v2133_v38 = vld [vmem:[#allocation2 + $0xa4] sm:$0x1]  ;;  %v19136_v31 = vshrl.u32 %v19135_v37, 16 }
 0x3b1   :  { %v1617_v53 = vor.u32 %v19132_v19, %v1614_v22  ;;  %v19137_v58 = vshll.u32 %v19124_v7, 16  ;;  %2121 = vst [vmem:[#allocation2 + $0x8c] sm:$0x1] %v2120_v30  ;;  %v2136_v22 = vld [vmem:[#allocation2 + $0xa8] sm:$0xf]  ;;  %v1627_v34 = vrot.slane %v1623_v24, 4  ;;  %v2130_v25 = vsel %vm11959_vm12, %v1609_v47, %v2129_v33 }
 0x3b2   :  { %v1640_v62 = vrot.slane %v19134_v1, 7  ;;  %v1648_v19 = vrot.slane %v19136_v31, 7  ;;  %v19138_v28 = vld [vmem:[#allocation98_spill] sm:$0xff]  ;;  %v19139_v27 = vshll.u32 %v19126_v12, 16  ;;  %9223 = vmatmul.msk.bf16.gmra.mxu0 %vm279_vm0, %v7847_v55  ;;  %2124 = vst [vmem:[#allocation2 + $0x90] sm:$0xf] %v2123_v9  ;;  %v2134_v55 = vsel %vm11395_vm10, %v1619_v44, %v2133_v38 }
 0x3b3   :  { %v1626_v2 = vor.u32 %v19137_v58, %v1623_v24  ;;  %v19140_v58 = vshrl.u32 %v12260_v48, 16  ;;  %v1636_v23 = vrot.slane %v1631_v41, 4  ;;  %v1618_v5 = vsel %vm11379_vm9, %v1610_v17, %v1617_v53  ;;  %2125 = vst.msk [vmem:[#allocation2 + $0x94] sm:$0xf] %vm1287_vm1, %v1601_v40  ;;  %v2140_v24 = vld [vmem:[#allocation2 + $0xb0] sm:$0x1] }
 0x3b4   :  { %v1634_v26 = vor.u32 %v19139_v27, %v1631_v41  ;;  %v19141_v30 = vld [vmem:[#allocation129_spill] sm:$0xff]  ;;  %v19142_v63 = vld [vmem:[#allocation112_spill] sm:$0xff]  ;;  %v19144_v33 = vshll.u32 %v19133_v51, 16  ;;  %2128 = vst [vmem:[#allocation2 + $0x98] sm:$0x1] %v2127_v60  ;;  %v1644_v3 = vrot.slane %v1640_v62, 4 }
 0x3b5   :  { %v1657_v31 = vrot.slane %v19140_v58, 7  ;;  %v19143_v1 = vshrl.u32 %v19142_v63, 16  ;;  %v2143_v58 = vld [vmem:[#allocation2 + $0xb4] sm:$0xf]  ;;  %v19145_v17 = vshll.u32 %v19135_v37, 16  ;;  %v2137_v40 = vsel %vm11959_vm12, %v1626_v2, %v2136_v22  ;;  %v19146_v27 = vld [vmem:[#allocation130_spill] sm:$0xff] }
 0x3b6   :  { %v1643_v9 = vor.u32 %v19144_v33, %v1640_v62  ;;  %2131 = vst [vmem:[#allocation2 + $0x9c] sm:$0xf] %v2130_v25  ;;  %v19147_v12 = vld [vmem:[#allocation113_spill] sm:$0xff]  ;;  %v1653_v7 = vrot.slane %v1648_v19, 4  ;;  %v1635_v44 = vsel %vm11379_vm9, %v1627_v34, %v1634_v26  ;;  %v19149_v60 = vld [vmem:[#allocation114_spill] sm:$0xff]  ;;  %v19151_v2 = vshll.u32 %v12260_v48, 16 }
 0x3b7   :  { %v1665_v47 = vrot.slane %v19143_v1, 7  ;;  %v1651_v53 = vor.u32 %v19145_v17, %v1648_v19  ;;  %v19148_v51 = vshrl.u32 %v19147_v12, 16  ;;  %2132 = vst.msk [vmem:[#allocation2 + $0xa0] sm:$0xf] %vm1287_vm1, %v1618_v5  ;;  %v2147_v38 = vld [vmem:[#allocation2 + $0xbc] sm:$0x1]  ;;  %v2141_v25 = vsel %vm11395_vm10, %v1636_v23, %v2140_v24 }
 0x3b8   :  { %v19150_v17 = vshrl.u32 %v19149_v60, 16  ;;  %v1660_v22 = vor.u32 %v19151_v2, %v1657_v31  ;;  %2135 = vst [vmem:[#allocation2 + $0xa4] sm:$0x1] %v2134_v55  ;;  %v19152_v19 = vld [vmem:[#allocation131_spill] sm:$0xff]  ;;  %v1661_v37 = vrot.slane %v1657_v31, 4  ;;  %v19153_v34 = vshll.u32 %v19142_v63, 16 }
 0x3b9   :  { %v1674_v33 = vrot.slane %v19148_v51, 7  ;;  %v2150_v51 = vld [vmem:[#allocation2 + $0xc0] sm:$0xf]  ;;  %v2144_v5 = vsel %vm11959_vm12, %v1643_v9, %v2143_v58  ;;  %2138 = vst [vmem:[#allocation2 + $0xa8] sm:$0xf] %v2137_v40  ;;  %v19154_v62 = vld [vmem:[#allocation115_spill] sm:$0xff]  ;;  %v1652_v23 = vsel %vm11379_vm9, %v1644_v3, %v1651_v53  ;;  %v2148_v40 = vsel %vm11395_vm10, %v1653_v7, %v2147_v38 }
 0x3ba   :  { %v1682_v41 = vrot.slane %v19150_v17, 7  ;;  %v1668_v26 = vor.u32 %v19153_v34, %v1665_v47  ;;  %v19155_v48 = vshrl.u32 %v19154_v62, 16  ;;  %v1670_v35 = vrot.slane %v1665_v47, 4  ;;  %2139 = vst.msk [vmem:[#allocation2 + $0xac] sm:$0xf] %vm1287_vm1, %v1635_v44  ;;  %v19156_v31 = vld [vmem:[#allocation132_spill] sm:$0xff] }
 0x3bb   :  { %v2154_v24 = vld [vmem:[#allocation2 + $0xc8] sm:$0x1]  ;;  %v19157_v1 = vld [vmem:[#allocation116_spill] sm:$0xff]  ;;  %v19159_v9 = vshll.u32 %v19147_v12, 16  ;;  %2142 = vst [vmem:[#allocation2 + $0xb0] sm:$0x1] %v2141_v25  ;;  %v2151_v44 = vsel %vm11959_vm12, %v1660_v22, %v2150_v51 }
 0x3bc   :  { %v1691_v2 = vrot.slane %v19155_v48, 7  ;;  %v19158_v34 = vshrl.u32 %v19157_v1, 16  ;;  %v2157_v48 = vld [vmem:[#allocation2 + $0xe4] sm:$0xf]  ;;  %v1678_v17 = vrot.slane %v1674_v33, 4  ;;  %v19160_v3 = vshll.u32 %v19149_v60, 16 }
 0x3bd   :  { %v1677_v58 = vor.u32 %v19159_v9, %v1674_v33  ;;  %2145 = vst [vmem:[#allocation2 + $0xb4] sm:$0xf] %v2144_v5  ;;  %v19161_v55 = vld [vmem:[#allocation133_spill] sm:$0xff]  ;;  %v19162_v59 = vld [vmem:[#allocation79_spill] sm:$0xff]  ;;  %v1687_v54 = vrot.slane %v1682_v41, 4  ;;  %v1669_v7 = vsel %vm11379_vm9, %v1661_v37, %v1668_v26  ;;  %v19166_v22 = vshll.u32 %v19154_v62, 16 }
 0x3be   :  { %v1699_v63 = vrot.slane %v19158_v34, 7  ;;  %v1685_v53 = vor.u32 %v19160_v3, %v1682_v41  ;;  %v19163_v12 = vshrl.u32 %v19162_v59, 16  ;;  %2146 = vst.msk [vmem:[#allocation2 + $0xb8] sm:$0xf] %vm1287_vm1, %v1652_v23  ;;  %v2161_v38 = vld [vmem:[#allocation2 + $0xec] sm:$0x1]  ;;  %v2155_v5 = vsel %vm11395_vm10, %v1670_v35, %v2154_v24 }
 0x3bf   :  { %v19164_v25 = vld [vmem:[#allocation93_spill] sm:$0xff]  ;;  %v1694_v51 = vor.u32 %v19166_v22, %v1691_v2  ;;  %2149 = vst [vmem:[#allocation2 + $0xbc] sm:$0x1] %v2148_v40  ;;  %v19167_v41 = vld [vmem:[#allocation134_spill] sm:$0xff]  ;;  %v1695_v60 = vrot.slane %v1691_v2, 4  ;;  %v19168_v37 = vshll.u32 %v19157_v1, 16  ;;  %v2158_v23 = vsel %vm11959_vm12, %v1677_v58, %v2157_v48 }
 0x3c0   :  { %v1708_v9 = vrot.slane %v19163_v12, 7  ;;  %v19165_v3 = vshrl.u32 %v19164_v25, 16  ;;  %v2164_v12 = vld [vmem:[#allocation2 + $0xf0] sm:$0xf]  ;;  %2152 = vst [vmem:[#allocation2 + $0xc0] sm:$0xf] %v2151_v44  ;;  %v1686_v35 = vsel %vm11379_vm9, %v1678_v17, %v1685_v53 }
 0x3c1   :  { %v1702_v26 = vor.u32 %v19168_v37, %v1699_v63  ;;  %v19169_v33 = vld [vmem:[#allocation94_spill] sm:$0xff]  ;;  %v19171_v22 = vshrl.u32 %v12313_v43, 16  ;;  %v1704_v61 = vrot.slane %v1699_v63, 4  ;;  %2153 = vst.msk [vmem:[#allocation2 + $0xc4] sm:$0xf] %vm1287_vm1, %v1669_v7  ;;  %v19172_v24 = vshrl.u32 %v12318_v29, 16 }
 0x3c2   :  { %v1716_v47 = vrot.slane %v19165_v3, 7  ;;  %v19170_v3 = vshrl.u32 %v19169_v33, 16  ;;  %v2168_v2 = vld [vmem:[#allocation2 + $0xf8] sm:$0x1]  ;;  %v19173_v58 = vshrl.u32 %v12323_v14, 16  ;;  %v19174_v44 = vshll.u32 %v19162_v59, 16 }
 0x3c3   :  { %v1733_v62 = vrot.slane %v19171_v22, 7  ;;  %v12789_v40 = vrot.slane %v19172_v24, 7  ;;  %v2162_v63 = vsel %vm11395_vm10, %v1687_v54, %v2161_v38  ;;  %2156 = vst [vmem:[#allocation2 + $0xc8] sm:$0x1] %v2155_v5  ;;  %v19175_v17 = vshrl.u32 %v12328_v8, 16 }
 0x3c4   :  { %v1725_v36 = vrot.slane %v19170_v3, 7  ;;  %v12793_v48 = vrot.slane %v19173_v58, 7  ;;  %v1711_v37 = vor.u32 %v19174_v44, %v1708_v9  ;;  %v2171_v3 = vld [vmem:[#allocation2 + $0xfc] sm:$0xf]  ;;  %v1712_v7 = vrot.slane %v1708_v9, 4 }
 0x3c5   :  { %v12801_v53 = vrot.slane %v19175_v17, 7  ;;  %v19176_v22 = vshll.u32 %v19164_v25, 16  ;;  %v2165_v58 = vsel %vm11959_vm12, %v1694_v51, %v2164_v12  ;;  %2159 = vst [vmem:[#allocation2 + $0xe4] sm:$0xf] %v2158_v23  ;;  %v19177_v34 = vshrl.u32 %v12337_v4, 16 }
 0x3c6   :  { %v19178_v54 = vshrl.u32 %v12342_v57, 16  ;;  %v1721_v5 = vrot.slane %v1716_v47, 4  ;;  %v1703_v17 = vsel %vm11379_vm9, %v1695_v60, %v1702_v26  ;;  %2160 = vst.msk [vmem:[#allocation2 + $0xe8] sm:$0xf] %vm1287_vm1, %v1686_v35  ;;  %v2175_v9 = vld [vmem:[#allocation2 + $0x104] sm:$0x1]  ;;  %v2172_v35 = vsel %vm11959_vm12, %v1711_v37, %v2171_v3 }
 0x3c7   :  { %v1719_v24 = vor.u32 %v19176_v22, %v1716_v47  ;;  %v12809_v44 = vrot.slane %v19177_v34, 7  ;;  %v19179_v22 = vshll.u32 %v19169_v33, 16  ;;  %v1729_v51 = vrot.slane %v1725_v36, 4  ;;  %2163 = vst [vmem:[#allocation2 + $0xec] sm:$0x1] %v2162_v63 }
 0x3c8   :  { %v12813_v38 = vrot.slane %v19178_v54, 7  ;;  %v19180_v12 = vshll.u32 %v12313_v43, 16  ;;  %v2169_v34 = vsel %vm11395_vm10, %v1704_v61, %v2168_v2  ;;  %v2178_v54 = vld [vmem:[#allocation2 + $0x108] sm:$0xf]  ;;  %v19181_v47 = vshrl.u32 %v12347_v10, 16 }
 0x3c9   :  { %v1728_v25 = vor.u32 %v19179_v22, %v1725_v36  ;;  %v19182_v60 = vshrl.u32 %v12352_v16, 16  ;;  %2166 = vst [vmem:[#allocation2 + $0xf0] sm:$0xf] %v2165_v58  ;;  %v19183_v36 = vld [vmem:[#allocation92_spill] sm:$0xff]  ;;  %v19185_v61 = vshrl.u32 %v12357_v50, 16  ;;  %v1440_v63 = vrot.slane %v12536_v0, 4 }
 0x3ca   :  { %v1736_v23 = vor.u32 %v19180_v12, %v1733_v62  ;;  %v12826_v59 = vrot.slane %v19181_v47, 7  ;;  %v19184_v22 = vmax.f32 %v19183_v36, 0.0  ;;  %v1738_v47 = vrot.slane %v1733_v62, 4  ;;  %2167 = vst.msk [vmem:[#allocation2 + $0xf4] sm:$0xf] %vm1287_vm1, %v1703_v17 }
 0x3cb   :  { %v12830_v26 = vrot.slane %v19182_v60, 7  ;;  %v12839_v2 = vrot.slane %v19185_v61, 7  ;;  %v1720_v43 = vsel %vm11379_vm9, %v1712_v7, %v1719_v24  ;;  %v2182_v60 = vld [vmem:[#allocation2 + $0x110] sm:$0x1]  ;;  %v19186_v37 = vshll.u32 %v12318_v29, 16 }
 0x3cc   :  { %v1228_v12 = vpack.c.bf16 %v19184_v22, %v19184_v22  ;;  %v1746_v58 = vrot.slane %v12789_v40, 4  ;;  %v2176_v36 = vsel %vm11395_vm10, %v1721_v5, %v2175_v9  ;;  %2170 = vst [vmem:[#allocation2 + $0xf8] sm:$0x1] %v2169_v34  ;;  %v2185_v61 = vld [vmem:[#allocation2 + $0x114] sm:$0xf]  ;;  %v19187_v0 = vshll.u32 %v12323_v14, 16 }
 0x3cd   :  { %v1745_v3 = vor.u32 %v19186_v37, %v12789_v40  ;;  %v1755_v7 = vrot.slane %v12793_v48, 4  ;;  %v1737_v24 = vsel %vm11379_vm9, %v1729_v51, %v1736_v23  ;;  %v2179_v17 = vsel %vm11959_vm12, %v1728_v25, %v2178_v54  ;;  %2173 = vst [vmem:[#allocation2 + $0xfc] sm:$0xf] %v2172_v35  ;;  %v2189_v37 = vld [vmem:[#allocation2 + $0x11c] sm:$0x1] }
 0x3ce   :  { %v1442_v22 = vshrl.u32 %v1228_v12, 16  ;;  %v1753_v62 = vor.u32 %v19187_v0, %v12793_v48  ;;  %2174 = vst.msk [vmem:[#allocation2 + $0x100] sm:$0xf] %vm1287_vm1, %v1720_v43  ;;  %v1445_v5 = vshll.u32 %v1228_v12, 16  ;;  %v7786_v9 = vunpack.c.l.b16 %v12139_v18  ;;  %v2192_v23 = vld [vmem:[#allocation2 + $0x120] sm:$0xf] }
 0x3cf   :  { %v7787_v34 = vunpack.c.l.b16 %v1228_v12  ;;  %v19188_v0 = vshrl.u32 %v12362_v15, 16  ;;  %v19189_v48 = vshll.u32 %v12328_v8, 16  ;;  %v1763_v25 = vrot.slane %v12801_v53, 4  ;;  %2177 = vst [vmem:[#allocation2 + $0x104] sm:$0x1] %v2176_v36 }
 0x3d0   :  { %v12860_v40 = vrot.slane %v1442_v22, 7  ;;  %v2183_v43 = vsel %vm11395_vm10, %v1738_v47, %v2182_v60  ;;  %v2196_v54 = vld [vmem:[#allocation2 + $0x128] sm:$0x1]  ;;  %v19190_v18 = vshll.u32 %v12337_v4, 16  ;;  %v2186_v12 = vsel %vm11959_vm12, %v1745_v3, %v2185_v61  ;;  %2180 = vst [vmem:[#allocation2 + $0x108] sm:$0xf] %v2179_v17 }
 0x3d1   :  { %v12865_v14 = vrot.slane %v19188_v0, 7  ;;  %v1762_v51 = vor.u32 %v19189_v48, %v12801_v53  ;;  %v7848_v0 = vpack.c.b16 %v7787_v34, %v7786_v9  ;;  %v19191_v48 = vshrl.u32 %v12367_v21, 16  ;;  %2181 = vst.msk [vmem:[#allocation2 + $0x10c] sm:$0xf] %vm1287_vm1, %v1737_v24  ;;  %v2199_v3 = vld [vmem:[#allocation2 + $0x12c] sm:$0xf] }
 0x3d2   :  { %v1770_v35 = vor.u32 %v19190_v18, %v12809_v44  ;;  %v1447_v22 = vor.u32 %v1445_v5, %v12860_v40  ;;  %v19192_v47 = vshrl.u32 %v19109_v45, 16  ;;  %v1772_v36 = vrot.slane %v12809_v44, 4  ;;  %2184 = vst [vmem:[#allocation2 + $0x110] sm:$0x1] %v2183_v43  ;;  %v9615_v11 = vld [vmem:[#allocation2 + $0x60] sm:$0xf0] }
 0x3d3   :  { %v12881_v53 = vrot.slane %v19191_v48, 7  ;;  %v1754_v18 = vsel %vm11379_vm9, %v1746_v58, %v1753_v62  ;;  %v19193_v61 = vshrl.u32 %v19112_v42, 16  ;;  %v19194_v5 = vshll.u32 %v12342_v57, 16  ;;  %9224 = vmatmul.msk.bf16.gmra.mxu0 %vm279_vm0, %v7848_v0  ;;  %2187 = vst [vmem:[#allocation2 + $0x114] sm:$0xf] %v2186_v12 }
 0x3d4   :  { %v12885_v60 = vrot.slane %v19192_v47, 7  ;;  %v2190_v34 = vsel %vm11395_vm10, %v1755_v7, %v2189_v37  ;;  %v12902_v44 = vsel %vm11379_vm9, %v1440_v63, %v1447_v22  ;;  %v1780_v58 = vrot.slane %v12813_v38, 4  ;;  %v9499_v47 = vld [vmem:[#allocation2 + $0x90] sm:$0xff]   ;;  %v12915_v37 = vld [vmem:[#allocation2 + $0x54] sm:$0xf0] }
 0x3d5   :  { %v12893_v17 = vrot.slane %v19193_v61, 7  ;;  %v1779_v9 = vor.u32 %v19194_v5, %v12813_v38  ;;  %v19195_v62 = vshll.u32 %v12347_v10, 16  ;;  %v2193_v48 = vsel %vm11959_vm12, %v1762_v51, %v2192_v23  ;;  %v12911_v61 = vld [vmem:[#allocation2 + $0x30] sm:$0xff]   ;;  %2188 = vst.msk [vmem:[#allocation2 + $0x118] sm:$0xf] %vm1287_vm1, %v1754_v18  ;;  %4820 = vrot.lane.b32.xlu0 %v9499_v47, %s9951_s28 }
 0x3d6   :  { %v12913_v7 = vld [vmem:[#allocation2 + $0x54] sm:$0xff]   ;;  %v19197_v63 = vshrl.u32 %v19116_v32, 16  ;;  %v19198_v38 = vshrl.u32 %v19119_v56, 16  ;;  %v1789_v0 = vrot.slane %v12826_v59, 4  ;;  %v1771_v51 = vsel %vm11379_vm9, %v1763_v25, %v1770_v35  ;;  %4804 = vrot.lane.b32.xlu2 %v12911_v61, %s9951_s28  ;;  %2191 = vst [vmem:[#allocation2 + $0x11c] sm:$0x1] %v2190_v34  ;;  %3782 = vrot.lane.b32.xlu1 %v12911_v61, %s9950_s27 }
 0x3d7   :  { %v1787_v24 = vor.u32 %v19195_v62, %v12826_v59  ;;  %19196 = vst [vmem:[#allocation104_spill] sm:$0xff] %v12913_v7  ;;  %v2203_v23 = vld [vmem:[#allocation2 + $0x134] sm:$0x1]  ;;  %v19199_v12 = vshrl.u32 %v19131_v49, 16  ;;  %v19200_v62 = vshll.u32 %v12352_v16, 16  ;;  %v1797_v59 = vrot.slane %v12830_v26, 4 }
 0x3d8   :  { %v12919_v43 = vrot.slane %v19197_v63, 7  ;;  %v12923_v22 = vrot.slane %v19198_v38, 7  ;;  %v2197_v25 = vsel %vm11395_vm10, %v1772_v36, %v2196_v54  ;;  %v2206_v35 = vld [vmem:[#allocation2 + $0x138] sm:$0xf]  ;;  %v2210_v18 = vld [vmem:[#allocation2 + $0x140] sm:$0x1] }
 0x3d9   :  { %v12934_v5 = vrot.slane %v19199_v12, 7  ;;  %v1796_v63 = vor.u32 %v19200_v62, %v12830_v26  ;;  %v19201_v47 = vshll.u32 %v12357_v50, 16  ;;  %v2200_v12 = vsel %vm11959_vm12, %v1779_v9, %v2199_v3  ;;  %2194 = vst [vmem:[#allocation2 + $0x120] sm:$0xf] %v2193_v48  ;;  %v12963_v50 = vld [vmem:[#allocation2 + $0x3c] sm:$0xf0] }
 0x3da   :  { %v19202_v62 = vshrl.u32 %v19138_v28, 16  ;;  %v19203_v54 = vshrl.u32 %v19141_v30, 16  ;;  %v1806_v34 = vrot.slane %v12839_v2, 4  ;;  %v1788_v16 = vsel %vm11379_vm9, %v1780_v58, %v1787_v24  ;;  %2195 = vst.msk [vmem:[#allocation2 + $0x124] sm:$0xf] %vm1287_vm1, %v1771_v51 }
 0x3db   :  { %v1804_v38 = vor.u32 %v19201_v47, %v12839_v2  ;;  %v12961_v47 = vld [vmem:[#allocation2 + $0x3c] sm:$0xff]   ;;  %v2213_v3 = vld [vmem:[#allocation2 + $0x144] sm:$0xf]  ;;  %v19205_v9 = vshrl.u32 %v19146_v27, 16  ;;  %v19207_v2 = vshll.u32 %v12362_v15, 16  ;;  %v2204_v58 = vsel %vm11395_vm10, %v1789_v0, %v2203_v23 }
 0x3dc   :  { %v12951_v26 = vrot.slane %v19202_v62, 7  ;;  %v12955_v36 = vrot.slane %v19203_v54, 7  ;;  %19204 = vst [vmem:[#allocation78_spill] sm:$0xff] %v12961_v47  ;;  %v19206_v62 = vshrl.u32 %v19152_v19, 16  ;;  %v2217_v24 = vld [vmem:[#allocation2 + $0x14c] sm:$0x1]  ;;  %v2207_v4 = vsel %vm11959_vm12, %v1796_v63, %v2206_v35 }
 0x3dd   :  { %v12967_v48 = vrot.slane %v19205_v9, 7  ;;  %v1813_v10 = vor.u32 %v19207_v2, %v12865_v14  ;;  %2198 = vst [vmem:[#allocation2 + $0x128] sm:$0x1] %v2197_v25  ;;  %v1814_v51 = vrot.slane %v12865_v14, 4  ;;  %v19208_v57 = vshll.u32 %v12367_v21, 16  ;;  %v12997_v35 = vld [vmem:[#allocation2 + $0x60] sm:$0xff]   ;;  %3788 = vrot.lane.b32.xlu0 %v12913_v7, %s9950_s27 }
 0x3de   :  { %v12971_v54 = vrot.slane %v19206_v62, 7  ;;  %2201 = vst [vmem:[#allocation2 + $0x12c] sm:$0xf] %v2200_v12  ;;  %v2220_v62 = vld [vmem:[#allocation2 + $0x150] sm:$0xf]  ;;  %v1823_v8 = vrot.slane %v12881_v53, 4  ;;  %v1805_v2 = vsel %vm11379_vm9, %v1797_v59, %v1804_v38  ;;  %v2211_v63 = vsel %vm11395_vm10, %v1806_v34, %v2210_v18  ;;  %3790 = vrot.lane.b32.xlu1 %v12997_v35, %s9950_s27 }
 0x3df   :  { %v1821_v9 = vor.u32 %v19208_v57, %v12881_v53  ;;  %2202 = vst.msk [vmem:[#allocation2 + $0x130] sm:$0xf] %vm1287_vm1, %v1788_v16  ;;  %v19209_v0 = vshll.u32 %v19109_v45, 16  ;;  %v1831_v23 = vrot.slane %v12885_v60, 4  ;;  %v19210_v57 = vshll.u32 %v19112_v42, 16  ;;  %v9496_v53 = vld [vmem:[#allocation2 + $0x48] sm:$0xff]  }
 0x3e0   :  { %2205 = vst [vmem:[#allocation2 + $0x134] sm:$0x1] %v2204_v58  ;;  %v12999_v59 = vld [vmem:[#allocation2 + $0x6c] sm:$0xff]   ;;  %v2214_v38 = vsel %vm11959_vm12, %v1813_v10, %v2213_v3  ;;  %4808 = vrot.lane.b32.xlu2 %v9496_v53, %s9951_s28  ;;  %v13008_v12 = vld [vmem:[#allocation2 + $0x3c] sm:$0xe]  ;;  %v7788_v18 = vunpack.c.l.b16 %v12144_v20  ;;  %v1840_v42 = vrot.slane %v12893_v17, 4 }
 0x3e1   :  { %v1830_v14 = vor.u32 %v19209_v0, %v12885_v60  ;;  %v1838_v25 = vor.u32 %v19210_v57, %v12893_v17  ;;  %19211 = vst [vmem:[#allocation81_spill] sm:$0xff] %v12999_v59  ;;  %v13001_v16 = vld [vmem:[#allocation2 + $0x6c] sm:$0xf0]  ;;  %v2338_v60 = vld [vmem:[#allocation2 + $0x44] sm:$0x1]  ;;  %v19213_v0 = vshrl.u32 %v19156_v31, 16  ;;  %v1822_v3 = vsel %vm11379_vm9, %v1814_v51, %v1821_v9 }
 0x3e2   :  { %2208 = vst [vmem:[#allocation2 + $0x138] sm:$0xf] %v2207_v4  ;;  %v19212_v34 = vld [vmem:[#allocation83_spill] sm:$0xff]  ;;  %v19214_v4 = vshll.u32 %v19116_v32, 16  ;;  %v2224_v20 = vld [vmem:[#allocation2 + $0x158] sm:$0x1]  ;;  %v2851_v9 = vunpack.c.l.b16 %v2338_v60 }
 0x3e3   :  { %v7789_v58 = vunpack.c.l.b16 %v19212_v34  ;;  %v13014_v57 = vrot.slane %v19213_v0, 7  ;;  %2209 = vst.msk [vmem:[#allocation2 + $0x13c] sm:$0xf] %vm1287_vm1, %v1805_v2  ;;  %v1848_v34 = vrot.slane %v12919_v43, 4  ;;  %v2218_v0 = vsel %vm11395_vm10, %v1823_v8, %v2217_v24  ;;  %v2227_v17 = vld [vmem:[#allocation2 + $0x15c] sm:$0xf] }
 0x3e4   :  { %v1847_v10 = vor.u32 %v19214_v4, %v12919_v43  ;;  %2212 = vst [vmem:[#allocation2 + $0x140] sm:$0x1] %v2211_v63  ;;  %v19215_v32 = vshll.u32 %v19119_v56, 16  ;;  %v2221_v51 = vsel %vm11959_vm12, %v1830_v14, %v2220_v62  ;;  %v19216_v2 = vshrl.u32 %v19161_v55, 16  ;;  %v2231_v63 = vld [vmem:[#allocation2 + $0x164] sm:$0x1] }
 0x3e5   :  { %2215 = vst [vmem:[#allocation2 + $0x144] sm:$0xf] %v2214_v38  ;;  %v1857_v43 = vrot.slane %v12923_v22, 4  ;;  %v1839_v8 = vsel %vm11379_vm9, %v1831_v23, %v1838_v25  ;;  %v7849_v24 = vpack.c.b16 %v7789_v58, %v7788_v18  ;;  %v19218_v62 = vshll.u32 %v19131_v49, 16  ;;  %v2234_v60 = vld [vmem:[#allocation2 + $0x168] sm:$0xf]  ;;  %4814 = vrot.lane.b32.xlu0 %v12999_v59, %s9951_s28 }
 0x3e6   :  { %v1855_v4 = vor.u32 %v19215_v32, %v12923_v22  ;;  %v13035_v45 = vrot.slane %v19216_v2, 7  ;;  %2216 = vst.msk [vmem:[#allocation2 + $0x148] sm:$0xf] %vm1287_vm1, %v1822_v3  ;;  %v19217_v32 = vshrl.u32 %v19167_v41, 16  ;;  %v1865_v38 = vrot.slane %v12934_v5, 4  ;;  %v19237_v49 = vld [vmem:[#allocation100_spill] sm:$0xff] }
 0x3e7   :  { %v1864_v14 = vor.u32 %v19218_v62, %v12934_v5  ;;  %v2225_v22 = vsel %vm11395_vm10, %v1840_v42, %v2224_v20  ;;  %2219 = vst [vmem:[#allocation2 + $0x14c] sm:$0x1] %v2218_v0  ;;  %v19219_v23 = vshll.u32 %v19138_v28, 16  ;;  %v1874_v18 = vrot.slane %v12951_v26, 4  ;;  %9225 = vmatmul.msk.bf16.gmra.mxu0 %vm279_vm0, %v7849_v24  ;;  %v2238_v3 = vld [vmem:[#allocation2 + $0x170] sm:$0x1] }
 0x3e8   :  { %v13043_v56 = vrot.slane %v19217_v32, 7  ;;  %v2228_v58 = vsel %vm11959_vm12, %v1847_v10, %v2227_v17  ;;  %2222 = vst [vmem:[#allocation2 + $0x150] sm:$0xf] %v2221_v51  ;;  %v1882_v5 = vrot.slane %v12955_v36, 4  ;;  %v1856_v42 = vsel %vm11379_vm9, %v1848_v34, %v1855_v4  ;;  %v13068_v2 = vld [vmem:[#allocation2 + $0xc] sm:$0xf0]  ;;  %3786 = vrot.lane.b32.xlu2 %v9496_v53, %s9950_s27 }
 0x3e9   :  { %v1872_v25 = vor.u32 %v19219_v23, %v12951_v26  ;;  %2223 = vst.msk [vmem:[#allocation2 + $0x154] sm:$0xf] %vm1287_vm1, %v1839_v8  ;;  %v13062_v20 = vpack.c.b16 %v2851_v9, %v2851_v9  ;;  %v9727_v0 = vor.u32 %v13008_v12, %v12963_v50  ;;  %v13066_v26 = vld [vmem:[#allocation2 + $0xc] sm:$0xff]   ;;  %v19221_v10 = vshll.u32 %v19141_v30, 16  ;;  %v2467_v34 = vld [vmem:[#allocation2 + $0x5c] sm:$0x1] }
 0x3ea   :  { %v2232_v51 = vsel %vm11395_vm10, %v1857_v43, %v2231_v63  ;;  %2226 = vst [vmem:[#allocation2 + $0x158] sm:$0x1] %v2225_v22  ;;  %v9729_v4 = vld [vmem:[#allocation2 + $0x54] sm:$0xe]  ;;  %v19222_v12 = vshll.u32 %v19146_v27, 16  ;;  %v1891_v8 = vrot.slane %v12967_v48, 4  ;;  %v2235_v43 = vsel %vm11959_vm12, %v1864_v14, %v2234_v60 }
 0x3eb   :  { %19220 = vst [vmem:[#allocation116_spill] sm:$0xff] %v13062_v20  ;;  %v1881_v17 = vor.u32 %v19221_v10, %v12955_v36  ;;  %v2241_v50 = vld [vmem:[#allocation2 + $0x174] sm:$0xf]  ;;  %v19223_v36 = vshll.u32 %v19152_v19, 16  ;;  %v13087_v63 = vld [vmem:[#allocation2 + $0x78] sm:$0xff]   ;;  %v1873_v32 = vsel %vm11379_vm9, %v1865_v38, %v1872_v25  ;;  %v3471_v22 = vrot.slane %v9727_v0, 1 }
 0x3ec   :  { %v1889_v9 = vor.u32 %v19222_v12, %v12967_v48  ;;  %2229 = vst [vmem:[#allocation2 + $0x15c] sm:$0xf] %v2228_v58  ;;  %4816 = vrot.lane.b32.xlu1 %v13087_v63, %s9951_s28  ;;  %v2245_v53 = vld [vmem:[#allocation2 + $0x17c] sm:$0x1]  ;;  %v2239_v48 = vsel %vm11395_vm10, %v1874_v18, %v2238_v3  ;;  %v2248_v62 = vld [vmem:[#allocation2 + $0x180] sm:$0xf]  ;;  %v3878_v60 = vunpack.c.l.b16 %v2467_v34 }
 0x3ed   :  { %v1898_v24 = vor.u32 %v19223_v36, %v12971_v54  ;;  %2230 = vst.msk [vmem:[#allocation2 + $0x160] sm:$0xf] %vm1287_vm1, %v1856_v42  ;;  %v3472_v14 = vrot.slane %v13062_v20, 1  ;;  %v1921_v23 = vshll.u32 %v19167_v41, 16  ;;  %v1899_v58 = vrot.slane %v12971_v54, 4 }
 0x3ee   :  { %2233 = vst [vmem:[#allocation2 + $0x164] sm:$0x1] %v2232_v51  ;;  %v19224_v10 = vshll.u32 %v19156_v31, 16  ;;  %v2242_v38 = vsel %vm11959_vm12, %v1881_v17, %v2241_v50  ;;  %v1908_v25 = vrot.slane %v13014_v57, 4  ;;  %v19225_v18 = vshll.u32 %v19161_v55, 16 }
 0x3ef   :  { %2236 = vst [vmem:[#allocation2 + $0x168] sm:$0xf] %v2235_v43  ;;  %v1890_v42 = vsel %vm11379_vm9, %v1882_v5, %v1889_v9  ;;  %v2252_v54 = vld [vmem:[#allocation2 + $0x188] sm:$0x1]  ;;  %v1916_v0 = vrot.slane %v13035_v45, 4  ;;  %v1923_v51 = vor.u32 %v1921_v23, %v13043_v56  ;;  %v2246_v17 = vsel %vm11395_vm10, %v1891_v8, %v2245_v53  ;;  %v19227_v43 = vld [vmem:[#allocation84_spill] sm:$0xff] }
 0x3f0   :  { %v1906_v12 = vor.u32 %v19224_v10, %v13014_v57  ;;  %v1915_v3 = vor.u32 %v19225_v18, %v13035_v45  ;;  %2237 = vst.msk [vmem:[#allocation2 + $0x16c] sm:$0xf] %vm1287_vm1, %v1873_v32  ;;  %v2249_v57 = vsel %vm11959_vm12, %v1898_v24, %v2248_v62  ;;  %v2255_v34 = vld [vmem:[#allocation2 + $0x18c] sm:$0xf]  ;;  %v3473_v50 = vsel %vm3455_vm13, %v3471_v22, %v3472_v14  ;;  %v2596_v8 = vld [vmem:[#allocation2 + $0x68] sm:$0x1] }
 0x3f1   :  { %2240 = vst [vmem:[#allocation2 + $0x170] sm:$0x1] %v2239_v48  ;;  %v13118_v36 = vpack.c.b16 %v3878_v60, %v3878_v60  ;;  %v9730_v5 = vor.u32 %v9729_v4, %v12915_v37  ;;  %v1925_v9 = vrot.slane %v13043_v56, 4  ;;  %3562 = vrot.lane.b32.xlu0 %v3473_v50, %s9948_s2  ;;  %4812 = vrot.lane.b32.xlu2 %v12997_v35, %s9951_s28  ;;  %v7790_v24 = vunpack.c.l.b16 %v12154_v52  ;;  %v2259_v32 = vld [vmem:[#allocation2 + $0x194] sm:$0x1]  ;;  %v13134_v56 = vld [vmem:[#allocation2 + $0xc] sm:$0xff]  }
 0x3f2   :  { %2243 = vst [vmem:[#allocation2 + $0x174] sm:$0xf] %v2242_v38  ;;  %v1907_v45 = vsel %vm11379_vm9, %v1899_v58, %v1906_v12  ;;  %v7791_v53 = vunpack.c.l.b16 %v19227_v43  ;;  %v2253_v37 = vsel %vm11395_vm10, %v1908_v25, %v2252_v54  ;;  %v13136_v4 = vld [vmem:[#allocation2 + $0xc] sm:$0xf0]  ;;  %v2256_v48 = vsel %vm11959_vm12, %v1915_v3, %v2255_v34  ;;  %v2063_v22 = vld [vmem:[#allocation2 + $0x2c] sm:$0x1] }
 0x3f3   :  { %19226 = vst [vmem:[#allocation92_spill] sm:$0xff] %v13118_v36  ;;  %v1449_v52 = vrot.slane %v12860_v40, 4  ;;  %v1924_v62 = vsel %vm11379_vm9, %v1916_v0, %v1923_v51  ;;  %v4498_v14 = vrot.slane %v9730_v5, 1  ;;  %v4499_v60 = vrot.slane %v13118_v36, 1  ;;  %v9616_v40 = vld [vmem:[#allocation2 + $0x60] sm:$0xe] }
 0x3f4   :  { %2244 = vst.msk [vmem:[#allocation2 + $0x178] sm:$0xf] %vm1287_vm1, %v1890_v42  ;;  %3776 = vrot.lane.b32.xlu1 %v13066_v26, %s9950_s27  ;;  %v4902_v23 = vunpack.c.l.b16 %v2596_v8  ;;  %v2260_v58 = vsel %vm11395_vm10, %v1925_v9, %v2259_v32  ;;  %v7850_v10 = vpack.c.b16 %v7791_v53, %v7790_v24  ;;  %v2341_v25 = vld [vmem:[#allocation2 + $0x68] sm:$0x1]  ;;  %v9617_v18 = vor.u32 %v9616_v40, %v9615_v11  ;;  %v9522_v54 = vld [vmem:[#allocation2 + $0x60] sm:$0xf0] }
 0x3f5   :  { %2247 = vst [vmem:[#allocation2 + $0x17c] sm:$0x1] %v2246_v17  ;;  %v2064_v6 = vsel %vm11395_vm10, %v1449_v52, %v2063_v22  ;;  %v4500_v12 = vsel %vm3455_vm13, %v4498_v14, %v4499_v60  ;;  %v2854_v3 = vunpack.c.l.b16 %v2341_v25  ;;  %v9523_v0 = vld [vmem:[#allocation2 + $0x60] sm:$0xe]  ;;  %v7792_v5 = vunpack.c.l.b16 %v12164_v46  ;;  %v2470_v8 = vld [vmem:[#allocation2 + $0x80] sm:$0x1] }
 0x3f6   :  { %2250 = vst [vmem:[#allocation2 + $0x180] sm:$0xf] %v2249_v57  ;;  %v13152_v38 = vpack.c.b16 %v4902_v23, %v4902_v23  ;;  %v5522_v42 = vrot.slane %v9617_v18, 1  ;;  %v19228_v9 = vld [vmem:[#allocation85_spill] sm:$0xff]  ;;  %v9524_v24 = vor.u32 %v9523_v0, %v9522_v54  ;;  %v3881_v52 = vunpack.c.l.b16 %v2470_v8  ;;  %v13183_v46 = vld [vmem:[#allocation2 + $0x84] sm:$0xf0] }
 0x3f7   :  { %2251 = vst.msk [vmem:[#allocation2 + $0x184] sm:$0xf] %vm1287_vm1, %v1907_v45  ;;  %9226 = vmatmul.msk.bf16.gmra.mxu0 %vm279_vm0, %v7850_v10  ;;  %v13167_v50 = vpack.c.b16 %v2854_v3, %v2854_v3  ;;  %v7793_v45 = vunpack.c.l.b16 %v19228_v9  ;;  %v13172_v43 = vld [vmem:[#allocation2 + $0x3c] sm:$0xff]   ;;  %v9571_v23 = vld [vmem:[#allocation2 + $0x78] sm:$0xe]  ;;  %v13196_v18 = vld [vmem:[#allocation2 + $0x6c] sm:$0xff]  }
 0x3f8   :  { %2254 = vst [vmem:[#allocation2 + $0x188] sm:$0x1] %v2253_v37  ;;  %v5523_v39 = vrot.slane %v13152_v38, 1  ;;  %v13174_v53 = vld [vmem:[#allocation2 + $0x3c] sm:$0xf0]  ;;  %v3480_v14 = vrot.slane %v9524_v24, 1  ;;  %v13191_v10 = vpack.c.b16 %v3881_v52, %v3881_v52 }
 0x3f9   :  { %2257 = vst [vmem:[#allocation2 + $0x18c] sm:$0xf] %v2256_v48  ;;  %4588 = vrot.lane.b32.xlu0 %v4500_v12, %s9952_s29  ;;  %v13176_v32 = vld [vmem:[#allocation2 + $0x3c] sm:$0xff]   ;;  %v3481_v48 = vrot.slane %v13167_v50, 1  ;;  %v7851_v22 = vpack.c.b16 %v7793_v45, %v7792_v5  ;;  %v9911_v11 = vld [vmem:[#allocation2 + $0x84] sm:$0xf0] }
 0x3fa   :  { %2258 = vst.msk [vmem:[#allocation2 + $0x190] sm:$0xf] %vm1287_vm1, %v1924_v62  ;;  %v13178_v37 = vld [vmem:[#allocation2 + $0x3c] sm:$0xf0]  ;;  %v13181_v62 = vld [vmem:[#allocation2 + $0x84] sm:$0xff]   ;;  %v13200_v3 = vld [vmem:[#allocation2 + $0x54] sm:$0xff]  }
 0x3fb   :  { %2261 = vst [vmem:[#allocation2 + $0x194] sm:$0x1] %v2260_v58  ;;  %v9570_v60 = vld [vmem:[#allocation2 + $0x78] sm:$0xf0]  ;;  %v3482_v58 = vsel %vm3455_vm13, %v3480_v14, %v3481_v48  ;;  %v2599_v40 = vld [vmem:[#allocation2 + $0x8c] sm:$0x1] }
 0x3fc   :  { %2062 = vst.msk [vmem:[#allocation2 + $0x28] sm:$0xf] %vm1287_vm1, %v12902_v44  ;;  %v5524_v44 = vsel %vm3455_vm13, %v5522_v42, %v5523_v39  ;;  %v9912_v12 = vld [vmem:[#allocation2 + $0x84] sm:$0xe]  ;;  %v9572_v25 = vor.u32 %v9571_v23, %v9570_v60  ;;  %v13198_v39 = vld [vmem:[#allocation2 + $0x6c] sm:$0xf0]  ;;  %v4905_v5 = vunpack.c.l.b16 %v2599_v40  ;;  %v7794_v23 = vunpack.c.l.b16 %v12174_v13 }
 0x3fd   :  { %2065 = vst [vmem:[#allocation2 + $0x2c] sm:$0x1] %v2064_v6  ;;  %v13194_v6 = vld [vmem:[#allocation2 + $0x84] sm:$0xff]   ;;  %v13202_v42 = vld [vmem:[#allocation2 + $0x54] sm:$0xf0]  ;;  %v4508_v0 = vrot.slane %v13191_v10, 1  ;;  %v9913_v60 = vor.u32 %v9912_v12, %v9911_v11 }
 0x3fe   :  { %19229 = vst [vmem:[#allocation83_spill] sm:$0xff] %v13172_v43  ;;  %v2461_v54 = vld [vmem:[#allocation2 + $0x14] sm:$0x1]  ;;  %v2590_v9 = vld [vmem:[#allocation2 + $0x20] sm:$0x1]  ;;  %v4507_v24 = vrot.slane %v9572_v25, 1  ;;  %v13214_v14 = vpack.c.b16 %v4905_v5, %v4905_v5 }
 0x3ff   :  { %19230 = vst [vmem:[#allocation84_spill] sm:$0xff] %v13181_v62  ;;  %v3872_v48 = vunpack.c.l.b16 %v2461_v54  ;;  %v4896_v52 = vunpack.c.l.b16 %v2590_v9  ;;  %v5531_v25 = vrot.slane %v9913_v60, 1  ;;  %v9735_v9 = vld [vmem:[#allocation2 + $0x24] sm:$0xe]  ;;  %v2468_v12 = vld [vmem:[#allocation2 + $0x68] sm:$0x1] }
 0x400   :  { %19231 = vst [vmem:[#allocation85_spill] sm:$0xff] %v13194_v6  ;;  %v5532_v54 = vrot.slane %v13214_v14, 1  ;;  %v9606_v19 = vld [vmem:[#allocation2 + $0x18] sm:$0xf0]  ;;  %v9607_v27 = vld [vmem:[#allocation2 + $0x18] sm:$0xe] }
 0x401   :  { %5612 = vrot.lane.b32.xlu0 %v5524_v44, %s9942_s25  ;;  %19232 = vst [vmem:[#allocation135_spill] sm:$0xff] %v13196_v18  ;;  %v9732_v44 = vld [vmem:[#allocation2 + $0xc] sm:$0xe]  ;;  %v13220_v55 = vpack.c.b16 %v4896_v52, %v4896_v52  ;;  %v13222_v31 = vpack.c.b16 %v3872_v48, %v3872_v48  ;;  %v2343_v15 = vld [vmem:[#allocation2 + $0x80] sm:$0x1]  ;;  %vm6086_vm1 = vcmask 326656  }
 0x402   :  { %19234 = vst [vmem:[#allocation137_spill] sm:$0xff] %v13214_v14  ;;  %v9733_v41 = vor.u32 %v9732_v44, %v13068_v2  ;;  %v5533_v48 = vsel %vm3455_vm13, %v5531_v25, %v5532_v54  ;;  %v2334_v54 = vld [vmem:[#allocation2 + $0x14] sm:$0x1]  ;;  %v19238_v62 = vld [vmem:[#allocation99_spill] sm:$0xff]  ;;  %v9559_v14 = vld [vmem:[#allocation2 + $0x18] sm:$0xe] }
 0x403   :  { %v13158_v51 = vld [vmem:[#allocation2 + $0x24] sm:$0xff]   ;;  %v4968_v44 = vshll.u32 %v13220_v55, 16  ;;  %v9747_v47 = vld [vmem:[#allocation2 + $0x3c] sm:$0xe]  ;;  %vm5924_vm9 = vcmask 982016  }
 0x404   :  { %v13160_v17 = vld [vmem:[#allocation2 + $0x24] sm:$0xf0]  ;;  %4802 = vrot.lane.b32.xlu2 %v13158_v51, %s9951_s28  ;;  %v2591_v13 = vld [vmem:[#allocation2 + $0x2c] sm:$0x1]  ;;  %v4480_v2 = vrot.slane %v9733_v41, 1 }
 0x405   :  { %v13162_v57 = vld [vmem:[#allocation2 + $0x24] sm:$0xff]   ;;  %v4897_v52 = vunpack.c.l.b16 %v2591_v13  ;;  %v4970_v30 = vrot.slane %v4968_v44, 1  ;;  %v13236_v41 = vld [vmem:[#allocation2 + $0x6c] sm:$0xf0]  ;;  %v9736_v25 = vor.u32 %v9735_v9, %v13160_v17  ;;  %v9738_v13 = vld [vmem:[#allocation2 + $0xc] sm:$0xe]  ;;  %v2847_v9 = vunpack.c.l.b16 %v2334_v54 }
 0x406   :  { %v13164_v34 = vld [vmem:[#allocation2 + $0x24] sm:$0xf0]  ;;  %3780 = vrot.lane.b32.xlu1 %v13162_v57, %s9950_s27  ;;  %v2598_v44 = vld [vmem:[#allocation2 + $0x80] sm:$0x1]  ;;  %v9739_v54 = vor.u32 %v9738_v13, %v13136_v4  ;;  %v4047_v4 = vshll.u32 %v13087_v63, 16 }
 0x407   :  { %9227 = vmatmul.msk.bf16.gmra.mxu0 %vm279_vm0, %v7851_v22  ;;  %v13209_v45 = vld [vmem:[#allocation2 + $0x24] sm:$0xff]   ;;  %v4509_v22 = vsel %vm3455_vm13, %v4507_v24, %v4508_v0  ;;  %v9696_v0 = vld [vmem:[#allocation2 + $0x18] sm:$0xff]   ;;  %v4481_v24 = vrot.slane %v13222_v31, 1  ;;  %v13239_v28 = vpack.c.b16 %v4897_v52, %v4897_v52  ;;  %v5507_v52 = vrot.slane %v9736_v25, 1 }
 0x408   :  { %19233 = vst [vmem:[#allocation136_spill] sm:$0xff] %v13209_v45  ;;  %v13211_v8 = vld [vmem:[#allocation2 + $0x24] sm:$0xf0]  ;;  %v4963_v5 = vshll.u32 %v9696_v0, 16  ;;  %v13261_v25 = vpack.c.b16 %v2847_v9, %v2847_v9 }
 0x409   :  { %3568 = vrot.lane.b32.xlu0 %v3482_v58, %s9948_s2  ;;  %v19235_v58 = vld [vmem:[#allocation96_spill] sm:$0xff] }
 0x40a   :  { %v7795_v40 = vunpack.c.l.b16 %v19235_v58  ;;  %v4965_v60 = vrot.slane %v4963_v5, 1  ;;  %v4961_v58 = vshrl.u32 %v9696_v0, 16  ;;  %v4023_v0 = vshll.u32 %v12997_v35, 16 }
 0x40c   :  { %4806 = vrot.lane.b32.xlu2 %v13172_v43, %s9951_s28  ;;  %v7852_v11 = vpack.c.b16 %v7795_v40, %v7794_v23  ;;  %v2462_v23 = vld [vmem:[#allocation2 + $0x20] sm:$0x1]  ;;  %v13234_v40 = vld [vmem:[#allocation2 + $0x6c] sm:$0xff]   ;;  %v2593_v43 = vld [vmem:[#allocation2 + $0x44] sm:$0x1] }
 0x40d   :  { %19236 = vst [vmem:[#allocation96_spill] sm:$0xff] %v13234_v40  ;;  %v19243_v40 = vld [vmem:[#allocation87_spill] sm:$0xff] }
 0x40e   :  { %3784 = vrot.lane.b32.xlu1 %v13176_v32, %s9950_s27  ;;  %v7799_v36 = vunpack.c.l.b16 %v19243_v40 }
 0x411   :  { %4594 = vrot.lane.b32.xlu0 %v4509_v22, %s9952_s29  ;;  %v3879_v22 = vunpack.c.l.b16 %v2468_v12  ;;  %v13244_v12 = vor.u32 %v4965_v60, %v4961_v58  ;;  %v4904_v58 = vunpack.c.l.b16 %v2598_v44  ;;  %v13264_v44 = vpop.permute.xlu2 %3552 }
 0x412   :  { %19239 = vst [vmem:[#allocation100_spill] sm:$0xff] %v13264_v44 }
 0x413   :  { %v13242_v5 = vpack.c.b16 %v3879_v22, %v3879_v22  ;;  %v4971_v17 = vsel %vm2910_vm14, %v13244_v12, %v4970_v30  ;;  %v5508_v22 = vrot.slane %v13239_v28, 1  ;;  %v4021_v30 = vshrl.u32 %v12997_v35, 16 }
 0x414   :  { %3792 = vrot.lane.b32.xlu2 %v13196_v18, %s9950_s27 }
 0x415   :  { %v4028_v60 = vshll.u32 %v13242_v5, 16 }
 0x416   :  { %4810 = vrot.lane.b32.xlu1 %v13200_v3, %s9951_s28 }
 0x417   :  { %9228 = vmatmul.msk.bf16.gmra.mxu0 %vm279_vm0, %v7852_v11  ;;  %v4482_v11 = vsel %vm3455_vm13, %v4480_v2, %v4481_v24  ;;  %v5505_v2 = vrot.slane %v13220_v55, 1  ;;  %v3873_v24 = vunpack.c.l.b16 %v2462_v23  ;;  %v9558_v23 = vld [vmem:[#allocation2 + $0x18] sm:$0xf0]  ;;  %v4030_v21 = vrot.slane %v4028_v60, 1 }
 0x418   :  { %v9560_v35 = vor.u32 %v9559_v14, %v9558_v23  ;;  %v4049_v23 = vrot.slane %v4047_v4, 1 }
 0x419   :  { %5618 = vrot.lane.b32.xlu0 %v5533_v48, %s9942_s25  ;;  %v9608_v48 = vor.u32 %v9607_v27, %v9606_v19  ;;  %v7797_v27 = vunpack.c.l.b16 %v19238_v62  ;;  %v4025_v19 = vrot.slane %v4023_v0, 1  ;;  %v9741_v62 = vld [vmem:[#allocation2 + $0x24] sm:$0xe]  ;;  %v2592_v0 = vld [vmem:[#allocation2 + $0x38] sm:$0x1] }
 0x41a   :  { %v4898_v60 = vunpack.c.l.b16 %v2592_v0  ;;  %v9609_v0 = vld [vmem:[#allocation2 + $0x30] sm:$0xf0] }
 0x41b   :  { %v5504_v55 = vrot.slane %v9608_v48, 1  ;;  %v13268_v48 = vpack.c.b16 %v4904_v58, %v4904_v58  ;;  %v13273_v13 = vor.u32 %v4025_v19, %v4021_v30  ;;  %v4045_v19 = vshrl.u32 %v13087_v63, 16  ;;  %v2464_v30 = vld [vmem:[#allocation2 + $0x38] sm:$0x1]  ;;  %v13294_v63 = vpop.permute.xlu2 %4800 }
 0x41c   :  { %4818 = vrot.lane.b32.xlu2 %v13194_v6, %s9951_s28  ;;  %v13258_v6 = vpack.c.b16 %v3873_v24, %v3873_v24  ;;  %v2463_v24 = vld [vmem:[#allocation2 + $0x2c] sm:$0x1]  ;;  %v3875_v4 = vunpack.c.l.b16 %v2464_v30 }
 0x41d   :  { %v4031_v58 = vsel %vm2910_vm14, %v13273_v13, %v4030_v21  ;;  %v5064_v14 = vshll.u32 %v13268_v48, 16  ;;  %v13285_v21 = vpack.c.b16 %v4898_v60, %v4898_v60 }
 0x41e   :  { %4576 = vrot.lane.b32.xlu1 %v4482_v11, %s9952_s29  ;;  %v7796_v11 = vunpack.c.l.b16 %v19237_v49  ;;  %v5506_v49 = vsel %vm3455_vm13, %v5504_v55, %v5505_v2  ;;  %v3459_v2 = vrot.slane %v9739_v54, 1  ;;  %v3874_v55 = vunpack.c.l.b16 %v2463_v24  ;;  %v9468_v54 = vld [vmem:[#allocation2 + $0x78] sm:$0xff]   ;;  %v2335_v24 = vld [vmem:[#allocation2 + $0x20] sm:$0x1] }
 0x41f   :  { %v2848_v60 = vunpack.c.l.b16 %v2335_v24  ;;  %v19242_v24 = vld [vmem:[#allocation86_spill] sm:$0xff]  ;;  %v3032_v7 = vshrl.u32 %v9468_v54, 16 }
 0x420   :  { %v7853_v9 = vpack.c.b16 %v7797_v27, %v7796_v11  ;;  %v2856_v11 = vunpack.c.l.b16 %v2343_v15  ;;  %v4483_v27 = vrot.slane %v9560_v35, 1  ;;  %v13287_v18 = vpack.c.b16 %v3874_v55, %v3874_v55  ;;  %v13298_v55 = vpop.f32.mrf.mxu0 }
 0x421   :  { %5344 = vrot.lane.b32.xlu0 %v4971_v17, %s9953_s30  ;;  %v5509_v17 = vsel %vm3455_vm13, %v5507_v52, %v5508_v22  ;;  %v4484_v52 = vrot.slane %v13258_v6, 1  ;;  %v3460_v22 = vrot.slane %v13261_v25, 1  ;;  %v9742_v15 = vor.u32 %v9741_v62, %v13164_v34  ;;  %19241 = vst [vmem:[#allocation138_spill] sm:$0xff] %v13298_v55  ;;  %v9562_v62 = vld [vmem:[#allocation2 + $0x30] sm:$0xe] }
 0x422   :  { %19240 = vst [vmem:[#allocation99_spill] sm:$0xff] %v13287_v18  ;;  %v5066_v35 = vrot.slane %v5064_v14, 1  ;;  %v5511_v34 = vrot.slane %v13285_v21, 1  ;;  %v2344_v14 = vld [vmem:[#allocation2 + $0x8c] sm:$0x1]  ;;  %v7798_v55 = vunpack.c.l.b16 %v19242_v24  ;;  %v4987_v24 = vshll.u32 %v12911_v61, 16 }
 0x423   :  { %v2857_v29 = vunpack.c.l.b16 %v2344_v14 }
 0x424   :  { %5602 = vrot.lane.b32.xlu2 %v5509_v17, %s9942_s25  ;;  %v4485_v17 = vsel %vm3455_vm13, %v4483_v27, %v4484_v52  ;;  %v13296_v52 = vor.u32 %v4049_v23, %v4045_v19  ;;  %v3034_v27 = vshll.u32 %v9468_v54, 16  ;;  %v9744_v19 = vld [vmem:[#allocation2 + $0x84] sm:$0xe]  ;;  %v13306_v23 = vpack.c.b16 %v3875_v4, %v3875_v4 }
 0x425   :  { %v7854_v54 = vpack.c.b16 %v7799_v36, %v7798_v55  ;;  %v9745_v14 = vor.u32 %v9744_v19, %v13183_v46  ;;  %v4989_v55 = vrot.slane %v4987_v24, 1  ;;  %v9753_v24 = vld [vmem:[#allocation2 + $0x24] sm:$0xe] }
 0x426   :  { %5600 = vrot.lane.b32.xlu1 %v5506_v49, %s9942_s25  ;;  %v3461_v49 = vsel %vm3455_vm13, %v3459_v2, %v3460_v22  ;;  %v9561_v22 = vld [vmem:[#allocation2 + $0x30] sm:$0xf0]  ;;  %v3036_v59 = vrot.slane %v3034_v27, 1  ;;  %v4490_v40 = vrot.slane %v13306_v23, 1 }
 0x427   :  { %9229 = vmatmul.msk.bf16.gmra.mxu0 %vm279_vm0, %v7853_v9  ;;  %v9610_v9 = vld [vmem:[#allocation2 + $0x30] sm:$0xe]  ;;  %v9563_v20 = vor.u32 %v9562_v62, %v9561_v22  ;;  %v13323_v62 = vpack.c.b16 %v2857_v29, %v2857_v29 }
 0x428   :  { %v9611_v2 = vor.u32 %v9610_v9, %v9609_v0  ;;  %v9513_v0 = vld [vmem:[#allocation2 + $0x18] sm:$0xf0]  ;;  %v9514_v9 = vld [vmem:[#allocation2 + $0x18] sm:$0xe]  ;;  %v3037_v22 = vor.u32 %v3036_v59, %v3032_v7  ;;  %v13319_v27 = vpop.f32.mrf.mxu0  ;;  %v9914_v59 = vld [vmem:[#allocation2 + $0x9c] sm:$0xf0] }
 0x429   :  { %4334 = vrot.lane.b32.xlu0 %v4031_v58, %s9954_s7  ;;  %v13290_v58 = vpack.c.b16 %v2856_v11, %v2856_v11  ;;  %v4486_v11 = vrot.slane %v9742_v15, 1  ;;  %v13310_v15 = vpack.c.b16 %v2848_v60, %v2848_v60  ;;  %19244 = vst [vmem:[#allocation86_spill] sm:$0xff] %v13319_v27  ;;  %v13330_v7 = vld [vmem:[#allocation2 + $0x9c] sm:$0xff]  }
 0x42a   :  { %v5510_v44 = vrot.slane %v9611_v2, 1  ;;  %19246 = vst [vmem:[#allocation139_spill] sm:$0xff] %v13323_v62 }
 0x42b   :  { %v3039_v30 = vshll.u32 %v13290_v58, 16  ;;  %v3463_v2 = vrot.slane %v13310_v15, 1  ;;  %19247 = vst [vmem:[#allocation140_spill] sm:$0xff] %v13330_v7 }
 0x42c   :  { %3554 = vrot.lane.b32.xlu2 %v3461_v49, %s9948_s2  ;;  %v5067_v49 = vsel %vm2910_vm14, %v13296_v52, %v5066_v35  ;;  %v2465_v35 = vld [vmem:[#allocation2 + $0x44] sm:$0x1]  ;;  %v5512_v4 = vsel %vm3455_vm13, %v5510_v44, %v5511_v34  ;;  %v4899_v34 = vunpack.c.l.b16 %v2593_v43  ;;  %v9915_v43 = vld [vmem:[#allocation2 + $0x9c] sm:$0xe] }
 0x42d   :  { %v3041_v45 = vrot.slane %v3039_v30, 1  ;;  %v3876_v60 = vunpack.c.l.b16 %v2465_v35  ;;  %v2473_v30 = vld [vmem:[#allocation2 + $0xa4] sm:$0x1]  ;;  %v3490_v35 = vrot.slane %v13323_v62, 1 }
 0x42e   :  { %4578 = vrot.lane.b32.xlu1 %v4485_v17, %s9952_s29  ;;  %v4487_v17 = vrot.slane %v13287_v18, 1  ;;  %v9750_v18 = vld [vmem:[#allocation2 + $0x3c] sm:$0xe] }
 0x42f   :  { %v3042_v36 = vsel %vm2910_vm14, %v3037_v22, %v3041_v45  ;;  %v13334_v19 = vpack.c.b16 %v3876_v60, %v3876_v60  ;;  %v9751_v45 = vor.u32 %v9750_v18, %v13174_v53 }
 0x430   :  { %v4488_v33 = vsel %vm3455_vm13, %v4486_v11, %v4487_v17  ;;  %v13321_v44 = vpop.permute.xlu2 %4804  ;;  %v4489_v11 = vrot.slane %v9563_v20, 1  ;;  %v13337_v20 = vpack.c.b16 %v4899_v34, %v4899_v34 }
 0x431   :  { %5360 = vrot.lane.b32.xlu0 %v5067_v49, %s9953_s30  ;;  %v9515_v49 = vor.u32 %v9514_v9, %v9513_v0  ;;  %19245 = vst [vmem:[#allocation87_spill] sm:$0xff] %v13321_v44  ;;  %v13340_v0 = vpop.permute.xlu1 %3295  ;;  %v3489_v9 = vrot.slane %v9745_v14, 1  ;;  %v4493_v53 = vrot.slane %v13334_v19, 1  ;;  %v5513_v22 = vrot.slane %v9751_v45, 1  ;;  %v9517_v44 = vld [vmem:[#allocation2 + $0x30] sm:$0xe] }
 0x432   :  { %v4491_v29 = vsel %vm3455_vm13, %v4489_v11, %v4490_v40  ;;  %v3980_v40 = vshll.u32 %v13306_v23, 16  ;;  %v5514_v60 = vrot.slane %v13337_v20, 1  ;;  %v9916_v23 = vor.u32 %v9915_v43, %v9914_v59 }
 0x433   :  { %v3462_v17 = vrot.slane %v9515_v49, 1  ;;  %v2336_v49 = vld [vmem:[#allocation2 + $0x2c] sm:$0x1]  ;;  %v3491_v14 = vsel %vm3455_vm13, %v3489_v9, %v3490_v35  ;;  %v9520_v35 = vld [vmem:[#allocation2 + $0x48] sm:$0xe] }
 0x434   :  { %5604 = vrot.lane.b32.xlu2 %v5512_v4, %s9942_s25  ;;  %v2339_v4 = vld [vmem:[#allocation2 + $0x50] sm:$0x1]  ;;  %v3982_v18 = vrot.slane %v3980_v40, 1  ;;  %v2849_v34 = vunpack.c.l.b16 %v2336_v49  ;;  %v9519_v9 = vld [vmem:[#allocation2 + $0x48] sm:$0xf0]  ;;  %v5515_v43 = vsel %vm3455_vm13, %v5513_v22, %v5514_v60  ;;  %v9754_v49 = vor.u32 %v9753_v24, %v13211_v8 }
 0x435   :  { %v3464_v46 = vsel %vm3455_vm13, %v3462_v17, %v3463_v2  ;;  %v4516_v40 = vrot.slane %v9916_v23, 1  ;;  %v9625_v60 = vld [vmem:[#allocation2 + $0xa8] sm:$0xe] }
 0x436   :  { %4580 = vrot.lane.b32.xlu1 %v4488_v33, %s9952_s29  ;;  %v4985_v33 = vshrl.u32 %v12911_v61, 16  ;;  %v9748_v61 = vor.u32 %v9747_v47, %v13178_v37  ;;  %v2852_v37 = vunpack.c.l.b16 %v2339_v4  ;;  %v3465_v24 = vrot.slane %v9754_v49, 1 }
 0x437   :  { %9230 = vmatmul.msk.bf16.gmra.mxu0 %vm279_vm0, %v7854_v54  ;;  %v3884_v54 = vunpack.c.l.b16 %v2473_v30  ;;  %v2602_v30 = vld [vmem:[#allocation2 + $0xb0] sm:$0x1] }
 0x438   :  { %v13344_v2 = vor.u32 %v4989_v55, %v4985_v33  ;;  %v4492_v47 = vrot.slane %v9748_v61, 1  ;;  %v13353_v33 = vpop.f32.mrf.mxu0  ;;  %v13362_v55 = vpop.permute.xlu0 %3794  ;;  %v19253_v61 = vld [vmem:[#allocation103_spill] sm:$0xff]  ;;  %v13368_v4 = vpack.c.b16 %v2852_v37, %v2852_v37 }
 0x439   :  { %3315 = vrot.lane.b32.xlu0 %v3042_v36, %s9949_s3  ;;  %v13351_v11 = vpack.c.b16 %v3884_v54, %v3884_v54  ;;  %19249 = vst [vmem:[#allocation142_spill] sm:$0xff] %v13353_v33  ;;  %v7801_v45 = vunpack.c.l.b16 %v19253_v61  ;;  %v13371_v54 = vpack.c.b16 %v2849_v34, %v2849_v34  ;;  %v4908_v33 = vunpack.c.l.b16 %v2602_v30  ;;  %v13376_v61 = vpop.permute.xlu1 %3778  ;;  %v9624_v37 = vld [vmem:[#allocation2 + $0xa8] sm:$0xf0]  ;;  %v2417_v34 = vld [vmem:[#allocation2 + $0x84] sm:$0xf] }
 0x43a   :  { %v13357_v17 = vsel %vm2910_vm14, %v13344_v2, %v3982_v18  ;;  %v13359_v36 = vpop.permute.xlu2 %4808  ;;  %19251 = vst [vmem:[#allocation144_spill] sm:$0xff] %v13362_v55  ;;  %v4494_v59 = vsel %vm3455_vm13, %v4492_v47, %v4493_v53  ;;  %v13378_v53 = vld [vmem:[#allocation2 + $0x88] sm:$0xf]  ;;  %v3475_v8 = vrot.slane %v13368_v4, 1  ;;  %v9626_v49 = vor.u32 %v9625_v60, %v9624_v37  ;;  %v2337_v37 = vld [vmem:[#allocation2 + $0x38] sm:$0x1] }
 0x43b   :  { %19248 = vst [vmem:[#allocation141_spill] sm:$0xff] %v13351_v11  ;;  %v4517_v18 = vrot.slane %v13351_v11, 1  ;;  %v3466_v23 = vrot.slane %v13371_v54, 1  ;;  %v3700_v27 = vunpack.c.l.b16 %v2417_v34  ;;  %v9612_v11 = vld [vmem:[#allocation2 + $0x48] sm:$0xf0]  ;;  %v19258_v34 = vunpack.c.l.b16 %v13378_v53 }
 0x43c   :  { %3556 = vrot.lane.b32.xlu2 %v3464_v46, %s9948_s2  ;;  %19250 = vst [vmem:[#allocation143_spill] sm:$0xff] %v13359_v36  ;;  %v9756_v36 = vld [vmem:[#allocation2 + $0x6c] sm:$0xe]  ;;  %v2850_v62 = vunpack.c.l.b16 %v2337_v37  ;;  %v9516_v37 = vld [vmem:[#allocation2 + $0x30] sm:$0xf0] }
 0x43d   :  { %v4518_v30 = vsel %vm3455_vm13, %v4516_v40, %v4517_v18  ;;  %v9613_v40 = vld [vmem:[#allocation2 + $0x48] sm:$0xe] }
 0x43e   :  { %4582 = vrot.lane.b32.xlu1 %v4491_v29, %s9952_s29  ;;  %v19252_v29 = vld [vmem:[#allocation102_spill] sm:$0xff] }
 0x43f   :  { %v7800_v46 = vunpack.c.l.b16 %v19252_v29  ;;  %v9521_v29 = vor.u32 %v9520_v35, %v9519_v9  ;;  %19254 = vst [vmem:[#allocation102_spill] sm:$0xff] %v13376_v61  ;;  %v9567_v35 = vld [vmem:[#allocation2 + $0x60] sm:$0xf0] }
 0x441   :  { %3574 = vrot.lane.b32.xlu0 %v3491_v14, %s9948_s2  ;;  %v2594_v14 = vld [vmem:[#allocation2 + $0x50] sm:$0x1]  ;;  %v7855_v47 = vpack.c.b16 %v7801_v45, %v7800_v46  ;;  %v3474_v46 = vrot.slane %v9521_v29, 1  ;;  %v2471_v45 = vld [vmem:[#allocation2 + $0x8c] sm:$0x1] }
 0x442   :  { %v4900_v22 = vunpack.c.l.b16 %v2594_v14  ;;  %v13388_v14 = vpop.f32.mrf.mxu0  ;;  %v13391_v55 = vpop.permute.xlu2 %3786  ;;  %v2597_v29 = vld [vmem:[#allocation2 + $0x74] sm:$0x1]  ;;  %v3882_v60 = vunpack.c.l.b16 %v2471_v45 }
 0x443   :  { %19255 = vst [vmem:[#allocation103_spill] sm:$0xff] %v13388_v14  ;;  %v13401_v14 = vpack.c.b16 %v19258_v34, %v3700_v27 }
 0x444   :  { %5606 = vrot.lane.b32.xlu2 %v5515_v43, %s9942_s25  ;;  %v9568_v43 = vld [vmem:[#allocation2 + $0x60] sm:$0xe]  ;;  %19256 = vst [vmem:[#allocation145_spill] sm:$0xff] %v13391_v55  ;;  %v4903_v55 = vunpack.c.l.b16 %v2597_v29  ;;  %v13411_v34 = vpack.c.b16 %v3882_v60, %v3882_v60  ;;  %v9757_v29 = vor.u32 %v9756_v36, %v13001_v16  ;;  %v2342_v36 = vld [vmem:[#allocation2 + $0x74] sm:$0x1] }
 0x446   :  { %4584 = vrot.lane.b32.xlu1 %v4494_v59, %s9952_s29  ;;  %v13384_v59 = vpack.c.b16 %v4908_v33, %v4908_v33  ;;  %v13393_v33 = vpack.c.b16 %v4900_v22, %v4900_v22  ;;  %v9614_v22 = vor.u32 %v9613_v40, %v9612_v11 }
 0x447   :  { %9231 = vmatmul.msk.bf16.gmra.mxu0 %vm279_vm0, %v7855_v47  ;;  %v3476_v47 = vsel %vm3455_vm13, %v3474_v46, %v3475_v8  ;;  %v13395_v18 = vpop.permute.xlu0 %4820  ;;  %v9569_v8 = vor.u32 %v9568_v43, %v9567_v35  ;;  %v5540_v46 = vrot.slane %v9626_v49, 1  ;;  %v19260_v35 = vld [vmem:[#allocation88_spill] sm:$0xff]  ;;  %v19261_v43 = vld [vmem:[#allocation89_spill] sm:$0xff] }
 0x448   :  { %19257 = vst [vmem:[#allocation146_spill] sm:$0xff] %v13395_v18  ;;  %v5541_v9 = vrot.slane %v13384_v59, 1  ;;  %v4059_v18 = vshll.u32 %v13401_v14, 16  ;;  %v5517_v45 = vrot.slane %v13393_v33, 1  ;;  %v7802_v11 = vunpack.c.l.b16 %v19260_v35 }
 0x449   :  { %4600 = vrot.lane.b32.xlu0 %v4518_v30, %s9952_s29  ;;  %v3467_v30 = vsel %vm3455_vm13, %v3465_v24, %v3466_v23  ;;  %v4502_v24 = vrot.slane %v13242_v5, 1  ;;  %v13407_v23 = vpop.permute.xlu1 %3782  ;;  %v7803_v49 = vunpack.c.l.b16 %v19261_v43  ;;  %v4501_v40 = vrot.slane %v9569_v8, 1 }
 0x44a   :  { %19259 = vst [vmem:[#allocation147_spill] sm:$0xff] %v13407_v23  ;;  %v5542_v27 = vsel %vm3455_vm13, %v5540_v46, %v5541_v9  ;;  %v4057_v5 = vshrl.u32 %v13401_v14, 16  ;;  %v13417_v23 = vpack.c.b16 %v4903_v55, %v4903_v55  ;;  %v13420_v9 = vpack.c.b16 %v2850_v62, %v2850_v62  ;;  %v9759_v62 = vld [vmem:[#allocation2 + $0x6c] sm:$0xe]  ;;  %v2466_v55 = vld [vmem:[#allocation2 + $0x50] sm:$0x1] }
 0x44b   :  { %v13431_v16 = vpop.permute.xlu2 %4812  ;;  %v7856_v35 = vpack.c.b16 %v7803_v49, %v7802_v11  ;;  %v9518_v43 = vor.u32 %v9517_v44, %v9516_v37  ;;  %v3987_v44 = vshll.u32 %v13176_v32, 16  ;;  %v9564_v49 = vld [vmem:[#allocation2 + $0x48] sm:$0xf0]  ;;  %v13450_v37 = vld [vmem:[#allocation2 + $0xe4] sm:$0xf0] }
 0x44c   :  { %3558 = vrot.lane.b32.xlu2 %v3467_v30, %s9948_s2  ;;  %v5516_v30 = vrot.slane %v9614_v22, 1  ;;  %19262 = vst [vmem:[#allocation88_spill] sm:$0xff] %v13417_v23  ;;  %v4064_v22 = vshll.u32 %v13411_v34, 16 }
 0x44d   :  { %19265 = vst [vmem:[#allocation149_spill] sm:$0xff] %v13431_v16  ;;  %v3468_v11 = vrot.slane %v9518_v43, 1  ;;  %v9760_v16 = vor.u32 %v9759_v62, %v13236_v41  ;;  %v2595_v43 = vld [vmem:[#allocation2 + $0x5c] sm:$0x1]  ;;  %v3985_v62 = vshrl.u32 %v13176_v32, 16 }
 0x44e   :  { %3564 = vrot.lane.b32.xlu1 %v3476_v47, %s9948_s2  ;;  %v4061_v47 = vrot.slane %v4059_v18, 1  ;;  %v4503_v18 = vsel %vm3455_vm13, %v4501_v40, %v4502_v24  ;;  %v5518_v46 = vsel %vm3455_vm13, %v5516_v30, %v5517_v45  ;;  %v5525_v24 = vrot.slane %v9757_v29, 1  ;;  %v13448_v29 = vld [vmem:[#allocation2 + $0xe4] sm:$0xff]  }
 0x44f   :  { %v13422_v60 = vpop.permute.xlu0 %3788  ;;  %v5526_v45 = vrot.slane %v13417_v23, 1  ;;  %v3469_v40 = vrot.slane %v13420_v9, 1  ;;  %v3877_v30 = vunpack.c.l.b16 %v2466_v55  ;;  %19269 = vst [vmem:[#allocation153_spill] sm:$0xff] %v13448_v29  ;;  %v3989_v23 = vrot.slane %v3987_v44, 1 }
 0x450   :  { %19263 = vst [vmem:[#allocation89_spill] sm:$0xff] %v13422_v60  ;;  %v4062_v8 = vor.u32 %v4061_v47, %v4057_v5  ;;  %v4066_v60 = vrot.slane %v4064_v22, 1  ;;  %v2855_v47 = vunpack.c.l.b16 %v2342_v36  ;;  %v13436_v5 = vld [vmem:[#allocation2 + $0xb4] sm:$0xff]   ;;  %v9565_v36 = vld [vmem:[#allocation2 + $0x48] sm:$0xe] }
 0x451   :  { %5624 = vrot.lane.b32.xlu0 %v5542_v27, %s9942_s25  ;;  %v13426_v27 = vpop.f32.mrf.mxu0  ;;  %19266 = vst [vmem:[#allocation150_spill] sm:$0xff] %v13436_v5  ;;  %v5527_v22 = vsel %vm3455_vm13, %v5525_v24, %v5526_v45  ;;  %v9566_v24 = vor.u32 %v9565_v36, %v9564_v49  ;;  %v19275_v49 = vld [vmem:[#allocation101_spill] sm:$0xff] }
 0x452   :  { %19264 = vst [vmem:[#allocation148_spill] sm:$0xff] %v13426_v27  ;;  %v13443_v27 = vpop.permute.xlu1 %3790  ;;  %v7805_v36 = vunpack.c.l.b16 %v19275_v49  ;;  %v2340_v49 = vld [vmem:[#allocation2 + $0x5c] sm:$0x1] }
 0x453   :  { %19268 = vst [vmem:[#allocation152_spill] sm:$0xff] %v13443_v27  ;;  %v13456_v27 = vpack.c.b16 %v2855_v47, %v2855_v47 }
 0x454   :  { %5608 = vrot.lane.b32.xlu2 %v5518_v46, %s9942_s25  ;;  %v13441_v46 = vsel %vm2910_vm14, %v4062_v8, %v4066_v60  ;;  %v2503_v60 = vld [vmem:[#allocation2 + $0x84] sm:$0xe]  ;;  %v9762_v8 = vld [vmem:[#allocation2 + $0x54] sm:$0xe] }
 0x455   :  { %19271 = vst [vmem:[#allocation155_spill] sm:$0xff] %v13456_v27  ;;  %v4426_v45 = vunpack.c.l.b16 %v2503_v60  ;;  %v3484_v47 = vrot.slane %v13456_v27, 1  ;;  %v4495_v60 = vrot.slane %v9566_v24, 1  ;;  %v9917_v24 = vld [vmem:[#allocation2 + $0x54] sm:$0xf0] }
 0x456   :  { %4590 = vrot.lane.b32.xlu1 %v4503_v18, %s9952_s29  ;;  %v13438_v18 = vld [vmem:[#allocation2 + $0xb4] sm:$0xf0] }
 0x457   :  { %9232 = vmatmul.msk.bf16.gmra.mxu0 %vm279_vm0, %v7856_v35  ;;  %19267 = vst [vmem:[#allocation151_spill] sm:$0xff] %v13438_v18  ;;  %v13453_v55 = vpop.permute.xlu0 %4814  ;;  %v3470_v35 = vsel %vm3455_vm13, %v3468_v11, %v3469_v40  ;;  %v3483_v40 = vrot.slane %v9760_v16, 1  ;;  %v19274_v11 = vld [vmem:[#allocation91_spill] sm:$0xff]  ;;  %v9763_v16 = vor.u32 %v9762_v8, %v13202_v42  ;;  %v13485_v18 = vld [vmem:[#allocation2 + $0x54] sm:$0xff]  }
 0x458   :  { %19270 = vst [vmem:[#allocation154_spill] sm:$0xff] %v13453_v55  ;;  %v4901_v55 = vunpack.c.l.b16 %v2595_v43  ;;  %v3992_v43 = vshll.u32 %v13334_v19, 16 }
 0x459   :  { %3800 = vrot.lane.b32.xlu0 %v13330_v7, %s9950_s27  ;;  %v13459_v7 = vpack.c.b16 %v3877_v30, %v3877_v30  ;;  %v13461_v61 = vpop.f32.mrf.mxu0  ;;  %v5023_v30 = vshll.u32 %v13200_v3, 16  ;;  %v3485_v27 = vsel %vm3455_vm13, %v3483_v40, %v3484_v47  ;;  %19279 = vst [vmem:[#allocation158_spill] sm:$0xff] %v13485_v18  ;;  %v4511_v40 = vrot.slane %v13411_v34, 1 }
 0x45a   :  { %19272 = vst [vmem:[#allocation156_spill] sm:$0xff] %v13461_v61  ;;  %v4933_v32 = vpack.c.b16 %v4901_v55, %v4901_v55  ;;  %v2474_v55 = vld [vmem:[#allocation2 + $0xb0] sm:$0x1]  ;;  %v5519_v47 = vrot.slane %v9763_v16, 1  ;;  %v5021_v34 = vshrl.u32 %v13200_v3, 16 }
 0x45b   :  { %v4496_v41 = vrot.slane %v13459_v7, 1  ;;  %v5025_v42 = vrot.slane %v5023_v30, 1  ;;  %v6242_v30 = vld [vmem:[%s18312_s4 + $0x68] sm:$0xf] }
 0x45c   :  { %3560 = vrot.lane.b32.xlu2 %v3470_v35, %s9948_s2  ;;  %v19276_v35 = vunpack.c.l.b16 %v13378_v53  ;;  %v9918_v53 = vld [vmem:[#allocation2 + $0x54] sm:$0xe]  ;;  %v5028_v16 = vshll.u32 %v4933_v32, 16 }
 0x45d   :  { %v9919_v3 = vor.u32 %v9918_v53, %v9917_v24  ;;  %v9464_v24 = vld [vmem:[#allocation2 + $0x18] sm:$0xff]  }
 0x45e   :  { %5614 = vrot.lane.b32.xlu1 %v5527_v22, %s9942_s25  ;;  %v13465_v29 = vpop.permute.xlu2 %4802  ;;  %v7804_v22 = vunpack.c.l.b16 %v19274_v11  ;;  %v4458_v44 = vpack.c.b16 %v19276_v35, %v4426_v45  ;;  %v13479_v61 = vpop.permute.xlu1 %4816  ;;  %v3990_v11 = vor.u32 %v3989_v23, %v3985_v62  ;;  %v5520_v62 = vrot.slane %v4933_v32, 1 }
 0x45f   :  { %19273 = vst [vmem:[#allocation157_spill] sm:$0xff] %v13465_v29 }
 0x460   :  { %19277 = vst [vmem:[#allocation91_spill] sm:$0xff] %v13479_v61  ;;  %v7857_v19 = vpack.c.b16 %v7805_v36, %v7804_v22  ;;  %v4510_v8 = vrot.slane %v4458_v44, 1  ;;  %v3885_v22 = vunpack.c.l.b16 %v2474_v55  ;;  %v6296_v36 = vunpack.c.l.b16 %v6242_v30  ;;  %v2469_v30 = vld [vmem:[#allocation2 + $0x74] sm:$0x1] }
 0x461   :  { %4826 = vrot.lane.b32.xlu0 %v13436_v5, %s9951_s28  ;;  %v4497_v5 = vsel %vm3455_vm13, %v4495_v60, %v4496_v41  ;;  %v3994_v41 = vrot.slane %v3992_v43, 1  ;;  %v2853_v60 = vunpack.c.l.b16 %v2340_v49  ;;  %v5026_v55 = vor.u32 %v5025_v42, %v5021_v34  ;;  %v2604_v42 = vld [vmem:[#allocation2 + $0xc8] sm:$0x1] }
 0x462   :  { %v4512_v44 = vsel %vm3455_vm13, %v4510_v8, %v4511_v40  ;;  %v6310_v43 = vpack.c.b16 %v6296_v36, %v6296_v36  ;;  %v3477_v34 = vrot.slane %v9919_v3, 1 }
 0x463   :  { %v13481_v29 = vpop.permute.xlu0 %3562  ;;  %v13504_v61 = vpack.c.b16 %v2853_v60, %v2853_v60 }
 0x464   :  { %19278 = vst [vmem:[#allocation101_spill] sm:$0xff] %v13481_v29  ;;  %v13487_v45 = vpop.f32.mrf.mxu0  ;;  %4586 = vrot.lane.b32.xlu2 %v4497_v5, %s9952_s29  ;;  %v3995_v5 = vsel %vm2910_vm14, %v3990_v11, %v3994_v41  ;;  %v13508_v41 = vld [vmem:[#allocation2 + $0xa8] sm:$0xff]   ;;  %v6391_v32 = vsel %vm6389_vm15, %v6310_v43, 0  ;;  %v4910_v43 = vunpack.c.l.b16 %v2604_v42 }
 0x465   :  { %19280 = vst [vmem:[#allocation159_spill] sm:$0xff] %v13487_v45  ;;  %v4992_v45 = vshll.u32 %v13285_v21, 16  ;;  %v4095_v53 = vshll.u32 %v13508_v41, 16  ;;  %6564 = vmatpush.bf16.msrb.mxu2 %v6391_v32  ;;  %v3478_v36 = vrot.slane %v13504_v61, 1 }
 0x466   :  { %3570 = vrot.lane.b32.xlu1 %v3485_v27, %s9948_s2  ;;  %v13492_v23 = vpop.permute.xlu2 %4806  ;;  %v7440_v27 = vld [vmem:[#allocation8 + $0x8] sm:$0xf]  ;;  %v13520_v21 = vpop.permute.xlu1 %3776 }
 0x467   :  { %19281 = vst [vmem:[#allocation160_spill] sm:$0xff] %v13492_v23  ;;  %9233 = vmatmul.msk.bf16.gmra.mxu0 %vm279_vm0, %v7857_v19  ;;  %v7446_v35 = vunpack.c.l.b16 %v7440_v27  ;;  %v5521_v19 = vsel %vm3455_vm13, %v5519_v47, %v5520_v62  ;;  %v9765_v27 = vld [vmem:[#allocation2 + $0x6c] sm:$0xe]  ;;  %v5030_v47 = vrot.slane %v5028_v16, 1  ;;  %v9268_v62 = vld [vmem:[%s18312_s4 + $0x60] sm:$0xff]  ;;  %v4097_v29 = vrot.slane %v4095_v53, 1 }
 0x468   :  { %v9766_v42 = vor.u32 %v9765_v27, %v13198_v39  ;;  %v4093_v53 = vshrl.u32 %v13508_v41, 16 }
 0x469   :  { %4328 = vrot.lane.b32.xlu0 %v3995_v5, %s9954_s7  ;;  %v7448_v49 = vpack.c.b16 %v7446_v35, %v7446_v35  ;;  %v13510_v5 = vpack.c.b16 %v3885_v22, %v3885_v22  ;;  %v4994_v22 = vrot.slane %v4992_v45, 1  ;;  %v3880_v35 = vunpack.c.l.b16 %v2469_v30  ;;  %6565 = vmatpush.bf16.msrb.mxu2 %v9268_v62  ;;  %v9267_v45 = vld [vmem:[%s18312_s4 + $0x58] sm:$0xff] }
 0x46a   :  { %v13556_v39 = vor.u32 %v4097_v29, %v4093_v53  ;;  %v9618_v53 = vld [vmem:[#allocation2 + $0x78] sm:$0xf0] }
 0x46b   :  { %v13506_v11 = vpop.permute.xlu0 %4588  ;;  %v13516_v40 = vsel %vm6389_vm15, %v7448_v49, 0  ;;  %v4100_v16 = vshll.u32 %v13510_v5, 16  ;;  %v2938_v49 = vshll.u32 %v9464_v24, 16  ;;  %v4995_v3 = vsel %vm2910_vm14, %v13344_v2, %v4994_v22  ;;  %v9266_v22 = vld [vmem:[%s18312_s4 + $0x50] sm:$0xff] }
 0x46c   :  { %19282 = vst [vmem:[#allocation161_spill] sm:$0xff] %v13506_v11  ;;  %v13512_v8 = vpop.f32.mrf.mxu0  ;;  %5610 = vrot.lane.b32.xlu2 %v5521_v19, %s9942_s25  ;;  %9660 = vmatpush.bf16.msrb.mxu3 %v13516_v40  ;;  %v19285_v19 = vld [vmem:[#allocation105_spill] sm:$0xff]  ;;  %v13541_v30 = vpack.c.b16 %v3880_v35, %v3880_v35 }
 0x46d   :  { %19283 = vst [vmem:[#allocation162_spill] sm:$0xff] %v13512_v8  ;;  %v7806_v32 = vunpack.c.l.b16 %v19285_v19  ;;  %v19286_v8 = vld [vmem:[#allocation106_spill] sm:$0xff]  ;;  %v4102_v62 = vrot.slane %v4100_v16, 1  ;;  %v13550_v19 = vpack.c.b16 %v4910_v43, %v4910_v43  ;;  %6566 = vmatpush.bf16.msrb.mxu2 %v9267_v45  ;;  %v4504_v43 = vrot.slane %v9766_v42, 1 }
 0x46e   :  { %4596 = vrot.lane.b32.xlu1 %v4512_v44, %s9952_s29  ;;  %v13527_v60 = vpop.permute.xlu2 %3792  ;;  %v5031_v44 = vsel %vm2910_vm14, %v5026_v55, %v5030_v47  ;;  %v7807_v11 = vunpack.c.l.b16 %v19286_v8  ;;  %v2943_v55 = vshll.u32 %v13310_v15, 16  ;;  %v3479_v8 = vsel %vm3455_vm13, %v3477_v34, %v3478_v36 }
 0x46f   :  { %19284 = vst [vmem:[#allocation163_spill] sm:$0xff] %v13527_v60  ;;  %v2940_v15 = vrot.slane %v2938_v49, 1  ;;  %v2936_v34 = vshrl.u32 %v9464_v24, 16  ;;  %v4103_v29 = vsel %vm2910_vm14, %v13556_v39, %v4102_v62  ;;  %v5136_v49 = vshll.u32 %v13550_v19, 16 }
 0x470   :  { %v7858_v2 = vpack.c.b16 %v7807_v11, %v7806_v32  ;;  %v2945_v16 = vrot.slane %v2943_v55, 1  ;;  %v4505_v11 = vrot.slane %v13541_v30, 1  ;;  %v9697_v32 = vld [vmem:[#allocation2 + $0x48] sm:$0xff]   ;;  %v5016_v62 = vshll.u32 %v13393_v33, 16  ;;  %v9264_v33 = vld [vmem:[%s18312_s4 + $0x40] sm:$0xff] }
 0x471   :  { %5354 = vrot.lane.b32.xlu0 %v5031_v44, %s9953_s30  ;;  %v13546_v44 = vld [vmem:[#allocation2 + $0xc0] sm:$0xff]   ;;  %v5011_v45 = vshll.u32 %v9697_v32, 16  ;;  %6567 = vmatpush.bf16.msrb.mxu2 %v9266_v22  ;;  %v9265_v55 = vld [vmem:[%s18312_s4 + $0x48] sm:$0xff]  ;;  %v5009_v22 = vshrl.u32 %v9697_v32, 16 }
 0x472   :  { %v5131_v27 = vshll.u32 %v13546_v44, 16 }
 0x473   :  { %v13544_v47 = vpop.permute.xlu0 %5612 }
 0x474   :  { %19287 = vst [vmem:[#allocation105_spill] sm:$0xff] %v13544_v47  ;;  %v13552_v60 = vpop.f32.mrf.mxu0  ;;  %3566 = vrot.lane.b32.xlu2 %v3479_v8, %s9948_s2  ;;  %v2347_v8 = vld [vmem:[#allocation2 + $0xb0] sm:$0x1]  ;;  %v5133_v24 = vrot.slane %v5131_v27, 1  ;;  %v5013_v47 = vrot.slane %v5011_v45, 1  ;;  %v5529_v45 = vrot.slane %v13268_v48, 1 }
 0x475   :  { %19288 = vst [vmem:[#allocation106_spill] sm:$0xff] %v13552_v60  ;;  %v9619_v60 = vld [vmem:[#allocation2 + $0x78] sm:$0xe]  ;;  %6568 = vmatpush.bf16.msrb.mxu2 %v9265_v55  ;;  %v19293_v55 = vld [vmem:[#allocation107_spill] sm:$0xff] }
 0x476   :  { %5348 = vrot.lane.b32.xlu1 %v4995_v3, %s9953_s30  ;;  %v13562_v36 = vpop.permute.xlu2 %4818  ;;  %v2941_v3 = vor.u32 %v2940_v15, %v2936_v34  ;;  %v5129_v15 = vshrl.u32 %v13546_v44, 16  ;;  %v5138_v34 = vrot.slane %v5136_v49, 1  ;;  %v9620_v27 = vor.u32 %v9619_v60, %v9618_v53  ;;  %v9532_v60 = vld [vmem:[#allocation2 + $0xa8] sm:$0xe] }
 0x477   :  { %19289 = vst [vmem:[#allocation164_spill] sm:$0xff] %v13562_v36  ;;  %9234 = vmatmul.msk.bf16.gmra.mxu0 %vm279_vm0, %v7858_v2  ;;  %v4506_v36 = vsel %vm3455_vm13, %v4504_v43, %v4505_v11  ;;  %v5018_v49 = vrot.slane %v5016_v62, 1  ;;  %v13599_v53 = vor.u32 %v5013_v47, %v5009_v22  ;;  %v2967_v47 = vshll.u32 %v13420_v9, 16 }
 0x478   :  { %v13564_v35 = vpop.permute.xlu1 %3780  ;;  %v2946_v42 = vsel %vm2910_vm14, %v2941_v3, %v2945_v16  ;;  %v13583_v23 = vor.u32 %v5133_v24, %v5129_v15  ;;  %v9465_v16 = vld [vmem:[#allocation2 + $0x30] sm:$0xff]   ;;  %v5528_v24 = vrot.slane %v9620_v27, 1  ;;  %v2998_v22 = vshll.u32 %v13485_v18, 16 }
 0x479   :  { %4346 = vrot.lane.b32.xlu0 %v4103_v29, %s9954_s7  ;;  %v2860_v29 = vunpack.c.l.b16 %v2347_v8  ;;  %v19294_v15 = vld [vmem:[#allocation108_spill] sm:$0xff]  ;;  %6569 = vmatpush.bf16.msrb.mxu2 %v9264_v33  ;;  %v5019_v48 = vsel %vm2910_vm14, %v13599_v53, %v5018_v49  ;;  %v2969_v9 = vrot.slane %v2967_v47, 1 }
 0x47a   :  { %v5139_v32 = vsel %vm2910_vm14, %v13583_v23, %v5138_v34 }
 0x47b   :  { %v13577_v2 = vpop.permute.xlu0 %3568  ;;  %v13597_v8 = vpack.c.b16 %v2860_v29, %v2860_v29  ;;  %v3956_v29 = vshll.u32 %v13258_v6, 16 }
 0x47c   :  { %19290 = vst [vmem:[#allocation165_spill] sm:$0xff] %v13577_v2  ;;  %4592 = vrot.lane.b32.xlu2 %v4506_v36, %s9952_s29  ;;  %v13585_v3 = vpop.f32.mrf.mxu0  ;;  %v9531_v36 = vld [vmem:[#allocation2 + $0xa8] sm:$0xf0]  ;;  %v2962_v2 = vshll.u32 %v9465_v16, 16 }
 0x47d   :  { %19291 = vst [vmem:[#allocation166_spill] sm:$0xff] %v13585_v3  ;;  %v7809_v3 = vunpack.c.l.b16 %v19294_v15  ;;  %v9533_v62 = vor.u32 %v9532_v60, %v9531_v36  ;;  %v3499_v27 = vrot.slane %v13597_v8, 1  ;;  %v3958_v6 = vrot.slane %v3956_v29, 1 }
 0x47e   :  { %3299 = vrot.lane.b32.xlu1 %v2946_v42, %s9949_s3  ;;  %v13590_v43 = vpop.permute.xlu2 %5602  ;;  %v7808_v42 = vunpack.c.l.b16 %v19293_v55  ;;  %v2964_v36 = vrot.slane %v2962_v2, 1  ;;  %v3000_v55 = vrot.slane %v2998_v22, 1  ;;  %v4004_v2 = vshll.u32 %v13459_v7, 16  ;;  %v9580_v7 = vld [vmem:[#allocation2 + $0xc0] sm:$0xe] }
 0x47f   :  { %v3498_v60 = vrot.slane %v9533_v62, 1  ;;  %v3003_v62 = vshll.u32 %v13504_v61, 16  ;;  %v3959_v29 = vsel %vm2910_vm14, %v13244_v12, %v3958_v6 }
 0x480   :  { %v13592_v11 = vpop.permute.xlu1 %3784  ;;  %v7859_v33 = vpack.c.b16 %v7809_v3, %v7808_v42  ;;  %v2996_v42 = vshrl.u32 %v13485_v18, 16  ;;  %v13649_v18 = vld [vmem:[#allocation2 + $0xb4] sm:$0xff]  }
 0x481   :  { %19292 = vst [vmem:[#allocation167_spill] sm:$0xff] %v13592_v11  ;;  %5372 = vrot.lane.b32.xlu0 %v5139_v32, %s9953_s30  ;;  %v5530_v11 = vsel %vm3455_vm13, %v5528_v24, %v5529_v45  ;;  %v2960_v32 = vshrl.u32 %v9465_v16, 16  ;;  %v3500_v24 = vsel %vm3455_vm13, %v3498_v60, %v3499_v27  ;;  %v3005_v60 = vrot.slane %v3003_v62, 1 }
 0x482   :  { %v3001_v27 = vor.u32 %v3000_v55, %v2996_v42 }
 0x483   :  { %v13607_v34 = vpop.permute.xlu0 %4594  ;;  %v2965_v3 = vor.u32 %v2964_v36, %v2960_v32  ;;  %v4006_v36 = vrot.slane %v4004_v2, 1  ;;  %v19300_v2 = vld [vmem:[#allocation110_spill] sm:$0xff] }
 0x484   :  { %19295 = vst [vmem:[#allocation107_spill] sm:$0xff] %v13607_v34  ;;  %5616 = vrot.lane.b32.xlu2 %v5530_v11, %s9942_s25  ;;  %v13621_v15 = vpop.f32.mrf.mxu0  ;;  %v2476_v11 = vld [vmem:[#allocation2 + $0xc8] sm:$0x1]  ;;  %v3006_v12 = vsel %vm2910_vm14, %v3001_v27, %v3005_v60  ;;  %v7811_v62 = vunpack.c.l.b16 %v19300_v2  ;;  %v9467_v2 = vld [vmem:[#allocation2 + $0x60] sm:$0xff]  }
 0x485   :  { %19297 = vst [vmem:[#allocation168_spill] sm:$0xff] %v13621_v15  ;;  %v2970_v47 = vsel %vm2910_vm14, %v2965_v3, %v2969_v9  ;;  %v3887_v22 = vunpack.c.l.b16 %v2476_v11  ;;  %v13638_v15 = vld [vmem:[#allocation2 + $0xd0] sm:$0xf]  ;;  %v2605_v9 = vld [vmem:[#allocation2 + $0xd4] sm:$0x1]  ;;  %v19299_v11 = vld [vmem:[#allocation109_spill] sm:$0xff]  ;;  %v4007_v27 = vsel %vm2910_vm14, %v13599_v53, %v4006_v36 }
 0x486   :  { %5352 = vrot.lane.b32.xlu1 %v5019_v48, %s9953_s30  ;;  %v13617_v45 = vpop.permute.xlu2 %3554  ;;  %v9466_v48 = vld [vmem:[#allocation2 + $0x48] sm:$0xff]   ;;  %v7810_v42 = vunpack.c.l.b16 %v19299_v11  ;;  %19302 = vst [vmem:[#allocation110_spill] sm:$0xff] %v13649_v18  ;;  %v2472_v18 = vld [vmem:[#allocation2 + $0x98] sm:$0x1] }
 0x487   :  { %9235 = vmatmul.msk.bf16.gmra.mxu0 %vm279_vm0, %v7859_v33  ;;  %v9579_v33 = vld [vmem:[#allocation2 + $0xc0] sm:$0xf0]  ;;  %v2986_v32 = vshll.u32 %v9466_v48, 16  ;;  %v2637_v3 = vld [vmem:[#allocation2 + $0xcc] sm:$0xe]  ;;  %v13641_v6 = vpack.c.b16 %v3887_v22, %v3887_v22  ;;  %v5040_v22 = vshll.u32 %v13152_v38, 16 }
 0x488   :  { %v13615_v49 = vpop.permute.xlu1 %4810  ;;  %v9581_v55 = vor.u32 %v9580_v7, %v9579_v33  ;;  %v5455_v34 = vunpack.c.l.b16 %v2637_v3  ;;  %v7860_v38 = vpack.c.b16 %v7811_v62, %v7810_v42  ;;  %v2984_v11 = vshrl.u32 %v9466_v48, 16 }
 0x489   :  { %19296 = vst [vmem:[#allocation108_spill] sm:$0xff] %v13615_v49  ;;  %3580 = vrot.lane.b32.xlu0 %v3500_v24, %s9948_s2  ;;  %v13651_v49 = vld [vmem:[#allocation2 + $0xb4] sm:$0xf0]  ;;  %v2988_v33 = vrot.slane %v2986_v32, 1  ;;  %v4526_v3 = vrot.slane %v13641_v6, 1  ;;  %v3010_v42 = vshll.u32 %v9467_v2, 16 }
 0x48b   :  { %v13627_v16 = vpop.permute.xlu0 %5618 }
 0x48c   :  { %19298 = vst [vmem:[#allocation169_spill] sm:$0xff] %v13627_v16  ;;  %4322 = vrot.lane.b32.xlu2 %v3959_v29, %s9954_s7  ;;  %v18578_v29 = vunpack.c.l.b16 %v13638_v15  ;;  %v4911_v16 = vunpack.c.l.b16 %v2605_v9  ;;  %v4525_v9 = vrot.slane %v9581_v55, 1  ;;  %v5042_v55 = vrot.slane %v5040_v22, 1 }
 0x48e   :  { %3303 = vrot.lane.b32.xlu1 %v2970_v47, %s9949_s3  ;;  %v13636_v24 = vpop.permute.xlu2 %5604  ;;  %v13646_v47 = vpop.f32.mrf.mxu0  ;;  %v13665_v36 = vpack.c.b16 %v4911_v16, %v4911_v16  ;;  %v2989_v16 = vor.u32 %v2988_v33, %v2984_v11  ;;  %v5043_v48 = vsel %vm2910_vm14, %v13273_v13, %v5042_v55  ;;  %v2600_v33 = vld [vmem:[#allocation2 + $0x98] sm:$0x1]  ;;  %v19304_v11 = vld [vmem:[#allocation111_spill] sm:$0xff] }
 0x48f   :  { %19301 = vst [vmem:[#allocation109_spill] sm:$0xff] %v13646_v47 }
 0x490   :  { %v13634_v61 = vpop.permute.xlu1 %4576  ;;  %v5550_v62 = vrot.slane %v13665_v36, 1 }
 0x491   :  { %3309 = vrot.lane.b32.xlu0 %v3006_v12, %s9949_s3  ;;  %v6023_v60 = vsel %vm6021_vm2, %v13634_v61, %v13294_v63  ;;  %v2991_v12 = vshll.u32 %v13368_v4, 16  ;;  %v5487_v63 = vpack.c.b16 %v18578_v29, %v5455_v34 }
 0x493   :  { %v5345_v7 = vpop.permute.xlu0 %5344  ;;  %v5549_v34 = vrot.slane %v5487_v63, 1 }
 0x494   :  { %4326 = vrot.lane.b32.xlu2 %v13357_v17, %s9954_s7  ;;  %v6088_v53 = vsel %vm6086_vm1, %v6023_v60, %v5345_v7  ;;  %v4527_v7 = vsel %vm3455_vm13, %v4525_v9, %v4526_v3  ;;  %v3015_v60 = vshll.u32 %v13167_v50, 16  ;;  %v3012_v9 = vrot.slane %v3010_v42, 1  ;;  %v9621_v42 = vld [vmem:[#allocation2 + $0x90] sm:$0xf0] }
 0x495   :  { %v5551_v3 = vsel %vm3455_vm13, %v5549_v34, %v5550_v62  ;;  %v2349_v34 = vld [vmem:[#allocation2 + $0xe0] sm:$0x1] }
 0x496   :  { %4330 = vrot.lane.b32.xlu1 %v4007_v27, %s9954_s7  ;;  %v13669_v4 = vpop.permute.xlu2 %3556  ;;  %v2993_v27 = vrot.slane %v2991_v12, 1  ;;  %v4052_v12 = vshll.u32 %v13191_v10, 16  ;;  %v3017_v50 = vrot.slane %v3015_v60, 1  ;;  %v4906_v10 = vunpack.c.l.b16 %v2600_v33 }
 0x497   :  { %9236 = vmatmul.msk.bf16.gmra.mxu0 %vm279_vm0, %v7860_v38  ;;  %v3939_v38 = vshll.u32 %v13066_v26, 16  ;;  %v3937_v33 = vshrl.u32 %v13066_v26, 16 }
 0x498   :  { %v5601_v32 = vpop.permute.xlu1 %5600  ;;  %v2994_v22 = vsel %vm2910_vm14, %v2989_v16, %v2993_v27  ;;  %v4054_v55 = vrot.slane %v4052_v12, 1  ;;  %v7812_v27 = vunpack.c.l.b16 %v19304_v11  ;;  %v4938_v29 = vpack.c.b16 %v4906_v10, %v4906_v10  ;;  %v9698_v10 = vld [vmem:[#allocation2 + $0x90] sm:$0xff]  }
 0x499   :  { %v6153_v17 = vsel %vm6151_vm3, %v6088_v53, %v5601_v32  ;;  %4606 = vrot.lane.b32.xlu0 %v4527_v7, %s9952_s29  ;;  %v13682_v53 = vpop.f32.mrf.mxu0  ;;  %v3008_v32 = vshrl.u32 %v9467_v2, 16  ;;  %v3941_v2 = vrot.slane %v3939_v38, 1 }
 0x49a   :  { %9146 = vmatmul.msk.bf16.vlgmr.msrb.gmra.mxu2 %vm6324_vm4, %v6153_v17  ;;  %19303 = vst [vmem:[#allocation170_spill] sm:$0xff] %v13682_v53  ;;  %v19305_v17 = vld [vmem:[#allocation112_spill] sm:$0xff]  ;;  %v5535_v38 = vrot.slane %v4938_v29, 1 }
 0x49b   :  { %v7813_v7 = vunpack.c.l.b16 %v19305_v17  ;;  %v3013_v16 = vor.u32 %v3012_v9, %v3008_v32  ;;  %v3944_v9 = vshll.u32 %v13222_v31, 16  ;;  %v2862_v32 = vunpack.c.l.b16 %v2349_v34  ;;  %v9526_v53 = vld [vmem:[#allocation2 + $0x78] sm:$0xe]  ;;  %v13738_v47 = vpop.permute.xlu0 %4334 }
 0x49c   :  { %3307 = vrot.lane.b32.xlu2 %v2994_v22, %s9949_s3  ;;  %v4055_v22 = vsel %vm2910_vm14, %v13296_v52, %v4054_v55  ;;  %v9471_v52 = vld [vmem:[#allocation2 + $0xd8] sm:$0xff]   ;;  %v3942_v55 = vor.u32 %v3941_v2, %v3937_v33  ;;  %v5083_v17 = vshll.u32 %v9698_v10, 16 }
 0x49d   :  { %v3018_v62 = vsel %vm2910_vm14, %v3013_v16, %v3017_v50  ;;  %v7861_v60 = vpack.c.b16 %v7813_v7, %v7812_v27  ;;  %v3946_v27 = vrot.slane %v3944_v9, 1  ;;  %v13711_v31 = vpack.c.b16 %v2862_v32, %v2862_v32  ;;  %v9263_v33 = vld [vmem:[%s18312_s4 + $0x38] sm:$0xff]  ;;  %v13726_v32 = vld [vmem:[#allocation2 + $0xf0] sm:$0xff]  }
 0x49e   :  { %5356 = vrot.lane.b32.xlu1 %v5043_v48, %s9953_s30  ;;  %v13690_v13 = vpop.permute.xlu2 %5606  ;;  %v9622_v48 = vld [vmem:[#allocation2 + $0x90] sm:$0xe]  ;;  %v3106_v7 = vshll.u32 %v9471_v52, 16  ;;  %v5085_v34 = vrot.slane %v5083_v17, 1  ;;  %v19310_v17 = vld [vmem:[#allocation113_spill] sm:$0xff]  ;;  %6393 = vmatpush.bf16.msrb.mxu1 %v9263_v33  ;;  %v4980_v33 = vshll.u32 %v13239_v28, 16 }
 0x49f   :  { %v9623_v12 = vor.u32 %v9622_v48, %v9621_v42  ;;  %v3947_v42 = vsel %vm2910_vm14, %v3942_v55, %v3946_v27  ;;  %v5088_v48 = vshll.u32 %v4938_v29, 16  ;;  %v3111_v2 = vshll.u32 %v13711_v31, 16  ;;  %v13734_v55 = vld [vmem:[#allocation2 + $0x9c] sm:$0xf0]  ;;  %v19311_v27 = vld [vmem:[#allocation114_spill] sm:$0xff]  ;;  %19312 = vst [vmem:[#allocation113_spill] sm:$0xff] %v13738_v47 }
 0x4a0   :  { %v13688_v63 = vpop.permute.xlu1 %4578  ;;  %v5081_v29 = vshrl.u32 %v9698_v10, 16  ;;  %v2926_v28 = vshll.u32 %v13134_v56, 16 }
 0x4a1   :  { %5630 = vrot.lane.b32.xlu0 %v5551_v3, %s9942_s25  ;;  %v13702_v3 = vpop.f32.mrf.mxu0  ;;  %v5534_v26 = vrot.slane %v9623_v12, 1  ;;  %v5090_v9 = vrot.slane %v5088_v48, 1  ;;  %v3113_v10 = vrot.slane %v3111_v2, 1 }
 0x4a2   :  { %19306 = vst [vmem:[#allocation111_spill] sm:$0xff] %v13702_v3  ;;  %v9525_v3 = vld [vmem:[#allocation2 + $0x78] sm:$0xf0]  ;;  %v2928_v47 = vrot.slane %v2926_v28, 1 }
 0x4a3   :  { %v5536_v16 = vsel %vm3455_vm13, %v5534_v26, %v5535_v38  ;;  %v7814_v26 = vunpack.c.l.b16 %v19310_v17  ;;  %v4973_v17 = vshrl.u32 %v13158_v51, 16 }
 0x4a4   :  { %4338 = vrot.lane.b32.xlu2 %v4055_v22, %s9954_s7  ;;  %v3108_v22 = vrot.slane %v3106_v7, 1  ;;  %v7815_v7 = vunpack.c.l.b16 %v19311_v27  ;;  %v3883_v27 = vunpack.c.l.b16 %v2472_v18 }
 0x4a6   :  { %3311 = vrot.lane.b32.xlu1 %v3018_v62, %s9949_s3  ;;  %v13706_v50 = vpop.permute.xlu2 %3558  ;;  %v3104_v62 = vshrl.u32 %v9471_v52, 16  ;;  %v13732_v52 = vld [vmem:[#allocation2 + $0x9c] sm:$0xff]  }
 0x4a7   :  { %19307 = vst [vmem:[#allocation112_spill] sm:$0xff] %v13706_v50  ;;  %9237 = vmatmul.msk.bf16.gmra.mxu0 %vm279_vm0, %v7861_v60 }
 0x4a8   :  { %v13704_v11 = vpop.permute.xlu1 %4580 }
 0x4a9   :  { %3806 = vrot.lane.b32.xlu0 %v13546_v44, %s9950_s27  ;;  %v4975_v44 = vshll.u32 %v13158_v51, 16  ;;  %v13728_v38 = vpop.f32.mrf.mxu0  ;;  %v3487_v51 = vrot.slane %v13290_v58, 1 }
 0x4aa   :  { %19309 = vst [vmem:[#allocation172_spill] sm:$0xff] %v13728_v38 }
 0x4ab   :  { %v4977_v48 = vrot.slane %v4975_v44, 1 }
 0x4ac   :  { %4320 = vrot.lane.b32.xlu2 %v3947_v42, %s9954_s7  ;;  %v3109_v42 = vor.u32 %v3108_v22, %v3104_v62  ;;  %v2442_v62 = vld [vmem:[#allocation2 + $0x12c] sm:$0xff]   ;;  %v9527_v22 = vor.u32 %v9526_v53, %v9525_v3 }
 0x4ae   :  { %5620 = vrot.lane.b32.xlu1 %v5536_v16, %s9942_s25  ;;  %v13721_v12 = vpop.permute.xlu2 %5608  ;;  %v5086_v16 = vor.u32 %v5085_v34, %v5081_v29  ;;  %v7862_v34 = vpack.c.b16 %v7815_v7, %v7814_v26  ;;  %v3114_v2 = vsel %vm2910_vm14, %v3109_v42, %v3113_v10  ;;  %v4982_v26 = vrot.slane %v4980_v33, 1  ;;  %v2352_v42 = vld [vmem:[#allocation2 + $0x104] sm:$0x1] }
 0x4af   :  { %19308 = vst [vmem:[#allocation171_spill] sm:$0xff] %v13721_v12  ;;  %v3486_v53 = vrot.slane %v9527_v22, 1  ;;  %v5095_v33 = vshll.u32 %v13732_v52, 16  ;;  %v9262_v22 = vld [vmem:[%s18312_s4 + $0x30] sm:$0xff] }
 0x4b0   :  { %v13719_v60 = vpop.permute.xlu1 %4582  ;;  %v5091_v38 = vsel %vm2910_vm14, %v5086_v16, %v5090_v9  ;;  %v4978_v9 = vor.u32 %v4977_v48, %v4973_v17  ;;  %v13752_v16 = vld [vmem:[#allocation2 + $0x130] sm:$0xf]  ;;  %v9573_v48 = vld [vmem:[#allocation2 + $0x90] sm:$0xf0]  ;;  %6394 = vmatpush.bf16.msrb.mxu1 %v9262_v22  ;;  %v5093_v22 = vshrl.u32 %v13732_v52, 16 }
 0x4b1   :  { %4832 = vrot.lane.b32.xlu0 %v13726_v32, %s9951_s28  ;;  %19315 = vst [vmem:[#allocation174_spill] sm:$0xff] %v13752_v16  ;;  %v13757_v3 = vpop.f32.mrf.mxu0  ;;  %v18580_v18 = vunpack.c.l.b16 %v13752_v16  ;;  %v9574_v17 = vld [vmem:[#allocation2 + $0x90] sm:$0xe]  ;;  %v3488_v58 = vsel %vm3455_vm13, %v3486_v53, %v3487_v51  ;;  %v2931_v51 = vshll.u32 %v13261_v25, 16  ;;  %v3963_v53 = vshll.u32 %v13162_v57, 16 }
 0x4b2   :  { %19316 = vst [vmem:[#allocation175_spill] sm:$0xff] %v13757_v3  ;;  %v4983_v10 = vsel %vm2910_vm14, %v4978_v9, %v4982_v26  ;;  %v13774_v9 = vpop.permute.xlu0 %5360  ;;  %v9920_v26 = vld [vmem:[#allocation2 + $0xfc] sm:$0xf0]  ;;  %v9921_v3 = vld [vmem:[#allocation2 + $0xfc] sm:$0xe] }
 0x4b3   :  { %19318 = vst [vmem:[#allocation177_spill] sm:$0xff] %v13774_v9  ;;  %v9768_v25 = vld [vmem:[#allocation2 + $0xe4] sm:$0xe]  ;;  %v7817_v9 = vunpack.c.l.b16 %v19157_v1  ;;  %v2933_v12 = vrot.slane %v2931_v51, 1  ;;  %v9771_v1 = vld [vmem:[#allocation2 + $0x9c] sm:$0xe]  ;;  %v9922_v50 = vor.u32 %v9921_v3, %v9920_v26 }
 0x4b4   :  { %5364 = vrot.lane.b32.xlu2 %v5091_v38, %s9953_s30  ;;  %v2764_v38 = vunpack.c.l.b16 %v2442_v62  ;;  %v9769_v3 = vor.u32 %v9768_v25, %v13450_v37  ;;  %v9772_v25 = vor.u32 %v9771_v1, %v13734_v55 }
 0x4b6   :  { %3796 = vrot.lane.b32.xlu1 %v13401_v14, %s9950_s27  ;;  %v13749_v29 = vpop.permute.xlu2 %3560  ;;  %v2601_v14 = vld [vmem:[#allocation2 + $0xa4] sm:$0x1]  ;;  %v13767_v62 = vpack.c.b16 %v18580_v18, %v2764_v38  ;;  %v13780_v38 = vld [vmem:[#allocation2 + $0xfc] sm:$0xff]   ;;  %v5537_v55 = vrot.slane %v9772_v25, 1 }
 0x4b7   :  { %19314 = vst [vmem:[#allocation173_spill] sm:$0xff] %v13749_v29  ;;  %9238 = vmatmul.msk.bf16.gmra.mxu0 %vm279_vm0, %v7862_v34  ;;  %v4907_v7 = vunpack.c.l.b16 %v2601_v14  ;;  %v13761_v34 = vpack.c.b16 %v3883_v27, %v3883_v27  ;;  %v9575_v27 = vor.u32 %v9574_v17, %v9573_v48  ;;  %v2924_v14 = vshrl.u32 %v13134_v56, 16  ;;  %v2350_v17 = vld [vmem:[#allocation2 + $0xec] sm:$0x1] }
 0x4b8   :  { %v13747_v44 = vpop.permute.xlu1 %4584  ;;  %19317 = vst [vmem:[#allocation176_spill] sm:$0xff] %v13767_v62  ;;  %v5097_v48 = vrot.slane %v5095_v33, 1  ;;  %v3965_v33 = vrot.slane %v3963_v53, 1 }
 0x4b9   :  { %19313 = vst [vmem:[#allocation114_spill] sm:$0xff] %v13747_v44  ;;  %3327 = vrot.lane.b32.xlu0 %v3114_v2, %s9949_s3  ;;  %v2865_v2 = vunpack.c.l.b16 %v2352_v42  ;;  %v13778_v28 = vpack.c.b16 %v4907_v7, %v4907_v7  ;;  %v4514_v42 = vrot.slane %v13761_v34, 1  ;;  %v2929_v18 = vor.u32 %v2928_v47, %v2924_v14  ;;  %v19322_v7 = vld [vmem:[#allocation115_spill] sm:$0xff]  ;;  %v13799_v44 = vpop.f32.mrf.mxu0 }
 0x4ba   :  { %19319 = vst [vmem:[#allocation178_spill] sm:$0xff] %v13780_v38  ;;  %v7816_v62 = vunpack.c.l.b16 %v19322_v7  ;;  %v3961_v47 = vshrl.u32 %v13162_v57, 16  ;;  %v2863_v14 = vunpack.c.l.b16 %v2350_v17  ;;  %v5098_v7 = vor.u32 %v5097_v48, %v5093_v22  ;;  %v13814_v48 = vpop.permute.xlu0 %3315  ;;  %v9923_v22 = vld [vmem:[#allocation2 + $0xfc] sm:$0xf0] }
 0x4bb   :  { %v13792_v29 = vpack.c.b16 %v2865_v2, %v2865_v2  ;;  %19323 = vst [vmem:[#allocation115_spill] sm:$0xff] %v13799_v44  ;;  %v19324_v2 = vld [vmem:[#allocation99_spill] sm:$0xff] }
 0x4bc   :  { %3572 = vrot.lane.b32.xlu2 %v3488_v58, %s9948_s2  ;;  %v7863_v51 = vpack.c.b16 %v7817_v9, %v7816_v62  ;;  %19328 = vst [vmem:[#allocation183_spill] sm:$0xff] %v13814_v48  ;;  %v9261_v9 = vld [vmem:[%s18312_s4 + $0x28] sm:$0xff] }
 0x4bd   :  { %v3514_v57 = vrot.slane %v13792_v29, 1  ;;  %6395 = vmatpush.bf16.msrb.mxu1 %v9261_v9 }
 0x4be   :  { %5346 = vrot.lane.b32.xlu1 %v4983_v10, %s9953_s30  ;;  %v13785_v58 = vpop.permute.xlu2 %4586 }
 0x4bf   :  { %19321 = vst [vmem:[#allocation180_spill] sm:$0xff] %v13785_v58  ;;  %v5100_v58 = vshll.u32 %v13778_v28, 16 }
 0x4c0   :  { %v13783_v10 = vpop.permute.xlu1 %3564 }
 0x4c1   :  { %19320 = vst [vmem:[#allocation179_spill] sm:$0xff] %v13783_v10  ;;  %4340 = vrot.lane.b32.xlu0 %v13441_v46, %s9954_s7  ;;  %v4513_v10 = vrot.slane %v9575_v27, 1  ;;  %v2934_v46 = vsel %vm2910_vm14, %v2929_v18, %v2933_v12  ;;  %v3968_v27 = vshll.u32 %v19324_v2, 16  ;;  %v5102_v53 = vrot.slane %v5100_v58, 1  ;;  %v13809_v18 = vld [vmem:[#allocation2 + $0x90] sm:$0xff]   ;;  %v13822_v58 = vld [vmem:[#allocation2 + $0xfc] sm:$0xff]  }
 0x4c2   :  { %v3966_v12 = vor.u32 %v3965_v33, %v3961_v47  ;;  %19329 = vst [vmem:[#allocation184_spill] sm:$0xff] %v13822_v58  ;;  %v2479_v47 = vld [vmem:[#allocation2 + $0x104] sm:$0x1]  ;;  %v9924_v33 = vld [vmem:[#allocation2 + $0xfc] sm:$0xe]  ;;  %v3507_v2 = vrot.slane %v9769_v3, 1  ;;  %v13850_v48 = vpop.permute.xlu0 %3574 }
 0x4c3   :  { %v4515_v16 = vsel %vm3455_vm13, %v4513_v10, %v4514_v42  ;;  %v13811_v42 = vpack.c.b16 %v2863_v14, %v2863_v14  ;;  %v5103_v62 = vsel %vm2910_vm14, %v5098_v7, %v5102_v53  ;;  %v3970_v26 = vrot.slane %v3968_v27, 1  ;;  %v19332_v53 = vld [vmem:[#allocation83_spill] sm:$0xff] }
 0x4c4   :  { %4598 = vrot.lane.b32.xlu2 %v4515_v16, %s9952_s29  ;;  %v3513_v16 = vrot.slane %v9922_v50, 1  ;;  %v4071_v14 = vshll.u32 %v13809_v18, 16  ;;  %v3890_v27 = vunpack.c.l.b16 %v2479_v47  ;;  %v4069_v1 = vshrl.u32 %v13809_v18, 16  ;;  %v2608_v47 = vld [vmem:[#allocation2 + $0x110] sm:$0x1] }
 0x4c5   :  { %19327 = vst [vmem:[#allocation182_spill] sm:$0xff] %v13811_v42  ;;  %v3971_v37 = vsel %vm2910_vm14, %v3966_v12, %v3970_v26  ;;  %v3508_v7 = vrot.slane %v13811_v42, 1 }
 0x4c6   :  { %3297 = vrot.lane.b32.xlu1 %v2934_v46, %s9949_s3  ;;  %v13807_v10 = vpop.permute.xlu2 %5610  ;;  %v13825_v50 = vsel %vm3455_vm13, %v3513_v16, %v3514_v57  ;;  %v4076_v46 = vshll.u32 %v13761_v34, 16  ;;  %v13835_v57 = vpop.f32.mrf.mxu0  ;;  %v4999_v16 = vshll.u32 %v19332_v53, 16  ;;  %v5538_v34 = vrot.slane %v13778_v28, 1 }
 0x4c7   :  { %19326 = vst [vmem:[#allocation181_spill] sm:$0xff] %v13807_v10  ;;  %9239 = vmatmul.msk.bf16.gmra.mxu0 %vm279_vm0, %v7863_v51  ;;  %v4073_v51 = vrot.slane %v4071_v14, 1  ;;  %v3509_v9 = vsel %vm3455_vm13, %v3507_v2, %v3508_v7  ;;  %v13845_v26 = vpack.c.b16 %v3890_v27, %v3890_v27  ;;  %v19336_v14 = vld [vmem:[#allocation79_spill] sm:$0xff]  ;;  %v4997_v2 = vshrl.u32 %v19332_v53, 16  ;;  %v9634_v53 = vld [vmem:[#allocation2 + $0x108] sm:$0xe] }
 0x4c8   :  { %v13805_v17 = vpop.permute.xlu1 %4590  ;;  %19330 = vst [vmem:[#allocation185_spill] sm:$0xff] %v13825_v50  ;;  %v4078_v3 = vrot.slane %v4076_v46, 1  ;;  %v5001_v28 = vrot.slane %v4999_v16, 1  ;;  %v5539_v42 = vsel %vm3455_vm13, %v5537_v55, %v5538_v34  ;;  %v5004_v27 = vshll.u32 %v13337_v20, 16  ;;  %v19377_v10 = vld [vmem:[#allocation81_spill] sm:$0xff] }
 0x4c9   :  { %19325 = vst [vmem:[#allocation99_spill] sm:$0xff] %v13805_v17  ;;  %5366 = vrot.lane.b32.xlu0 %v5103_v62, %s9953_s30  ;;  %v13852_v25 = vor.u32 %v4073_v51, %v4069_v1  ;;  %v19341_v1 = vld [vmem:[#allocation136_spill] sm:$0xff] }
 0x4ca   :  { %19331 = vst [vmem:[#allocation186_spill] sm:$0xff] %v13835_v57  ;;  %v19337_v57 = vld [vmem:[#allocation93_spill] sm:$0xff]  ;;  %v5002_v34 = vor.u32 %v5001_v28, %v4997_v2 }
 0x4cb   :  { %19335 = vst [vmem:[#allocation188_spill] sm:$0xff] %v13845_v26  ;;  %v7819_v44 = vunpack.c.l.b16 %v19337_v57  ;;  %v4079_v46 = vsel %vm2910_vm14, %v13852_v25, %v4078_v3  ;;  %v9260_v57 = vld [vmem:[%s18312_s4 + $0x20] sm:$0xff]  ;;  %v2950_v3 = vshll.u32 %v19341_v1, 16  ;;  %v9259_v28 = vld [vmem:[%s18312_s4 + $0x18] sm:$0xff] }
 0x4cc   :  { %4324 = vrot.lane.b32.xlu2 %v3971_v37, %s9954_s7  ;;  %v7818_v37 = vunpack.c.l.b16 %v19336_v14  ;;  %19338 = vst [vmem:[#allocation79_spill] sm:$0xff] %v13850_v48  ;;  %6396 = vmatpush.bf16.msrb.mxu1 %v9260_v57  ;;  %v13877_v14 = vld [vmem:[#allocation2 + $0x9c] sm:$0xff]   ;;  %v2948_v57 = vshrl.u32 %v19341_v1, 16 }
 0x4cd   :  { %19344 = vst [vmem:[#allocation191_spill] sm:$0xff] %v13877_v14 }
 0x4ce   :  { %4822 = vrot.lane.b32.xlu1 %v13732_v52, %s9951_s28  ;;  %v13840_v12 = vpop.permute.xlu2 %3566  ;;  %v9925_v52 = vor.u32 %v9924_v33, %v9923_v22  ;;  %v4535_v22 = vrot.slane %v13845_v26, 1  ;;  %v4914_v33 = vunpack.c.l.b16 %v2608_v47  ;;  %v7864_v51 = vpack.c.b16 %v7819_v44, %v7818_v37  ;;  %v2345_v47 = vld [vmem:[#allocation2 + $0x98] sm:$0x1]  ;;  %v13879_v37 = vld [vmem:[#allocation2 + $0x9c] sm:$0xf0] }
 0x4cf   :  { %19334 = vst [vmem:[#allocation187_spill] sm:$0xff] %v13840_v12  ;;  %v13986_v12 = vld [vmem:[#allocation2 + $0x120] sm:$0xff]  }
 0x4d0   :  { %v13838_v62 = vpop.permute.xlu1 %5614  ;;  %v4534_v7 = vrot.slane %v9925_v52, 1  ;;  %v13874_v44 = vpack.c.b16 %v4914_v33, %v4914_v33  ;;  %v5006_v52 = vrot.slane %v5004_v27, 1  ;;  %6397 = vmatpush.bf16.msrb.mxu1 %v9259_v28  ;;  %v2858_v33 = vunpack.c.l.b16 %v2345_v47  ;;  %v9258_v27 = vld [vmem:[%s18312_s4 + $0x10] sm:$0xff]  ;;  %v19348_v28 = vld [vmem:[#allocation94_spill] sm:$0xff] }
 0x4d1   :  { %19333 = vst [vmem:[#allocation83_spill] sm:$0xff] %v13838_v62  ;;  %3586 = vrot.lane.b32.xlu0 %v3509_v9, %s9948_s2  ;;  %v9633_v9 = vld [vmem:[#allocation2 + $0x108] sm:$0xf0] }
 0x4d2   :  { %v4536_v20 = vsel %vm3455_vm13, %v4534_v7, %v4535_v22  ;;  %19343 = vst [vmem:[#allocation190_spill] sm:$0xff] %v13874_v44  ;;  %v5007_v2 = vsel %vm2910_vm14, %v5002_v34, %v5006_v52  ;;  %v13885_v7 = vpop.permute.xlu0 %4600  ;;  %v5559_v22 = vrot.slane %v13874_v44, 1  ;;  %v2955_v34 = vshll.u32 %v13371_v54, 16  ;;  %v9257_v54 = vld [vmem:[%s18312_s4 + $0x8] sm:$0xff] }
 0x4d3   :  { %19345 = vst [vmem:[#allocation192_spill] sm:$0xff] %v13885_v7  ;;  %v13901_v47 = vpack.c.b16 %v2858_v33, %v2858_v33  ;;  %v5112_v33 = vshll.u32 %v13384_v59, 16 }
 0x4d4   :  { %5622 = vrot.lane.b32.xlu2 %v5539_v42, %s9942_s25  ;;  %v13871_v42 = vpop.f32.mrf.mxu0  ;;  %6398 = vmatpush.bf16.msrb.mxu1 %v9258_v27  ;;  %v3070_v27 = vshll.u32 %v13877_v14, 16 }
 0x4d5   :  { %19342 = vst [vmem:[#allocation136_spill] sm:$0xff] %v13871_v42  ;;  %v19349_v42 = vld [vmem:[#allocation117_spill] sm:$0xff] }
 0x4d6   :  { %4342 = vrot.lane.b32.xlu1 %v4079_v46, %s9954_s7  ;;  %v13867_v55 = vpop.permute.xlu2 %4592  ;;  %v9635_v46 = vor.u32 %v9634_v53, %v9633_v9  ;;  %v7821_v7 = vunpack.c.l.b16 %v19349_v42  ;;  %v9774_v42 = vld [vmem:[#allocation2 + $0x9c] sm:$0xe] }
 0x4d7   :  { %19340 = vst [vmem:[#allocation189_spill] sm:$0xff] %v13867_v55  ;;  %9240 = vmatmul.msk.bf16.gmra.mxu0 %vm279_vm0, %v7864_v51  ;;  %v2952_v51 = vrot.slane %v2950_v3, 1 }
 0x4d8   :  { %v13865_v16 = vpop.permute.xlu1 %3570  ;;  %v5558_v3 = vrot.slane %v9635_v46, 1  ;;  %v2957_v46 = vrot.slane %v2955_v34, 1  ;;  %6399 = vmatpush.bf16.msrb.mxu1 %v9257_v54  ;;  %v9256_v34 = vld [vmem:[%s18312_s4] sm:$0xff]  ;;  %v9528_v54 = vld [vmem:[#allocation2 + $0x90] sm:$0xf0] }
 0x4d9   :  { %19339 = vst [vmem:[#allocation93_spill] sm:$0xff] %v13865_v16  ;;  %4612 = vrot.lane.b32.xlu0 %v4536_v20, %s9952_s29  ;;  %v2346_v20 = vld [vmem:[#allocation2 + $0xa4] sm:$0x1]  ;;  %v2953_v52 = vor.u32 %v2952_v51, %v2948_v57  ;;  %v13951_v16 = vld [vmem:[#allocation2 + $0x114] sm:$0xff]  }
 0x4da   :  { %19355 = vst [vmem:[#allocation198_spill] sm:$0xff] %v13951_v16 }
 0x4db   :  { %v2958_v51 = vsel %vm2910_vm14, %v2953_v52, %v2957_v46 }
 0x4dc   :  { %3798 = vrot.lane.b32.xlu2 %v13809_v18, %s9950_s27  ;;  %v5560_v18 = vsel %vm3455_vm13, %v5558_v3, %v5559_v22  ;;  %v13909_v48 = vpop.f32.mrf.mxu0  ;;  %v3063_v22 = vshll.u32 %v13901_v47, 16  ;;  %v13921_v3 = vpop.permute.xlu0 %5624  ;;  %6400 = vmatpush.bf16.msrb.mxu1 %v9256_v34  ;;  %v2475_v34 = vld [vmem:[#allocation2 + $0xbc] sm:$0x1] }
 0x4dd   :  { %19350 = vst [vmem:[#allocation94_spill] sm:$0xff] %v13909_v48  ;;  %v9927_v48 = vld [vmem:[#allocation2 + $0xb4] sm:$0xe] }
 0x4de   :  { %5350 = vrot.lane.b32.xlu1 %v5007_v2, %s9953_s30  ;;  %v13898_v53 = vpop.permute.xlu2 %5616  ;;  %v7820_v2 = vunpack.c.l.b16 %v19348_v28  ;;  %19351 = vst [vmem:[#allocation117_spill] sm:$0xff] %v13921_v3  ;;  %v3065_v59 = vrot.slane %v3063_v22, 1  ;;  %v3072_v28 = vrot.slane %v3070_v27, 1  ;;  %v9775_v22 = vor.u32 %v9774_v42, %v13879_v37  ;;  %v9926_v27 = vld [vmem:[#allocation2 + $0xb4] sm:$0xf0] }
 0x4df   :  { %19347 = vst [vmem:[#allocation194_spill] sm:$0xff] %v13898_v53  ;;  %v3886_v37 = vunpack.c.l.b16 %v2475_v34  ;;  %v9928_v34 = vor.u32 %v9927_v48, %v9926_v27 }
 0x4e0   :  { %v13896_v9 = vpop.permute.xlu1 %4596  ;;  %v7865_v57 = vpack.c.b16 %v7821_v7, %v7820_v2  ;;  %7555 = vmatpush.bf16.msra.mxu1 %v13516_v40  ;;  %v3068_v7 = vshrl.u32 %v13877_v14, 16  ;;  %v3066_v46 = vsel %vm2910_vm14, %v13852_v25, %v3065_v59  ;;  %v13939_v40 = vld [vmem:[#allocation2 + $0xb4] sm:$0xff]   ;;  %v2480_v14 = vld [vmem:[#allocation2 + $0x110] sm:$0x1] }
 0x4e1   :  { %19346 = vst [vmem:[#allocation193_spill] sm:$0xff] %v13896_v9  ;;  %5636 = vrot.lane.b32.xlu0 %v5560_v18, %s9942_s25  ;;  %v2859_v9 = vunpack.c.l.b16 %v2346_v20 }
 0x4e2   :  { %19353 = vst [vmem:[#allocation196_spill] sm:$0xff] %v13939_v40 }
 0x4e3   :  { %v2891_v20 = vpack.c.b16 %v2859_v9, %v2859_v9  ;;  %v9529_v9 = vld [vmem:[#allocation2 + $0x90] sm:$0xe] }
 0x4e4   :  { %4824 = vrot.lane.b32.xlu2 %v13508_v41, %s9951_s28  ;;  %v5114_v41 = vrot.slane %v5112_v33, 1  ;;  %v3073_v33 = vor.u32 %v3072_v28, %v3068_v7  ;;  %v9530_v3 = vor.u32 %v9529_v9, %v9528_v54  ;;  %v13948_v42 = vpop.permute.xlu0 %3800  ;;  %v3495_v28 = vrot.slane %v9775_v22, 1  ;;  %v19358_v9 = vld [vmem:[#allocation119_spill] sm:$0xff]  ;;  %v9577_v22 = vld [vmem:[#allocation2 + $0xa8] sm:$0xe] }
 0x4e5   :  { %v3075_v2 = vshll.u32 %v2891_v20, 16  ;;  %19354 = vst [vmem:[#allocation197_spill] sm:$0xff] %v13948_v42  ;;  %v3496_v7 = vrot.slane %v2891_v20, 1  ;;  %v7823_v26 = vunpack.c.l.b16 %v19358_v9  ;;  %v9576_v42 = vld [vmem:[#allocation2 + $0xa8] sm:$0xf0] }
 0x4e6   :  { %3301 = vrot.lane.b32.xlu1 %v2958_v51, %s9949_s3  ;;  %v13925_v18 = vpop.permute.xlu2 %4322  ;;  %v5115_v51 = vsel %vm2910_vm14, %v13556_v39, %v5114_v41  ;;  %v3493_v41 = vrot.slane %v13901_v47, 1  ;;  %v3492_v53 = vrot.slane %v9530_v3, 1  ;;  %v13958_v47 = vpack.c.b16 %v3886_v37, %v3886_v37  ;;  %v13960_v20 = vld [vmem:[#allocation2 + $0x108] sm:$0xff]  }
 0x4e7   :  { %9241 = vmatmul.msk.bf16.gmra.mxu0 %vm279_vm0, %v7865_v57  ;;  %v13936_v57 = vpop.f32.mrf.mxu0  ;;  %v3077_v25 = vrot.slane %v3075_v2, 1  ;;  %v19357_v2 = vld [vmem:[#allocation118_spill] sm:$0xff]  ;;  %19360 = vst [vmem:[#allocation119_spill] sm:$0xff] %v13960_v20  ;;  %v9578_v37 = vor.u32 %v9577_v22, %v9576_v42  ;;  %v4167_v48 = vshll.u32 %v13960_v20, 16  ;;  %v19365_v22 = vld [vmem:[#allocation104_spill] sm:$0xff] }
 0x4e8   :  { %v13923_v52 = vpop.permute.xlu1 %5348  ;;  %19352 = vst [vmem:[#allocation195_spill] sm:$0xff] %v13936_v57  ;;  %v7822_v54 = vunpack.c.l.b16 %v19357_v2 }
 0x4e9   :  { %3812 = vrot.lane.b32.xlu0 %v13822_v58, %s9950_s27  ;;  %v3078_v57 = vsel %vm2910_vm14, %v3073_v33, %v3077_v25  ;;  %19359 = vst [vmem:[#allocation118_spill] sm:$0xff] %v13958_v47  ;;  %v3497_v33 = vsel %vm3455_vm13, %v3495_v28, %v3496_v7  ;;  %v3494_v25 = vsel %vm3455_vm13, %v3492_v53, %v3493_v41  ;;  %v4522_v28 = vrot.slane %v9928_v34, 1  ;;  %v19364_v41 = vld [vmem:[#allocation78_spill] sm:$0xff] }
 0x4ea   :  { %v4523_v53 = vrot.slane %v13958_v47, 1  ;;  %v2974_v7 = vshll.u32 %v19364_v41, 16  ;;  %v4519_v34 = vrot.slane %v9578_v37, 1  ;;  %v2972_v37 = vshrl.u32 %v19364_v41, 16 }
 0x4ec   :  { %3319 = vrot.lane.b32.xlu2 %v3066_v46, %s9949_s3  ;;  %v13953_v46 = vld [vmem:[#allocation2 + $0x114] sm:$0xf0]  ;;  %v4524_v55 = vsel %vm3455_vm13, %v4522_v28, %v4523_v53  ;;  %v2976_v47 = vrot.slane %v2974_v7, 1  ;;  %v5547_v53 = vrot.slane %v13550_v19, 1 }
 0x4ed   :  { %19356 = vst [vmem:[#allocation199_spill] sm:$0xff] %v13953_v46 }
 0x4ee   :  { %5368 = vrot.lane.b32.xlu1 %v5115_v51, %s9953_s30  ;;  %v13945_v39 = vpop.permute.xlu2 %4326  ;;  %v3891_v51 = vunpack.c.l.b16 %v2480_v14  ;;  %v7866_v14 = vpack.c.b16 %v7823_v26, %v7822_v54  ;;  %v9627_v26 = vld [vmem:[#allocation2 + $0xc0] sm:$0xf0]  ;;  %v9628_v54 = vld [vmem:[#allocation2 + $0xc0] sm:$0xe] }
 0x4ef   :  { %v13968_v3 = vpop.f32.mrf.mxu0 }
 0x4f0   :  { %v13943_v59 = vpop.permute.xlu1 %3299  ;;  %v13964_v58 = vpack.c.b16 %v3891_v51, %v3891_v51  ;;  %19362 = vst [vmem:[#allocation201_spill] sm:$0xff] %v13968_v3  ;;  %v4520_v51 = vrot.slane %v13510_v5, 1  ;;  %v4169_v3 = vrot.slane %v4167_v48, 1  ;;  %v2603_v5 = vld [vmem:[#allocation2 + $0xbc] sm:$0x1]  ;;  %v19368_v48 = vld [vmem:[#allocation116_spill] sm:$0xff] }
 0x4f1   :  { %3321 = vrot.lane.b32.xlu0 %v3078_v57, %s9949_s3  ;;  %v2610_v57 = vld [vmem:[#allocation2 + $0x128] sm:$0x1]  ;;  %v2979_v28 = vshll.u32 %v19368_v48, 16 }
 0x4f2   :  { %19361 = vst [vmem:[#allocation200_spill] sm:$0xff] %v13964_v58  ;;  %v4172_v9 = vshll.u32 %v13964_v58, 16  ;;  %v4916_v42 = vunpack.c.l.b16 %v2610_v57  ;;  %v4521_v62 = vsel %vm3455_vm13, %v4519_v34, %v4520_v51  ;;  %v4165_v57 = vshrl.u32 %v13960_v20, 16  ;;  %v14007_v34 = vld [vmem:[#allocation2 + $0x174] sm:$0xff]   ;;  %v14019_v58 = vld [vmem:[#allocation2 + $0xe4] sm:$0xf0] }
 0x4f3   :  { %v4909_v51 = vunpack.c.l.b16 %v2603_v5  ;;  %v2353_v5 = vld [vmem:[#allocation2 + $0x110] sm:$0x1]  ;;  %v2776_v50 = vunpack.c.l.b16 %v14007_v34  ;;  %v5047_v20 = vshll.u32 %v19377_v10, 16 }
 0x4f4   :  { %3578 = vrot.lane.b32.xlu2 %v3497_v33, %s9948_s2  ;;  %v4011_v33 = vshll.u32 %v19365_v22, 16  ;;  %v4174_v17 = vrot.slane %v4172_v9, 1  ;;  %v13990_v46 = vpack.c.b16 %v4916_v42, %v4916_v42  ;;  %v13998_v7 = vor.u32 %v4169_v3, %v4165_v57  ;;  %v9699_v9 = vld [vmem:[#allocation2] sm:$0xff]  }
 0x4f5   :  { %v5666_v42 = vsel %vm5664_vm5, %v9699_v9, %v13340_v0  ;;  %v2981_v57 = vrot.slane %v2979_v28, 1  ;;  %v19372_v0 = vld [vmem:[#allocation120_spill] sm:$0xff] }
 0x4f6   :  { %3576 = vrot.lane.b32.xlu1 %v3494_v25, %s9948_s2  ;;  %v13973_v2 = vpop.permute.xlu2 %3307  ;;  %v13983_v25 = vpop.permute.xlu0 %4826  ;;  %19367 = vst [vmem:[#allocation203_spill] sm:$0xff] %v13990_v46  ;;  %v4175_v3 = vsel %vm2910_vm14, %v13998_v7, %v4174_v17  ;;  %v7824_v9 = vunpack.c.l.b16 %v19372_v0  ;;  %v14024_v17 = vpack.c.b16 %v4909_v51, %v4909_v51  ;;  %v5201_v0 = vshrl.u32 %v13986_v12, 16 }
 0x4f7   :  { %19363 = vst [vmem:[#allocation202_spill] sm:$0xff] %v13973_v2  ;;  %9242 = vmatmul.msk.bf16.gmra.mxu0 %vm279_vm0, %v7866_v14  ;;  %v9629_v14 = vor.u32 %v9628_v54, %v9627_v26  ;;  %v5203_v26 = vshll.u32 %v13986_v12, 16  ;;  %v4013_v54 = vrot.slane %v4011_v33, 1  ;;  %v14009_v48 = vpop.f32.mrf.mxu0  ;;  %v5208_v33 = vshll.u32 %v13990_v46, 16 }
 0x4f8   :  { %v13971_v27 = vpop.permute.xlu1 %5352  ;;  %19366 = vst [vmem:[#allocation104_spill] sm:$0xff] %v13983_v25  ;;  %v4009_v25 = vshrl.u32 %v19365_v22, 16 }
 0x4f9   :  { %4838 = vrot.lane.b32.xlu0 %v13951_v16, %s9951_s28  ;;  %v9777_v16 = vld [vmem:[#allocation2 + $0xb4] sm:$0xe]  ;;  %19369 = vst [vmem:[#allocation116_spill] sm:$0xff] %v13998_v7  ;;  %v5546_v19 = vrot.slane %v9629_v14, 1  ;;  %v5205_v46 = vrot.slane %v5203_v26, 1  ;;  %v5210_v41 = vrot.slane %v5208_v33, 1 }
 0x4fa   :  { %19371 = vst [vmem:[#allocation205_spill] sm:$0xff] %v14009_v48  ;;  %v14021_v48 = vld [vmem:[#allocation2 + $0x178] sm:$0xf]  ;;  %v9540_v33 = vld [vmem:[#allocation2 + $0x108] sm:$0xf0] }
 0x4fb   :  { %19374 = vst [vmem:[#allocation120_spill] sm:$0xff] %v14021_v48  ;;  %v5548_v14 = vsel %vm3455_vm13, %v5546_v19, %v5547_v53  ;;  %v18603_v44 = vunpack.c.l.b16 %v14021_v48  ;;  %v19378_v53 = vld [vmem:[#allocation100_spill] sm:$0xff] }
 0x4fc   :  { %4604 = vrot.lane.b32.xlu2 %v4524_v55, %s9952_s29  ;;  %v5731_v51 = vsel %vm5729_vm6, %v5666_v42, %v19378_v53  ;;  %v19379_v26 = vld [vmem:[#allocation92_spill] sm:$0xff]  ;;  %v5544_v53 = vrot.slane %v14024_v17, 1 }
 0x4fd   :  { %v5796_v19 = vsel %vm5794_vm7, %v5731_v51, %v13520_v21  ;;  %v2477_v21 = vld [vmem:[#allocation2 + $0xec] sm:$0x1] }
 0x4fe   :  { %4602 = vrot.lane.b32.xlu1 %v4521_v62, %s9952_s29  ;;  %v14005_v55 = vpop.permute.xlu2 %4338  ;;  %v2977_v62 = vor.u32 %v2976_v47, %v2972_v37  ;;  %v14017_v37 = vld [vmem:[#allocation2 + $0xe4] sm:$0xff]   ;;  %v14030_v7 = vpop.permute.xlu0 %4328  ;;  %v3888_v51 = vunpack.c.l.b16 %v2477_v21 }
 0x4ff   :  { %19370 = vst [vmem:[#allocation204_spill] sm:$0xff] %v14005_v55  ;;  %v19373_v55 = vld [vmem:[#allocation121_spill] sm:$0xff] }
 0x500   :  { %v14003_v22 = vpop.permute.xlu1 %3303  ;;  %v7825_v47 = vunpack.c.l.b16 %v19373_v55  ;;  %v2982_v28 = vsel %vm2910_vm14, %v2977_v62, %v2981_v57  ;;  %v2866_v55 = vunpack.c.l.b16 %v2353_v5  ;;  %19376 = vst [vmem:[#allocation121_spill] sm:$0xff] %v14030_v7  ;;  %v4016_v62 = vshll.u32 %v19379_v26, 16 }
 0x501   :  { %4358 = vrot.lane.b32.xlu0 %v4175_v3, %s9954_s7  ;;  %v19375_v3 = vld [vmem:[#allocation151_spill] sm:$0xff]  ;;  %v4014_v5 = vor.u32 %v4013_v54, %v4009_v25  ;;  %v14041_v57 = vor.u32 %v5205_v46, %v5201_v0  ;;  %v14045_v7 = vpack.c.b16 %v18603_v44, %v2776_v50  ;;  %v14063_v0 = vpop.f32.mrf.mxu0  ;;  %v5049_v26 = vrot.slane %v5047_v20, 1 }
 0x502   :  { %v9778_v2 = vor.u32 %v9777_v16, %v19375_v3  ;;  %v7867_v16 = vpack.c.b16 %v7825_v47, %v7824_v9  ;;  %v9541_v3 = vld [vmem:[#allocation2 + $0x108] sm:$0xe]  ;;  %v14050_v9 = vpack.c.b16 %v2866_v55, %v2866_v55  ;;  %v4018_v54 = vrot.slane %v4016_v62, 1  ;;  %v14061_v47 = vld [vmem:[#allocation2 + $0xfc] sm:$0xf0]  ;;  %19382 = vst [vmem:[#allocation100_spill] sm:$0xff] %v14063_v0 }
 0x503   :  { %19380 = vst [vmem:[#allocation151_spill] sm:$0xff] %v14045_v7  ;;  %v5211_v25 = vsel %vm2910_vm14, %v14041_v57, %v5210_v41  ;;  %v9542_v55 = vor.u32 %v9541_v3, %v9540_v33  ;;  %v5045_v62 = vshrl.u32 %v19377_v10, 16  ;;  %v14075_v20 = vpack.c.b16 %v3888_v51, %v3888_v51  ;;  %v2556_v0 = vld [vmem:[#allocation2 + $0xcc] sm:$0xf] }
 0x504   :  { %5628 = vrot.lane.b32.xlu2 %v5548_v14, %s9942_s25  ;;  %19381 = vst [vmem:[#allocation81_spill] sm:$0xff] %v14050_v9 }
 0x505   :  { %v3516_v3 = vrot.slane %v9542_v55, 1  ;;  %v5050_v21 = vor.u32 %v5049_v26, %v5045_v62  ;;  %v4129_v55 = vshrl.u32 %v14017_v37, 16  ;;  %v4136_v51 = vshll.u32 %v14075_v20, 16 }
 0x506   :  { %3305 = vrot.lane.b32.xlu1 %v2982_v28, %s9949_s3  ;;  %v4321_v14 = vpop.permute.xlu2 %4320  ;;  %v5543_v28 = vrot.slane %v9778_v2, 1  ;;  %v14059_v2 = vld [vmem:[#allocation2 + $0xfc] sm:$0xff]  }
 0x507   :  { %9243 = vmatmul.msk.bf16.gmra.mxu0 %vm279_vm0, %v7867_v16  ;;  %v5861_v46 = vsel %vm5859_vm8, %v5796_v19, %v4321_v14  ;;  %v4019_v16 = vsel %vm2910_vm14, %v4014_v5, %v4018_v54  ;;  %v3517_v19 = vrot.slane %v14050_v9, 1  ;;  %v14072_v14 = vpop.permute.xlu0 %5354  ;;  %v19385_v54 = vld [vmem:[#allocation122_spill] sm:$0xff] }
 0x508   :  { %v14047_v42 = vpop.permute.xlu1 %4330  ;;  %v5926_v50 = vsel %vm5924_vm9, %v5861_v46, %v13634_v61  ;;  %v5545_v41 = vsel %vm3455_vm13, %v5543_v28, %v5544_v53  ;;  %v4131_v61 = vshll.u32 %v14017_v37, 16  ;;  %v19383_v46 = vld [vmem:[#allocation88_spill] sm:$0xff]  ;;  %v2607_v53 = vld [vmem:[#allocation2 + $0x104] sm:$0x1]  ;;  %v7826_v10 = vunpack.c.l.b16 %v19385_v54  ;;  %v9470_v54 = vld [vmem:[#allocation2 + $0xa8] sm:$0xff]  }
 0x509   :  { %5384 = vrot.lane.b32.xlu0 %v5211_v25, %s9953_s30  ;;  %6401 = vmatmul.bf16.vlgmr.msrb.gmra.mxu1 %v5926_v50  ;;  %v5052_v33 = vshll.u32 %v19383_v46, 16  ;;  %v3518_v25 = vsel %vm3455_vm13, %v3516_v3, %v3517_v19  ;;  %v4913_v46 = vunpack.c.l.b16 %v2607_v53  ;;  %v14087_v7 = vpop.f32.mrf.mxu0  ;;  %v5167_v19 = vshll.u32 %v14059_v2, 16 }
 0x50a   :  { %v4133_v50 = vrot.slane %v4131_v61, 1  ;;  %19387 = vst [vmem:[#allocation88_spill] sm:$0xff] %v14087_v7  ;;  %v9700_v61 = vld [vmem:[#allocation2 + $0xa8] sm:$0xff]  }
 0x50b   :  { %v5054_v44 = vrot.slane %v5052_v33, 1  ;;  %v4138_v33 = vrot.slane %v4136_v51, 1 }
 0x50c   :  { %4332 = vrot.lane.b32.xlu2 %v4019_v16, %s9954_s7  ;;  %v19386_v16 = vld [vmem:[#allocation123_spill] sm:$0xff]  ;;  %v4134_v62 = vor.u32 %v4133_v50, %v4129_v55  ;;  %v5169_v50 = vrot.slane %v5167_v19, 1  ;;  %v3082_v55 = vshll.u32 %v9470_v54, 16 }
 0x50d   :  { %v5055_v26 = vsel %vm2910_vm14, %v5050_v21, %v5054_v44 }
 0x50e   :  { %5626 = vrot.lane.b32.xlu1 %v5545_v41, %s9942_s25  ;;  %v14079_v28 = vpop.permute.xlu2 %5364  ;;  %v7827_v41 = vunpack.c.l.b16 %v19386_v16  ;;  %v14093_v16 = vpack.c.b16 %v4913_v46, %v4913_v46  ;;  %v4139_v21 = vsel %vm2910_vm14, %v4134_v62, %v4138_v33  ;;  %v3087_v46 = vshll.u32 %v13597_v8, 16  ;;  %v9701_v62 = vld [vmem:[#allocation2 + $0xc0] sm:$0xff]  }
 0x50f   :  { %19384 = vst [vmem:[#allocation92_spill] sm:$0xff] %v14079_v28  ;;  %v14100_v44 = vpop.permute.xlu0 %4346  ;;  %v3084_v19 = vrot.slane %v3082_v55, 1  ;;  %v19395_v55 = vld [vmem:[#allocation124_spill] sm:$0xff] }
 0x510   :  { %v14077_v5 = vpop.permute.xlu1 %5356  ;;  %v7868_v3 = vpack.c.b16 %v7827_v41, %v7826_v10  ;;  %19390 = vst [vmem:[#allocation206_spill] sm:$0xff] %v14100_v44  ;;  %v19391_v10 = vunpack.c.l.b16 %v13638_v15  ;;  %v5165_v41 = vshrl.u32 %v14059_v2, 16  ;;  %v5172_v51 = vshll.u32 %v14093_v16, 16 }
 0x511   :  { %3592 = vrot.lane.b32.xlu0 %v3518_v25, %s9948_s2  ;;  %v4734_v25 = vunpack.c.l.b16 %v2556_v0  ;;  %v3089_v8 = vrot.slane %v3087_v46, 1  ;;  %v3140_v44 = vshrl.u32 %v13780_v38, 16  ;;  %v3147_v46 = vshll.u32 %v13792_v29, 16 }
 0x512   :  { %v5174_v15 = vrot.slane %v5172_v51, 1 }
 0x513   :  { %v4783_v0 = vpack.c.b16 %v19391_v10, %v4734_v25  ;;  %v3080_v10 = vshrl.u32 %v9470_v54, 16  ;;  %v5148_v54 = vshll.u32 %v13665_v36, 16 }
 0x514   :  { %5358 = vrot.lane.b32.xlu2 %v5055_v26, %s9953_s30  ;;  %v5170_v26 = vor.u32 %v5169_v50, %v5165_v41 }
 0x515   :  { %v5143_v33 = vshll.u32 %v4783_v0, 16  ;;  %v3085_v7 = vor.u32 %v3084_v19, %v3080_v10  ;;  %v9780_v10 = vld [vmem:[#allocation2 + $0xb4] sm:$0xe] }
 0x516   :  { %3802 = vrot.lane.b32.xlu1 %v9700_v61, %s9950_s27  ;;  %v14097_v48 = vpop.permute.xlu2 %3572  ;;  %v3142_v61 = vshll.u32 %v13780_v38, 16  ;;  %v5175_v50 = vsel %vm2910_vm14, %v5170_v26, %v5174_v15  ;;  %v4124_v26 = vshll.u32 %v13641_v6, 16  ;;  %v2348_v15 = vld [vmem:[#allocation2 + $0xbc] sm:$0x1]  ;;  %v5150_v38 = vrot.slane %v5148_v54, 1 }
 0x517   :  { %19389 = vst [vmem:[#allocation123_spill] sm:$0xff] %v14097_v48  ;;  %9244 = vmatmul.msk.bf16.gmra.mxu0 %vm279_vm0, %v7868_v3  ;;  %v14113_v3 = vpop.f32.mrf.mxu0  ;;  %v7828_v48 = vunpack.c.l.b16 %v19395_v55  ;;  %v14124_v28 = vpop.permute.xlu0 %5372  ;;  %v5145_v9 = vrot.slane %v5143_v33, 1  ;;  %v3149_v33 = vrot.slane %v3147_v46, 1  ;;  %v2611_v54 = vld [vmem:[#allocation2 + $0x134] sm:$0x1] }
 0x518   :  { %v14095_v53 = vpop.permute.xlu1 %3311  ;;  %19392 = vst [vmem:[#allocation207_spill] sm:$0xff] %v14113_v3  ;;  %v3144_v41 = vrot.slane %v3142_v61, 1  ;;  %v19396_v3 = vld [vmem:[#allocation90_spill] sm:$0xff]  ;;  %v3090_v61 = vsel %vm2910_vm14, %v3085_v7, %v3089_v8  ;;  %v4126_v7 = vrot.slane %v4124_v26, 1  ;;  %v9589_v8 = vld [vmem:[#allocation2 + $0x120] sm:$0xe] }
 0x519   :  { %19388 = vst [vmem:[#allocation122_spill] sm:$0xff] %v14095_v53  ;;  %4352 = vrot.lane.b32.xlu0 %v4139_v21, %s9954_s7  ;;  %v7829_v51 = vunpack.c.l.b16 %v19396_v3  ;;  %v2643_v46 = vld [vmem:[#allocation2 + $0x12c] sm:$0xe] }
 0x51a   :  { %19397 = vst [vmem:[#allocation124_spill] sm:$0xff] %v14124_v28  ;;  %v3145_v19 = vor.u32 %v3144_v41, %v3140_v44  ;;  %v19398_v28 = vld [vmem:[#allocation96_spill] sm:$0xff]  ;;  %v2861_v44 = vunpack.c.l.b16 %v2348_v15 }
 0x51b   :  { %v7869_v3 = vpack.c.b16 %v7829_v51, %v7828_v48  ;;  %v3022_v36 = vshll.u32 %v19398_v28, 16  ;;  %v2606_v41 = vld [vmem:[#allocation2 + $0xf8] sm:$0x1]  ;;  %v14145_v51 = vld [vmem:[#allocation2 + $0x12c] sm:$0xff]  }
 0x51c   :  { %3804 = vrot.lane.b32.xlu2 %v13939_v40, %s9950_s27  ;;  %v3150_v48 = vsel %vm2910_vm14, %v3145_v19, %v3149_v33  ;;  %v3020_v19 = vshrl.u32 %v19398_v28, 16  ;;  %v9781_v33 = vor.u32 %v9780_v10, %v13651_v49  ;;  %v4917_v40 = vunpack.c.l.b16 %v2611_v54  ;;  %v9535_v28 = vld [vmem:[#allocation2 + $0xd8] sm:$0xe] }
 0x51d   :  { %v5155_v49 = vshll.u32 %v13726_v32, 16 }
 0x51e   :  { %4828 = vrot.lane.b32.xlu1 %v9701_v62, %s9951_s28  ;;  %v14117_v21 = vpop.permute.xlu2 %4598  ;;  %v2482_v62 = vld [vmem:[#allocation2 + $0x128] sm:$0x1]  ;;  %v14173_v32 = vpack.c.b16 %v4917_v40, %v4917_v40 }
 0x51f   :  { %19394 = vst [vmem:[#allocation209_spill] sm:$0xff] %v14117_v21  ;;  %v9588_v21 = vld [vmem:[#allocation2 + $0x120] sm:$0xf0] }
 0x520   :  { %v14115_v25 = vpop.permute.xlu1 %5620  ;;  %v9590_v15 = vor.u32 %v9589_v8, %v9588_v21 }
 0x521   :  { %19393 = vst [vmem:[#allocation208_spill] sm:$0xff] %v14115_v25  ;;  %5378 = vrot.lane.b32.xlu0 %v5175_v50, %s9953_s30  ;;  %v5141_v25 = vshrl.u32 %v4783_v0, 16  ;;  %v3893_v50 = vunpack.c.l.b16 %v2482_v62 }
 0x523   :  { %v5146_v55 = vor.u32 %v5145_v9, %v5141_v25  ;;  %v14141_v9 = vpack.c.b16 %v3893_v50, %v3893_v50  ;;  %v19402_v25 = vld [vmem:[#allocation135_spill] sm:$0xff]  ;;  %v14151_v50 = vpack.c.b16 %v2861_v44, %v2861_v44  ;;  %v4543_v44 = vrot.slane %v9590_v15, 1 }
 0x524   :  { %4830 = vrot.lane.b32.xlu2 %v4783_v0, %s9951_s28  ;;  %v14138_v0 = vpop.f32.mrf.mxu0  ;;  %v4035_v62 = vshll.u32 %v19402_v25, 16  ;;  %v4033_v21 = vshrl.u32 %v19402_v25, 16  ;;  %v3501_v25 = vrot.slane %v9781_v33, 1 }
 0x525   :  { %19400 = vst [vmem:[#allocation210_spill] sm:$0xff] %v14138_v0  ;;  %v5151_v26 = vsel %vm2910_vm14, %v5146_v55, %v5150_v38  ;;  %v14154_v0 = vpop.permute.xlu0 %3580  ;;  %v5461_v38 = vunpack.c.l.b16 %v2643_v46  ;;  %v2489_v55 = vld [vmem:[#allocation2 + $0x17c] sm:$0x1] }
 0x526   :  { %3323 = vrot.lane.b32.xlu1 %v3090_v61, %s9949_s3  ;;  %v14135_v6 = vpop.permute.xlu2 %4324  ;;  %19401 = vst [vmem:[#allocation211_spill] sm:$0xff] %v14141_v9  ;;  %v3024_v61 = vrot.slane %v3022_v36, 1  ;;  %v4037_v36 = vrot.slane %v4035_v62, 1  ;;  %v3502_v62 = vrot.slane %v14151_v50, 1 }
 0x527   :  { %9245 = vmatmul.msk.bf16.gmra.mxu0 %vm279_vm0, %v7869_v3  ;;  %v4127_v3 = vsel %vm2910_vm14, %v13583_v23, %v4126_v7  ;;  %19403 = vst [vmem:[#allocation135_spill] sm:$0xff] %v14154_v0  ;;  %v19404_v23 = vld [vmem:[#allocation155_spill] sm:$0xff]  ;;  %v19410_v0 = vld [vmem:[#allocation125_spill] sm:$0xff] }
 0x528   :  { %v14133_v29 = vpop.permute.xlu1 %3796  ;;  %v3027_v7 = vshll.u32 %v19404_v23, 16  ;;  %v3025_v10 = vor.u32 %v3024_v61, %v3020_v19 }
 0x529   :  { %19399 = vst [vmem:[#allocation90_spill] sm:$0xff] %v14133_v29  ;;  %3333 = vrot.lane.b32.xlu0 %v3150_v48, %s9949_s3  ;;  %v4912_v29 = vunpack.c.l.b16 %v2606_v41  ;;  %v4544_v48 = vrot.slane %v14141_v9, 1  ;;  %v19405_v41 = vld [vmem:[#allocation157_spill] sm:$0xff] }
 0x52a   :  { %v6025_v54 = vsel %vm6021_vm2, %v13688_v63, %v19405_v41  ;;  %19407 = vst [vmem:[#allocation157_spill] sm:$0xff] %v14173_v32  ;;  %v3029_v19 = vrot.slane %v3027_v7, 1  ;;  %v19409_v41 = vld [vmem:[#allocation77_spill] sm:$0xff] }
 0x52b   :  { %v14163_v8 = vpack.c.b16 %v4912_v29, %v4912_v29  ;;  %v4545_v23 = vsel %vm3455_vm13, %v4543_v44, %v4544_v48  ;;  %v19408_v29 = vunpack.c.h.b16 %v14145_v51  ;;  %v7830_v33 = vunpack.c.l.b16 %v19409_v41  ;;  %v2619_v48 = vld [vmem:[#allocation2 + $0x194] sm:$0x1] }
 0x52c   :  { %4350 = vrot.lane.b32.xlu2 %v4127_v3, %s9954_s7  ;;  %v3900_v3 = vunpack.c.l.b16 %v2489_v55  ;;  %v19411_v55 = vld [vmem:[#allocation85_spill] sm:$0xff]  ;;  %v5157_v44 = vrot.slane %v5155_v49, 1  ;;  %v4925_v41 = vunpack.c.l.b16 %v2619_v48 }
 0x52d   :  { %v5493_v61 = vpack.c.b16 %v19408_v29, %v5461_v38  ;;  %v5071_v9 = vshll.u32 %v19411_v55, 16  ;;  %v5160_v40 = vshll.u32 %v14163_v8, 16  ;;  %v2521_v38 = vld [vmem:[#allocation2 + $0x174] sm:$0xe]  ;;  %v5568_v29 = vrot.slane %v14173_v32, 1 }
 0x52e   :  { %5374 = vrot.lane.b32.xlu1 %v5151_v26, %s9953_s30  ;;  %v14168_v53 = vpop.permute.xlu2 %5622  ;;  %v4444_v49 = vunpack.c.l.b16 %v2521_v38  ;;  %v2651_v38 = vld [vmem:[#allocation2 + $0x18c] sm:$0xe] }
 0x52f   :  { %19406 = vst [vmem:[#allocation155_spill] sm:$0xff] %v14168_v53  ;;  %v7831_v53 = vunpack.c.l.b16 %v19410_v0  ;;  %v4040_v0 = vshll.u32 %v13541_v30, 16  ;;  %v5073_v30 = vrot.slane %v5071_v9, 1  ;;  %v2620_v9 = vld [vmem:[#allocation2 + $0x1a0] sm:$0x1] }
 0x530   :  { %v5347_v46 = vpop.permute.xlu1 %5346 }
 0x531   :  { %v6090_v26 = vsel %vm6086_vm1, %v6025_v54, %v5347_v46  ;;  %4618 = vrot.lane.b32.xlu0 %v4545_v23, %s9952_s29  ;;  %v14183_v54 = vpop.f32.mrf.mxu0  ;;  %v14189_v46 = vpack.c.b16 %v3900_v3, %v3900_v3  ;;  %v5567_v23 = vrot.slane %v5493_v61, 1  ;;  %v14197_v3 = vpop.permute.xlu0 %3309 }
 0x532   :  { %v6155_v15 = vsel %vm6151_vm3, %v6090_v26, %v13590_v43  ;;  %19412 = vst [vmem:[#allocation77_spill] sm:$0xff] %v14183_v54  ;;  %v3030_v43 = vsel %vm2910_vm14, %v3025_v10, %v3029_v19  ;;  %v3503_v26 = vsel %vm3455_vm13, %v3501_v25, %v3502_v62  ;;  %v5069_v10 = vshrl.u32 %v19411_v55, 16  ;;  %v9702_v19 = vld [vmem:[#allocation2 + $0xf0] sm:$0xff]  }
 0x533   :  { %9147 = vmatmul.msk.bf16.gmra.mxu2 %vm6324_vm4, %v6155_v15  ;;  %v7870_v15 = vpack.c.b16 %v7831_v53, %v7830_v33  ;;  %v5153_v7 = vshrl.u32 %v9702_v19, 16  ;;  %v5162_v54 = vrot.slane %v5160_v40, 1  ;;  %v4038_v25 = vor.u32 %v4037_v36, %v4033_v21  ;;  %v14199_v62 = vld [vmem:[#allocation2 + $0x18c] sm:$0xff]   ;;  %v14213_v19 = vld [vmem:[#allocation2 + $0xe4] sm:$0xe] }
 0x534   :  { %3313 = vrot.lane.b32.xlu2 %v3030_v43, %s9949_s3  ;;  %v9534_v43 = vld [vmem:[#allocation2 + $0xd8] sm:$0xf0]  ;;  %v19414_v53 = vunpack.c.h.b16 %v14007_v34  ;;  %v4565_v55 = vrot.slane %v14189_v46, 1  ;;  %v4042_v21 = vrot.slane %v4040_v0, 1  ;;  %v5569_v36 = vsel %vm3455_vm13, %v5567_v23, %v5568_v29 }
 0x535   :  { %v5158_v48 = vor.u32 %v5157_v44, %v5153_v7  ;;  %v19415_v7 = vld [vmem:[#allocation102_spill] sm:$0xff]  ;;  %v9536_v23 = vor.u32 %v9535_v28, %v9534_v43  ;;  %v9494_v29 = vld [vmem:[#allocation2 + $0x198] sm:$0xff]  }
 0x536   :  { %3582 = vrot.lane.b32.xlu1 %v3503_v26, %s9948_s2  ;;  %v14201_v61 = vpop.permute.xlu2 %3798  ;;  %v4476_v33 = vpack.c.b16 %v19414_v53, %v4444_v49  ;;  %v14216_v53 = vpack.c.b16 %v4925_v41, %v4925_v41  ;;  %v5469_v41 = vunpack.c.l.b16 %v2651_v38  ;;  %v4311_v43 = vshll.u32 %v9494_v29, 16 }
 0x537   :  { %19413 = vst [vmem:[#allocation125_spill] sm:$0xff] %v14201_v61  ;;  %9246 = vmatmul.msk.bf16.gmra.mxu0 %vm279_vm0, %v7870_v15  ;;  %v2478_v15 = vld [vmem:[#allocation2 + $0xf8] sm:$0x1] }
 0x538   :  { %v3298_v32 = vpop.permute.xlu1 %3297  ;;  %v4564_v44 = vrot.slane %v4476_v33, 1  ;;  %v5592_v38 = vrot.slane %v14216_v53, 1 }
 0x539   :  { %v5668_v40 = vsel %vm5664_vm5, %v13134_v56, %v3298_v32  ;;  %5642 = vrot.lane.b32.xlu0 %v5569_v36, %s9942_s25  ;;  %v5163_v56 = vsel %vm2910_vm14, %v5158_v48, %v5162_v54  ;;  %v4043_v32 = vsel %vm2910_vm14, %v4038_v25, %v4042_v21  ;;  %v2364_v36 = vld [vmem:[#allocation2 + $0x194] sm:$0x1]  ;;  %v14227_v49 = vpop.f32.mrf.mxu0  ;;  %v19418_v25 = vld [vmem:[#allocation137_spill] sm:$0xff]  ;;  %v3889_v48 = vunpack.c.l.b16 %v2478_v15  ;;  %v19419_v21 = vld [vmem:[#allocation87_spill] sm:$0xff] }
 0x53a   :  { %v5733_v26 = vsel %vm5729_vm6, %v5668_v40, %v13617_v45  ;;  %v4926_v40 = vunpack.c.l.b16 %v2620_v9  ;;  %v14225_v61 = vsel %vm3455_vm13, %v4564_v44, %v4565_v55  ;;  %19417 = vst [vmem:[#allocation102_spill] sm:$0xff] %v14227_v49  ;;  %v5076_v33 = vshll.u32 %v19418_v25, 16  ;;  %v14251_v25 = vpop.permute.xlu0 %4606 }
 0x53b   :  { %v5798_v0 = vsel %vm5794_vm7, %v5733_v26, %v19415_v7  ;;  %19416 = vst [vmem:[#allocation85_spill] sm:$0xff] %v14225_v61  ;;  %v6027_v28 = vsel %vm6021_vm2, %v13704_v11, %v19419_v21  ;;  %v19420_v55 = vunpack.c.h.b16 %v14199_v62  ;;  %v3504_v26 = vrot.slane %v9536_v23, 1  ;;  %v19423_v23 = vld [vmem:[#allocation126_spill] sm:$0xff]  ;;  %v19452_v61 = vld [vmem:[#allocation171_spill] sm:$0xff] }
 0x53c   :  { %v5863_v45 = vsel %vm5859_vm8, %v5798_v0, %v13925_v18  ;;  %5376 = vrot.lane.b32.xlu2 %v5163_v56, %s9953_s30  ;;  %v2355_v18 = vld [vmem:[#allocation2 + $0x128] sm:$0x1]  ;;  %v3505_v15 = vrot.slane %v13711_v31, 1  ;;  %v2877_v44 = vunpack.c.l.b16 %v2364_v36  ;;  %v14247_v0 = vpack.c.b16 %v4926_v40, %v4926_v40  ;;  %19422 = vst [vmem:[#allocation87_spill] sm:$0xff] %v14251_v25  ;;  %v2396_v31 = vld [vmem:[#allocation2 + $0x18c] sm:$0xe] }
 0x53d   :  { %v5929_v54 = vsel %vm5924_vm9, %v5863_v45, %v13688_v63  ;;  %v5501_v9 = vpack.c.b16 %v19420_v55, %v5469_v41  ;;  %v6092_v63 = vsel %vm6086_vm1, %v6027_v28, %v13923_v52  ;;  %v14249_v45 = vld [vmem:[#allocation2 + $0x18c] sm:$0xff]   ;;  %v5078_v21 = vrot.slane %v5076_v33, 1 }
 0x53e   :  { %4336 = vrot.lane.b32.xlu1 %v4043_v32, %s9954_s7  ;;  %6406 = vmatmul.bf16.gmra.mxu1 %v5929_v54  ;;  %v14243_v7 = vpop.permute.xlu2 %4824  ;;  %v5074_v32 = vor.u32 %v5073_v30, %v5069_v10  ;;  %19421 = vst [vmem:[#allocation137_spill] sm:$0xff] %v14249_v45  ;;  %v14253_v55 = vpack.c.b16 %v3889_v48, %v3889_v48  ;;  %v2868_v52 = vunpack.c.l.b16 %v2355_v18  ;;  %v7832_v54 = vunpack.c.l.b16 %v19423_v23  ;;  %v19424_v10 = vld [vmem:[#allocation127_spill] sm:$0xff]  ;;  %v9582_v48 = vld [vmem:[#allocation2 + $0xf0] sm:$0xf0] }
 0x53f   :  { %v5591_v41 = vrot.slane %v5501_v9, 1  ;;  %v6157_v36 = vsel %vm6151_vm3, %v6092_v63, %v13636_v24  ;;  %v7833_v30 = vunpack.c.l.b16 %v19424_v10  ;;  %v4313_v40 = vrot.slane %v4311_v43, 1  ;;  %v9583_v18 = vld [vmem:[#allocation2 + $0xf0] sm:$0xe] }
 0x540   :  { %v14245_v56 = vpop.permute.xlu1 %4822  ;;  %v3506_v33 = vsel %vm3455_vm13, %v3504_v26, %v3505_v15  ;;  %v9784_v9 = vor.u32 %v14213_v19, %v14019_v58  ;;  %v18614_v24 = vunpack.c.h.b16 %v14249_v45  ;;  %v14269_v63 = vpack.c.b16 %v2877_v44, %v2877_v44  ;;  %v9786_v26 = vld [vmem:[#allocation2 + $0xfc] sm:$0xe]  ;;  %v14278_v58 = vld [vmem:[#allocation2 + $0x12c] sm:$0xff]   ;;  %v2486_v45 = vld [vmem:[#allocation2 + $0x158] sm:$0x1] }
 0x541   :  { %3818 = vrot.lane.b32.xlu0 %v13986_v12, %s9950_s27  ;;  %v14262_v28 = vsel %vm3455_vm13, %v5591_v41, %v5592_v38  ;;  %v9703_v12 = vld [vmem:[#allocation2 + $0x18] sm:$0xff]   ;;  %v4309_v23 = vshrl.u32 %v9494_v29, 16  ;;  %v5328_v38 = vshll.u32 %v14247_v0, 16  ;;  %v3422_v41 = vunpack.c.l.b16 %v2396_v31 }
 0x542   :  { %19425 = vst [vmem:[#allocation126_spill] sm:$0xff] %v14262_v28  ;;  %v5670_v43 = vsel %vm5664_vm5, %v9703_v12, %v13943_v59  ;;  %v14275_v15 = vpack.c.b16 %v2868_v52, %v2868_v52  ;;  %v3724_v10 = vunpack.c.l.b16 %v14145_v51  ;;  %v9584_v59 = vor.u32 %v9583_v18, %v9582_v48 }
 0x543   :  { %9148 = vmatmul.msk.bf16.gmra.mxu2 %vm6324_vm4, %v6157_v36  ;;  %19426 = vst [vmem:[#allocation127_spill] sm:$0xff] %v14269_v63  ;;  %v5079_v36 = vsel %vm2910_vm14, %v5074_v32, %v5078_v21  ;;  %v7871_v29 = vpack.c.b16 %v7833_v30, %v7832_v54  ;;  %v14283_v44 = vor.u32 %v4313_v40, %v4309_v23  ;;  %v5330_v31 = vrot.slane %v5328_v38, 1  ;;  %v14287_v21 = vpop.f32.mrf.mxu0  ;;  %v2483_v40 = vld [vmem:[#allocation2 + $0x134] sm:$0x1] }
 0x544   :  { %3584 = vrot.lane.b32.xlu2 %v3506_v33, %s9948_s2  ;;  %v5735_v32 = vsel %vm5729_vm6, %v5670_v43, %v13669_v4  ;;  %19428 = vst [vmem:[#allocation213_spill] sm:$0xff] %v14287_v21  ;;  %v4529_v52 = vrot.slane %v14075_v20, 1  ;;  %v3454_v12 = vpack.c.b16 %v18614_v24, %v3422_v41  ;;  %v3550_v19 = vrot.slane %v14269_v63, 1  ;;  %v9505_v20 = vld [vmem:[#allocation2 + $0x138] sm:$0xff]  }
 0x545   :  { %19427 = vst [vmem:[#allocation212_spill] sm:$0xff] %v14283_v44  ;;  %v4532_v54 = vrot.slane %v14253_v55, 1  ;;  %v4528_v30 = vrot.slane %v9784_v9, 1  ;;  %v14301_v4 = vsel %vm2910_vm14, %v14283_v44, %v5330_v31  ;;  %v3183_v48 = vshll.u32 %v14275_v15, 16  ;;  %v14311_v9 = vld [vmem:[#allocation2 + $0x144] sm:$0xff]   ;;  %v14315_v31 = vpop.permute.xlu0 %5630  ;;  %v19464_v44 = vld [vmem:[#allocation180_spill] sm:$0xff] }
 0x546   :  { %5362 = vrot.lane.b32.xlu1 %v5079_v36, %s9953_s30  ;;  %v14293_v33 = vpop.permute.xlu2 %3319  ;;  %19429 = vst [vmem:[#allocation214_spill] sm:$0xff] %v14301_v4  ;;  %v19430_v18 = vunpack.c.h.b16 %v14278_v58  ;;  %v3549_v23 = vrot.slane %v3454_v12, 1  ;;  %v5800_v38 = vsel %vm5794_vm7, %v5735_v32, %v13564_v35  ;;  %v4531_v41 = vrot.slane %v9584_v59, 1  ;;  %v9630_v32 = vld [vmem:[#allocation2 + $0xf0] sm:$0xf0] }
 0x547   :  { %9247 = vmatmul.msk.bf16.gmra.mxu0 %vm279_vm0, %v7871_v29  ;;  %v14313_v29 = vld [vmem:[#allocation2 + $0x144] sm:$0xf0]  ;;  %19431 = vst [vmem:[#allocation215_spill] sm:$0xff] %v14315_v31  ;;  %v5865_v24 = vsel %vm5859_vm8, %v5800_v38, %v14135_v6  ;;  %v3894_v21 = vunpack.c.l.b16 %v2483_v40  ;;  %v4530_v35 = vsel %vm3455_vm13, %v4528_v30, %v4529_v52  ;;  %v9787_v59 = vor.u32 %v9786_v26, %v14061_v47  ;;  %v2613_v38 = vld [vmem:[#allocation2 + $0x14c] sm:$0x1] }
 0x548   :  { %v14295_v36 = vpop.permute.xlu1 %4342  ;;  %v14306_v43 = vpack.c.b16 %v19430_v18, %v3724_v10  ;;  %v14320_v10 = vsel %vm3455_vm13, %v3549_v23, %v3550_v19  ;;  %v4533_v12 = vsel %vm3455_vm13, %v4531_v41, %v4532_v54  ;;  %v3185_v18 = vrot.slane %v3183_v48, 1  ;;  %v19433_v54 = vld [vmem:[#allocation160_spill] sm:$0xff] }
 0x549   :  { %4844 = vrot.lane.b32.xlu0 %v9505_v20, %s9951_s28  ;;  %19432 = vst [vmem:[#allocation216_spill] sm:$0xff] %v14320_v10  ;;  %v9631_v20 = vld [vmem:[#allocation2 + $0xf0] sm:$0xe]  ;;  %v5932_v6 = vsel %vm5924_vm9, %v5865_v24, %v13704_v11  ;;  %v14330_v40 = vpack.c.b16 %v3894_v21, %v3894_v21  ;;  %v6029_v47 = vsel %vm6021_vm2, %v13719_v60, %v19433_v54  ;;  %v5555_v30 = vrot.slane %v9787_v59, 1 }
 0x54a   :  { %v4203_v49 = vshll.u32 %v14306_v43, 16  ;;  %v9632_v19 = vor.u32 %v9631_v20, %v9630_v32  ;;  %v5556_v48 = vrot.slane %v14093_v16, 1  ;;  %v5553_v23 = vrot.slane %v14163_v8, 1  ;;  %v19437_v32 = vld [vmem:[#allocation82_spill] sm:$0xff] }
 0x54b   :  { %v14339_v41 = vpop.f32.mrf.mxu0  ;;  %v3186_v24 = vsel %vm2910_vm14, %v14041_v57, %v3185_v18  ;;  %v7835_v16 = vunpack.c.l.b16 %v19437_v32  ;;  %v4201_v20 = vshrl.u32 %v14306_v43, 16  ;;  %v4919_v54 = vunpack.c.l.b16 %v2613_v38 }
 0x54c   :  { %4610 = vrot.lane.b32.xlu2 %v4533_v12, %s9952_s29  ;;  %19435 = vst [vmem:[#allocation217_spill] sm:$0xff] %v14339_v41  ;;  %v4205_v21 = vrot.slane %v4203_v49, 1  ;;  %v5552_v8 = vrot.slane %v9632_v19, 1  ;;  %v5557_v49 = vsel %vm3455_vm13, %v5555_v30, %v5556_v48  ;;  %v19449_v41 = vld [vmem:[#allocation174_spill] sm:$0xff] }
 0x54d   :  { %v19450_v10 = vunpack.c.l.b16 %v19449_v41 }
 0x54e   :  { %4608 = vrot.lane.b32.xlu1 %v4530_v35, %s9952_s29  ;;  %6411 = vmatmul.bf16.gmra.mxu1 %v5932_v6  ;;  %v14335_v26 = vpop.permute.xlu2 %3578  ;;  %v19436_v35 = vld [vmem:[#allocation128_spill] sm:$0xff]  ;;  %v4208_v6 = vshll.u32 %v14330_v40, 16  ;;  %v4206_v18 = vor.u32 %v4205_v21, %v4201_v20 }
 0x54f   :  { %19434 = vst [vmem:[#allocation160_spill] sm:$0xff] %v14335_v26  ;;  %v7834_v59 = vunpack.c.l.b16 %v19436_v35  ;;  %v19440_v35 = vld [vmem:[#allocation84_spill] sm:$0xff] }
 0x550   :  { %v5351_v52 = vpop.permute.xlu1 %5350  ;;  %v4210_v19 = vrot.slane %v4208_v6, 1  ;;  %v3046_v32 = vshll.u32 %v19440_v35, 16  ;;  %v19441_v21 = vld [vmem:[#allocation112_spill] sm:$0xff]  ;;  %v19443_v6 = vld [vmem:[#allocation147_spill] sm:$0xff] }
 0x551   :  { %v6094_v11 = vsel %vm6086_vm1, %v6029_v47, %v5351_v52  ;;  %3339 = vrot.lane.b32.xlu0 %v3186_v24, %s9949_s3  ;;  %v14352_v47 = vpop.permute.xlu0 %3806  ;;  %v5239_v52 = vshll.u32 %v14311_v9, 16  ;;  %v14359_v24 = vpack.c.b16 %v4919_v54, %v4919_v54 }
 0x552   :  { %v6159_v12 = vsel %vm6151_vm3, %v6094_v11, %v13690_v13  ;;  %19438 = vst [vmem:[#allocation128_spill] sm:$0xff] %v14352_v47  ;;  %v5554_v13 = vsel %vm3455_vm13, %v5552_v8, %v5553_v23  ;;  %v7872_v11 = vpack.c.b16 %v7835_v16, %v7834_v59  ;;  %v4211_v48 = vsel %vm2910_vm14, %v4206_v18, %v4210_v19  ;;  %v2356_v59 = vld [vmem:[#allocation2 + $0x134] sm:$0x1]  ;;  %v2388_v16 = vld [vmem:[#allocation2 + $0x12c] sm:$0xe]  ;;  %v19455_v47 = vld [vmem:[#allocation173_spill] sm:$0xff] }
 0x553   :  { %9149 = vmatmul.msk.bf16.gmra.mxu2 %vm6324_vm4, %v6159_v12  ;;  %v5241_v23 = vrot.slane %v5239_v52, 1  ;;  %v14371_v20 = vpop.f32.mrf.mxu0  ;;  %v3048_v18 = vrot.slane %v3046_v32, 1  ;;  %v19444_v52 = vld [vmem:[#allocation139_spill] sm:$0xff] }
 0x554   :  { %5634 = vrot.lane.b32.xlu2 %v5557_v49, %s9942_s25  ;;  %19442 = vst [vmem:[#allocation84_spill] sm:$0xff] %v14371_v20  ;;  %v5237_v49 = vshrl.u32 %v14311_v9, 16  ;;  %v14380_v19 = vld [vmem:[#allocation2 + $0xf0] sm:$0xff]  }
 0x555   :  { %v19445_v20 = vld [vmem:[#allocation143_spill] sm:$0xff] }
 0x556   :  { %5632 = vrot.lane.b32.xlu1 %v5554_v13, %s9942_s25  ;;  %v14361_v12 = vpop.permute.xlu2 %4604  ;;  %v5244_v13 = vshll.u32 %v14359_v24, 16 }
 0x557   :  { %19439 = vst [vmem:[#allocation82_spill] sm:$0xff] %v14361_v12  ;;  %9248 = vmatmul.msk.bf16.gmra.mxu0 %vm279_vm0, %v7872_v11  ;;  %v3051_v11 = vshll.u32 %v19444_v52, 16 }
 0x558   :  { %v3302_v38 = vpop.permute.xlu1 %3301 }
 0x559   :  { %v5672_v30 = vsel %vm5664_vm5, %v19341_v1, %v3302_v38  ;;  %4364 = vrot.lane.b32.xlu0 %v4211_v48, %s9954_s7  ;;  %v2869_v48 = vunpack.c.l.b16 %v2356_v59 }
 0x55a   :  { %v5737_v8 = vsel %vm5729_vm6, %v5672_v30, %v19441_v21  ;;  %v5242_v30 = vor.u32 %v5241_v23, %v5237_v49  ;;  %v3414_v21 = vunpack.c.l.b16 %v2388_v16 }
 0x55b   :  { %v5802_v54 = vsel %vm5794_vm7, %v5737_v8, %v19443_v6  ;;  %v19446_v8 = vld [vmem:[#allocation114_spill] sm:$0xff] }
 0x55c   :  { %v5867_v1 = vsel %vm5859_vm8, %v5802_v54, %v13945_v39  ;;  %v6031_v6 = vsel %vm6021_vm2, %v19446_v8, %v19445_v20  ;;  %3810 = vrot.lane.b32.xlu2 %v14380_v19, %s9950_s27  ;;  %v3044_v39 = vshrl.u32 %v19440_v35, 16  ;;  %v14394_v54 = vpop.permute.xlu0 %4832  ;;  %v19448_v20 = vld [vmem:[#allocation140_spill] sm:$0xff]  ;;  %v3446_v4 = vpack.c.b16 %v19450_v10, %v3414_v21 }
 0x55d   :  { %v5935_v38 = vsel %vm5924_vm9, %v5867_v1, %v13719_v60  ;;  %v6096_v32 = vsel %vm6086_vm1, %v6031_v6, %v13971_v27  ;;  %v5246_v60 = vrot.slane %v5244_v13, 1  ;;  %v4083_v49 = vshll.u32 %v19448_v20, 16  ;;  %v14406_v27 = vld [vmem:[#allocation2 + $0x144] sm:$0xff]   ;;  %v9705_v13 = vld [vmem:[#allocation2 + $0x30] sm:$0xff]  }
 0x55e   :  { %3808 = vrot.lane.b32.xlu1 %v14017_v37, %s9950_s27  ;;  %6416 = vmatmul.bf16.gmra.mxu1 %v5935_v38  ;;  %v14396_v23 = vpop.permute.xlu2 %5628  ;;  %v3049_v16 = vor.u32 %v3048_v18, %v3044_v39  ;;  %v3053_v1 = vrot.slane %v3051_v11, 1  ;;  %v14402_v37 = vpack.c.b16 %v2869_v48, %v2869_v48  ;;  %19451 = vst [vmem:[#allocation147_spill] sm:$0xff] %v14406_v27  ;;  %v9929_v6 = vld [vmem:[#allocation2 + $0x144] sm:$0xf0]  ;;  %v2485_v38 = vld [vmem:[#allocation2 + $0x14c] sm:$0x1] }
 0x55f   :  { %19447 = vst [vmem:[#allocation112_spill] sm:$0xff] %v14396_v23  ;;  %v5247_v52 = vsel %vm2910_vm14, %v5242_v30, %v5246_v60  ;;  %v5674_v28 = vsel %vm5664_vm5, %v9705_v13, %v14003_v22  ;;  %v6161_v18 = vsel %vm6151_vm3, %v6096_v32, %v19452_v61  ;;  %v9930_v11 = vld [vmem:[#allocation2 + $0x144] sm:$0xe]  ;;  %v19453_v30 = vld [vmem:[#allocation97_spill] sm:$0xff]  ;;  %v4085_v41 = vrot.slane %v4083_v49, 1  ;;  %v14419_v22 = vpop.f32.mrf.mxu0  ;;  %v19457_v32 = vld [vmem:[#allocation119_spill] sm:$0xff] }
 0x560   :  { %v14398_v59 = vpop.permute.xlu1 %5368  ;;  %v7836_v48 = vunpack.c.l.b16 %v19453_v30  ;;  %v19454_v39 = vld [vmem:[#allocation98_spill] sm:$0xff]  ;;  %v3054_v10 = vsel %vm2910_vm14, %v3049_v16, %v3053_v1  ;;  %v3896_v21 = vunpack.c.l.b16 %v2485_v38  ;;  %v5739_v31 = vsel %vm5729_vm6, %v5674_v28, %v19455_v47  ;;  %19456 = vst [vmem:[#allocation139_spill] sm:$0xff] %v14419_v22  ;;  %v19459_v47 = vld [vmem:[#allocation167_spill] sm:$0xff] }
 0x561   :  { %5390 = vrot.lane.b32.xlu0 %v5247_v52, %s9953_s30  ;;  %v7837_v60 = vunpack.c.l.b16 %v19454_v39  ;;  %v3525_v13 = vrot.slane %v3446_v4, 1  ;;  %v3526_v61 = vrot.slane %v14402_v37, 1  ;;  %v4081_v52 = vshrl.u32 %v19448_v20, 16  ;;  %v19460_v38 = vld [vmem:[#allocation150_spill] sm:$0xff] }
 0x562   :  { %v5804_v4 = vsel %vm5794_vm7, %v5739_v31, %v19459_v47  ;;  %v5119_v39 = vshll.u32 %v19460_v38, 16  ;;  %v9931_v20 = vor.u32 %v9930_v11, %v9929_v6  ;;  %v19486_v23 = vld [vmem:[#allocation202_spill] sm:$0xff] }
 0x563   :  { %9150 = vmatmul.msk.bf16.gmra.mxu2 %vm6324_vm4, %v6161_v18  ;;  %v19458_v18 = vld [vmem:[#allocation141_spill] sm:$0xff]  ;;  %v7873_v16 = vpack.c.b16 %v7837_v60, %v7836_v48  ;;  %v4086_v28 = vor.u32 %v4085_v41, %v4081_v52  ;;  %v2351_v60 = vld [vmem:[#allocation2 + $0xf8] sm:$0x1]  ;;  %v4143_v41 = vshll.u32 %v14380_v19, 16 }
 0x564   :  { %4836 = vrot.lane.b32.xlu2 %v19457_v32, %s9951_s28  ;;  %v4088_v30 = vshll.u32 %v19458_v18, 16  ;;  %v3527_v32 = vsel %vm3455_vm13, %v3525_v13, %v3526_v61  ;;  %v14438_v22 = vpop.permute.xlu0 %3327  ;;  %v2614_v18 = vld [vmem:[#allocation2 + $0x158] sm:$0x1]  ;;  %v19462_v52 = vld [vmem:[#allocation121_spill] sm:$0xff]  ;;  %v4148_v13 = vshll.u32 %v14253_v55, 16  ;;  %v2864_v11 = vunpack.c.l.b16 %v2351_v60 }
 0x565   :  { %v5869_v31 = vsel %vm5859_vm8, %v5804_v4, %v19462_v52  ;;  %v4920_v61 = vunpack.c.l.b16 %v2614_v18  ;;  %v4141_v60 = vshrl.u32 %v14380_v19, 16 }
 0x566   :  { %3317 = vrot.lane.b32.xlu1 %v3054_v10, %s9949_s3  ;;  %v14427_v49 = vpop.permute.xlu2 %4332  ;;  %v14436_v10 = vpack.c.b16 %v3896_v21, %v3896_v21  ;;  %v4090_v48 = vrot.slane %v4088_v30, 1  ;;  %v4552_v21 = vrot.slane %v9931_v20, 1  ;;  %v19463_v30 = vld [vmem:[#allocation108_spill] sm:$0xff]  ;;  %v5117_v20 = vshrl.u32 %v19460_v38, 16 }
 0x567   :  { %9249 = vmatmul.msk.bf16.gmra.mxu0 %vm279_vm0, %v7873_v16  ;;  %v5121_v16 = vrot.slane %v5119_v39, 1  ;;  %v14457_v4 = vpop.f32.mrf.mxu0  ;;  %v4145_v39 = vrot.slane %v4143_v41, 1  ;;  %v14469_v41 = vpack.c.b16 %v4920_v61, %v4920_v61 }
 0x568   :  { %v14429_v1 = vpop.permute.xlu1 %3576  ;;  %19461 = vst [vmem:[#allocation143_spill] sm:$0xff] %v14436_v10  ;;  %v4091_v47 = vsel %vm2910_vm14, %v4086_v28, %v4090_v48  ;;  %v4553_v6 = vrot.slane %v14436_v10, 1  ;;  %v5938_v28 = vsel %vm5924_vm9, %v5869_v31, %v19446_v8  ;;  %v5124_v48 = vshll.u32 %v14024_v17, 16  ;;  %v9643_v8 = vld [vmem:[#allocation2 + $0x150] sm:$0xe]  ;;  %v19468_v17 = vld [vmem:[#allocation129_spill] sm:$0xff] }
 0x569   :  { %3598 = vrot.lane.b32.xlu0 %v3527_v32, %s9948_s2  ;;  %v6033_v32 = vsel %vm6021_vm2, %v19464_v44, %v19463_v30  ;;  %19465 = vst [vmem:[#allocation114_spill] sm:$0xff] %v14457_v4  ;;  %v5122_v31 = vor.u32 %v5121_v16, %v5117_v20  ;;  %v14467_v30 = vpack.c.b16 %v2864_v11, %v2864_v11  ;;  %v7838_v19 = vunpack.c.l.b16 %v19468_v17 }
 0x56a   :  { %v6098_v55 = vsel %vm6086_vm1, %v6033_v32, %v14072_v14  ;;  %v4554_v14 = vsel %vm3455_vm13, %v4552_v21, %v4553_v6  ;;  %19466 = vst [vmem:[#allocation140_spill] sm:$0xff] %v14469_v41  ;;  %v19467_v32 = vld [vmem:[#allocation181_spill] sm:$0xff]  ;;  %v4146_v63 = vor.u32 %v4145_v39, %v4141_v60  ;;  %v19470_v21 = vld [vmem:[#allocation190_spill] sm:$0xff] }
 0x56b   :  { %v6163_v38 = vsel %vm6151_vm3, %v6098_v55, %v19467_v32  ;;  %v5184_v6 = vshll.u32 %v19470_v21, 16  ;;  %v3135_v55 = vshll.u32 %v14467_v30, 16  ;;  %v19472_v32 = vld [vmem:[#allocation78_spill] sm:$0xff] }
 0x56c   :  { %4344 = vrot.lane.b32.xlu2 %v4091_v47, %s9954_s7  ;;  %v9642_v47 = vld [vmem:[#allocation2 + $0x150] sm:$0xf0]  ;;  %v14477_v20 = vpop.permute.xlu0 %4340 }
 0x56d   :  { %v9644_v16 = vor.u32 %v9643_v8, %v9642_v47  ;;  %v5186_v8 = vrot.slane %v5184_v6, 1  ;;  %v19478_v6 = vld [vmem:[#allocation116_spill] sm:$0xff] }
 0x56e   :  { %4834 = vrot.lane.b32.xlu1 %v14059_v2, %s9951_s28  ;;  %6421 = vmatmul.bf16.gmra.mxu1 %v5938_v28  ;;  %v14462_v18 = vpop.permute.xlu2 %5358  ;;  %v4150_v2 = vrot.slane %v4148_v13, 1  ;;  %v19469_v28 = vld [vmem:[#allocation130_spill] sm:$0xff]  ;;  %v5126_v13 = vrot.slane %v5124_v48, 1 }
 0x56f   :  { %v7839_v4 = vunpack.c.l.b16 %v19469_v28  ;;  %v5576_v60 = vrot.slane %v9644_v16, 1  ;;  %v14492_v17 = vpop.f32.mrf.mxu0  ;;  %v19474_v28 = vld [vmem:[#allocation101_spill] sm:$0xff] }
 0x570   :  { %v14464_v52 = vpop.permute.xlu1 %4602  ;;  %v5127_v11 = vsel %vm2910_vm14, %v5122_v31, %v5126_v13  ;;  %v4151_v61 = vsel %vm2910_vm14, %v4146_v63, %v4150_v2  ;;  %v3137_v2 = vrot.slane %v3135_v55, 1  ;;  %19473 = vst [vmem:[#allocation171_spill] sm:$0xff] %v14492_v17  ;;  %v19477_v16 = vld [vmem:[#allocation145_spill] sm:$0xff]  ;;  %v9537_v55 = vld [vmem:[#allocation2 + $0xf0] sm:$0xf0] }
 0x571   :  { %4624 = vrot.lane.b32.xlu0 %v4554_v14, %s9952_s29  ;;  %v5577_v14 = vrot.slane %v14469_v41, 1  ;;  %v7874_v39 = vpack.c.b16 %v7839_v4, %v7838_v19  ;;  %v14497_v4 = vld [vmem:[#allocation2 + $0x144] sm:$0xff]   ;;  %v9789_v41 = vld [vmem:[#allocation2 + $0x114] sm:$0xe] }
 0x572   :  { %19475 = vst [vmem:[#allocation97_spill] sm:$0xff] %v14497_v4  ;;  %v14499_v19 = vld [vmem:[#allocation2 + $0x144] sm:$0xf0] }
 0x573   :  { %9151 = vmatmul.msk.bf16.gmra.mxu2 %vm6324_vm4, %v6163_v38  ;;  %v5578_v38 = vsel %vm3455_vm13, %v5576_v60, %v5577_v14  ;;  %19476 = vst [vmem:[#allocation98_spill] sm:$0xff] %v14499_v19  ;;  %v9538_v14 = vld [vmem:[#allocation2 + $0xf0] sm:$0xe]  ;;  %v9586_v19 = vld [vmem:[#allocation2 + $0x108] sm:$0xe] }
 0x574   :  { %5370 = vrot.lane.b32.xlu2 %v5127_v11, %s9953_s30  ;;  %v5187_v11 = vsel %vm2910_vm14, %v19478_v6, %v5186_v8  ;;  %v14517_v8 = vld [vmem:[#allocation2 + $0x114] sm:$0xff]   ;;  %v2358_v6 = vld [vmem:[#allocation2 + $0x14c] sm:$0x1] }
 0x576   :  { %4354 = vrot.lane.b32.xlu1 %v4151_v61, %s9954_s7  ;;  %v14486_v48 = vpop.permute.xlu2 %3804 }
 0x577   :  { %19471 = vst [vmem:[#allocation174_spill] sm:$0xff] %v14486_v48  ;;  %9250 = vmatmul.msk.bf16.gmra.mxu0 %vm279_vm0, %v7874_v39  ;;  %v3138_v39 = vsel %vm2910_vm14, %v4146_v63, %v3137_v2  ;;  %v9706_v48 = vld [vmem:[#allocation2 + $0x48] sm:$0xff]   ;;  %v14539_v10 = vpop.f32.mrf.mxu0 }
 0x578   :  { %v3306_v47 = vpop.permute.xlu1 %3305  ;;  %19487 = vst [vmem:[#allocation141_spill] sm:$0xff] %v14539_v10  ;;  %v19490_v10 = vld [vmem:[#allocation200_spill] sm:$0xff] }
 0x579   :  { %v5676_v31 = vsel %vm5664_vm5, %v19472_v32, %v3306_v47  ;;  %5648 = vrot.lane.b32.xlu0 %v5578_v38, %s9942_s25  ;;  %v19479_v47 = vld [vmem:[#allocation149_spill] sm:$0xff]  ;;  %v14513_v38 = vpop.permute.xlu0 %5366 }
 0x57a   :  { %v5741_v13 = vsel %vm5729_vm6, %v5676_v31, %v19474_v28  ;;  %v19480_v32 = vld [vmem:[#allocation161_spill] sm:$0xff] }
 0x57b   :  { %v5806_v21 = vsel %vm5794_vm7, %v5741_v13, %v19477_v16  ;;  %v6035_v31 = vsel %vm6021_vm2, %v19480_v32, %v19479_v47  ;;  %v2481_v28 = vld [vmem:[#allocation2 + $0x11c] sm:$0x1]  ;;  %v9933_v13 = vld [vmem:[#allocation2 + $0x114] sm:$0xe] }
 0x57c   :  { %v5871_v61 = vsel %vm5859_vm8, %v5806_v21, %v14047_v42  ;;  %3331 = vrot.lane.b32.xlu2 %v3138_v39, %s9949_s3  ;;  %v9932_v42 = vld [vmem:[#allocation2 + $0x114] sm:$0xf0]  ;;  %v6100_v63 = vsel %vm6086_vm1, %v6035_v31, %v14077_v5  ;;  %v3511_v21 = vrot.slane %v14467_v30, 1  ;;  %v14526_v39 = vld [vmem:[#allocation2 + $0x15c] sm:$0xff]   ;;  %v19484_v5 = vld [vmem:[#allocation131_spill] sm:$0xff] }
 0x57d   :  { %v5941_v60 = vsel %vm5924_vm9, %v5871_v61, %v19464_v44  ;;  %v9539_v44 = vor.u32 %v9538_v14, %v9537_v55  ;;  %v3892_v61 = vunpack.c.l.b16 %v2481_v28  ;;  %19481 = vst [vmem:[#allocation173_spill] sm:$0xff] %v14526_v39  ;;  %v19483_v47 = vld [vmem:[#allocation105_spill] sm:$0xff]  ;;  %v7840_v55 = vunpack.c.l.b16 %v19484_v5  ;;  %v19485_v14 = vld [vmem:[#allocation132_spill] sm:$0xff]  ;;  %v9585_v30 = vld [vmem:[#allocation2 + $0x108] sm:$0xf0] }
 0x57e   :  { %5380 = vrot.lane.b32.xlu1 %v5187_v11, %s9953_s30  ;;  %6426 = vmatmul.bf16.gmra.mxu1 %v5941_v60  ;;  %v14521_v2 = vpop.permute.xlu2 %4830  ;;  %v14528_v11 = vld [vmem:[#allocation2 + $0x15c] sm:$0xf0]  ;;  %v6165_v17 = vsel %vm6151_vm3, %v6100_v63, %v19483_v47  ;;  %v7841_v60 = vunpack.c.l.b16 %v19485_v14  ;;  %v2871_v28 = vunpack.c.l.b16 %v2358_v6  ;;  %v9934_v12 = vor.u32 %v9933_v13, %v9932_v42  ;;  %v2609_v5 = vld [vmem:[#allocation2 + $0x11c] sm:$0x1] }
 0x57f   :  { %19482 = vst [vmem:[#allocation119_spill] sm:$0xff] %v14528_v11  ;;  %v3510_v31 = vrot.slane %v9539_v44, 1  ;;  %v5678_v11 = vsel %vm5664_vm5, %v9706_v48, %v19486_v23  ;;  %v14542_v47 = vpack.c.b16 %v3892_v61, %v3892_v61  ;;  %v3214_v14 = vshll.u32 %v14497_v4, 16  ;;  %v19489_v23 = vld [vmem:[#allocation179_spill] sm:$0xff] }
 0x580   :  { %v14523_v16 = vpop.permute.xlu1 %5626  ;;  %v9587_v44 = vor.u32 %v9586_v19, %v9585_v30  ;;  %v7875_v6 = vpack.c.b16 %v7841_v60, %v7840_v55  ;;  %v5743_v48 = vsel %vm5729_vm6, %v5678_v11, %v19489_v23  ;;  %v14551_v61 = vpack.c.b16 %v2871_v28, %v2871_v28  ;;  %v19496_v30 = vld [vmem:[#allocation89_spill] sm:$0xff] }
 0x581   :  { %3824 = vrot.lane.b32.xlu0 %v14406_v27, %s9950_s27  ;;  %v3512_v63 = vsel %vm3455_vm13, %v3510_v31, %v3511_v21  ;;  %v4538_v21 = vrot.slane %v19490_v10, 1  ;;  %v14553_v42 = vpop.permute.xlu0 %3586  ;;  %v19494_v31 = vld [vmem:[#allocation110_spill] sm:$0xff]  ;;  %v4915_v26 = vunpack.c.l.b16 %v2609_v5  ;;  %v4540_v19 = vrot.slane %v9934_v12, 1 }
 0x582   :  { %19491 = vst [vmem:[#allocation167_spill] sm:$0xff] %v14551_v61  ;;  %v3094_v27 = vshll.u32 %v19494_v31, 16  ;;  %v4541_v55 = vrot.slane %v14542_v47, 1  ;;  %v3216_v60 = vrot.slane %v3214_v14, 1  ;;  %v3897_v11 = vunpack.c.l.b16 %v2486_v45  ;;  %v19497_v45 = vld [vmem:[#allocation199_spill] sm:$0xff] }
 0x583   :  { %9152 = vmatmul.msk.bf16.gmra.mxu2 %vm6324_vm4, %v6165_v17  ;;  %v19488_v17 = vld [vmem:[#allocation185_spill] sm:$0xff]  ;;  %19492 = vst [vmem:[#allocation150_spill] sm:$0xff] %v14553_v42  ;;  %v5808_v10 = vsel %vm5794_vm7, %v5743_v48, %v19496_v30  ;;  %v4537_v28 = vrot.slane %v9587_v44, 1  ;;  %v3212_v5 = vshrl.u32 %v14497_v4, 16  ;;  %v14571_v42 = vpack.c.b16 %v4915_v26, %v4915_v26 }
 0x584   :  { %3590 = vrot.lane.b32.xlu2 %v19488_v17, %s9948_s2  ;;  %v5873_v17 = vsel %vm5859_vm8, %v5808_v10, %v14427_v49  ;;  %v3096_v23 = vrot.slane %v3094_v27, 1  ;;  %v9790_v14 = vor.u32 %v9789_v41, %v19497_v45  ;;  %v4542_v44 = vsel %vm3455_vm13, %v4540_v19, %v4541_v55  ;;  %v19500_v49 = vld [vmem:[#allocation154_spill] sm:$0xff]  ;;  %v19501_v10 = vld [vmem:[#allocation99_spill] sm:$0xff] }
 0x585   :  { %v4539_v12 = vsel %vm3455_vm13, %v4537_v28, %v4538_v21  ;;  %v3099_v48 = vshll.u32 %v14151_v50, 16  ;;  %v3217_v30 = vor.u32 %v3216_v60, %v3212_v5  ;;  %v6037_v4 = vsel %vm6021_vm2, %v19501_v10, %v19500_v49  ;;  %v2616_v41 = vld [vmem:[#allocation2 + $0x170] sm:$0x1]  ;;  %v19503_v5 = vld [vmem:[#allocation196_spill] sm:$0xff] }
 0x586   :  { %3588 = vrot.lane.b32.xlu1 %v3512_v63, %s9948_s2  ;;  %v14555_v13 = vpop.permute.xlu2 %4350  ;;  %v5944_v26 = vsel %vm5924_vm9, %v5873_v17, %v19480_v32  ;;  %v3092_v27 = vshrl.u32 %v19494_v31, 16  ;;  %v6102_v50 = vsel %vm6086_vm1, %v6037_v4, %v14462_v18  ;;  %v5562_v28 = vrot.slane %v14571_v42, 1  ;;  %v19505_v4 = vld [vmem:[#allocation158_spill] sm:$0xff] }
 0x587   :  { %19493 = vst [vmem:[#allocation121_spill] sm:$0xff] %v14555_v13  ;;  %9251 = vmatmul.msk.bf16.gmra.mxu0 %vm279_vm0, %v7875_v6  ;;  %v3219_v6 = vshll.u32 %v14551_v61, 16  ;;  %v14574_v13 = vld [vmem:[#allocation2 + $0x150] sm:$0xff]   ;;  %v14583_v61 = vpop.f32.mrf.mxu0  ;;  %v3101_v32 = vrot.slane %v3099_v48, 1  ;;  %v4922_v18 = vunpack.c.l.b16 %v2616_v41  ;;  %v14614_v31 = vld [vmem:[#allocation2 + $0x168] sm:$0xff]  }
 0x588   :  { %v14559_v63 = vpop.permute.xlu1 %3802  ;;  %19498 = vst [vmem:[#allocation180_spill] sm:$0xff] %v14574_v13  ;;  %v4239_v19 = vshll.u32 %v14574_v13, 16  ;;  %v3097_v60 = vor.u32 %v3096_v23, %v3092_v27  ;;  %v19506_v23 = vld [vmem:[#allocation83_spill] sm:$0xff] }
 0x589   :  { %19495 = vst [vmem:[#allocation108_spill] sm:$0xff] %v14559_v63  ;;  %4850 = vrot.lane.b32.xlu0 %v14526_v39, %s9951_s28  ;;  %v14578_v39 = vpack.c.b16 %v3897_v11, %v3897_v11  ;;  %v3221_v21 = vrot.slane %v3219_v6, 1  ;;  %v5561_v11 = vrot.slane %v9790_v14, 1  ;;  %v5680_v6 = vsel %vm5664_vm5, %v19505_v4, %v14197_v3  ;;  %v14604_v49 = vpop.permute.xlu0 %4612 }
 0x58a   :  { %19502 = vst [vmem:[#allocation129_spill] sm:$0xff] %v14583_v61  ;;  %v6167_v14 = vsel %vm6151_vm3, %v6102_v50, %v19506_v23  ;;  %v19508_v61 = vld [vmem:[#allocation134_spill] sm:$0xff]  ;;  %v4241_v41 = vrot.slane %v4239_v19, 1 }
 0x58b   :  { %19499 = vst [vmem:[#allocation181_spill] sm:$0xff] %v14578_v39  ;;  %v3222_v17 = vsel %vm2910_vm14, %v3217_v30, %v3221_v21  ;;  %v7843_v48 = vunpack.c.l.b16 %v19508_v61  ;;  %v9636_v30 = vld [vmem:[#allocation2 + $0x120] sm:$0xf0]  ;;  %v9637_v21 = vld [vmem:[#allocation2 + $0x120] sm:$0xe]  ;;  %v5563_v3 = vsel %vm3455_vm13, %v5561_v11, %v5562_v28 }
 0x58c   :  { %4616 = vrot.lane.b32.xlu2 %v4542_v44, %s9952_s29  ;;  %v4244_v44 = vshll.u32 %v14578_v39, 16  ;;  %v3102_v39 = vsel %vm2910_vm14, %v3097_v60, %v3101_v32  ;;  %v9638_v61 = vor.u32 %v9637_v21, %v9636_v30  ;;  %v4105_v60 = vshrl.u32 %v19503_v5, 16  ;;  %v19511_v11 = vld [vmem:[#allocation118_spill] sm:$0xff] }
 0x58d   :  { %v4112_v28 = vshll.u32 %v19511_v11, 16  ;;  %v5275_v32 = vshll.u32 %v14614_v31, 16 }
 0x58e   :  { %4614 = vrot.lane.b32.xlu1 %v4539_v12, %s9952_s29  ;;  %6431 = vmatmul.bf16.gmra.mxu1 %v5944_v26  ;;  %v14593_v55 = vpop.permute.xlu2 %3313  ;;  %v4107_v12 = vshll.u32 %v19503_v5, 16  ;;  %v19507_v26 = vld [vmem:[#allocation133_spill] sm:$0xff]  ;;  %v4246_v23 = vrot.slane %v4244_v44, 1  ;;  %v19514_v44 = vld [vmem:[#allocation203_spill] sm:$0xff]  ;;  %v5564_v21 = vrot.slane %v9638_v61, 1  ;;  %v5273_v61 = vshrl.u32 %v14614_v31, 16 }
 0x58f   :  { %v7842_v27 = vunpack.c.l.b16 %v19507_v26  ;;  %v14619_v26 = vpack.c.b16 %v4922_v18, %v4922_v18  ;;  %v5565_v18 = vrot.slane %v19514_v44, 1  ;;  %v5277_v44 = vrot.slane %v5275_v32, 1 }
 0x590   :  { %v14597_v45 = vpop.permute.xlu1 %4828  ;;  %v4109_v4 = vrot.slane %v4107_v12, 1 }
 0x591   :  { %19504 = vst [vmem:[#allocation130_spill] sm:$0xff] %v14597_v45  ;;  %3345 = vrot.lane.b32.xlu0 %v3222_v17, %s9949_s3  ;;  %v19509_v45 = vld [vmem:[#allocation187_spill] sm:$0xff]  ;;  %v4237_v17 = vshrl.u32 %v14574_v13, 16  ;;  %v7876_v19 = vpack.c.b16 %v7843_v48, %v7842_v27  ;;  %v5280_v30 = vshll.u32 %v14619_v26, 16 }
 0x592   :  { %v5745_v50 = vsel %vm5729_vm6, %v5680_v6, %v19509_v45  ;;  %19510 = vst [vmem:[#allocation190_spill] sm:$0xff] %v14619_v26  ;;  %v14628_v45 = vpop.f32.mrf.mxu0  ;;  %v4110_v5 = vor.u32 %v4109_v4, %v4105_v60  ;;  %v5566_v4 = vsel %vm3455_vm13, %v5564_v21, %v5565_v18  ;;  %v9707_v26 = vld [vmem:[#allocation2 + $0xd8] sm:$0xff]  }
 0x593   :  { %9153 = vmatmul.msk.bf16.gmra.mxu2 %vm6324_vm4, %v6167_v14  ;;  %v14625_v12 = vor.u32 %v4241_v41, %v4237_v17  ;;  %19513 = vst [vmem:[#allocation101_spill] sm:$0xff] %v14628_v45  ;;  %v19515_v14 = vld [vmem:[#allocation152_spill] sm:$0xff]  ;;  %v19517_v17 = vld [vmem:[#allocation113_spill] sm:$0xff]  ;;  %v14647_v45 = vpop.permute.xlu0 %5636  ;;  %v5282_v60 = vrot.slane %v5280_v30, 1 }
 0x594   :  { %3325 = vrot.lane.b32.xlu2 %v3102_v39, %s9949_s3  ;;  %v5810_v39 = vsel %vm5794_vm7, %v5745_v50, %v19515_v14  ;;  %v2359_v41 = vld [vmem:[#allocation2 + $0x158] sm:$0x1]  ;;  %v19518_v50 = vld [vmem:[#allocation91_spill] sm:$0xff]  ;;  %v19519_v14 = vld [vmem:[#allocation189_spill] sm:$0xff]  ;;  %19520 = vst [vmem:[#allocation116_spill] sm:$0xff] %v14647_v45 }
 0x595   :  { %19512 = vst [vmem:[#allocation78_spill] sm:$0xff] %v14625_v12  ;;  %v4247_v48 = vsel %vm2910_vm14, %v14625_v12, %v4246_v23  ;;  %v5875_v11 = vsel %vm5859_vm8, %v5810_v39, %v19517_v17  ;;  %v14658_v39 = vor.u32 %v5277_v44, %v5273_v61  ;;  %v19521_v18 = vld [vmem:[#allocation177_spill] sm:$0xff]  ;;  %v19522_v30 = vld [vmem:[#allocation184_spill] sm:$0xff]  ;;  %v9550_v17 = vld [vmem:[#allocation2 + $0x150] sm:$0xe]  ;;  %v14680_v61 = vpop.f32.mrf.mxu2 }
 0x596   :  { %5638 = vrot.lane.b32.xlu1 %v5563_v3, %s9942_s25  ;;  %v14630_v6 = vpop.permute.xlu2 %5376  ;;  %v4114_v3 = vrot.slane %v4112_v28, 1  ;;  %v5698_v28 = vsel %vm5664_vm5, %v9707_v26, %v14438_v22  ;;  %v5947_v32 = vsel %vm5924_vm9, %v5875_v11, %v19501_v10  ;;  %v6053_v22 = vsel %vm6021_vm2, %v14251_v25, %v14521_v2  ;;  %v2488_v44 = vld [vmem:[#allocation2 + $0x170] sm:$0x1]  ;;  %19526 = vst [vmem:[#allocation105_spill] sm:$0xff] %v14680_v61  ;;  %v2617_v45 = vld [vmem:[#allocation2 + $0x17c] sm:$0x1] }
 0x597   :  { %9252 = vmatmul.msk.bf16.gmra.mxu0 %vm279_vm0, %v7876_v19  ;;  %v6039_v19 = vsel %vm6021_vm2, %v19519_v14, %v19518_v50  ;;  %v5283_v10 = vsel %vm2910_vm14, %v14658_v39, %v5282_v60  ;;  %v2649_v25 = vld [vmem:[#allocation2 + $0x174] sm:$0xe] }
 0x598   :  { %v14636_v27 = vpop.permute.xlu1 %3323  ;;  %v4115_v23 = vsel %vm2910_vm14, %v4110_v5, %v4114_v3  ;;  %v6104_v5 = vsel %vm6086_vm1, %v6039_v19, %v19521_v18  ;;  %v9549_v3 = vld [vmem:[#allocation2 + $0x150] sm:$0xf0]  ;;  %v19524_v19 = vld [vmem:[#allocation194_spill] sm:$0xff] }
 0x599   :  { %19516 = vst [vmem:[#allocation145_spill] sm:$0xff] %v14636_v27  ;;  %4370 = vrot.lane.b32.xlu0 %v4247_v48, %s9954_s7  ;;  %v2872_v48 = vunpack.c.l.b16 %v2359_v41  ;;  %v4155_v41 = vshll.u32 %v19522_v30, 16  ;;  %v9551_v2 = vor.u32 %v9550_v17, %v9549_v3  ;;  %v9708_v18 = vld [vmem:[#allocation2 + $0x108] sm:$0xff]   ;;  %v19529_v3 = vld [vmem:[#allocation188_spill] sm:$0xff]  ;;  %v19537_v27 = vld [vmem:[#allocation165_spill] sm:$0xff] }
 0x59a   :  { %v4160_v17 = vshll.u32 %v19529_v3, 16  ;;  %v14704_v3 = vld [vmem:[#allocation2 + $0x174] sm:$0xff]  }
 0x59b   :  { %v14671_v11 = vpack.c.b16 %v2872_v48, %v2872_v48  ;;  %v14683_v48 = vpop.permute.xlu0 %3812 }
 0x59c   :  { %5640 = vrot.lane.b32.xlu2 %v5566_v4, %s9942_s25  ;;  %v6169_v4 = vsel %vm6151_vm3, %v6104_v5, %v19524_v19  ;;  %19527 = vst [vmem:[#allocation131_spill] sm:$0xff] %v14683_v48  ;;  %v14688_v5 = vld [vmem:[#allocation2 + $0x108] sm:$0xff]   ;;  %v4162_v12 = vrot.slane %v4160_v17, 1  ;;  %v5196_v17 = vshll.u32 %v14571_v42, 16 }
 0x59d   :  { %19523 = vst [vmem:[#allocation149_spill] sm:$0xff] %v14671_v11  ;;  %v3535_v60 = vrot.slane %v14671_v11, 1  ;;  %v14700_v11 = vpop.f32.mrf.mxu1  ;;  %v14715_v63 = vpop.f32.mrf.mxu2  ;;  %v19543_v42 = vld [vmem:[#allocation163_spill] sm:$0xff] }
 0x59e   :  { %4348 = vrot.lane.b32.xlu1 %v4115_v23, %s9954_s7  ;;  %6436 = vmatmul.bf16.gmra.mxu1 %v5947_v32  ;;  %v3585_v21 = vpop.permute.xlu2 %3584  ;;  %v4157_v32 = vrot.slane %v4155_v41, 1  ;;  %19528 = vst [vmem:[#allocation132_spill] sm:$0xff] %v14688_v5 }
 0x59f   :  { %v14667_v26 = vsel %vm5729_vm6, %v5698_v28, %v3585_v21  ;;  %v3899_v28 = vunpack.c.l.b16 %v2488_v44  ;;  %v9597_v21 = vld [vmem:[#allocation2 + $0x168] sm:$0xf0]  ;;  %v9598_v44 = vld [vmem:[#allocation2 + $0x168] sm:$0xe]  ;;  %19534 = vst [vmem:[#allocation200_spill] sm:$0xff] %v14700_v11 }
 0x5a0   :  { %v5375_v50 = vpop.permute.xlu1 %5374  ;;  %19538 = vst [vmem:[#allocation89_spill] sm:$0xff] %v14715_v63  ;;  %v19544_v63 = vunpack.c.h.b16 %v14704_v3 }
 0x5a1   :  { %v14676_v23 = vsel %vm6086_vm1, %v6053_v22, %v5375_v50  ;;  %5396 = vrot.lane.b32.xlu0 %v5283_v10, %s9953_s30  ;;  %v4153_v22 = vshrl.u32 %v19522_v30, 16  ;;  %v3534_v50 = vrot.slane %v9551_v2, 1  ;;  %v19530_v10 = vld [vmem:[#allocation198_spill] sm:$0xff]  ;;  %v3154_v30 = vshll.u32 %v14688_v5, 16 }
 0x5a2   :  { %19525 = vst [vmem:[#allocation161_spill] sm:$0xff] %v14676_v23  ;;  %v5191_v41 = vshll.u32 %v19530_v10, 16  ;;  %v9599_v2 = vor.u32 %v9598_v44, %v9597_v21  ;;  %v9709_v23 = vld [vmem:[#allocation2 + $0x60] sm:$0xff]   ;;  %v5467_v44 = vunpack.c.l.b16 %v2649_v25  ;;  %v3152_v25 = vshrl.u32 %v14688_v5, 16 }
 0x5a3   :  { %9154 = vmatmul.msk.bf16.gmra.mxu2 %vm6324_vm4, %v6169_v4  ;;  %v14695_v4 = vpack.c.b16 %v3899_v28, %v3899_v28  ;;  %v4158_v48 = vor.u32 %v4157_v32, %v4153_v22  ;;  %v19536_v32 = vld [vmem:[#allocation81_spill] sm:$0xff] }
 0x5a4   :  { %3816 = vrot.lane.b32.xlu2 %v14517_v8, %s9950_s27  ;;  %v3159_v22 = vshll.u32 %v19536_v32, 16  ;;  %v19541_v32 = vld [vmem:[#allocation153_spill] sm:$0xff] }
 0x5a5   :  { %19532 = vst [vmem:[#allocation185_spill] sm:$0xff] %v14695_v4  ;;  %v4163_v11 = vsel %vm2910_vm14, %v4158_v48, %v4162_v12  ;;  %v14720_v12 = vld [vmem:[#allocation2 + $0x114] sm:$0xff]  }
 0x5a6   :  { %3814 = vrot.lane.b32.xlu1 %v9708_v18, %s9950_s27  ;;  %v14693_v19 = vpop.permute.xlu2 %4610  ;;  %v3536_v18 = vsel %vm3455_vm13, %v3534_v50, %v3535_v60  ;;  %v4562_v60 = vrot.slane %v14695_v4, 1  ;;  %v4923_v50 = vunpack.c.l.b16 %v2617_v45  ;;  %v3156_v45 = vrot.slane %v3154_v30, 1  ;;  %19539 = vst [vmem:[#allocation199_spill] sm:$0xff] %v14720_v12  ;;  %v14722_v48 = vld [vmem:[#allocation2 + $0x114] sm:$0xf0] }
 0x5a7   :  { %19531 = vst [vmem:[#allocation202_spill] sm:$0xff] %v14693_v19  ;;  %v19535_v19 = vld [vmem:[#allocation122_spill] sm:$0xff]  ;;  %v5198_v4 = vrot.slane %v5196_v17, 1 }
 0x5a8   :  { %v14697_v61 = vpop.permute.xlu1 %3582  ;;  %v5682_v28 = vsel %vm5664_vm5, %v9709_v23, %v19535_v19  ;;  %v9710_v23 = vld [vmem:[#allocation2 + $0x120] sm:$0xff]   ;;  %v14725_v19 = vpop.permute.xlu0 %3321  ;;  %v14731_v21 = vpack.c.b16 %v4923_v50, %v4923_v50  ;;  %v3157_v5 = vor.u32 %v3156_v45, %v3152_v25  ;;  %v3116_v25 = vshrl.u32 %v19541_v32, 16 }
 0x5a9   :  { %19533 = vst [vmem:[#allocation179_spill] sm:$0xff] %v14697_v61  ;;  %3604 = vrot.lane.b32.xlu0 %v3536_v18, %s9948_s2  ;;  %v5193_v61 = vrot.slane %v5191_v41, 1  ;;  %v5189_v18 = vshrl.u32 %v19530_v10, 16  ;;  %v5747_v13 = vsel %vm5729_vm6, %v5682_v28, %v19537_v27  ;;  %v4561_v41 = vrot.slane %v9599_v2, 1 }
 0x5aa   :  { %v3161_v28 = vrot.slane %v3159_v22, 1  ;;  %19542 = vst [vmem:[#allocation99_spill] sm:$0xff] %v14731_v21  ;;  %v5812_v30 = vsel %vm5794_vm7, %v5747_v13, %v19543_v42  ;;  %v2568_v42 = vld [vmem:[#allocation2 + $0x12c] sm:$0xf] }
 0x5ab   :  { %v5194_v10 = vor.u32 %v5193_v61, %v5189_v18  ;;  %v5499_v61 = vpack.c.b16 %v19544_v63, %v5467_v44  ;;  %v5586_v44 = vrot.slane %v14731_v21, 1 }
 0x5ac   :  { %4356 = vrot.lane.b32.xlu2 %v4163_v11, %s9954_s7  ;;  %v4563_v11 = vsel %vm3455_vm13, %v4561_v41, %v4562_v60  ;;  %v14741_v60 = vpop.f32.mrf.mxu1  ;;  %v3162_v13 = vsel %vm2910_vm14, %v3157_v5, %v3161_v28  ;;  %v2354_v41 = vld [vmem:[#allocation2 + $0x11c] sm:$0x1] }
 0x5ad   :  { %19545 = vst [vmem:[#allocation196_spill] sm:$0xff] %v14741_v60  ;;  %v5199_v50 = vsel %vm2910_vm14, %v5194_v10, %v5198_v4  ;;  %v5585_v63 = vrot.slane %v5499_v61, 1  ;;  %v19547_v4 = vld [vmem:[#allocation182_spill] sm:$0xff]  ;;  %v2867_v5 = vunpack.c.l.b16 %v2354_v41 }
 0x5ae   :  { %4840 = vrot.lane.b32.xlu1 %v9710_v23, %s9951_s28  ;;  %v14727_v27 = vpop.permute.xlu2 %5634  ;;  %v3118_v23 = vshll.u32 %v19541_v32, 16  ;;  %v3123_v10 = vshll.u32 %v19547_v4, 16 }
 0x5af   :  { %19540 = vst [vmem:[#allocation154_spill] sm:$0xff] %v14727_v27 }
 0x5b0   :  { %v4337_v2 = vpop.permute.xlu1 %4336  ;;  %v3120_v27 = vrot.slane %v3118_v23, 1  ;;  %v4179_v23 = vshll.u32 %v14517_v8, 16  ;;  %v3125_v21 = vrot.slane %v3123_v10, 1  ;;  %v4177_v10 = vshrl.u32 %v14517_v8, 16 }
 0x5b1   :  { %v5877_v18 = vsel %vm5859_vm8, %v5812_v30, %v4337_v2  ;;  %4630 = vrot.lane.b32.xlu0 %v4563_v11, %s9952_s29  ;;  %v4746_v11 = vunpack.c.l.b16 %v2568_v42  ;;  %v19548_v30 = vld [vmem:[#allocation164_spill] sm:$0xff]  ;;  %v19549_v2 = vld [vmem:[#allocation107_spill] sm:$0xff]  ;;  %v19552_v42 = vld [vmem:[#allocation169_spill] sm:$0xff] }
 0x5b2   :  { %v5950_v22 = vsel %vm5924_vm9, %v5877_v18, %v19519_v14  ;;  %v19546_v14 = vld [vmem:[#allocation96_spill] sm:$0xff]  ;;  %v6041_v61 = vsel %vm6021_vm2, %v19549_v2, %v19548_v30  ;;  %v14769_v30 = vpack.c.b16 %v2867_v5, %v2867_v5  ;;  %v3164_v5 = vshrl.u32 %v14720_v12, 16 }
 0x5b3   :  { %6441 = vmatmul.bf16.gmra.mxu1 %v5950_v22  ;;  %v5684_v45 = vsel %vm5664_vm5, %v19546_v14, %v14593_v55  ;;  %v3121_v22 = vor.u32 %v3120_v27, %v3116_v25  ;;  %v3166_v55 = vshll.u32 %v14720_v12, 16  ;;  %v19551_v14 = vld [vmem:[#allocation93_spill] sm:$0xff]  ;;  %v4181_v25 = vrot.slane %v4179_v23, 1  ;;  %v19568_v12 = vld [vmem:[#allocation208_spill] sm:$0xff] }
 0x5b4   :  { %5382 = vrot.lane.b32.xlu2 %v5199_v50, %s9953_s30  ;;  %v5587_v50 = vsel %vm3455_vm13, %v5585_v63, %v5586_v44  ;;  %v5749_v41 = vsel %vm5729_vm6, %v5684_v45, %v19551_v14  ;;  %v19553_v63 = vunpack.c.h.b16 %v14145_v51  ;;  %v2361_v51 = vld [vmem:[#allocation2 + $0x170] sm:$0x1] }
 0x5b5   :  { %v3126_v45 = vsel %vm2910_vm14, %v3121_v22, %v3125_v21  ;;  %v19556_v21 = vld [vmem:[#allocation204_spill] sm:$0xff]  ;;  %v4182_v22 = vor.u32 %v4181_v25, %v4177_v10 }
 0x5b6   :  { %v6576_v17 = vpop.f32.mrf.mxu2  ;;  %3335 = vrot.lane.b32.xlu1 %v3162_v13, %s9949_s3  ;;  %v14753_v28 = vpop.permute.xlu2 %3810  ;;  %v4789_v44 = vpack.c.b16 %v19553_v63, %v4746_v11 }
 0x5b7   :  { %v14761_v13 = vpop.permute.xlu0 %4838 }
 0x5b8   :  { %v5363_v18 = vpop.permute.xlu1 %5362  ;;  %19550 = vst [vmem:[#allocation158_spill] sm:$0xff] %v14761_v13 }
 0x5b9   :  { %v6106_v4 = vsel %vm6086_vm1, %v6041_v61, %v5363_v18  ;;  %5654 = vrot.lane.b32.xlu0 %v5587_v50, %s9942_s25  ;;  %v19555_v61 = vld [vmem:[#allocation144_spill] sm:$0xff]  ;;  %v3168_v50 = vrot.slane %v3166_v55, 1  ;;  %v5215_v55 = vshll.u32 %v4789_v44, 16 }
 0x5ba   :  { %v6171_v60 = vsel %vm6151_vm3, %v6106_v4, %v19552_v42  ;;  %v5814_v18 = vsel %vm5794_vm7, %v5749_v41, %v19555_v61  ;;  %v2612_v42 = vld [vmem:[#allocation2 + $0x140] sm:$0x1] }
 0x5bb   :  { %v6407_v27 = vpop.f32.mrf.mxu1  ;;  %9155 = vmatmul.msk.bf16.gmra.mxu2 %vm6324_vm4, %v6171_v60  ;;  %v4184_v60 = vshll.u32 %v14542_v47, 16  ;;  %v5879_v23 = vsel %vm5859_vm8, %v5814_v18, %v19556_v21  ;;  %v3169_v4 = vor.u32 %v3168_v50, %v3164_v5  ;;  %v19558_v18 = vld [vmem:[#allocation211_spill] sm:$0xff]  ;;  %v5217_v21 = vrot.slane %v5215_v55, 1  ;;  %v19561_v55 = vld [vmem:[#allocation157_spill] sm:$0xff] }
 0x5bc   :  { %v14774_v13 = vadd.f32 %v6576_v17, %v6407_v27  ;;  %4842 = vrot.lane.b32.xlu2 %v4789_v44, %s9951_s28  ;;  %v3171_v17 = vshll.u32 %v14769_v30, 16  ;;  %v2874_v27 = vunpack.c.l.b16 %v2361_v51  ;;  %v5953_v47 = vsel %vm5924_vm9, %v5879_v23, %v19549_v2  ;;  %v9792_v51 = vld [vmem:[#allocation2 + $0x114] sm:$0xe] }
 0x5bd   :  { %v4186_v8 = vrot.slane %v4184_v60, 1  ;;  %v4196_v10 = vshll.u32 %v19558_v18, 16  ;;  %v4918_v50 = vunpack.c.l.b16 %v2612_v42  ;;  %v3736_v2 = vunpack.c.l.b16 %v14704_v3 }
 0x5be   :  { %19554 = vst [vmem:[#allocation83_spill] sm:$0xff] %v14774_v13  ;;  %v6578_v14 = vpop.f32.mrf.mxu2  ;;  %3329 = vrot.lane.b32.xlu1 %v3126_v45, %s9949_s3  ;;  %v14785_v11 = vpop.permute.xlu2 %4836  ;;  %v3173_v63 = vrot.slane %v3171_v17, 1 }
 0x5bf   :  { %v14795_v45 = vpop.permute.xlu0 %4358  ;;  %v4187_v25 = vsel %vm2910_vm14, %v4182_v22, %v4186_v8  ;;  %v5213_v22 = vshrl.u32 %v4789_v44, 16 }
 0x5c0   :  { %v14789_v41 = vpop.permute.xlu1 %4608  ;;  %19557 = vst [vmem:[#allocation133_spill] sm:$0xff] %v14795_v45  ;;  %v3174_v60 = vsel %vm2910_vm14, %v3169_v4, %v3173_v63  ;;  %v4198_v4 = vrot.slane %v4196_v10, 1  ;;  %v19563_v63 = vld [vmem:[#allocation193_spill] sm:$0xff]  ;;  %v19566_v10 = vld [vmem:[#allocation92_spill] sm:$0xff]  ;;  %v2515_v45 = vld [vmem:[#allocation2 + $0x12c] sm:$0xe] }
 0x5c1   :  { %3830 = vrot.lane.b32.xlu0 %v14614_v31, %s9950_s27  ;;  %v14802_v31 = vpack.c.b16 %v2874_v27, %v2874_v27  ;;  %v6055_v17 = vsel %vm6021_vm2, %v14789_v41, %v14394_v54  ;;  %v5218_v8 = vor.u32 %v5217_v21, %v5213_v22  ;;  %v14813_v27 = vpack.c.b16 %v4918_v50, %v4918_v50  ;;  %v9711_v50 = vld [vmem:[#allocation2 + $0x138] sm:$0xff]  }
 0x5c2   :  { %v6120_v54 = vsel %vm6086_vm1, %v6055_v17, %v14630_v6  ;;  %v5227_v22 = vshll.u32 %v9711_v50, 16  ;;  %v9712_v6 = vld [vmem:[#allocation2 + $0x78] sm:$0xff]   ;;  %v19567_v17 = vld [vmem:[#allocation183_spill] sm:$0xff] }
 0x5c3   :  { %v6409_v61 = vpop.f32.mrf.mxu1  ;;  %6446 = vmatmul.bf16.gmra.mxu1 %v5953_v47  ;;  %19560 = vst [vmem:[#allocation187_spill] sm:$0xff] %v14802_v31  ;;  %v19562_v47 = vld [vmem:[#allocation146_spill] sm:$0xff]  ;;  %v3255_v44 = vshll.u32 %v14802_v31, 16  ;;  %v5686_v13 = vsel %vm5664_vm5, %v9712_v6, %v19567_v17  ;;  %v9713_v17 = vld [vmem:[#allocation2 + $0x18c] sm:$0xff]  }
 0x5c4   :  { %v14799_v5 = vadd.f32 %v6578_v14, %v6409_v61  ;;  %3337 = vrot.lane.b32.xlu2 %v3174_v60, %s9949_s3  ;;  %v5220_v14 = vshll.u32 %v19561_v55, 16  ;;  %v6043_v61 = vsel %vm6021_vm2, %v19563_v63, %v19562_v47  ;;  %v14820_v60 = vld [vmem:[#allocation2 + $0x180] sm:$0xff]   ;;  %v5229_v31 = vrot.slane %v5227_v22, 1 }
 0x5c5   :  { %19564 = vst [vmem:[#allocation118_spill] sm:$0xff] %v14820_v60  ;;  %v6108_v21 = vsel %vm6086_vm1, %v6043_v61, %v19566_v10  ;;  %v4199_v61 = vsel %vm2910_vm14, %v14041_v57, %v4198_v4  ;;  %v3257_v10 = vrot.slane %v3255_v44, 1  ;;  %v9543_v22 = vld [vmem:[#allocation2 + $0x120] sm:$0xf0] }
 0x5c6   :  { %19559 = vst [vmem:[#allocation134_spill] sm:$0xff] %v14799_v5  ;;  %v6581_v23 = vpop.f32.mrf.mxu2  ;;  %4360 = vrot.lane.b32.xlu1 %v4187_v25, %s9954_s7  ;;  %v14811_v42 = vpop.permute.xlu2 %4344  ;;  %v19565_v25 = vunpack.c.h.b16 %v14007_v34  ;;  %v5222_v47 = vrot.slane %v5220_v14, 1  ;;  %v6173_v34 = vsel %vm6151_vm3, %v6108_v21, %v19568_v12  ;;  %v5232_v14 = vshll.u32 %v14813_v27, 16  ;;  %v19570_v21 = vld [vmem:[#allocation123_spill] sm:$0xff] }
 0x5c7   :  { %v4762_v12 = vunpack.c.l.b16 %v9713_v17 }
 0x5c8   :  { %v5633_v18 = vpop.permute.xlu1 %5632  ;;  %v14825_v55 = vpack.c.b16 %v19565_v25, %v3736_v2 }
 0x5c9   :  { %v14830_v5 = vsel %vm6151_vm3, %v6120_v54, %v5633_v18  ;;  %4856 = vrot.lane.b32.xlu0 %v14820_v60, %s9951_s28  ;;  %v5223_v54 = vsel %vm2910_vm14, %v5218_v8, %v5222_v47  ;;  %v9793_v18 = vor.u32 %v9792_v51, %v14722_v48  ;;  %v14849_v60 = vpop.permute.xlu0 %5384  ;;  %v19571_v48 = vld [vmem:[#allocation90_spill] sm:$0xff]  ;;  %v9544_v47 = vld [vmem:[#allocation2 + $0x120] sm:$0xe] }
 0x5ca   :  { %v4275_v6 = vshll.u32 %v14825_v55, 16 }
 0x5cb   :  { %v6412_v2 = vpop.f32.mrf.mxu1  ;;  %9156 = vmatmul.msk.bf16.gmra.mxu2 %vm6324_vm4, %v6173_v34  ;;  %v5751_v34 = vsel %vm5729_vm6, %v5686_v13, %v19570_v21  ;;  %v3519_v44 = vrot.slane %v9793_v18, 1  ;;  %v3520_v13 = vrot.slane %v14769_v30, 1  ;;  %v5234_v21 = vrot.slane %v5232_v14, 1 }
 0x5cc   :  { %v14844_v25 = vadd.f32 %v6581_v23, %v6412_v2  ;;  %4362 = vrot.lane.b32.xlu2 %v4199_v61, %s9954_s7  ;;  %v5816_v51 = vsel %vm5794_vm7, %v5751_v34, %v19571_v48  ;;  %v5225_v23 = vshrl.u32 %v9711_v50, 16  ;;  %v4438_v2 = vunpack.c.l.b16 %v2515_v45 }
 0x5cd   :  { %v5881_v4 = vsel %vm5859_vm8, %v5816_v51, %v14477_v20  ;;  %v3258_v61 = vsel %vm2910_vm14, %v14658_v39, %v3257_v10  ;;  %v19572_v34 = vunpack.c.h.b16 %v14199_v62  ;;  %v9545_v45 = vor.u32 %v9544_v47, %v9543_v22 }
 0x5ce   :  { %19569 = vst [vmem:[#allocation203_spill] sm:$0xff] %v14844_v25  ;;  %v6583_v57 = vpop.f32.mrf.mxu2  ;;  %5386 = vrot.lane.b32.xlu1 %v5223_v54, %s9953_s30  ;;  %v14857_v8 = vpop.permute.xlu2 %5370  ;;  %v4277_v54 = vrot.slane %v4275_v6, 1  ;;  %v5230_v48 = vor.u32 %v5229_v31, %v5225_v23  ;;  %v5956_v30 = vsel %vm5924_vm9, %v5881_v4, %v19563_v63  ;;  %v4273_v14 = vshrl.u32 %v14825_v55, 16  ;;  %v2484_v23 = vld [vmem:[#allocation2 + $0x140] sm:$0x1] }
 0x5cf   :  { %v14864_v50 = vpack.c.b16 %v19572_v34, %v4762_v12  ;;  %v4280_v18 = vshll.u32 %v14189_v46, 16  ;;  %v3521_v62 = vsel %vm3455_vm13, %v3519_v44, %v3520_v13  ;;  %v19573_v31 = vunpack.c.h.b16 %v14278_v58  ;;  %v19575_v44 = vld [vmem:[#allocation209_spill] sm:$0xff]  ;;  %v9798_v25 = vld [vmem:[#allocation2 + $0x144] sm:$0xe] }
 0x5d0   :  { %v3809_v17 = vpop.permute.xlu1 %3808  ;;  %v4278_v51 = vor.u32 %v4277_v54, %v4273_v14  ;;  %v3523_v4 = vrot.slane %v14275_v15, 1  ;;  %v6045_v58 = vsel %vm6021_vm2, %v19575_v44, %v14245_v56  ;;  %v3522_v13 = vrot.slane %v9545_v45, 1  ;;  %v9639_v54 = vld [vmem:[#allocation2 + $0x138] sm:$0xf0]  ;;  %v2394_v14 = vld [vmem:[#allocation2 + $0x174] sm:$0xe] }
 0x5d1   :  { %v14868_v20 = vsel %vm5794_vm7, %v14667_v26, %v3809_v17  ;;  %3351 = vrot.lane.b32.xlu0 %v3258_v61, %s9949_s3  ;;  %v4470_v6 = vpack.c.b16 %v19573_v31, %v4438_v2  ;;  %v5235_v26 = vsel %vm2910_vm14, %v5230_v48, %v5234_v21  ;;  %v5311_v63 = vshll.u32 %v14864_v50, 16  ;;  %v14890_v47 = vpop.permute.xlu0 %3592  ;;  %v9640_v48 = vld [vmem:[#allocation2 + $0x138] sm:$0xe]  ;;  %v2362_v56 = vld [vmem:[#allocation2 + $0x17c] sm:$0x1] }
 0x5d2   :  { %v6110_v22 = vsel %vm6086_vm1, %v6045_v58, %v14513_v38  ;;  %v4547_v21 = vrot.slane %v14330_v40, 1  ;;  %v3895_v61 = vunpack.c.l.b16 %v2484_v23  ;;  %v3524_v38 = vsel %vm3455_vm13, %v3522_v13, %v3523_v4  ;;  %v19577_v40 = vld [vmem:[#allocation155_spill] sm:$0xff]  ;;  %v9591_v31 = vld [vmem:[#allocation2 + $0x138] sm:$0xf0] }
 0x5d3   :  { %v6414_v10 = vpop.f32.mrf.mxu1  ;;  %6451 = vmatmul.bf16.gmra.mxu1 %v5956_v30  ;;  %v4546_v17 = vrot.slane %v4470_v6, 1  ;;  %v5313_v30 = vrot.slane %v5311_v63, 1  ;;  %v9592_v6 = vld [vmem:[#allocation2 + $0x138] sm:$0xe]  ;;  %v9641_v4 = vor.u32 %v9640_v48, %v9639_v54  ;;  %v2875_v58 = vunpack.c.l.b16 %v2362_v56 }
 0x5d4   :  { %v14878_v12 = vadd.f32 %v6583_v57, %v6414_v10  ;;  %5388 = vrot.lane.b32.xlu2 %v5235_v26, %s9953_s30  ;;  %v4282_v57 = vrot.slane %v4280_v18, 1  ;;  %v19576_v18 = vld [vmem:[#allocation79_spill] sm:$0xff]  ;;  %v5309_v26 = vshrl.u32 %v14864_v50, 16  ;;  %v14908_v63 = vpack.c.b16 %v3895_v61, %v3895_v61 }
 0x5d5   :  { %v14922_v48 = vpack.c.b16 %v2875_v58, %v2875_v58  ;;  %v5570_v56 = vrot.slane %v9641_v4, 1 }
 0x5d6   :  { %19574 = vst [vmem:[#allocation152_spill] sm:$0xff] %v14878_v12  ;;  %3594 = vrot.lane.b32.xlu1 %v3521_v62, %s9948_s2  ;;  %v6586_v46 = vpop.f32.mrf.mxu2  ;;  %v14892_v2 = vpop.permute.xlu2 %3331  ;;  %v4283_v15 = vsel %vm2910_vm14, %v4278_v51, %v4282_v57  ;;  %v6175_v62 = vsel %vm6151_vm3, %v6110_v22, %v19577_v40  ;;  %v5316_v51 = vshll.u32 %v14216_v53, 16  ;;  %v19579_v57 = vld [vmem:[#allocation125_spill] sm:$0xff]  ;;  %v4550_v54 = vrot.slane %v14908_v63, 1 }
 0x5d8   :  { %v3318_v34 = vpop.permute.xlu1 %3317 }
 0x5d9   :  { %v5688_v45 = vsel %vm5664_vm5, %v19440_v35, %v3318_v34  ;;  %4376 = vrot.lane.b32.xlu0 %v4283_v15, %s9954_s7  ;;  %v4548_v35 = vsel %vm3455_vm13, %v4546_v17, %v4547_v21  ;;  %v5314_v34 = vor.u32 %v5313_v30, %v5309_v26  ;;  %v9795_v15 = vld [vmem:[#allocation2 + $0x144] sm:$0xe]  ;;  %v5571_v17 = vrot.slane %v14813_v27, 1  ;;  %v9935_v27 = vld [vmem:[#allocation2 + $0x18c] sm:$0xf0] }
 0x5da   :  { %v5753_v10 = vsel %vm5729_vm6, %v5688_v45, %v19576_v18  ;;  %v3420_v45 = vunpack.c.l.b16 %v2394_v14  ;;  %v9593_v18 = vor.u32 %v9592_v6, %v9591_v31  ;;  %v5318_v21 = vrot.slane %v5316_v51, 1  ;;  %v19580_v14 = vld [vmem:[#allocation120_spill] sm:$0xff]  ;;  %v14931_v31 = vpop.permute.xlu0 %4352  ;;  %v9936_v26 = vld [vmem:[#allocation2 + $0x18c] sm:$0xe] }
 0x5db   :  { %v6417_v23 = vpop.f32.mrf.mxu1  ;;  %9157 = vmatmul.msk.bf16.gmra.mxu2 %vm6324_vm4, %v6175_v62  ;;  %v5818_v22 = vsel %vm5794_vm7, %v5753_v10, %v19579_v57  ;;  %v19581_v10 = vunpack.c.l.b16 %v19580_v14  ;;  %v14929_v62 = vld [vmem:[#allocation2 + $0x18c] sm:$0xff]   ;;  %v9796_v58 = vor.u32 %v9795_v15, %v14313_v29  ;;  %v3544_v57 = vrot.slane %v14922_v48, 1 }
 0x5dc   :  { %v14910_v13 = vadd.f32 %v6586_v46, %v6417_v23  ;;  %3596 = vrot.lane.b32.xlu2 %v3524_v38, %s9948_s2  ;;  %v5883_v46 = vsel %vm5859_vm8, %v5818_v22, %v14295_v36  ;;  %v5319_v38 = vsel %vm2910_vm14, %v5314_v34, %v5318_v21  ;;  %v4549_v6 = vrot.slane %v9593_v18, 1  ;;  %v2491_v36 = vld [vmem:[#allocation2 + $0x194] sm:$0x1] }
 0x5dd   :  { %v3452_v40 = vpack.c.b16 %v19581_v10, %v3420_v45  ;;  %v5959_v51 = vsel %vm5924_vm9, %v5883_v46, %v19575_v44  ;;  %v5572_v23 = vsel %vm3455_vm13, %v5570_v56, %v5571_v17  ;;  %v3902_v45 = vunpack.c.l.b16 %v2491_v36  ;;  %v19583_v44 = vld [vmem:[#allocation192_spill] sm:$0xff]  ;;  %v19584_v10 = vld [vmem:[#allocation117_spill] sm:$0xff] }
 0x5de   :  { %19578 = vst [vmem:[#allocation113_spill] sm:$0xff] %v14910_v13  ;;  %4620 = vrot.lane.b32.xlu1 %v4548_v35, %s9952_s29  ;;  %v6588_v53 = vpop.f32.mrf.mxu2  ;;  %v14917_v61 = vpop.permute.xlu2 %3590  ;;  %v4551_v4 = vsel %vm3455_vm13, %v4549_v6, %v4550_v54  ;;  %v6047_v17 = vsel %vm6021_vm2, %v19583_v44, %v14243_v7  ;;  %v5574_v29 = vrot.slane %v14359_v24, 1  ;;  %v9714_v14 = vld [vmem:[#allocation2 + $0x90] sm:$0xff]   ;;  %v9547_v13 = vld [vmem:[#allocation2 + $0x138] sm:$0xe] }
 0x5df   :  { %v3543_v34 = vrot.slane %v3452_v40, 1  ;;  %v6112_v21 = vsel %vm6086_vm1, %v6047_v17, %v14398_v59  ;;  %v14955_v56 = vpack.c.b16 %v3902_v45, %v3902_v45  ;;  %v5690_v7 = vsel %vm5664_vm5, %v9714_v14, %v14293_v33  ;;  %v9652_v45 = vld [vmem:[#allocation2 + $0x198] sm:$0xe] }
 0x5e0   :  { %v14924_v30 = vpop.permute.xlu1 %4834  ;;  %v6177_v59 = vsel %vm6151_vm3, %v6112_v21, %v19584_v10  ;;  %v5755_v24 = vsel %vm5729_vm6, %v5690_v7, %v14429_v1  ;;  %v9490_v7 = vld [vmem:[#allocation2 + $0x138] sm:$0xff]  }
 0x5e1   :  { %5402 = vrot.lane.b32.xlu0 %v5319_v38, %s9953_s30  ;;  %v3545_v54 = vsel %vm3455_vm13, %v3543_v34, %v3544_v57  ;;  %v9937_v38 = vor.u32 %v9936_v26, %v9935_v27  ;;  %v9651_v34 = vld [vmem:[#allocation2 + $0x198] sm:$0xf0] }
 0x5e2   :  { %v14964_v40 = vpop.permute.xlu0 %5378 }
 0x5e3   :  { %v6419_v35 = vpop.f32.mrf.mxu1  ;;  %6456 = vmatmul.bf16.gmra.mxu1 %v5959_v51  ;;  %v4570_v26 = vrot.slane %v9937_v38, 1  ;;  %v4571_v51 = vrot.slane %v14955_v56, 1 }
 0x5e4   :  { %v14940_v22 = vadd.f32 %v6588_v53, %v6419_v35  ;;  %4622 = vrot.lane.b32.xlu2 %v4551_v4, %s9952_s29  ;;  %v5573_v53 = vrot.slane %v9796_v58, 1  ;;  %v19587_v58 = vld [vmem:[#allocation176_spill] sm:$0xff] }
 0x5e5   :  { %v3190_v57 = vshll.u32 %v19587_v58, 16 }
 0x5e6   :  { %19582 = vst [vmem:[#allocation91_spill] sm:$0xff] %v14940_v22  ;;  %5644 = vrot.lane.b32.xlu1 %v5572_v23, %s9942_s25  ;;  %v6591_v18 = vpop.f32.mrf.mxu2  ;;  %v14949_v46 = vpop.permute.xlu2 %4616  ;;  %v5575_v27 = vsel %vm3455_vm13, %v5573_v53, %v5574_v29  ;;  %v19586_v23 = vld [vmem:[#allocation197_spill] sm:$0xff]  ;;  %v9653_v53 = vor.u32 %v9652_v45, %v9651_v34 }
 0x5e7   :  { %v5820_v1 = vsel %vm5794_vm7, %v5755_v24, %v19586_v23  ;;  %v2357_v29 = vld [vmem:[#allocation2 + $0x140] sm:$0x1]  ;;  %v3192_v38 = vrot.slane %v3190_v57, 1  ;;  %v9546_v22 = vld [vmem:[#allocation2 + $0x138] sm:$0xf0] }
 0x5e8   :  { %v14952_v15 = vpop.permute.xlu1 %4354  ;;  %v5885_v35 = vsel %vm5859_vm8, %v5820_v1, %v14811_v42  ;;  %v2870_v10 = vunpack.c.l.b16 %v2357_v29  ;;  %v19590_v1 = vld [vmem:[#allocation191_spill] sm:$0xff] }
 0x5e9   :  { %3610 = vrot.lane.b32.xlu0 %v3545_v54, %s9948_s2  ;;  %v5962_v42 = vsel %vm5924_vm9, %v5885_v35, %v19583_v44  ;;  %v3188_v44 = vshrl.u32 %v19587_v58, 16  ;;  %v9715_v35 = vld [vmem:[#allocation2 + $0xf0] sm:$0xff]  }
 0x5ea   :  { %v5702_v57 = vsel %vm5664_vm5, %v9715_v35, %v14892_v2  ;;  %v15014_v45 = vpack.c.b16 %v2870_v10, %v2870_v10 }
 0x5eb   :  { %v6422_v6 = vpop.f32.mrf.mxu1  ;;  %9158 = vmatmul.msk.bf16.gmra.mxu2 %vm6324_vm4, %v6177_v59  ;;  %v14994_v59 = vpop.permute.xlu0 %3333  ;;  %v3193_v23 = vor.u32 %v3192_v38, %v3188_v44  ;;  %v9716_v44 = vld [vmem:[#allocation2 + $0x18c] sm:$0xff]  }
 0x5ec   :  { %v14967_v36 = vadd.f32 %v6591_v18, %v6422_v6  ;;  %5646 = vrot.lane.b32.xlu2 %v5575_v27, %s9942_s25  ;;  %v6059_v18 = vsel %vm6021_vm2, %v14604_v49, %v14785_v11  ;;  %v5595_v11 = vrot.slane %v14247_v0, 1  ;;  %v3195_v6 = vshll.u32 %v14402_v37, 16  ;;  %v19589_v27 = vld [vmem:[#allocation104_spill] sm:$0xff] }
 0x5ed   :  { %v3207_v10 = vshll.u32 %v15014_v45, 16 }
 0x5ee   :  { %19585 = vst [vmem:[#allocation189_spill] sm:$0xff] %v14967_v36  ;;  %3820 = vrot.lane.b32.xlu1 %v14306_v43, %s9950_s27  ;;  %v6593_v33 = vpop.f32.mrf.mxu2  ;;  %v14978_v4 = vpop.permute.xlu2 %3325  ;;  %v4572_v43 = vsel %vm3455_vm13, %v4570_v26, %v4571_v51  ;;  %v6049_v26 = vsel %vm6021_vm2, %v14464_v52, %v19589_v27  ;;  %v5594_v51 = vrot.slane %v9653_v53, 1  ;;  %v4220_v53 = vshll.u32 %v14908_v63, 16  ;;  %v19594_v27 = vld [vmem:[#allocation180_spill] sm:$0xff]  ;;  %v15037_v63 = vld [vmem:[#allocation2 + $0x1a4] sm:$0xf0] }
 0x5ef   :  { %v6114_v0 = vsel %vm6086_vm1, %v6049_v26, %v14857_v8  ;;  %v3197_v8 = vrot.slane %v3195_v6, 1  ;;  %v2780_v6 = vunpack.c.l.b16 %v9716_v44  ;;  %19595 = vst [vmem:[#allocation194_spill] sm:$0xff] %v15037_v63  ;;  %v19611_v36 = vld [vmem:[#allocation78_spill] sm:$0xff] }
 0x5f0   :  { %v5381_v17 = vpop.permute.xlu1 %5380  ;;  %v5596_v34 = vsel %vm3455_vm13, %v5594_v51, %v5595_v11  ;;  %v4213_v51 = vshrl.u32 %v9490_v7, 16  ;;  %v4222_v35 = vrot.slane %v4220_v53, 1 }
 0x5f1   :  { %v14986_v21 = vsel %vm6086_vm1, %v6059_v18, %v5381_v17  ;;  %4636 = vrot.lane.b32.xlu0 %v4572_v43, %s9952_s29  ;;  %v4215_v18 = vshll.u32 %v9490_v7, 16  ;;  %v6179_v43 = vsel %vm6151_vm3, %v6114_v0, %v14523_v16  ;;  %v3198_v2 = vsel %vm2910_vm14, %v3193_v23, %v3197_v8  ;;  %v15035_v0 = vld [vmem:[#allocation2 + $0x1a4] sm:$0xff]   ;;  %v19598_v8 = vld [vmem:[#allocation137_spill] sm:$0xff] }
 0x5f3   :  { %v6424_v54 = vpop.f32.mrf.mxu1  ;;  %6461 = vmatmul.bf16.gmra.mxu1 %v5962_v42  ;;  %v4217_v16 = vrot.slane %v4215_v18, 1  ;;  %v15039_v23 = vpop.permute.xlu0 %4618  ;;  %v3209_v18 = vrot.slane %v3207_v10, 1  ;;  %v19602_v10 = vld [vmem:[#allocation130_spill] sm:$0xff] }
 0x5f4   :  { %v14991_v14 = vadd.f32 %v6593_v33, %v6424_v54  ;;  %3822 = vrot.lane.b32.xlu2 %v9490_v7, %s9950_s27  ;;  %v19592_v54 = vld [vmem:[#allocation108_spill] sm:$0xff] }
 0x5f6   :  { %19588 = vst [vmem:[#allocation177_spill] sm:$0xff] %v14991_v14  ;;  %4846 = vrot.lane.b32.xlu1 %v14311_v9, %s9951_s28  ;;  %v6596_v24 = vpop.f32.mrf.mxu2  ;;  %v15006_v33 = vpop.permute.xlu2 %5640  ;;  %v5692_v9 = vsel %vm5664_vm5, %v19590_v1, %v14725_v19  ;;  %v19591_v19 = vld [vmem:[#allocation160_spill] sm:$0xff]  ;;  %v19596_v1 = vld [vmem:[#allocation206_spill] sm:$0xff]  ;;  %v19610_v14 = vld [vmem:[#allocation127_spill] sm:$0xff] }
 0x5f7   :  { %v5757_v29 = vsel %vm5729_vm6, %v5692_v9, %v19591_v19  ;;  %v4218_v19 = vor.u32 %v4217_v16, %v4213_v51 }
 0x5f8   :  { %v3589_v37 = vpop.permute.xlu1 %3588  ;;  %v5822_v38 = vsel %vm5794_vm7, %v5757_v29, %v19592_v54 }
 0x5f9   :  { %v15017_v17 = vsel %vm5729_vm6, %v5702_v57, %v3589_v37  ;;  %5660 = vrot.lane.b32.xlu0 %v5596_v34, %s9942_s25  ;;  %v5887_v9 = vsel %vm5859_vm8, %v5822_v38, %v19596_v1  ;;  %v19597_v57 = vld [vmem:[#allocation147_spill] sm:$0xff]  ;;  %v4223_v53 = vsel %vm2910_vm14, %v4218_v19, %v4222_v35  ;;  %v19601_v38 = vld [vmem:[#allocation140_spill] sm:$0xff]  ;;  %v3210_v16 = vsel %vm2910_vm14, %v4218_v19, %v3209_v18 }
 0x5fa   :  { %v4227_v37 = vshll.u32 %v19597_v57, 16  ;;  %v5965_v29 = vsel %vm5924_vm9, %v5887_v9, %v14464_v52  ;;  %v5256_v44 = vshll.u32 %v19601_v38, 16  ;;  %v4225_v9 = vshrl.u32 %v19597_v57, 16  ;;  %v19605_v35 = vld [vmem:[#allocation143_spill] sm:$0xff] }
 0x5fb   :  { %v6427_v42 = vpop.f32.mrf.mxu1  ;;  %9159 = vmatmul.msk.bf16.gmra.mxu2 %vm6324_vm4, %v6179_v43  ;;  %v19599_v43 = vunpack.c.h.b16 %v19598_v8 }
 0x5fc   :  { %v15029_v11 = vadd.f32 %v6596_v24, %v6427_v42  ;;  %4848 = vrot.lane.b32.xlu2 %v19594_v27, %s9951_s28  ;;  %v2615_v42 = vld [vmem:[#allocation2 + $0x164] sm:$0x1]  ;;  %v4229_v54 = vrot.slane %v4227_v37, 1  ;;  %v4232_v37 = vshll.u32 %v19605_v35, 16  ;;  %v5258_v18 = vrot.slane %v5256_v44, 1  ;;  %v9717_v35 = vld [vmem:[#allocation2 + $0xa8] sm:$0xff]  }
 0x5fd   :  { %v15050_v7 = vpack.c.b16 %v19599_v43, %v2780_v6  ;;  %v19603_v27 = vld [vmem:[#allocation82_spill] sm:$0xff]  ;;  %v4921_v8 = vunpack.c.l.b16 %v2615_v42  ;;  %v2492_v43 = vld [vmem:[#allocation2 + $0x1a0] sm:$0x1] }
 0x5fe   :  { %19593 = vst [vmem:[#allocation184_spill] sm:$0xff] %v15029_v11  ;;  %3341 = vrot.lane.b32.xlu1 %v3198_v2, %s9949_s3  ;;  %v6598_v26 = vpop.f32.mrf.mxu2  ;;  %v15041_v24 = vpop.permute.xlu2 %3816  ;;  %v6051_v6 = vsel %vm6021_vm2, %v19603_v27, %v19602_v10  ;;  %v19607_v10 = vld [vmem:[#allocation173_spill] sm:$0xff]  ;;  %v4234_v57 = vrot.slane %v4232_v37, 1 }
 0x5ff   :  { %19600 = vst [vmem:[#allocation188_spill] sm:$0xff] %v15050_v7  ;;  %v3286_v51 = vshll.u32 %v15050_v7, 16  ;;  %v15076_v11 = vpop.permute.xlu0 %5642  ;;  %v15080_v42 = vpack.c.b16 %v4921_v8, %v4921_v8  ;;  %v5259_v8 = vsel %vm2910_vm14, %v19611_v36, %v5258_v18  ;;  %v9548_v18 = vor.u32 %v9547_v13, %v9546_v22 }
 0x600   :  { %v15046_v34 = vpop.permute.xlu1 %4614 }
 0x601   :  { %3836 = vrot.lane.b32.xlu0 %v14929_v62, %s9950_s27  ;;  %v5268_v36 = vshll.u32 %v15080_v42, 16 }
 0x603   :  { %v6429_v2 = vpop.f32.mrf.mxu1  ;;  %6466 = vmatmul.bf16.gmra.mxu1 %v5965_v29  ;;  %v19606_v29 = vld [vmem:[#allocation124_spill] sm:$0xff]  ;;  %v5270_v22 = vrot.slane %v5268_v36, 1  ;;  %v2487_v36 = vld [vmem:[#allocation2 + $0x164] sm:$0x1] }
 0x604   :  { %v15061_v1 = vadd.f32 %v6598_v26, %v6429_v2  ;;  %3343 = vrot.lane.b32.xlu2 %v3210_v16, %s9949_s3  ;;  %v6116_v38 = vsel %vm6086_vm1, %v6051_v6, %v19606_v29  ;;  %v4230_v2 = vor.u32 %v4229_v54, %v4225_v9  ;;  %v5263_v16 = vshll.u32 %v19607_v10, 16  ;;  %v19608_v6 = vld [vmem:[#allocation145_spill] sm:$0xff]  ;;  %v19609_v54 = vld [vmem:[#allocation112_spill] sm:$0xff] }
 0x605   :  { %v5694_v29 = vsel %vm5664_vm5, %v9717_v35, %v19608_v6  ;;  %v6181_v44 = vsel %vm6151_vm3, %v6116_v38, %v19609_v54  ;;  %v3284_v9 = vshrl.u32 %v15050_v7, 16  ;;  %v19613_v54 = vld [vmem:[#allocation135_spill] sm:$0xff] }
 0x606   :  { %19604 = vst [vmem:[#allocation198_spill] sm:$0xff] %v15061_v1  ;;  %4366 = vrot.lane.b32.xlu1 %v4223_v53, %s9954_s7  ;;  %v6601_v52 = vpop.f32.mrf.mxu2  ;;  %v15071_v26 = vpop.permute.xlu2 %4356  ;;  %v3288_v1 = vrot.slane %v3286_v51, 1  ;;  %v3903_v53 = vunpack.c.l.b16 %v2492_v43  ;;  %v3291_v51 = vshll.u32 %v19610_v14, 16  ;;  %v4235_v37 = vsel %vm2910_vm14, %v4230_v2, %v4234_v57 }
 0x607   :  { %v5265_v35 = vrot.slane %v5263_v16, 1  ;;  %v5759_v14 = vsel %vm5729_vm6, %v5694_v29, %v19613_v54  ;;  %v5261_v57 = vshrl.u32 %v19607_v10, 16  ;;  %v19614_v16 = vld [vmem:[#allocation174_spill] sm:$0xff]  ;;  %v3528_v10 = vrot.slane %v9548_v18, 1  ;;  %v15113_v54 = vpop.permute.xlu0 %3818 }
 0x608   :  { %v15073_v19 = vpop.permute.xlu1 %5638  ;;  %v3289_v6 = vor.u32 %v3288_v1, %v3284_v9  ;;  %v15094_v38 = vpack.c.b16 %v3903_v53, %v3903_v53  ;;  %v3529_v1 = vrot.slane %v15014_v45, 1  ;;  %v5824_v53 = vsel %vm5794_vm7, %v5759_v14, %v19614_v16  ;;  %v9595_v45 = vld [vmem:[#allocation2 + $0x150] sm:$0xe] }
 0x609   :  { %4862 = vrot.lane.b32.xlu0 %v15035_v0, %s9951_s28  ;;  %v5266_v29 = vor.u32 %v5265_v35, %v5261_v57  ;;  %v19615_v35 = vld [vmem:[#allocation98_spill] sm:$0xff] }
 0x60a   :  { %v9799_v57 = vor.u32 %v9798_v25, %v19615_v35  ;;  %v3530_v16 = vsel %vm3455_vm13, %v3528_v10, %v3529_v1  ;;  %v19617_v25 = vld [vmem:[#allocation110_spill] sm:$0xff] }
 0x60b   :  { %v6432_v43 = vpop.f32.mrf.mxu1  ;;  %9160 = vmatmul.msk.bf16.gmra.mxu2 %vm6324_vm4, %v6181_v44 }
 0x60c   :  { %v15092_v12 = vadd.f32 %v6601_v52, %v6432_v43  ;;  %4368 = vrot.lane.b32.xlu2 %v4235_v37, %s9954_s7  ;;  %v3293_v52 = vrot.slane %v3291_v51, 1  ;;  %v4316_v37 = vshll.u32 %v15094_v38, 16  ;;  %v9594_v51 = vld [vmem:[#allocation2 + $0x150] sm:$0xf0]  ;;  %v3531_v35 = vrot.slane %v9799_v57, 1  ;;  %v19624_v57 = vld [vmem:[#allocation161_spill] sm:$0xff] }
 0x60d   :  { %v9596_v18 = vor.u32 %v9595_v45, %v9594_v51 }
 0x60e   :  { %19612 = vst [vmem:[#allocation122_spill] sm:$0xff] %v15092_v12  ;;  %5392 = vrot.lane.b32.xlu1 %v5259_v8, %s9953_s30  ;;  %v6603_v2 = vpop.f32.mrf.mxu2  ;;  %v15102_v44 = vpop.permute.xlu2 %5382  ;;  %v3294_v43 = vsel %vm2910_vm14, %v3289_v6, %v3293_v52  ;;  %v5271_v52 = vsel %vm2910_vm14, %v5266_v29, %v5270_v22  ;;  %v19619_v22 = vld [vmem:[#allocation181_spill] sm:$0xff] }
 0x60f   :  { %v4556_v1 = vrot.slane %v19619_v22, 1  ;;  %v4555_v12 = vrot.slane %v9596_v18, 1 }
 0x610   :  { %v4349_v9 = vpop.permute.xlu1 %4348 }
 0x611   :  { %v5889_v8 = vsel %vm5859_vm8, %v5824_v53, %v4349_v9  ;;  %3357 = vrot.lane.b32.xlu0 %v3294_v43, %s9949_s3  ;;  %v4318_v53 = vrot.slane %v4316_v37, 1  ;;  %v15120_v9 = vld [vmem:[#allocation2 + $0x15c] sm:$0xff]   ;;  %v19620_v37 = vld [vmem:[#allocation178_spill] sm:$0xff] }
 0x612   :  { %v5968_v13 = vsel %vm5924_vm9, %v5889_v8, %v19603_v27  ;;  %v9938_v27 = vld [vmem:[#allocation2 + $0x15c] sm:$0xf0]  ;;  %v9939_v43 = vld [vmem:[#allocation2 + $0x15c] sm:$0xe]  ;;  %v5704_v10 = vsel %vm5664_vm5, %v19620_v37, %v14994_v59  ;;  %v19623_v59 = vld [vmem:[#allocation215_spill] sm:$0xff]  ;;  %v4251_v7 = vshll.u32 %v15120_v9, 16 }
 0x613   :  { %v6434_v14 = vpop.f32.mrf.mxu1  ;;  %6471 = vmatmul.bf16.gmra.mxu1 %v5968_v13  ;;  %v9801_v8 = vld [vmem:[#allocation2 + $0x15c] sm:$0xe]  ;;  %v19618_v13 = vld [vmem:[#allocation167_spill] sm:$0xff]  ;;  %v5769_v51 = vsel %vm5729_vm6, %v5704_v10, %v14917_v61  ;;  %v19626_v10 = vld [vmem:[#allocation128_spill] sm:$0xff] }
 0x614   :  { %v15116_v6 = vadd.f32 %v6603_v2, %v6434_v14  ;;  %5394 = vrot.lane.b32.xlu2 %v5271_v52, %s9953_s30  ;;  %v5696_v2 = vsel %vm5664_vm5, %v19617_v25, %v14978_v4  ;;  %v3532_v29 = vrot.slane %v19618_v13, 1  ;;  %v3898_v52 = vunpack.c.l.b16 %v2487_v36  ;;  %v19622_v25 = vld [vmem:[#allocation179_spill] sm:$0xff] }
 0x615   :  { %v5761_v13 = vsel %vm5729_vm6, %v5696_v2, %v19622_v25  ;;  %v6183_v36 = vsel %vm6151_vm3, %v19624_v57, %v19623_v59  ;;  %v15157_v25 = vpop.permute.xlu0 %4844 }
 0x616   :  { %19616 = vst [vmem:[#allocation81_spill] sm:$0xff] %v15116_v6  ;;  %3600 = vrot.lane.b32.xlu1 %v3530_v16, %s9948_s2  ;;  %v15132_v14 = vpop.permute.xlu2 %4842  ;;  %v6606_v45 = vpop.f32.mrf.mxu2  ;;  %v19621_v6 = vld [vmem:[#allocation212_spill] sm:$0xff]  ;;  %v3533_v61 = vsel %vm3455_vm13, %v3531_v35, %v3532_v29  ;;  %v5826_v18 = vsel %vm5794_vm7, %v5761_v13, %v19626_v10  ;;  %v19628_v29 = vld [vmem:[#allocation121_spill] sm:$0xff] }
 0x617   :  { %v4319_v4 = vsel %vm2910_vm14, %v19621_v6, %v4318_v53  ;;  %v4557_v6 = vsel %vm3455_vm13, %v4555_v12, %v4556_v1  ;;  %v15150_v53 = vpack.c.b16 %v3898_v52, %v3898_v52  ;;  %v5891_v12 = vsel %vm5859_vm8, %v5826_v18, %v19628_v29 }
 0x618   :  { %v3815_v16 = vpop.permute.xlu1 %3814 }
 0x619   :  { %v15141_v22 = vsel %vm5794_vm7, %v5769_v51, %v3815_v16  ;;  %4382 = vrot.lane.b32.xlu0 %v4319_v4, %s9954_s7  ;;  %v9940_v51 = vor.u32 %v9939_v43, %v9938_v27  ;;  %v19627_v16 = vld [vmem:[#allocation119_spill] sm:$0xff]  ;;  %v4559_v52 = vrot.slane %v15150_v53, 1  ;;  %v5580_v27 = vrot.slane %v15080_v42, 1 }
 0x61a   :  { %v9802_v4 = vor.u32 %v9801_v8, %v19627_v16  ;;  %v19629_v8 = vld [vmem:[#allocation87_spill] sm:$0xff] }
 0x61b   :  { %v6437_v37 = vpop.f32.mrf.mxu1  ;;  %9161 = vmatmul.msk.bf16.gmra.mxu2 %vm6324_vm4, %v6183_v36  ;;  %v4558_v35 = vrot.slane %v9940_v51, 1  ;;  %v5971_v13 = vsel %vm5924_vm9, %v5891_v12, %v19629_v8  ;;  %v9645_v36 = vld [vmem:[#allocation2 + $0x168] sm:$0xf0]  ;;  %v19632_v12 = vld [vmem:[#allocation132_spill] sm:$0xff] }
 0x61c   :  { %v15152_v2 = vadd.f32 %v6606_v45, %v6437_v37  ;;  %3602 = vrot.lane.b32.xlu2 %v3533_v61, %s9948_s2  ;;  %v5579_v45 = vrot.slane %v9802_v4, 1  ;;  %v9646_v37 = vld [vmem:[#allocation2 + $0x168] sm:$0xe] }
 0x61d   :  { %v9647_v18 = vor.u32 %v9646_v37, %v9645_v36  ;;  %v15177_v42 = vpop.permute.xlu0 %3339  ;;  %v19631_v4 = vld [vmem:[#allocation190_spill] sm:$0xff]  ;;  %v15197_v36 = vld [vmem:[#allocation2 + $0x15c] sm:$0xf0] }
 0x61e   :  { %19625 = vst [vmem:[#allocation165_spill] sm:$0xff] %v15152_v2  ;;  %4626 = vrot.lane.b32.xlu1 %v4557_v6, %s9952_s29  ;;  %v15161_v59 = vpop.permute.xlu2 %3337  ;;  %v6608_v43 = vpop.f32.mrf.mxu2  ;;  %v4560_v6 = vsel %vm3455_vm13, %v4558_v35, %v4559_v52  ;;  %v5581_v10 = vsel %vm3455_vm13, %v5579_v45, %v5580_v27  ;;  %v5583_v29 = vrot.slane %v19631_v4, 1 }
 0x61f   :  { %v5582_v52 = vrot.slane %v9647_v18, 1 }
 0x620   :  { %v15165_v1 = vpop.permute.xlu1 %4840 }
 0x621   :  { %v5584_v8 = vsel %vm3455_vm13, %v5582_v52, %v5583_v29  ;;  %v2360_v29 = vld [vmem:[#allocation2 + $0x164] sm:$0x1]  ;;  %v15219_v52 = vld [vmem:[#allocation2 + $0x168] sm:$0xff]  }
 0x622   :  { %19638 = vst [vmem:[#allocation164_spill] sm:$0xff] %v15219_v52 }
 0x623   :  { %v6439_v57 = vpop.f32.mrf.mxu1  ;;  %6476 = vmatmul.bf16.gmra.mxu1 %v5971_v13  ;;  %v9718_v13 = vld [vmem:[#allocation2 + $0x150] sm:$0xff]  }
 0x624   :  { %v15171_v61 = vadd.f32 %v6608_v43, %v6439_v57  ;;  %4628 = vrot.lane.b32.xlu2 %v4560_v6, %s9952_s29  ;;  %v15195_v57 = vld [vmem:[#allocation2 + $0x15c] sm:$0xff]  }
 0x625   :  { %19633 = vst [vmem:[#allocation163_spill] sm:$0xff] %v15195_v57  ;;  %v3238_v2 = vshll.u32 %v15195_v57, 16 }
 0x626   :  { %19630 = vst [vmem:[#allocation153_spill] sm:$0xff] %v15171_v61  ;;  %5650 = vrot.lane.b32.xlu1 %v5581_v10, %s9942_s25  ;;  %v15179_v51 = vpop.permute.xlu2 %4362  ;;  %v6611_v27 = vpop.f32.mrf.mxu2 }
 0x627   :  { %v15206_v10 = vpop.permute.xlu0 %4364 }
 0x628   :  { %v3336_v16 = vpop.permute.xlu1 %3335 }
 0x629   :  { %v5706_v43 = vsel %vm5664_vm5, %v19632_v12, %v3336_v16  ;;  %v19636_v12 = vld [vmem:[#allocation202_spill] sm:$0xff] }
 0x62a   :  { %v5771_v35 = vsel %vm5729_vm6, %v5706_v43, %v14890_v47  ;;  %v6057_v43 = vsel %vm6021_vm2, %v19636_v12, %v14924_v30 }
 0x62b   :  { %9162 = vmatmul.msk.bf16.gmra.mxu2 %vm6324_vm4, %v14830_v5  ;;  %v15190_v45 = vsel %vm5794_vm7, %v5771_v35, %v15041_v24  ;;  %v5893_v5 = vsel %vm5859_vm8, %v14868_v20, %v14931_v31  ;;  %v15204_v24 = vld [vmem:[#allocation2 + $0x150] sm:$0xff]   ;;  %v19637_v31 = vld [vmem:[#allocation149_spill] sm:$0xff]  ;;  %v6122_v30 = vsel %vm6086_vm1, %v6057_v43, %v14964_v40 }
 0x62c   :  { %5652 = vrot.lane.b32.xlu2 %v5584_v8, %s9942_s25  ;;  %19634 = vst [vmem:[#allocation96_spill] sm:$0xff] %v15204_v24  ;;  %v5974_v16 = vsel %vm5924_vm9, %v5893_v5, %v14789_v41  ;;  %v3226_v4 = vshll.u32 %v15204_v24, 16  ;;  %v2580_v20 = vld [vmem:[#allocation2 + $0x174] sm:$0xf]  ;;  %v3231_v35 = vshll.u32 %v19637_v31, 16 }
 0x62e   :  { %3826 = vrot.lane.b32.xlu1 %v9718_v13, %s9950_s27  ;;  %v15199_v47 = vpop.permute.xlu2 %5388  ;;  %v6613_v41 = vpop.f32.mrf.mxu2  ;;  %v3228_v8 = vrot.slane %v3226_v4, 1  ;;  %v2873_v13 = vunpack.c.l.b16 %v2360_v29  ;;  %v3233_v61 = vrot.slane %v3231_v35, 1  ;;  %v19641_v4 = vld [vmem:[#allocation154_spill] sm:$0xff]  ;;  %v19642_v35 = vunpack.c.h.b16 %v14704_v3 }
 0x62f   :  { %v6187_v40 = vsel %vm6151_vm3, %v6122_v30, %v19641_v4  ;;  %v4249_v30 = vshrl.u32 %v15120_v9, 16  ;;  %v4256_v3 = vshll.u32 %v15150_v53, 16  ;;  %v2618_v4 = vld [vmem:[#allocation2 + $0x188] sm:$0x1]  ;;  %v19643_v53 = vld [vmem:[#allocation185_spill] sm:$0xff] }
 0x630   :  { %v6442_v37 = vpop.f32.mrf.mxu1  ;;  %v3330_v6 = vpop.permute.xlu1 %3329  ;;  %v15240_v43 = vpack.c.b16 %v2873_v13, %v2873_v13 }
 0x631   :  { %v15208_v18 = vadd.f32 %v6611_v27, %v6442_v37  ;;  %v5700_v27 = vsel %vm5664_vm5, %v19541_v32, %v3330_v6  ;;  %v4758_v37 = vunpack.c.l.b16 %v2580_v20  ;;  %v15242_v20 = vpop.permute.xlu0 %5390 }
 0x632   :  { %v3243_v13 = vshll.u32 %v15240_v43, 16 }
 0x633   :  { %19635 = vst [vmem:[#allocation182_spill] sm:$0xff] %v15208_v18  ;;  %6481 = vmatmul.bf16.gmra.mxu1 %v5974_v16  ;;  %v3224_v18 = vshrl.u32 %v15204_v24, 16  ;;  %v4795_v24 = vpack.c.b16 %v19642_v35, %v4758_v37  ;;  %v4268_v35 = vshll.u32 %v19643_v53, 16 }
 0x634   :  { %3828 = vrot.lane.b32.xlu2 %v15120_v9, %s9950_s27  ;;  %v3245_v9 = vrot.slane %v3243_v13, 1 }
 0x635   :  { %v3229_v29 = vor.u32 %v3228_v8, %v3224_v18  ;;  %v3236_v8 = vshrl.u32 %v15195_v57, 16  ;;  %v4924_v57 = vunpack.c.l.b16 %v2618_v4  ;;  %v19645_v4 = vld [vmem:[#allocation118_spill] sm:$0xff] }
 0x636   :  { %4852 = vrot.lane.b32.xlu1 %v15219_v52, %s9951_s28  ;;  %v15227_v5 = vpop.permute.xlu2 %3596  ;;  %v19639_v52 = vld [vmem:[#allocation150_spill] sm:$0xff] }
 0x637   :  { %v5765_v32 = vsel %vm5729_vm6, %v5700_v27, %v19639_v52  ;;  %v3234_v63 = vsel %vm2910_vm14, %v3229_v29, %v3233_v61  ;;  %v4253_v27 = vrot.slane %v4251_v7, 1  ;;  %v4258_v29 = vrot.slane %v4256_v3, 1 }
 0x638   :  { %v6444_v16 = vpop.f32.mrf.mxu1  ;;  %v15229_v31 = vpop.permute.xlu1 %4360  ;;  %v5830_v52 = vsel %vm5794_vm7, %v5765_v32, %v14753_v28 }
 0x639   :  { %v15236_v6 = vadd.f32 %v6613_v41, %v6444_v16  ;;  %v3240_v41 = vrot.slane %v3238_v2, 1  ;;  %v5895_v28 = vsel %vm5859_vm8, %v5830_v52, %v14952_v15  ;;  %v4254_v16 = vor.u32 %v4253_v27, %v4249_v30  ;;  %v9804_v27 = vld [vmem:[#allocation2 + $0x15c] sm:$0xe] }
 0x63b   :  { %19640 = vst [vmem:[#allocation107_spill] sm:$0xff] %v15236_v6  ;;  %9163 = vmatmul.msk.bf16.gmra.mxu2 %vm6324_vm4, %v6187_v40  ;;  %v3241_v61 = vor.u32 %v3240_v41, %v3236_v8  ;;  %v5977_v40 = vsel %vm5924_vm9, %v5895_v28, %v19636_v12  ;;  %v4259_v15 = vsel %vm2910_vm14, %v4254_v16, %v4258_v29  ;;  %v15269_v41 = vpop.permute.xlu0 %3598  ;;  %v5285_v12 = vshrl.u32 %v4795_v24, 16  ;;  %v19644_v8 = vld [vmem:[#allocation99_spill] sm:$0xff] }
 0x63c   :  { %4854 = vrot.lane.b32.xlu2 %v4795_v24, %s9951_s28  ;;  %v5292_v13 = vshll.u32 %v19644_v8, 16  ;;  %v15278_v16 = vpack.c.b16 %v4924_v57, %v4924_v57  ;;  %v9805_v57 = vor.u32 %v9804_v27, %v15197_v36 }
 0x63d   :  { %v3246_v6 = vsel %vm2910_vm14, %v3241_v61, %v3245_v9 }
 0x63e   :  { %3347 = vrot.lane.b32.xlu1 %v3234_v63, %s9949_s3  ;;  %v6616_v18 = vpop.f32.mrf.mxu2  ;;  %v15256_v37 = vpop.permute.xlu2 %4622  ;;  %v5287_v63 = vshll.u32 %v4795_v24, 16  ;;  %v5294_v24 = vrot.slane %v5292_v13, 1  ;;  %v5297_v13 = vshrl.u32 %v19645_v4, 16 }
 0x640   :  { %v6447_v2 = vpop.f32.mrf.mxu1  ;;  %v15260_v7 = vpop.permute.xlu1 %5386  ;;  %v5289_v52 = vrot.slane %v5287_v63, 1 }
 0x641   :  { %v15262_v32 = vadd.f32 %v6616_v18, %v6447_v2  ;;  %v4270_v2 = vrot.slane %v4268_v35, 1  ;;  %v5304_v35 = vshll.u32 %v15278_v16, 16 }
 0x642   :  { %v5290_v61 = vor.u32 %v5289_v52, %v5285_v12  ;;  %v19647_v52 = vld [vmem:[#allocation131_spill] sm:$0xff] }
 0x643   :  { %6486 = vmatmul.bf16.gmra.mxu1 %v5977_v40  ;;  %v19646_v40 = vld [vmem:[#allocation116_spill] sm:$0xff]  ;;  %v4271_v29 = vsel %vm2910_vm14, %v14658_v39, %v4270_v2  ;;  %v15297_v12 = vpop.permute.xlu0 %4624  ;;  %v3537_v2 = vrot.slane %v9805_v57, 1 }
 0x644   :  { %3349 = vrot.lane.b32.xlu2 %v3246_v6, %s9949_s3  ;;  %v5299_v6 = vshll.u32 %v19645_v4, 16  ;;  %v6189_v9 = vsel %vm6151_vm3, %v14986_v21, %v19646_v40  ;;  %v5295_v53 = vsel %vm2910_vm14, %v5290_v61, %v5294_v24  ;;  %v5832_v21 = vsel %vm5794_vm7, %v15017_v17, %v19647_v52 }
 0x645   :  { %v5897_v39 = vsel %vm5859_vm8, %v5832_v21, %v15071_v26  ;;  %v3538_v61 = vrot.slane %v15240_v43, 1  ;;  %v9553_v26 = vld [vmem:[#allocation2 + $0x168] sm:$0xe] }
 0x646   :  { %4372 = vrot.lane.b32.xlu1 %v4259_v15, %s9954_s7  ;;  %v6618_v18 = vpop.f32.mrf.mxu2  ;;  %v15274_v30 = vpop.permute.xlu2 %5646  ;;  %v5301_v15 = vrot.slane %v5299_v6, 1  ;;  %v5980_v40 = vsel %vm5924_vm9, %v5897_v39, %v14604_v49 }
 0x647   :  { %v3539_v4 = vsel %vm3455_vm13, %v3537_v2, %v3538_v61 }
 0x648   :  { %v6449_v3 = vpop.f32.mrf.mxu1  ;;  %v15276_v28 = vpop.permute.xlu1 %3594  ;;  %v5302_v17 = vor.u32 %v5301_v15, %v5297_v13 }
 0x649   :  { %v15280_v63 = vadd.f32 %v6618_v18, %v6449_v3  ;;  %v5306_v3 = vrot.slane %v5304_v35, 1 }
 0x64b   :  { %9164 = vmatmul.msk.bf16.gmra.mxu2 %vm6324_vm4, %v6189_v9  ;;  %v9552_v9 = vld [vmem:[#allocation2 + $0x168] sm:$0xf0]  ;;  %v5307_v24 = vsel %vm2910_vm14, %v5302_v17, %v5306_v3  ;;  %v9600_v17 = vld [vmem:[#allocation2 + $0x180] sm:$0xf0] }
 0x64c   :  { %4374 = vrot.lane.b32.xlu2 %v4271_v29, %s9954_s7  ;;  %v2490_v29 = vld [vmem:[#allocation2 + $0x188] sm:$0x1]  ;;  %v9554_v57 = vor.u32 %v9553_v26, %v9552_v9  ;;  %v9649_v9 = vld [vmem:[#allocation2 + $0x180] sm:$0xe] }
 0x64d   :  { %v3901_v13 = vunpack.c.l.b16 %v2490_v29 }
 0x64e   :  { %5398 = vrot.lane.b32.xlu1 %v5295_v53, %s9953_s30  ;;  %v6621_v18 = vpop.f32.mrf.mxu2  ;;  %v15301_v8 = vpop.permute.xlu2 %3822  ;;  %v19648_v53 = vld [vmem:[#allocation158_spill] sm:$0xff]  ;;  %v3540_v61 = vrot.slane %v9554_v57, 1 }
 0x64f   :  { %v6061_v43 = vsel %vm6021_vm2, %v15046_v34, %v19648_v53 }
 0x650   :  { %v6452_v36 = vpop.f32.mrf.mxu1  ;;  %v15304_v27 = vpop.permute.xlu1 %4620  ;;  %v6126_v49 = vsel %vm6086_vm1, %v6061_v43, %v15102_v44  ;;  %v9601_v44 = vld [vmem:[#allocation2 + $0x180] sm:$0xe] }
 0x651   :  { %v15307_v6 = vadd.f32 %v6621_v18, %v6452_v36  ;;  %v19649_v18 = vld [vmem:[#allocation187_spill] sm:$0xff]  ;;  %v15325_v36 = vpop.permute.xlu0 %5648  ;;  %v6191_v2 = vsel %vm6151_vm3, %v6126_v49, %v15073_v19  ;;  %v9602_v53 = vor.u32 %v9601_v44, %v9600_v17 }
 0x652   :  { %v3541_v39 = vrot.slane %v19649_v18, 1 }
 0x653   :  { %6491 = vmatmul.bf16.gmra.mxu1 %v5980_v40  ;;  %v9648_v40 = vld [vmem:[#allocation2 + $0x180] sm:$0xf0] }
 0x654   :  { %5400 = vrot.lane.b32.xlu2 %v5307_v24, %s9953_s30  ;;  %v3542_v26 = vsel %vm3455_vm13, %v3540_v61, %v3541_v39  ;;  %v15333_v24 = vpack.c.b16 %v3901_v13, %v3901_v13  ;;  %v9650_v43 = vor.u32 %v9649_v9, %v9648_v40  ;;  %v5589_v39 = vrot.slane %v15278_v16, 1 }
 0x655   :  { %v4567_v61 = vrot.slane %v9602_v53, 1 }
 0x656   :  { %3606 = vrot.lane.b32.xlu1 %v3539_v4, %s9948_s2  ;;  %v6623_v35 = vpop.f32.mrf.mxu2  ;;  %v15320_v15 = vpop.permute.xlu2 %4848  ;;  %v19650_v4 = vld [vmem:[#allocation85_spill] sm:$0xff]  ;;  %v4568_v18 = vrot.slane %v15333_v24, 1  ;;  %v5588_v17 = vrot.slane %v9650_v43, 1 }
 0x658   :  { %v6454_v52 = vpop.f32.mrf.mxu1  ;;  %v15322_v21 = vpop.permute.xlu1 %5644  ;;  %v4569_v40 = vsel %vm3455_vm13, %v4567_v61, %v4568_v18  ;;  %v5590_v9 = vsel %vm3455_vm13, %v5588_v17, %v5589_v39  ;;  %v19654_v39 = vld [vmem:[#allocation151_spill] sm:$0xff]  ;;  %v2363_v61 = vld [vmem:[#allocation2 + $0x188] sm:$0x1] }
 0x659   :  { %v15327_v3 = vadd.f32 %v6623_v35, %v6454_v52  ;;  %v19651_v35 = vld [vmem:[#allocation133_spill] sm:$0xff]  ;;  %v15351_v44 = vpop.permute.xlu0 %3824 }
 0x65a   :  { %v5899_v57 = vsel %vm5859_vm8, %v15141_v22, %v19651_v35  ;;  %v6063_v22 = vsel %vm6021_vm2, %v14949_v46, %v15165_v1  ;;  %v19653_v35 = vld [vmem:[#allocation126_spill] sm:$0xff] }
 0x65b   :  { %9165 = vmatmul.msk.bf16.gmra.mxu2 %vm6324_vm4, %v6191_v2  ;;  %v5983_v2 = vsel %vm5924_vm9, %v5899_v57, %v15046_v34  ;;  %v6128_v34 = vsel %vm6086_vm1, %v6063_v22, %v14849_v60  ;;  %v5901_v57 = vsel %vm5859_vm8, %v15190_v45, %v15229_v31  ;;  %v6065_v45 = vsel %vm6021_vm2, %v15039_v23, %v15132_v14 }
 0x65c   :  { %3608 = vrot.lane.b32.xlu2 %v3542_v26, %s9948_s2  ;;  %v6193_v1 = vsel %vm6151_vm3, %v6128_v34, %v15006_v33  ;;  %v3262_v33 = vshll.u32 %v19654_v39, 16  ;;  %v5986_v17 = vsel %vm5924_vm9, %v5901_v57, %v14949_v46  ;;  %v3260_v46 = vshrl.u32 %v19654_v39, 16 }
 0x65e   :  { %4632 = vrot.lane.b32.xlu1 %v19650_v4, %s9952_s29  ;;  %v6626_v29 = vpop.f32.mrf.mxu2  ;;  %v15338_v19 = vpop.permute.xlu2 %3343 }
 0x660   :  { %v6457_v49 = vpop.f32.mrf.mxu1  ;;  %v15343_v52 = vpop.permute.xlu1 %3820 }
 0x661   :  { %v15347_v13 = vadd.f32 %v6626_v29, %v6457_v49  ;;  %v15371_v43 = vpop.permute.xlu0 %4850 }
 0x663   :  { %19652 = vst [vmem:[#allocation93_spill] sm:$0xff] %v15347_v13  ;;  %6496 = vmatmul.bf16.gmra.mxu1 %v5983_v2 }
 0x664   :  { %4634 = vrot.lane.b32.xlu2 %v4569_v40, %s9952_s29  ;;  %v3264_v40 = vrot.slane %v3262_v33, 1 }
 0x666   :  { %5656 = vrot.lane.b32.xlu1 %v5590_v9, %s9942_s25  ;;  %v6628_v16 = vpop.f32.mrf.mxu2  ;;  %v15364_v29 = vpop.permute.xlu2 %4368  ;;  %v2876_v9 = vunpack.c.l.b16 %v2363_v61  ;;  %v3265_v57 = vor.u32 %v3264_v40, %v3260_v46  ;;  %v2621_v46 = vld [vmem:[#allocation2 + $0x1ac] sm:$0x1] }
 0x668   :  { %v6459_v26 = vpop.f32.mrf.mxu1  ;;  %v15362_v4 = vpop.permute.xlu1 %4846 }
 0x669   :  { %v15366_v53 = vadd.f32 %v6628_v16, %v6459_v26  ;;  %v3267_v16 = vshll.u32 %v14922_v48, 16  ;;  %v15400_v34 = vpop.permute.xlu0 %3345  ;;  %v6130_v26 = vsel %vm6086_vm1, %v6065_v45, %v15260_v7  ;;  %v15426_v45 = vld [vmem:[#allocation2 + $0x198] sm:$0xff]  }
 0x66a   :  { %v6195_v7 = vsel %vm6151_vm3, %v6130_v26, %v15076_v11 }
 0x66b   :  { %9166 = vmatmul.msk.bf16.gmra.mxu2 %vm6324_vm4, %v6193_v1  ;;  %v19656_v1 = vld [vmem:[#allocation199_spill] sm:$0xff]  ;;  %v3269_v61 = vrot.slane %v3267_v16, 1 }
 0x66c   :  { %5658 = vrot.lane.b32.xlu2 %v19653_v35, %s9942_s25  ;;  %v5708_v35 = vsel %vm5664_vm5, %v19656_v1, %v15161_v59 }
 0x66d   :  { %v5773_v14 = vsel %vm5729_vm6, %v5708_v35, %v15276_v28 }
 0x66e   :  { %3832 = vrot.lane.b32.xlu1 %v14825_v55, %s9950_s27  ;;  %v6631_v60 = vpop.f32.mrf.mxu2  ;;  %v15387_v22 = vpop.permute.xlu2 %5394  ;;  %v15389_v55 = vld [vmem:[#allocation2 + $0x180] sm:$0xff]   ;;  %v5838_v59 = vsel %vm5794_vm7, %v5773_v14, %v15113_v54 }
 0x66f   :  { %v4287_v48 = vshll.u32 %v15389_v55, 16  ;;  %v5903_v54 = vsel %vm5859_vm8, %v5838_v59, %v15179_v51  ;;  %v4285_v16 = vshrl.u32 %v15389_v55, 16 }
 0x670   :  { %v6462_v49 = vpop.f32.mrf.mxu1  ;;  %v15380_v18 = vpop.permute.xlu1 %3341 }
 0x671   :  { %v15383_v2 = vadd.f32 %v6631_v60, %v6462_v49  ;;  %v15409_v49 = vpack.c.b16 %v2876_v9, %v2876_v9  ;;  %v4292_v9 = vshll.u32 %v15333_v24, 16  ;;  %v4289_v11 = vrot.slane %v4287_v48, 1 }
 0x672   :  { %v5989_v48 = vsel %vm5924_vm9, %v5903_v54, %v15039_v23  ;;  %v4297_v23 = vshrl.u32 %v14929_v62, 16  ;;  %v5335_v54 = vshll.u32 %v15035_v0, 16 }
 0x673   :  { %19655 = vst [vmem:[#allocation169_spill] sm:$0xff] %v15383_v2  ;;  %6501 = vmatmul.bf16.gmra.mxu1 %v5986_v17  ;;  %v3270_v17 = vsel %vm2910_vm14, %v3265_v57, %v3269_v61  ;;  %v3279_v40 = vshll.u32 %v15409_v49, 16  ;;  %v4294_v35 = vrot.slane %v4292_v9, 1  ;;  %v15437_v57 = vpop.permute.xlu0 %4370  ;;  %v4927_v61 = vunpack.c.l.b16 %v2621_v46 }
 0x674   :  { %3834 = vrot.lane.b32.xlu2 %v15389_v55, %s9950_s27  ;;  %v6067_v9 = vsel %vm6021_vm2, %v15304_v27, %v15157_v25 }
 0x675   :  { %v3281_v24 = vrot.slane %v3279_v40, 1  ;;  %v4304_v40 = vshll.u32 %v14955_v56, 16  ;;  %v6132_v25 = vsel %vm6086_vm1, %v6067_v9, %v15199_v47  ;;  %v9556_v47 = vld [vmem:[#allocation2 + $0x180] sm:$0xe] }
 0x676   :  { %4858 = vrot.lane.b32.xlu1 %v14864_v50, %s9951_s28  ;;  %v6633_v31 = vpop.f32.mrf.mxu2  ;;  %v15424_v28 = vpop.permute.xlu2 %3602 }
 0x678   :  { %v6464_v60 = vpop.f32.mrf.mxu1  ;;  %v15407_v50 = vpop.permute.xlu1 %4366 }
 0x679   :  { %v15413_v33 = vadd.f32 %v6633_v31, %v6464_v60  ;;  %v4299_v60 = vshll.u32 %v14929_v62, 16  ;;  %v4306_v62 = vrot.slane %v4304_v40, 1 }
 0x67b   :  { %19657 = vst [vmem:[#allocation144_spill] sm:$0xff] %v15413_v33  ;;  %9167 = vmatmul.msk.bf16.gmra.mxu2 %vm6324_vm4, %v6195_v7  ;;  %v4290_v7 = vor.u32 %v4289_v11, %v4285_v16 }
 0x67c   :  { %4860 = vrot.lane.b32.xlu2 %v15426_v45, %s9951_s28 }
 0x67d   :  { %v3282_v51 = vsel %vm2910_vm14, %v4290_v7, %v3281_v24  ;;  %v4295_v59 = vsel %vm2910_vm14, %v4290_v7, %v4294_v35  ;;  %v9721_v35 = vld [vmem:[#allocation2 + $0x120] sm:$0xff]   ;;  %v6197_v7 = vsel %vm6151_vm3, %v6132_v25, %v15322_v21 }
 0x67e   :  { %3353 = vrot.lane.b32.xlu1 %v3270_v17, %s9949_s3  ;;  %v6636_v31 = vpop.f32.mrf.mxu2  ;;  %v4301_v17 = vrot.slane %v4299_v60, 1  ;;  %v15455_v46 = vpop.permute.xlu2 %4628  ;;  %v5710_v56 = vsel %vm5664_vm5, %v9721_v35, %v15177_v42  ;;  %v9555_v42 = vld [vmem:[#allocation2 + $0x180] sm:$0xf0] }
 0x680   :  { %v6467_v26 = vpop.f32.mrf.mxu1  ;;  %v15434_v1 = vpop.permute.xlu1 %5392  ;;  %v4302_v24 = vor.u32 %v4301_v17, %v4297_v23  ;;  %v5775_v17 = vsel %vm5729_vm6, %v5710_v56, %v15227_v5  ;;  %v3547_v56 = vrot.slane %v15409_v49, 1 }
 0x681   :  { %v15439_v14 = vadd.f32 %v6636_v31, %v6467_v26  ;;  %v15452_v31 = vpack.c.b16 %v4927_v61, %v4927_v61  ;;  %v5337_v61 = vrot.slane %v5335_v54, 1  ;;  %v5840_v40 = vsel %vm5794_vm7, %v5775_v17, %v15343_v52 }
 0x682   :  { %v4307_v9 = vsel %vm2910_vm14, %v4302_v24, %v4306_v62  ;;  %v9557_v54 = vor.u32 %v9556_v47, %v9555_v42  ;;  %v5905_v5 = vsel %vm5859_vm8, %v5840_v40, %v15206_v10  ;;  %v6069_v10 = vsel %vm6021_vm2, %v15256_v37, %v15362_v4 }
 0x683   :  { %19658 = vst [vmem:[#allocation204_spill] sm:$0xff] %v15439_v14  ;;  %6506 = vmatmul.bf16.gmra.mxu1 %v5989_v48  ;;  %v5333_v48 = vshrl.u32 %v15035_v0, 16  ;;  %v19659_v0 = vld [vmem:[#allocation214_spill] sm:$0xff]  ;;  %v5992_v25 = vsel %vm5924_vm9, %v5905_v5, %v15304_v27  ;;  %v6134_v47 = vsel %vm6086_vm1, %v6069_v10, %v15242_v20  ;;  %v5712_v40 = vsel %vm5664_vm5, %v19587_v58, %v15380_v18  ;;  %v19662_v18 = vld [vmem:[#allocation216_spill] sm:$0xff] }
 0x684   :  { %3355 = vrot.lane.b32.xlu2 %v3282_v51, %s9949_s3  ;;  %v5340_v51 = vshll.u32 %v15452_v31, 16  ;;  %v4574_v4 = vrot.slane %v15094_v38, 1 }
 0x686   :  { %4378 = vrot.lane.b32.xlu1 %v4295_v59, %s9954_s7  ;;  %v6638_v11 = vpop.f32.mrf.mxu2  ;;  %v15469_v59 = vpop.permute.xlu0 %5396  ;;  %v5342_v23 = vrot.slane %v5340_v51, 1  ;;  %v9807_v51 = vld [vmem:[#allocation2 + $0x1a4] sm:$0xe] }
 0x687   :  { %v15485_v52 = vpop.permute.xlu2 %5652 }
 0x688   :  { %v6469_v16 = vpop.f32.mrf.mxu1  ;;  %v15457_v26 = vpop.permute.xlu1 %3600 }
 0x689   :  { %v15463_v60 = vadd.f32 %v6638_v11, %v6469_v16  ;;  %v5338_v11 = vor.u32 %v5337_v61, %v5333_v48  ;;  %v9603_v48 = vld [vmem:[#allocation2 + $0x198] sm:$0xf0]  ;;  %v9604_v61 = vld [vmem:[#allocation2 + $0x198] sm:$0xe] }
 0x68a   :  { %v9605_v42 = vor.u32 %v9604_v61, %v9603_v48 }
 0x68b   :  { %9168 = vmatmul.msk.bf16.gmra.mxu2 %vm6324_vm4, %v6197_v7  ;;  %v5343_v62 = vsel %vm2910_vm14, %v5338_v11, %v5342_v23  ;;  %v3546_v7 = vrot.slane %v9557_v54, 1  ;;  %v6199_v11 = vsel %vm6151_vm3, %v6134_v47, %v15274_v30  ;;  %v19661_v54 = vld [vmem:[#allocation194_spill] sm:$0xff] }
 0x68c   :  { %4380 = vrot.lane.b32.xlu2 %v4307_v9, %s9954_s7  ;;  %v4573_v23 = vrot.slane %v9605_v42, 1  ;;  %v9808_v5 = vor.u32 %v9807_v51, %v19661_v54  ;;  %s9955_s7 = smov [#allocation9]  }
 0x68d   :  { %v3548_v49 = vsel %vm3455_vm13, %v3546_v7, %v3547_v56  ;;  %s9038_s21 = sshll.u32 %s9955_s7, 4  ;;  %s9039_s21 = int_to_ptr.vmem [resolvable:$true] %s9038_s21 }
 0x68e   :  { %5404 = vrot.lane.b32.xlu1 %v19659_v0, %s9953_s30  ;;  %v6641_v21 = vpop.f32.mrf.mxu2  ;;  %v15496_v17 = vpop.permute.xlu0 %3604  ;;  %v4575_v58 = vsel %vm3455_vm13, %v4573_v23, %v4574_v4  ;;  %v5597_v56 = vrot.slane %v9808_v5, 1 }
 0x68f   :  { %v15513_v20 = vpop.permute.xlu2 %3828 }
 0x690   :  { %v6472_v16 = vpop.f32.mrf.mxu1  ;;  %v15482_v35 = vpop.permute.xlu1 %4626 }
 0x691   :  { %v15487_v24 = vadd.f32 %v6641_v21, %v6472_v16  ;;  %v5777_v16 = vsel %vm5729_vm6, %v5712_v40, %v15269_v41 }
 0x692   :  { %v5842_v38 = vsel %vm5794_vm7, %v5777_v16, %v15301_v8 }
 0x693   :  { %6511 = vmatmul.bf16.gmra.mxu1 %v5992_v25  ;;  %v5598_v25 = vrot.slane %v15452_v31, 1  ;;  %v5907_v41 = vsel %vm5859_vm8, %v5842_v38, %v15407_v50  ;;  %v6071_v31 = vsel %vm6021_vm2, %v15297_v12, %v15320_v15 }
 0x694   :  { %5406 = vrot.lane.b32.xlu2 %v5343_v62, %s9953_s30  ;;  %v5995_v51 = vsel %vm5924_vm9, %v5907_v41, %v15256_v37  ;;  %v6136_v50 = vsel %vm6086_vm1, %v6071_v31, %v15434_v1  ;;  %s9040_s30 = sshll.u32 %s18319_s11, 4  ;;  %s9041_s30 = int_to_ptr.hbm [resolvable:$true] %s9040_s30 }
 0x695   :  { %v5599_v10 = vsel %vm3455_vm13, %v5597_v56, %v5598_v25  ;;  %v6201_v15 = vsel %vm6151_vm3, %v6136_v50, %v15325_v36  ;;  %v19665_v56 = vld [vmem:[#allocation97_spill] sm:$0xff] }
 0x696   :  { %3612 = vrot.lane.b32.xlu1 %v3548_v49, %s9948_s2  ;;  %v6643_v27 = vpop.f32.mrf.mxu2  ;;  %v15523_v62 = vpop.permute.xlu0 %4630  ;;  %v5716_v25 = vsel %vm5664_vm5, %v19665_v56, %v15400_v34 }
 0x697   :  { %v15532_v8 = vpop.permute.xlu2 %4854  ;;  %v5781_v41 = vsel %vm5729_vm6, %v5716_v25, %v15424_v28 }
 0x698   :  { %v6474_v9 = vpop.f32.mrf.mxu1  ;;  %v5651_v0 = vpop.permute.xlu1 %5650 }
 0x699   :  { %v15506_v21 = vadd.f32 %v6643_v27, %v6474_v9  ;;  %v9722_v27 = vld [vmem:[#allocation2 + $0x138] sm:$0xff]  }
 0x69a   :  { %v5714_v42 = vsel %vm5664_vm5, %v9722_v27, %v15338_v19 }
 0x69b   :  { %19660 = vst [vmem:[#allocation211_spill] sm:$0xff] %v15506_v21  ;;  %9169 = vmatmul.msk.bf16.gmra.mxu2 %vm6324_vm4, %v6199_v11  ;;  %v5779_v9 = vsel %vm5729_vm6, %v5714_v42, %v15457_v26  ;;  %v19667_v42 = vld [vmem:[#allocation96_spill] sm:$0xff] }
 0x69c   :  { %3614 = vrot.lane.b32.xlu2 %v19662_v18, %s9948_s2  ;;  %v5844_v1 = vsel %vm5794_vm7, %v5779_v9, %v15351_v44  ;;  %v6073_v44 = vsel %vm6021_vm2, %v15482_v35, %v15371_v43 }
 0x69d   :  { %v5909_v23 = vsel %vm5859_vm8, %v5844_v1, %v15364_v29  ;;  %v6138_v38 = vsel %vm6086_vm1, %v6073_v44, %v15387_v22 }
 0x69e   :  { %4638 = vrot.lane.b32.xlu1 %v4575_v58, %s9952_s29  ;;  %v6646_v30 = vpop.f32.mrf.mxu2  ;;  %v15542_v40 = vpop.permute.xlu0 %5654  ;;  %v5998_v36 = vsel %vm5924_vm9, %v5909_v23, %v15297_v12  ;;  %v6203_v12 = vsel %vm6151_vm3, %v6138_v38, %v5651_v0  ;;  %v19668_v38 = vld [vmem:[#allocation163_spill] sm:$0xff] }
 0x69f   :  { %v3350_v11 = vpop.permute.xlu2 %3349 }
 0x6a0   :  { %v6477_v7 = vpop.f32.mrf.mxu1  ;;  %v3827_v48 = vpop.permute.xlu1 %3826 }
 0x6a1   :  { %v15527_v61 = vadd.f32 %v6646_v30, %v6477_v7  ;;  %v5846_v43 = vsel %vm5794_vm7, %v5781_v41, %v3827_v48 }
 0x6a2   :  { %v5911_v22 = vsel %vm5859_vm8, %v5846_v43, %v15437_v57 }
 0x6a3   :  { %19663 = vst [vmem:[#allocation157_spill] sm:$0xff] %v15527_v61  ;;  %6516 = vmatmul.bf16.gmra.mxu1 %v5995_v51  ;;  %v6001_v34 = vsel %vm5924_vm9, %v5911_v22, %v15482_v35 }
 0x6a6   :  { %5662 = vrot.lane.b32.xlu1 %v5599_v10, %s9942_s25  ;;  %v6648_v49 = vpop.f32.mrf.mxu2  ;;  %v3831_v16 = vpop.permute.xlu0 %3830 }
 0x6a7   :  { %v4375_v29 = vpop.permute.xlu2 %4374 }
 0x6a8   :  { %v6479_v37 = vpop.f32.mrf.mxu1  ;;  %v4853_v47 = vpop.permute.xlu1 %4852 }
 0x6a9   :  { %v15546_v4 = vadd.f32 %v6648_v49, %v6479_v37  ;;  %v6075_v28 = vsel %vm6021_vm2, %v15455_v46, %v4853_v47 }
 0x6aa   :  { %v6140_v48 = vsel %vm6086_vm1, %v6075_v28, %v15469_v59 }
 0x6ab   :  { %9170 = vmatmul.msk.bf16.gmra.mxu2 %vm6324_vm4, %v6201_v15  ;;  %v6205_v35 = vsel %vm6151_vm3, %v6140_v48, %v15485_v52 }
 0x6ae   :  { %3838 = vrot.lane.b32.xlu1 %v15426_v45, %s9950_s27  ;;  %v6651_v19 = vpop.f32.mrf.mxu2  ;;  %v4857_v7 = vpop.permute.xlu0 %4856 }
 0x6af   :  { %v5401_v0 = vpop.permute.xlu2 %5400 }
 0x6b0   :  { %v6482_v54 = vpop.f32.mrf.mxu1  ;;  %v3348_v26 = vpop.permute.xlu1 %3347 }
 0x6b1   :  { %v15557_v5 = vadd.f32 %v6651_v19, %v6482_v54  ;;  %v5718_v57 = vsel %vm5664_vm5, %v19667_v42, %v3348_v26 }
 0x6b2   :  { %v5783_v1 = vsel %vm5729_vm6, %v5718_v57, %v15496_v17  ;;  %v6077_v17 = vsel %vm6021_vm2, %v15523_v62, %v15532_v8 }
 0x6b3   :  { %6521 = vmatmul.bf16.gmra.mxu1 %v5998_v36  ;;  %v5848_v19 = vsel %vm5794_vm7, %v5783_v1, %v15513_v20 }
 0x6b6   :  { %v6653_v58 = vpop.f32.mrf.mxu2  ;;  %v3352_v27 = vpop.permute.xlu0 %3351 }
 0x6b7   :  { %v3609_v47 = vpop.permute.xlu2 %3608 }
 0x6b8   :  { %v6484_v45 = vpop.f32.mrf.mxu1  ;;  %v4373_v18 = vpop.permute.xlu1 %4372 }
 0x6b9   :  { %v15566_v30 = vadd.f32 %v6653_v58, %v6484_v45  ;;  %v5913_v23 = vsel %vm5859_vm8, %v5848_v19, %v4373_v18  ;;  %v5720_v18 = vsel %vm5664_vm5, %v19668_v38, %v3350_v11 }
 0x6ba   :  { %v6004_v52 = vsel %vm5924_vm9, %v5913_v23, %v15455_v46 }
 0x6bb   :  { %19664 = vst [vmem:[#allocation146_spill] sm:$0xff] %v15566_v30  ;;  %9171 = vmatmul.msk.bf16.gmra.mxu2 %vm6324_vm4, %v6203_v12 }
 0x6be   :  { %v6656_v51 = vpop.f32.mrf.mxu2  ;;  %v4377_v36 = vpop.permute.xlu0 %4376 }
 0x6bf   :  { %v4635_v45 = vpop.permute.xlu2 %4634 }
 0x6c0   :  { %v6487_v10 = vpop.f32.mrf.mxu1  ;;  %v5399_v31 = vpop.permute.xlu1 %5398 }
 0x6c1   :  { %v15578_v49 = vadd.f32 %v6656_v51, %v6487_v10  ;;  %v6142_v20 = vsel %vm6086_vm1, %v6077_v17, %v5399_v31 }
 0x6c2   :  { %v6207_v46 = vsel %vm6151_vm3, %v6142_v20, %v15542_v40 }
 0x6c3   :  { %19666 = vst [vmem:[#allocation193_spill] sm:$0xff] %v15578_v49  ;;  %6526 = vmatmul.bf16.gmra.mxu1 %v6001_v34 }
 0x6c6   :  { %v6658_v50 = vpop.f32.mrf.mxu2  ;;  %v5403_v43 = vpop.permute.xlu0 %5402 }
 0x6c7   :  { %v5659_v11 = vpop.permute.xlu2 %5658 }
 0x6c8   :  { %v6489_v37 = vpop.f32.mrf.mxu1  ;;  %v3607_v9 = vpop.permute.xlu1 %3606 }
 0x6c9   :  { %v15588_v15 = vadd.f32 %v6658_v50, %v6489_v37  ;;  %v5785_v12 = vsel %vm5729_vm6, %v5720_v18, %v3607_v9 }
 0x6ca   :  { %v5850_v8 = vsel %vm5794_vm7, %v5785_v12, %v3831_v16 }
 0x6cb   :  { %9172 = vmatmul.msk.bf16.gmra.mxu2 %vm6324_vm4, %v6205_v35  ;;  %v5915_v22 = vsel %vm5859_vm8, %v5850_v8, %v4375_v29  ;;  %v19670_v29 = vld [vmem:[#allocation164_spill] sm:$0xff] }
 0x6cc   :  { %v6007_v28 = vsel %vm5924_vm9, %v5915_v22, %v15523_v62  ;;  %v5722_v9 = vsel %vm5664_vm5, %v19670_v29, %v3352_v27 }
 0x6cd   :  { %v5787_v1 = vsel %vm5729_vm6, %v5722_v9, %v3609_v47 }
 0x6ce   :  { %v6661_v59 = vpop.f32.mrf.mxu2  ;;  %v3611_v50 = vpop.permute.xlu0 %3610 }
 0x6cf   :  { %v3835_v19 = vpop.permute.xlu2 %3834 }
 0x6d0   :  { %v6492_v54 = vpop.f32.mrf.mxu1  ;;  %v4633_v26 = vpop.permute.xlu1 %4632 }
 0x6d1   :  { %v15598_v44 = vadd.f32 %v6661_v59, %v6492_v54  ;;  %v6079_v40 = vsel %vm6021_vm2, %v4633_v26, %v4857_v7 }
 0x6d2   :  { %v6144_v16 = vsel %vm6086_vm1, %v6079_v40, %v5401_v0 }
 0x6d3   :  { %6531 = vmatmul.bf16.gmra.mxu1 %v6004_v52 }
 0x6d6   :  { %v6663_v58 = vpop.f32.mrf.mxu2  ;;  %v4637_v59 = vpop.permute.xlu0 %4636 }
 0x6d8   :  { %v6494_v56 = vpop.f32.mrf.mxu1  ;;  %v5657_v25 = vpop.permute.xlu1 %5656 }
 0x6d9   :  { %v15609_v41 = vadd.f32 %v6663_v58, %v6494_v56  ;;  %v6209_v35 = vsel %vm6151_vm3, %v6144_v16, %v5657_v25  ;;  %v4861_v58 = vpop.permute.xlu2 %4860 }
 0x6db   :  { %9173 = vmatmul.msk.bf16.gmra.mxu2 %vm6324_vm4, %v6207_v46 }
 0x6de   :  { %v6666_v51 = vpop.f32.mrf.mxu2  ;;  %v5661_v56 = vpop.permute.xlu0 %5660 }
 0x6e0   :  { %v6497_v10 = vpop.f32.mrf.mxu1  ;;  %v3833_v31 = vpop.permute.xlu1 %3832 }
 0x6e1   :  { %v15616_v34 = vadd.f32 %v6666_v51, %v6497_v10  ;;  %v5852_v62 = vsel %vm5794_vm7, %v5787_v1, %v3833_v31  ;;  %v3356_v8 = vpop.permute.xlu2 %3355 }
 0x6e2   :  { %v5917_v23 = vsel %vm5859_vm8, %v5852_v62, %v4377_v36  ;;  %v5726_v40 = vsel %vm5664_vm5, %v15389_v55, %v3356_v8 }
 0x6e3   :  { %6536 = vmatmul.bf16.gmra.mxu1 %v6007_v28  ;;  %v6010_v17 = vsel %vm5924_vm9, %v5917_v23, %v4633_v26 }
 0x6e6   :  { %v6668_v48 = vpop.f32.mrf.mxu2  ;;  %v3837_v31 = vpop.permute.xlu0 %3836 }
 0x6e8   :  { %v6499_v42 = vpop.f32.mrf.mxu1  ;;  %v4859_v57 = vpop.permute.xlu1 %4858 }
 0x6e9   :  { %v15622_v37 = vadd.f32 %v6668_v48, %v6499_v42  ;;  %v6081_v27 = vsel %vm6021_vm2, %v4635_v45, %v4859_v57  ;;  %v4381_v57 = vpop.permute.xlu2 %4380 }
 0x6ea   :  { %v6146_v20 = vsel %vm6086_vm1, %v6081_v27, %v5403_v43 }
 0x6eb   :  { %19669 = vst [vmem:[#allocation92_spill] sm:$0xff] %v15622_v37  ;;  %9174 = vmatmul.msk.bf16.gmra.mxu2 %vm6324_vm4, %v6209_v35  ;;  %v6211_v25 = vsel %vm6151_vm3, %v6146_v20, %v5659_v11  ;;  %v6083_v11 = vsel %vm6021_vm2, %v4637_v59, %v4861_v58 }
 0x6ee   :  { %v6671_v7 = vpop.f32.mrf.mxu2  ;;  %v4863_v9 = vpop.permute.xlu0 %4862 }
 0x6f0   :  { %v6502_v54 = vpop.f32.mrf.mxu1  ;;  %v3354_v0 = vpop.permute.xlu1 %3353 }
 0x6f1   :  { %v15631_v52 = vadd.f32 %v6671_v7, %v6502_v54  ;;  %v5724_v38 = vsel %vm5664_vm5, %v19654_v39, %v3354_v0  ;;  %v5407_v23 = vpop.permute.xlu2 %5406 }
 0x6f2   :  { %v5789_v12 = vsel %vm5729_vm6, %v5724_v38, %v3611_v50 }
 0x6f3   :  { %6541 = vmatmul.bf16.gmra.mxu1 %v6010_v17  ;;  %v5854_v26 = vsel %vm5794_vm7, %v5789_v12, %v3835_v19  ;;  %v19673_v12 = vld [vmem:[#allocation188_spill] sm:$0xff] }
 0x6f6   :  { %v15635_v47 = vpop.f32.mrf.mxu2  ;;  %v3358_v17 = vpop.permute.xlu0 %3357 }
 0x6f8   :  { %v15640_v18 = vpop.f32.mrf.mxu1  ;;  %v4379_v36 = vpop.permute.xlu1 %4378 }
 0x6f9   :  { %v5919_v51 = vsel %vm5859_vm8, %v5854_v26, %v4379_v36 }
 0x6fa   :  { %v6013_v39 = vsel %vm5924_vm9, %v5919_v51, %v4635_v45 }
 0x6fb   :  { %9175 = vmatmul.msk.bf16.gmra.mxu2 %vm6324_vm4, %v6211_v25 }
 0x6fe   :  { %v6676_v46 = vpop.f32.mrf.mxu2  ;;  %v4383_v51 = vpop.permute.xlu0 %4382 }
 0x700   :  { %v6507_v43 = vpop.f32.mrf.mxu1  ;;  %v5405_v22 = vpop.permute.xlu1 %5404 }
 0x701   :  { %v15647_v10 = vadd.f32 %v6676_v46, %v6507_v43  ;;  %v6148_v50 = vsel %vm6086_vm1, %v6083_v11, %v5405_v22 }
 0x702   :  { %v6213_v29 = vsel %vm6151_vm3, %v6148_v50, %v5661_v56  ;;  %v3615_v56 = vpop.permute.xlu2 %3614 }
 0x703   :  { %19671 = vst [vmem:[#allocation183_spill] sm:$0xff] %v15647_v10  ;;  %6546 = vmatmul.bf16.gmra.mxu1 %v6013_v39 }
 0x706   :  { %v15651_v28 = vpop.f32.mrf.mxu2 }
 0x708   :  { %v15656_v48 = vpop.f32.mrf.mxu1  ;;  %v3613_v42 = vpop.permute.xlu1 %3612 }
 0x709   :  { %v5791_v16 = vsel %vm5729_vm6, %v5726_v40, %v3613_v42  ;;  %v19675_v42 = vld [vmem:[#allocation196_spill] sm:$0xff] }
 0x70a   :  { %v5856_v45 = vsel %vm5794_vm7, %v5791_v16, %v3837_v31 }
 0x70b   :  { %9176 = vmatmul.msk.bf16.gmra.mxu2 %vm6324_vm4, %v6213_v29  ;;  %v5921_v1 = vsel %vm5859_vm8, %v5856_v45, %v4381_v57  ;;  %v19676_v57 = vld [vmem:[#allocation89_spill] sm:$0xff]  ;;  %v19677_v29 = vld [vmem:[#allocation200_spill] sm:$0xff] }
 0x70c   :  { %v6016_v55 = vsel %vm5924_vm9, %v5921_v1, %v4637_v59  ;;  %v5728_v59 = vsel %vm5664_vm5, %v19673_v12, %v3358_v17  ;;  %v15684_v16 = vadd.f32 %v19676_v57, %v19675_v42  ;;  %v19678_v45 = vld [vmem:[#allocation105_spill] sm:$0xff]  ;;  %v19680_v17 = vld [vmem:[#allocation134_spill] sm:$0xff] }
 0x70d   :  { %v5793_v26 = vsel %vm5729_vm6, %v5728_v59, %v3615_v56  ;;  %v19685_v42 = vld [vmem:[#allocation189_spill] sm:$0xff] }
 0x70e   :  { %v6681_v35 = vpop.f32.mrf.mxu2  ;;  %v6748_v57 = vsel %vm5664_vm5, %v19685_v42, 0.0 }
 0x710   :  { %v6512_v19 = vpop.f32.mrf.mxu1  ;;  %v4639_v62 = vpop.permute.xlu1 %4638 }
 0x711   :  { %v15663_v7 = vadd.f32 %v6681_v35, %v6512_v19  ;;  %v6085_v54 = vsel %vm6021_vm2, %v4639_v62, %v4863_v9  ;;  %v15688_v9 = vadd.f32 %v19678_v45, %v19677_v29  ;;  %v6734_v35 = vsel %vm5664_vm5, %v15684_v16, 0.0  ;;  %v19686_v45 = vld [vmem:[#allocation177_spill] sm:$0xff] }
 0x712   :  { %v6150_v58 = vsel %vm6086_vm1, %v6085_v54, %v5407_v23 }
 0x713   :  { %6551 = vmatmul.bf16.gmra.mxu1 %v6016_v55  ;;  %v6733_v19 = vsel %vm5664_vm5, %v15688_v9, 0.0 }
 0x714   :  { %v6735_v54 = vadd.f32 %v6734_v35, %v6733_v19  ;;  %v6750_v35 = vsel %vm5664_vm5, %v19686_v45, 0.0 }
 0x716   :  { %v6683_v0 = vpop.f32.mrf.mxu2 }
 0x718   :  { %v6514_v27 = vpop.f32.mrf.mxu1  ;;  %v5663_v20 = vpop.permute.xlu1 %5662 }
 0x719   :  { %v15668_v38 = vadd.f32 %v6683_v0, %v6514_v27  ;;  %v6215_v36 = vsel %vm6151_vm3, %v6150_v58, %v5663_v20  ;;  %v6738_v27 = vsel %vm5664_vm5, %v19680_v17, 0.0  ;;  %v19681_v20 = vld [vmem:[#allocation203_spill] sm:$0xff] }
 0x71b   :  { %19672 = vst [vmem:[#allocation208_spill] sm:$0xff] %v15668_v38  ;;  %9177 = vmatmul.msk.bf16.gmra.mxu2 %vm6324_vm4, %v6215_v36  ;;  %v6740_v36 = vsel %vm5664_vm5, %v19681_v20, 0.0 }
 0x71e   :  { %v6686_v25 = vpop.f32.mrf.mxu2 }
 0x720   :  { %v6517_v46 = vpop.f32.mrf.mxu1  ;;  %v3839_v8 = vpop.permute.xlu1 %3838 }
 0x721   :  { %v15675_v43 = vadd.f32 %v6686_v25, %v6517_v46  ;;  %v5858_v22 = vsel %vm5794_vm7, %v5793_v26, %v3839_v8  ;;  %v19682_v25 = vld [vmem:[#allocation152_spill] sm:$0xff]  ;;  %v19683_v46 = vld [vmem:[#allocation113_spill] sm:$0xff] }
 0x722   :  { %v5923_v39 = vsel %vm5859_vm8, %v5858_v22, %v4383_v51  ;;  %v6742_v12 = vsel %vm5664_vm5, %v19682_v25, 0.0  ;;  %v6744_v8 = vsel %vm5664_vm5, %v19683_v46, 0.0 }
 0x723   :  { %19674 = vst [vmem:[#allocation123_spill] sm:$0xff] %v15675_v43  ;;  %v6019_v31 = vsel %vm5924_vm9, %v5923_v39, %v4639_v62  ;;  %v19679_v62 = vld [vmem:[#allocation83_spill] sm:$0xff] }
 0x724   :  { %6556 = vmatmul.bf16.gmra.mxu1 %v6019_v31  ;;  %v6736_v55 = vsel %vm5664_vm5, %v19679_v62, 0.0  ;;  %v19684_v31 = vld [vmem:[#allocation91_spill] sm:$0xff] }
 0x725   :  { %v6737_v58 = vadd.f32 %v6736_v55, %v6735_v54  ;;  %v19687_v55 = vld [vmem:[#allocation184_spill] sm:$0xff] }
 0x726   :  { %v6688_v11 = vpop.f32.mrf.mxu2 }
 0x727   :  { %v6739_v56 = vadd.f32 %v6738_v27, %v6737_v58 }
 0x728   :  { %v6519_v50 = vpop.f32.mrf.mxu1 }
 0x729   :  { %v15680_v40 = vadd.f32 %v6688_v11, %v6519_v50  ;;  %v6741_v26 = vadd.f32 %v6740_v36, %v6739_v56  ;;  %v6746_v11 = vsel %vm5664_vm5, %v19684_v31, 0.0  ;;  %v19688_v36 = vld [vmem:[#allocation198_spill] sm:$0xff] }
 0x72a   :  { %v6754_v56 = vsel %vm5664_vm5, %v19688_v36, 0.0 }
 0x72b   :  { %v6743_v22 = vadd.f32 %v6742_v12, %v6741_v26 }
 0x72d   :  { %v6745_v50 = vadd.f32 %v6744_v8, %v6743_v22 }
 0x72e   :  { %v6691_v1 = vpop.f32.mrf.mxu2 }
 0x72f   :  { %v6747_v29 = vadd.f32 %v6746_v11, %v6745_v50 }
 0x730   :  { %v6522_v23 = vpop.f32.mrf.mxu1 }
 0x731   :  { %v15696_v0 = vadd.f32 %v6691_v1, %v6522_v23  ;;  %v6749_v19 = vadd.f32 %v6748_v57, %v6747_v29  ;;  %v6752_v23 = vsel %vm5664_vm5, %v19687_v55, 0.0  ;;  %v19691_v57 = vld [vmem:[#allocation165_spill] sm:$0xff] }
 0x732   :  { %v6760_v29 = vsel %vm5664_vm5, %v19691_v57, 0.0 }
 0x733   :  { %v6751_v27 = vadd.f32 %v6750_v35, %v6749_v19  ;;  %v19692_v19 = vld [vmem:[#allocation153_spill] sm:$0xff] }
 0x735   :  { %v6753_v12 = vadd.f32 %v6752_v23, %v6751_v27  ;;  %v19693_v27 = vld [vmem:[#allocation182_spill] sm:$0xff] }
 0x736   :  { %v6693_v59 = vpop.f32.mrf.mxu2 }
 0x737   :  { %v6755_v8 = vadd.f32 %v6754_v56, %v6753_v12  ;;  %v19694_v12 = vld [vmem:[#allocation107_spill] sm:$0xff] }
 0x738   :  { %v6524_v51 = vpop.f32.mrf.mxu1 }
 0x739   :  { %v15706_v39 = vadd.f32 %v6693_v59, %v6524_v51  ;;  %v19689_v59 = vld [vmem:[#allocation122_spill] sm:$0xff]  ;;  %v19690_v51 = vld [vmem:[#allocation81_spill] sm:$0xff] }
 0x73a   :  { %v6756_v26 = vsel %vm5664_vm5, %v19689_v59, 0.0  ;;  %v6758_v22 = vsel %vm5664_vm5, %v19690_v51, 0.0  ;;  %v6764_v59 = vsel %vm5664_vm5, %v19693_v27, 0.0  ;;  %v6766_v51 = vsel %vm5664_vm5, %v19694_v12, 0.0 }
 0x73b   :  { %v6757_v50 = vadd.f32 %v6756_v26, %v6755_v8  ;;  %v6768_v8 = vsel %vm5664_vm5, %v15262_v32, 0.0 }
 0x73d   :  { %v6759_v35 = vadd.f32 %v6758_v22, %v6757_v50 }
 0x73e   :  { %v6696_v1 = vpop.f32.mrf.mxu2 }
 0x73f   :  { %v6761_v23 = vadd.f32 %v6760_v29, %v6759_v35  ;;  %v6772_v29 = vsel %vm5664_vm5, %v15307_v6, 0.0 }
 0x740   :  { %v6527_v54 = vpop.f32.mrf.mxu1 }
 0x741   :  { %v15716_v58 = vadd.f32 %v6696_v1, %v6527_v54  ;;  %v6762_v54 = vsel %vm5664_vm5, %v19692_v19, 0.0 }
 0x742   :  { %v6763_v56 = vadd.f32 %v6762_v54, %v6761_v23  ;;  %v6774_v54 = vsel %vm5664_vm5, %v15327_v3, 0.0 }
 0x744   :  { %v6765_v26 = vadd.f32 %v6764_v59, %v6763_v56  ;;  %v6776_v56 = vsel %vm5664_vm5, %v15347_v13, 0.0 }
 0x746   :  { %v6698_v11 = vpop.f32.mrf.mxu2  ;;  %v6767_v22 = vadd.f32 %v6766_v51, %v6765_v26 }
 0x748   :  { %v6529_v55 = vpop.f32.mrf.mxu1  ;;  %v6769_v50 = vadd.f32 %v6768_v8, %v6767_v22  ;;  %v6780_v8 = vsel %vm5664_vm5, %v15383_v2, 0.0 }
 0x749   :  { %v15726_v1 = vadd.f32 %v6698_v11, %v6529_v55  ;;  %v6770_v11 = vsel %vm5664_vm5, %v15280_v63, 0.0 }
 0x74a   :  { %v6771_v35 = vadd.f32 %v6770_v11, %v6769_v50  ;;  %v6782_v11 = vsel %vm5664_vm5, %v15413_v33, 0.0 }
 0x74c   :  { %v6773_v59 = vadd.f32 %v6772_v29, %v6771_v35  ;;  %v6784_v35 = vsel %vm5664_vm5, %v15439_v14, 0.0 }
 0x74e   :  { %v6701_v36 = vpop.f32.mrf.mxu2 }
 0x750   :  { %v6532_v57 = vpop.f32.mrf.mxu1 }
 0x751   :  { %v15736_v55 = vadd.f32 %v6701_v36, %v6532_v57  ;;  %v6775_v36 = vadd.f32 %v6774_v54, %v6773_v59  ;;  %v6778_v57 = vsel %vm5664_vm5, %v15366_v53, 0.0  ;;  %v6786_v59 = vsel %vm5664_vm5, %v15463_v60, 0.0 }
 0x753   :  { %v6777_v26 = vadd.f32 %v6776_v56, %v6775_v36  ;;  %v6788_v36 = vsel %vm5664_vm5, %v15487_v24, 0.0 }
 0x755   :  { %v6779_v22 = vadd.f32 %v6778_v57, %v6777_v26  ;;  %v6790_v26 = vsel %vm5664_vm5, %v15506_v21, 0.0 }
 0x756   :  { %v15744_v23 = vpop.f32.mrf.mxu2 }
 0x757   :  { %v6781_v29 = vadd.f32 %v6780_v8, %v6779_v22  ;;  %v6792_v22 = vsel %vm5664_vm5, %v15527_v61, 0.0 }
 0x758   :  { %v15748_v51 = vpop.f32.mrf.mxu1 }
 0x759   :  { %v6783_v54 = vadd.f32 %v6782_v11, %v6781_v29  ;;  %v6794_v11 = vsel %vm5664_vm5, %v15546_v4, 0.0 }
 0x75b   :  { %v6785_v56 = vadd.f32 %v6784_v35, %v6783_v54  ;;  %v6796_v35 = vsel %vm5664_vm5, %v15557_v5, 0.0 }
 0x75d   :  { %v6787_v57 = vadd.f32 %v6786_v59, %v6785_v56  ;;  %v6798_v59 = vsel %vm5664_vm5, %v15566_v30, 0.0 }
 0x75e   :  { %v15756_v50 = vpop.f32.mrf.mxu2 }
 0x75f   :  { %v6789_v8 = vadd.f32 %v6788_v36, %v6787_v57  ;;  %v6800_v36 = vsel %vm5664_vm5, %v15578_v49, 0.0 }
 0x760   :  { %v15760_v13 = vpop.f32.mrf.mxu1 }
 0x761   :  { %v6791_v2 = vadd.f32 %v6790_v26, %v6789_v8  ;;  %v6802_v26 = vsel %vm5664_vm5, %v15588_v15, 0.0 }
 0x763   :  { %v6793_v29 = vadd.f32 %v6792_v22, %v6791_v2  ;;  %v6804_v2 = vsel %vm5664_vm5, %v15598_v44, 0.0 }
 0x765   :  { %v6795_v54 = vadd.f32 %v6794_v11, %v6793_v29  ;;  %v6806_v11 = vsel %vm5664_vm5, %v15609_v41, 0.0 }
 0x766   :  { %v15768_v33 = vpop.f32.mrf.mxu2 }
 0x767   :  { %v6797_v21 = vadd.f32 %v6796_v35, %v6795_v54  ;;  %v6808_v35 = vsel %vm5664_vm5, %v15616_v34, 0.0 }
 0x768   :  { %v6539_v14 = vpop.f32.mrf.mxu1 }
 0x769   :  { %v6799_v61 = vadd.f32 %v6798_v59, %v6797_v21  ;;  %v6810_v21 = vsel %vm5664_vm5, %v15622_v37, 0.0 }
 0x76b   :  { %v6801_v8 = vadd.f32 %v6800_v36, %v6799_v61  ;;  %v15792_v61 = vadd.f32 %v15635_v47, %v15640_v18  ;;  %v6812_v36 = vsel %vm5664_vm5, %v15631_v52, 0.0 }
 0x76d   :  { %v6803_v22 = vadd.f32 %v6802_v26, %v6801_v8  ;;  %v6814_v8 = vsel %vm5664_vm5, %v15792_v61, 0.0 }
 0x76e   :  { %v6711_v56 = vpop.f32.mrf.mxu2 }
 0x76f   :  { %v6805_v30 = vadd.f32 %v6804_v2, %v6803_v22  ;;  %v15800_v2 = vadd.f32 %v15651_v28, %v15656_v48 }
 0x770   :  { %v6542_v57 = vpop.f32.mrf.mxu1 }
 0x771   :  { %v6807_v49 = vadd.f32 %v6806_v11, %v6805_v30  ;;  %v6816_v11 = vsel %vm5664_vm5, %v15647_v10, 0.0 }
 0x773   :  { %v6809_v59 = vadd.f32 %v6808_v35, %v6807_v49  ;;  %v6818_v49 = vsel %vm5664_vm5, %v15800_v2, 0.0  ;;  %v6820_v35 = vsel %vm5664_vm5, %v15663_v7, 0.0 }
 0x775   :  { %v6811_v26 = vadd.f32 %v6810_v21, %v6809_v59  ;;  %v6822_v59 = vsel %vm5664_vm5, %v15668_v38, 0.0 }
 0x776   :  { %v6713_v29 = vpop.f32.mrf.mxu2 }
 0x777   :  { %v6813_v22 = vadd.f32 %v6812_v36, %v6811_v26  ;;  %v6824_v36 = vsel %vm5664_vm5, %v15675_v43, 0.0 }
 0x778   :  { %v6544_v54 = vpop.f32.mrf.mxu1 }
 0x779   :  { %v6815_v47 = vadd.f32 %v6814_v8, %v6813_v22  ;;  %v6826_v8 = vsel %vm5664_vm5, %v15680_v40, 0.0 }
 0x77b   :  { %v6817_v18 = vadd.f32 %v6816_v11, %v6815_v47  ;;  %v6828_v11 = vsel %vm5664_vm5, %v15696_v0, 0.0 }
 0x77d   :  { %v6819_v21 = vadd.f32 %v6818_v49, %v6817_v18  ;;  %v6830_v49 = vsel %vm5664_vm5, %v15706_v39, 0.0 }
 0x77e   :  { %v6716_v30 = vpop.f32.mrf.mxu2 }
 0x77f   :  { %v6821_v48 = vadd.f32 %v6820_v35, %v6819_v21  ;;  %v6832_v35 = vsel %vm5664_vm5, %v15716_v58, 0.0 }
 0x780   :  { %v6547_v37 = vpop.f32.mrf.mxu1 }
 0x781   :  { %v6823_v10 = vadd.f32 %v6822_v59, %v6821_v48  ;;  %v6834_v59 = vsel %vm5664_vm5, %v15726_v1, 0.0 }
 0x783   :  { %v6825_v22 = vadd.f32 %v6824_v36, %v6823_v10  ;;  %v15824_v10 = vadd.f32 %v15744_v23, %v15748_v51  ;;  %v6836_v36 = vsel %vm5664_vm5, %v15736_v55, 0.0 }
 0x785   :  { %v6827_v47 = vadd.f32 %v6826_v8, %v6825_v22  ;;  %v15830_v8 = vadd.f32 %v15756_v50, %v15760_v13  ;;  %v15843_v50 = vadd.f32 %v6713_v29, %v6544_v54 }
 0x786   :  { %v6718_v28 = vpop.f32.mrf.mxu2 }
 0x787   :  { %v6829_v38 = vadd.f32 %v6828_v11, %v6827_v47  ;;  %v6838_v11 = vsel %vm5664_vm5, %v15824_v10, 0.0  ;;  %v6840_v23 = vsel %vm5664_vm5, %v15830_v8, 0.0  ;;  %19696 = vst [vmem:[#allocation209_spill] sm:$0xff] %v15843_v50 }
 0x788   :  { %v6549_v26 = vpop.f32.mrf.mxu1 }
 0x789   :  { %v6831_v43 = vadd.f32 %v6830_v49, %v6829_v38  ;;  %v15835_v38 = vadd.f32 %v15768_v33, %v6539_v14  ;;  %v15847_v33 = vadd.f32 %v6716_v30, %v6547_v37 }
 0x78b   :  { %v6833_v48 = vadd.f32 %v6832_v35, %v6831_v43  ;;  %19695 = vst [vmem:[#allocation90_spill] sm:$0xff] %v15835_v38  ;;  %v15839_v43 = vadd.f32 %v6711_v56, %v6542_v57  ;;  %v6842_v13 = vsel %vm5664_vm5, %v15835_v38, 0.0 }
 0x78c   :  { %19697 = vst [vmem:[#allocation79_spill] sm:$0xff] %v15847_v33 }
 0x78d   :  { %v6835_v22 = vadd.f32 %v6834_v59, %v6833_v48  ;;  %v6844_v48 = vsel %vm5664_vm5, %v15839_v43, 0.0 }
 0x78e   :  { %v6721_v18 = vpop.f32.mrf.mxu2 }
 0x78f   :  { %v6837_v49 = vadd.f32 %v6836_v36, %v6835_v22  ;;  %v6846_v36 = vsel %vm5664_vm5, %v15843_v50, 0.0  ;;  %v6719_v22 = vadd.f32 %v6718_v28, %v6549_v26 }
 0x790   :  { %v6552_v21 = vpop.f32.mrf.mxu1 }
 0x791   :  { %v6839_v35 = vadd.f32 %v6838_v11, %v6837_v49  ;;  %v6848_v11 = vsel %vm5664_vm5, %v15847_v33, 0.0  ;;  %v6722_v49 = vadd.f32 %v6721_v18, %v6552_v21  ;;  %v6850_v54 = vsel %vm5664_vm5, %v6719_v22, 0.0 }
 0x793   :  { %v6841_v59 = vadd.f32 %v6840_v23, %v6839_v35  ;;  %v6852_v37 = vsel %vm5664_vm5, %v6722_v49, 0.0 }
 0x795   :  { %v6843_v14 = vadd.f32 %v6842_v13, %v6841_v59 }
 0x796   :  { %v6723_v47 = vpop.f32.mrf.mxu2 }
 0x797   :  { %v6845_v56 = vadd.f32 %v6844_v48, %v6843_v14 }
 0x798   :  { %v6554_v51 = vpop.f32.mrf.mxu1 }
 0x799   :  { %v6847_v38 = vadd.f32 %v6846_v36, %v6845_v56  ;;  %v6724_v23 = vadd.f32 %v6723_v47, %v6554_v51 }
 0x79b   :  { %v6849_v35 = vadd.f32 %v6848_v11, %v6847_v38  ;;  %v6854_v59 = vsel %vm5664_vm5, %v6724_v23, 0.0 }
 0x79d   :  { %v6851_v13 = vadd.f32 %v6850_v54, %v6849_v35 }
 0x79e   :  { %v6726_v57 = vpop.f32.mrf.mxu2 }
 0x79f   :  { %v6853_v50 = vadd.f32 %v6852_v37, %v6851_v13 }
 0x7a1   :  { %v6557_v29 = vpop.f32.mrf.mxu1  ;;  %v6855_v26 = vadd.f32 %v6854_v59, %v6853_v50 }
 0x7a2   :  { %v6727_v30 = vadd.f32 %v6726_v57, %v6557_v29  ;;  %v19698_v29 = vld [vmem:[#allocation95_spill] sm:$0xff] }
 0x7a4   :  { %v6856_v28 = vsel %vm5664_vm5, %v6727_v30, 0.0 }
 0x7a5   :  { %v6857_v18 = vadd.f32 %v6856_v28, %v6855_v26 }
 0x7a6   :  { %v6728_v48 = vpop.f32.mrf.mxu2 }
 0x7a9   :  { %v6559_v14 = vpop.f32.mrf.mxu1 }
 0x7aa   :  { %v6729_v33 = vadd.f32 %v6728_v48, %v6559_v14 }
 0x7ac   :  { %v6858_v21 = vsel %vm5664_vm5, %v6729_v33, 0.0 }
 0x7ad   :  { %v6859_v36 = vadd.f32 %v6858_v21, %v6857_v18 }
 0x7af   :  { %v6860_v56 = vrot.slane %v6859_v36, 4 }
 0x7b1   :  { %v6861_v47 = vadd.f32 %v6860_v56, %v6859_v36 }
 0x7b3   :  { %v6862_v38 = vrot.slane %v6861_v47, 2 }
 0x7b5   :  { %v6863_v51 = vadd.f32 %v6862_v38, %v6861_v47 }
 0x7b7   :  { %v6864_v11 = vrot.slane %v6863_v51, 1 }
 0x7b9   :  { %v6865_v57 = vadd.f32 %v6864_v11, %v6863_v51 }
 0x7bb   :  { %v15859_v54 = vmul.f32 %v6865_v57, %v19698_v29 }
 0x7bd   :  { %v15862_v35 = vsub.f32 %v6719_v22, %v15859_v54  ;;  %v15865_v50 = vsub.f32 %v6722_v49, %v15859_v54  ;;  %v15868_v37 = vsub.f32 %v6724_v23, %v15859_v54  ;;  %v15871_v13 = vsub.f32 %v6727_v30, %v15859_v54 }
 0x7be   :  { %v15874_v59 = vsub.f32 %v6729_v33, %v15859_v54  ;;  %v15878_v28 = vsub.f32 %v15688_v9, %v15859_v54  ;;  %v15882_v22 = vsub.f32 %v15684_v16, %v15859_v54  ;;  %v15886_v49 = vsub.f32 %v19679_v62, %v15859_v54 }
 0x7bf   :  { %19699 = vst [vmem:[#allocation155_spill] sm:$0xff] %v15862_v35  ;;  %v15890_v23 = vsub.f32 %v19680_v17, %v15859_v54  ;;  %v15898_v9 = vsub.f32 %v19681_v20, %v15859_v54  ;;  %v15904_v62 = vsub.f32 %v19682_v25, %v15859_v54  ;;  %v15912_v18 = vsub.f32 %v19683_v46, %v15859_v54 }
 0x7c0   :  { %19700 = vst [vmem:[#allocation125_spill] sm:$0xff] %v15865_v50  ;;  %v6931_v33 = vmul.f32 %v15878_v28, %v15878_v28  ;;  %v6932_v30 = vmul.f32 %v15882_v22, %v15882_v22  ;;  %v6933_v16 = vmul.f32 %v15886_v49, %v15886_v49  ;;  %v15919_v25 = vsub.f32 %v19684_v31, %v15859_v54 }
 0x7c1   :  { %19701 = vst [vmem:[#allocation120_spill] sm:$0xff] %v15868_v37  ;;  %v6934_v17 = vmul.f32 %v15890_v23, %v15890_v23  ;;  %v6935_v20 = vmul.f32 %v15898_v9, %v15898_v9  ;;  %v6936_v56 = vmul.f32 %v15904_v62, %v15904_v62  ;;  %v15926_v46 = vsub.f32 %v19685_v42, %v15859_v54 }
 0x7c2   :  { %19702 = vst [vmem:[#allocation192_spill] sm:$0xff] %v15871_v13  ;;  %v6995_v26 = vsel %vm5664_vm5, %v6931_v33, 0.0  ;;  %v6996_v48 = vsel %vm5664_vm5, %v6932_v30, 0.0  ;;  %v6998_v21 = vsel %vm5664_vm5, %v6933_v16, 0.0  ;;  %v6937_v51 = vmul.f32 %v15912_v18, %v15912_v18 }
 0x7c3   :  { %19703 = vst [vmem:[#allocation117_spill] sm:$0xff] %v15886_v49  ;;  %v6997_v14 = vadd.f32 %v6996_v48, %v6995_v26  ;;  %v7000_v47 = vsel %vm5664_vm5, %v6934_v17, 0.0  ;;  %v7002_v11 = vsel %vm5664_vm5, %v6935_v20, 0.0  ;;  %v15933_v31 = vsub.f32 %v19686_v45, %v15859_v54  ;;  %v19711_v17 = vld [vmem:[#allocation184_spill] sm:$0xff]  ;;  %v19712_v20 = vld [vmem:[#allocation198_spill] sm:$0xff] }
 0x7c4   :  { %19704 = vst [vmem:[#allocation197_spill] sm:$0xff] %v15890_v23  ;;  %v6938_v33 = vmul.f32 %v15919_v25, %v15919_v25  ;;  %v7004_v30 = vsel %vm5664_vm5, %v6936_v56, 0.0  ;;  %v15940_v42 = vsub.f32 %v19711_v17, %v15859_v54  ;;  %v6939_v26 = vmul.f32 %v15926_v46, %v15926_v46 }
 0x7c5   :  { %19705 = vst [vmem:[#allocation176_spill] sm:$0xff] %v15898_v9  ;;  %v6999_v36 = vadd.f32 %v6998_v21, %v6997_v14  ;;  %v7006_v48 = vsel %vm5664_vm5, %v6937_v51, 0.0  ;;  %v15947_v45 = vsub.f32 %v19712_v20, %v15859_v54  ;;  %v6940_v21 = vmul.f32 %v15933_v31, %v15933_v31 }
 0x7c6   :  { %19706 = vst [vmem:[#allocation104_spill] sm:$0xff] %v15904_v62  ;;  %v7010_v51 = vsel %vm5664_vm5, %v6939_v26, 0.0 }
 0x7c7   :  { %19707 = vst [vmem:[#allocation191_spill] sm:$0xff] %v15912_v18  ;;  %v7001_v38 = vadd.f32 %v7000_v47, %v6999_v36  ;;  %v7008_v36 = vsel %vm5664_vm5, %v6938_v33, 0.0  ;;  %v19713_v47 = vld [vmem:[#allocation122_spill] sm:$0xff]  ;;  %v6942_v17 = vmul.f32 %v15947_v45, %v15947_v45  ;;  %v7012_v33 = vsel %vm5664_vm5, %v6940_v21, 0.0 }
 0x7c8   :  { %19708 = vst [vmem:[#allocation160_spill] sm:$0xff] %v15919_v25 }
 0x7c9   :  { %19709 = vst [vmem:[#allocation108_spill] sm:$0xff] %v15926_v46  ;;  %v7003_v57 = vadd.f32 %v7002_v11, %v7001_v38  ;;  %v15954_v38 = vsub.f32 %v19713_v47, %v15859_v54  ;;  %v6941_v11 = vmul.f32 %v15940_v42, %v15940_v42  ;;  %v15975_v47 = vsub.f32 %v19692_v19, %v15859_v54 }
 0x7ca   :  { %19710 = vst [vmem:[#allocation180_spill] sm:$0xff] %v15933_v31  ;;  %v7016_v21 = vsel %vm5664_vm5, %v6942_v17, 0.0  ;;  %v15989_v19 = vsub.f32 %v19694_v12, %v15859_v54  ;;  %v16003_v12 = vsub.f32 %v15280_v63, %v15859_v54  ;;  %v16017_v63 = vsub.f32 %v15327_v3, %v15859_v54 }
 0x7cb   :  { %v7005_v16 = vadd.f32 %v7004_v30, %v7003_v57  ;;  %v19714_v30 = vld [vmem:[#allocation81_spill] sm:$0xff]  ;;  %v7014_v26 = vsel %vm5664_vm5, %v6941_v11, 0.0  ;;  %v16031_v3 = vsub.f32 %v15366_v53, %v15859_v54 }
 0x7cd   :  { %v7007_v14 = vadd.f32 %v7006_v48, %v7005_v16  ;;  %v15961_v16 = vsub.f32 %v19714_v30, %v15859_v54  ;;  %v15982_v30 = vsub.f32 %v19693_v27, %v15859_v54  ;;  %v15996_v27 = vsub.f32 %v15262_v32, %v15859_v54 }
 0x7ce   :  { %v16010_v32 = vsub.f32 %v15307_v6, %v15859_v54  ;;  %v6954_v46 = vmul.f32 %v16031_v3, %v16031_v3 }
 0x7cf   :  { %v7009_v56 = vadd.f32 %v7008_v36, %v7007_v14  ;;  %v19715_v14 = vld [vmem:[#allocation165_spill] sm:$0xff]  ;;  %v6943_v36 = vmul.f32 %v15954_v38, %v15954_v38 }
 0x7d0   :  { %v15968_v20 = vsub.f32 %v19715_v14, %v15859_v54  ;;  %v6946_v14 = vmul.f32 %v15975_v47, %v15975_v47 }
 0x7d1   :  { %v7011_v57 = vadd.f32 %v7010_v51, %v7009_v56  ;;  %v6944_v51 = vmul.f32 %v15961_v16, %v15961_v16  ;;  %v7018_v11 = vsel %vm5664_vm5, %v6943_v36, 0.0 }
 0x7d3   :  { %v7013_v48 = vadd.f32 %v7012_v33, %v7011_v57  ;;  %v6945_v33 = vmul.f32 %v15968_v20, %v15968_v20  ;;  %v7020_v17 = vsel %vm5664_vm5, %v6944_v51, 0.0  ;;  %v7024_v51 = vsel %vm5664_vm5, %v6946_v14, 0.0 }
 0x7d5   :  { %v7015_v56 = vadd.f32 %v7014_v26, %v7013_v48  ;;  %v7022_v36 = vsel %vm5664_vm5, %v6945_v33, 0.0 }
 0x7d7   :  { %v7017_v57 = vadd.f32 %v7016_v21, %v7015_v56  ;;  %v6947_v56 = vmul.f32 %v15982_v30, %v15982_v30 }
 0x7d9   :  { %v7019_v48 = vadd.f32 %v7018_v11, %v7017_v57  ;;  %v6948_v57 = vmul.f32 %v15989_v19, %v15989_v19  ;;  %v7026_v33 = vsel %vm5664_vm5, %v6947_v56, 0.0 }
 0x7db   :  { %v7021_v26 = vadd.f32 %v7020_v17, %v7019_v48  ;;  %v6949_v48 = vmul.f32 %v15996_v27, %v15996_v27  ;;  %v7028_v14 = vsel %vm5664_vm5, %v6948_v57, 0.0 }
 0x7dd   :  { %v7023_v21 = vadd.f32 %v7022_v36, %v7021_v26  ;;  %v6950_v26 = vmul.f32 %v16003_v12, %v16003_v12  ;;  %v7030_v56 = vsel %vm5664_vm5, %v6949_v48, 0.0 }
 0x7df   :  { %v7025_v11 = vadd.f32 %v7024_v51, %v7023_v21  ;;  %v19716_v21 = vld [vmem:[#allocation93_spill] sm:$0xff]  ;;  %v6951_v51 = vmul.f32 %v16010_v32, %v16010_v32  ;;  %v7032_v57 = vsel %vm5664_vm5, %v6950_v26, 0.0 }
 0x7e0   :  { %v16024_v6 = vsub.f32 %v19716_v21, %v15859_v54 }
 0x7e1   :  { %v7027_v17 = vadd.f32 %v7026_v33, %v7025_v11  ;;  %v6952_v33 = vmul.f32 %v16017_v63, %v16017_v63  ;;  %v7034_v48 = vsel %vm5664_vm5, %v6951_v51, 0.0 }
 0x7e2   :  { %v6953_v31 = vmul.f32 %v16024_v6, %v16024_v6 }
 0x7e3   :  { %v7029_v36 = vadd.f32 %v7028_v14, %v7027_v17  ;;  %v19717_v14 = vld [vmem:[#allocation169_spill] sm:$0xff]  ;;  %v7036_v26 = vsel %vm5664_vm5, %v6952_v33, 0.0  ;;  %v7040_v33 = vsel %vm5664_vm5, %v6954_v46, 0.0 }
 0x7e4   :  { %v16038_v21 = vsub.f32 %v19717_v14, %v15859_v54  ;;  %v7038_v51 = vsel %vm5664_vm5, %v6953_v31, 0.0 }
 0x7e5   :  { %v7031_v11 = vadd.f32 %v7030_v56, %v7029_v36  ;;  %v19718_v56 = vld [vmem:[#allocation144_spill] sm:$0xff] }
 0x7e6   :  { %v16045_v53 = vsub.f32 %v19718_v56, %v15859_v54  ;;  %v6955_v25 = vmul.f32 %v16038_v21, %v16038_v21 }
 0x7e7   :  { %v7033_v17 = vadd.f32 %v7032_v57, %v7031_v11  ;;  %v19719_v57 = vld [vmem:[#allocation204_spill] sm:$0xff] }
 0x7e8   :  { %v16052_v14 = vsub.f32 %v19719_v57, %v15859_v54  ;;  %v6956_v56 = vmul.f32 %v16045_v53, %v16045_v53  ;;  %v7042_v31 = vsel %vm5664_vm5, %v6955_v25, 0.0 }
 0x7e9   :  { %v7035_v36 = vadd.f32 %v7034_v48, %v7033_v17  ;;  %v16059_v48 = vsub.f32 %v15463_v60, %v15859_v54 }
 0x7ea   :  { %v6957_v57 = vmul.f32 %v16052_v14, %v16052_v14  ;;  %v7044_v46 = vsel %vm5664_vm5, %v6956_v56, 0.0 }
 0x7eb   :  { %v7037_v11 = vadd.f32 %v7036_v26, %v7035_v36  ;;  %v16066_v26 = vsub.f32 %v15487_v24, %v15859_v54  ;;  %v6958_v18 = vmul.f32 %v16059_v48, %v16059_v48 }
 0x7ec   :  { %v7046_v25 = vsel %vm5664_vm5, %v6957_v57, 0.0 }
 0x7ed   :  { %v7039_v17 = vadd.f32 %v7038_v51, %v7037_v11  ;;  %v19720_v51 = vld [vmem:[#allocation211_spill] sm:$0xff]  ;;  %v6959_v62 = vmul.f32 %v16066_v26, %v16066_v26  ;;  %v7048_v56 = vsel %vm5664_vm5, %v6958_v18, 0.0 }
 0x7ee   :  { %v16073_v60 = vsub.f32 %v19720_v51, %v15859_v54 }
 0x7ef   :  { %v7041_v36 = vadd.f32 %v7040_v33, %v7039_v17  ;;  %v19721_v33 = vld [vmem:[#allocation157_spill] sm:$0xff]  ;;  %v7050_v57 = vsel %vm5664_vm5, %v6959_v62, 0.0 }
 0x7f0   :  { %v16080_v24 = vsub.f32 %v19721_v33, %v15859_v54  ;;  %v6960_v51 = vmul.f32 %v16073_v60, %v16073_v60 }
 0x7f1   :  { %v7043_v11 = vadd.f32 %v7042_v31, %v7041_v36  ;;  %v16087_v31 = vsub.f32 %v15546_v4, %v15859_v54 }
 0x7f2   :  { %v6961_v33 = vmul.f32 %v16080_v24, %v16080_v24  ;;  %v7052_v18 = vsel %vm5664_vm5, %v6960_v51, 0.0 }
 0x7f3   :  { %v7045_v17 = vadd.f32 %v7044_v46, %v7043_v11  ;;  %v16094_v46 = vsub.f32 %v15557_v5, %v15859_v54  ;;  %v6962_v9 = vmul.f32 %v16087_v31, %v16087_v31 }
 0x7f4   :  { %v7054_v62 = vsel %vm5664_vm5, %v6961_v33, 0.0 }
 0x7f5   :  { %v7047_v36 = vadd.f32 %v7046_v25, %v7045_v17  ;;  %v19722_v25 = vld [vmem:[#allocation146_spill] sm:$0xff]  ;;  %v6963_v23 = vmul.f32 %v16094_v46, %v16094_v46  ;;  %v7056_v51 = vsel %vm5664_vm5, %v6962_v9, 0.0 }
 0x7f6   :  { %v16101_v4 = vsub.f32 %v19722_v25, %v15859_v54 }
 0x7f7   :  { %v7049_v11 = vadd.f32 %v7048_v56, %v7047_v36  ;;  %v19723_v56 = vld [vmem:[#allocation193_spill] sm:$0xff]  ;;  %v7058_v33 = vsel %vm5664_vm5, %v6963_v23, 0.0 }
 0x7f8   :  { %v16108_v5 = vsub.f32 %v19723_v56, %v15859_v54  ;;  %v6964_v25 = vmul.f32 %v16101_v4, %v16101_v4 }
 0x7f9   :  { %v7051_v17 = vadd.f32 %v7050_v57, %v7049_v11  ;;  %v16115_v57 = vsub.f32 %v15588_v15, %v15859_v54  ;;  %v16129_v15 = vsub.f32 %v15609_v41, %v15859_v54 }
 0x7fa   :  { %v6965_v56 = vmul.f32 %v16108_v5, %v16108_v5  ;;  %v7060_v9 = vsel %vm5664_vm5, %v6964_v25, 0.0 }
 0x7fb   :  { %v7053_v36 = vadd.f32 %v7052_v18, %v7051_v17  ;;  %v16122_v18 = vsub.f32 %v15598_v44, %v15859_v54  ;;  %v16136_v44 = vsub.f32 %v15616_v34, %v15859_v54  ;;  %v6968_v49 = vmul.f32 %v16129_v15, %v16129_v15 }
 0x7fc   :  { %v7062_v23 = vsel %vm5664_vm5, %v6965_v56, 0.0  ;;  %v16150_v34 = vsub.f32 %v15631_v52, %v15859_v54 }
 0x7fd   :  { %v7055_v11 = vadd.f32 %v7054_v62, %v7053_v36  ;;  %v6966_v62 = vmul.f32 %v16115_v57, %v16115_v57  ;;  %19724 = vst [vmem:[#allocation206_spill] sm:$0xff] %v16136_v44 }
 0x7ff   :  { %v7057_v17 = vadd.f32 %v7056_v51, %v7055_v11  ;;  %v6967_v51 = vmul.f32 %v16122_v18, %v16122_v18  ;;  %v7064_v25 = vsel %vm5664_vm5, %v6966_v62, 0.0  ;;  %v7068_v62 = vsel %vm5664_vm5, %v6968_v49, 0.0 }
 0x801   :  { %v7059_v36 = vadd.f32 %v7058_v33, %v7057_v17  ;;  %v19725_v33 = vld [vmem:[#allocation92_spill] sm:$0xff]  ;;  %v7066_v56 = vsel %vm5664_vm5, %v6967_v51, 0.0 }
 0x802   :  { %v16143_v41 = vsub.f32 %v19725_v33, %v15859_v54 }
 0x803   :  { %v7061_v11 = vadd.f32 %v7060_v9, %v7059_v36  ;;  %v6969_v9 = vmul.f32 %v16136_v44, %v16136_v44  ;;  %v6971_v44 = vmul.f32 %v16150_v34, %v16150_v34 }
 0x804   :  { %v6970_v33 = vmul.f32 %v16143_v41, %v16143_v41 }
 0x805   :  { %v7063_v17 = vadd.f32 %v7062_v23, %v7061_v11  ;;  %v16157_v23 = vsub.f32 %v15792_v61, %v15859_v54  ;;  %v7070_v51 = vsel %vm5664_vm5, %v6969_v9, 0.0  ;;  %v16171_v61 = vsub.f32 %v15800_v2, %v15859_v54 }
 0x806   :  { %v7072_v49 = vsel %vm5664_vm5, %v6970_v33, 0.0  ;;  %v7074_v9 = vsel %vm5664_vm5, %v6971_v44, 0.0 }
 0x807   :  { %v7065_v36 = vadd.f32 %v7064_v25, %v7063_v17  ;;  %19726 = vst [vmem:[#allocation147_spill] sm:$0xff] %v16157_v23  ;;  %v19727_v25 = vld [vmem:[#allocation183_spill] sm:$0xff] }
 0x808   :  { %v16164_v52 = vsub.f32 %v19727_v25, %v15859_v54 }
 0x809   :  { %v7067_v11 = vadd.f32 %v7066_v56, %v7065_v36  ;;  %v6972_v56 = vmul.f32 %v16157_v23, %v16157_v23  ;;  %v6974_v23 = vmul.f32 %v16171_v61, %v16171_v61 }
 0x80a   :  { %19728 = vst [vmem:[#allocation137_spill] sm:$0xff] %v16164_v52  ;;  %v6973_v25 = vmul.f32 %v16164_v52, %v16164_v52 }
 0x80b   :  { %v7069_v17 = vadd.f32 %v7068_v62, %v7067_v11  ;;  %v16178_v62 = vsub.f32 %v15663_v7, %v15859_v54  ;;  %v7076_v33 = vsel %vm5664_vm5, %v6972_v56, 0.0  ;;  %v7080_v56 = vsel %vm5664_vm5, %v6974_v23, 0.0 }
 0x80c   :  { %v7078_v44 = vsel %vm5664_vm5, %v6973_v25, 0.0 }
 0x80d   :  { %v7071_v36 = vadd.f32 %v7070_v51, %v7069_v17  ;;  %v19729_v51 = vld [vmem:[#allocation208_spill] sm:$0xff]  ;;  %v6975_v52 = vmul.f32 %v16178_v62, %v16178_v62 }
 0x80e   :  { %v16185_v2 = vsub.f32 %v19729_v51, %v15859_v54 }
 0x80f   :  { %v7073_v11 = vadd.f32 %v7072_v49, %v7071_v36  ;;  %v19730_v49 = vld [vmem:[#allocation123_spill] sm:$0xff]  ;;  %v7082_v25 = vsel %vm5664_vm5, %v6975_v52, 0.0 }
 0x810   :  { %v16192_v7 = vsub.f32 %v19730_v49, %v15859_v54  ;;  %v6976_v51 = vmul.f32 %v16185_v2, %v16185_v2 }
 0x811   :  { %v7075_v17 = vadd.f32 %v7074_v9, %v7073_v11  ;;  %v16199_v9 = vsub.f32 %v15680_v40, %v15859_v54  ;;  %v16213_v40 = vsub.f32 %v15706_v39, %v15859_v54  ;;  %v16227_v39 = vsub.f32 %v15726_v1, %v15859_v54 }
 0x812   :  { %v6977_v49 = vmul.f32 %v16192_v7, %v16192_v7  ;;  %v7084_v23 = vsel %vm5664_vm5, %v6976_v51, 0.0  ;;  %v16241_v1 = vsub.f32 %v15824_v10, %v15859_v54 }
 0x813   :  { %v7077_v36 = vadd.f32 %v7076_v33, %v7075_v17  ;;  %v16206_v33 = vsub.f32 %v15696_v0, %v15859_v54  ;;  %v16220_v0 = vsub.f32 %v15716_v58, %v15859_v54  ;;  %19731 = vst [vmem:[#allocation140_spill] sm:$0xff] %v16227_v39  ;;  %v16234_v58 = vsub.f32 %v15736_v55, %v15859_v54 }
 0x814   :  { %v7086_v52 = vsel %vm5664_vm5, %v6977_v49, 0.0  ;;  %19733 = vst [vmem:[#allocation82_spill] sm:$0xff] %v16241_v1  ;;  %v16248_v55 = vsub.f32 %v15830_v8, %v15859_v54  ;;  %v16262_v8 = vsub.f32 %v15839_v43, %v15859_v54 }
 0x815   :  { %v7079_v11 = vadd.f32 %v7078_v44, %v7077_v36  ;;  %v6978_v44 = vmul.f32 %v16199_v9, %v16199_v9  ;;  %19732 = vst [vmem:[#allocation130_spill] sm:$0xff] %v16234_v58 }
 0x816   :  { %19734 = vst [vmem:[#allocation143_spill] sm:$0xff] %v16248_v55 }
 0x817   :  { %v7081_v17 = vadd.f32 %v7080_v56, %v7079_v11  ;;  %v6979_v56 = vmul.f32 %v16206_v33, %v16206_v33  ;;  %v7088_v51 = vsel %vm5664_vm5, %v6978_v44, 0.0  ;;  %19736 = vst [vmem:[#allocation124_spill] sm:$0xff] %v16262_v8 }
 0x819   :  { %v7083_v36 = vadd.f32 %v7082_v25, %v7081_v17  ;;  %v6980_v25 = vmul.f32 %v16213_v40, %v16213_v40  ;;  %v7090_v49 = vsel %vm5664_vm5, %v6979_v56, 0.0 }
 0x81b   :  { %v7085_v11 = vadd.f32 %v7084_v23, %v7083_v36  ;;  %v6981_v23 = vmul.f32 %v16220_v0, %v16220_v0  ;;  %v7092_v44 = vsel %vm5664_vm5, %v6980_v25, 0.0 }
 0x81d   :  { %v7087_v17 = vadd.f32 %v7086_v52, %v7085_v11  ;;  %v6982_v52 = vmul.f32 %v16227_v39, %v16227_v39  ;;  %v7094_v56 = vsel %vm5664_vm5, %v6981_v23, 0.0  ;;  %v6984_v39 = vmul.f32 %v16241_v1, %v16241_v1 }
 0x81f   :  { %v7089_v36 = vadd.f32 %v7088_v51, %v7087_v17  ;;  %v6983_v51 = vmul.f32 %v16234_v58, %v16234_v58  ;;  %v7096_v25 = vsel %vm5664_vm5, %v6982_v52, 0.0  ;;  %v7100_v52 = vsel %vm5664_vm5, %v6984_v39, 0.0 }
 0x821   :  { %v7091_v11 = vadd.f32 %v7090_v49, %v7089_v36  ;;  %v19735_v49 = vld [vmem:[#allocation90_spill] sm:$0xff]  ;;  %v7098_v23 = vsel %vm5664_vm5, %v6983_v51, 0.0 }
 0x822   :  { %v16255_v10 = vsub.f32 %v19735_v49, %v15859_v54 }
 0x823   :  { %v7093_v17 = vadd.f32 %v7092_v44, %v7091_v11  ;;  %v6985_v44 = vmul.f32 %v16248_v55, %v16248_v55  ;;  %v6987_v55 = vmul.f32 %v16262_v8, %v16262_v8 }
 0x824   :  { %v6986_v1 = vmul.f32 %v16255_v10, %v16255_v10 }
 0x825   :  { %v7095_v36 = vadd.f32 %v7094_v56, %v7093_v17  ;;  %v19737_v56 = vld [vmem:[#allocation209_spill] sm:$0xff]  ;;  %v7102_v51 = vsel %vm5664_vm5, %v6985_v44, 0.0  ;;  %v6991_v44 = vmul.f32 %v15865_v50, %v15865_v50 }
 0x826   :  { %v16269_v49 = vsub.f32 %v19737_v56, %v15859_v54  ;;  %v7104_v56 = vsel %vm5664_vm5, %v6986_v1, 0.0  ;;  %v6992_v1 = vmul.f32 %v15868_v37, %v15868_v37 }
 0x827   :  { %v7097_v11 = vadd.f32 %v7096_v25, %v7095_v36  ;;  %v19738_v25 = vld [vmem:[#allocation79_spill] sm:$0xff] }
 0x828   :  { %v16276_v43 = vsub.f32 %v19738_v25, %v15859_v54  ;;  %v6990_v54 = vmul.f32 %v15862_v35, %v15862_v35 }
 0x829   :  { %v7099_v17 = vadd.f32 %v7098_v23, %v7097_v11  ;;  %v6988_v23 = vmul.f32 %v16269_v49, %v16269_v49 }
 0x82a   :  { %19739 = vst [vmem:[#allocation173_spill] sm:$0xff] %v16276_v43  ;;  %v6989_v39 = vmul.f32 %v16276_v43, %v16276_v43 }
 0x82b   :  { %v7101_v36 = vadd.f32 %v7100_v52, %v7099_v17  ;;  %v7106_v17 = vsel %vm5664_vm5, %v6987_v55, 0.0  ;;  %v7108_v25 = vsel %vm5664_vm5, %v6988_v23, 0.0  ;;  %v7114_v55 = vsel %vm5664_vm5, %v6991_v44, 0.0 }
 0x82c   :  { %v6994_v23 = vmul.f32 %v15874_v59, %v15874_v59 }
 0x82d   :  { %v7103_v11 = vadd.f32 %v7102_v51, %v7101_v36  ;;  %v7110_v36 = vsel %vm5664_vm5, %v6989_v39, 0.0 }
 0x82f   :  { %v7105_v58 = vadd.f32 %v7104_v56, %v7103_v11  ;;  %v7112_v11 = vsel %vm5664_vm5, %v6990_v54, 0.0 }
 0x831   :  { %v7107_v52 = vadd.f32 %v7106_v17, %v7105_v58  ;;  %v6993_v58 = vmul.f32 %v15871_v13, %v15871_v13 }
 0x833   :  { %v7109_v8 = vadd.f32 %v7108_v25, %v7107_v52  ;;  %v7116_v52 = vsel %vm5664_vm5, %v6992_v1, 0.0 }
 0x835   :  { %v7111_v51 = vadd.f32 %v7110_v36, %v7109_v8  ;;  %v7118_v8 = vsel %vm5664_vm5, %v6993_v58, 0.0  ;;  %v7120_v36 = vsel %vm5664_vm5, %v6994_v23, 0.0 }
 0x837   :  { %v7113_v56 = vadd.f32 %v7112_v11, %v7111_v51 }
 0x839   :  { %v7115_v17 = vadd.f32 %v7114_v55, %v7113_v56 }
 0x83b   :  { %v7117_v25 = vadd.f32 %v7116_v52, %v7115_v17 }
 0x83d   :  { %v7119_v39 = vadd.f32 %v7118_v8, %v7117_v25 }
 0x83f   :  { %v7121_v37 = vadd.f32 %v7120_v36, %v7119_v39 }
 0x841   :  { %v7122_v54 = vrot.slane %v7121_v37, 4 }
 0x843   :  { %v7123_v51 = vadd.f32 %v7122_v54, %v7121_v37  ;;  %v16308_v37 = vld [vmem:[%s18313_s5] ss:$0 sm:$0xff] }
 0x845   :  { %v7124_v11 = vrot.slane %v7123_v51, 2 }
 0x847   :  { %v7125_v50 = vadd.f32 %v7124_v11, %v7123_v51  ;;  %v19742_v11 = vld [vmem:[#allocation206_spill] sm:$0xff] }
 0x849   :  { %v7126_v13 = vrot.slane %v7125_v50, 1 }
 0x84b   :  { %v7127_v35 = vadd.f32 %v7126_v13, %v7125_v50 }
 0x84d   :  { %v7128_v44 = vmul.f32 %v7127_v35, %v19698_v29  ;;  %v16315_v35 = vld [vmem:[%s18314_s6] ss:$0 sm:$0xff] }
 0x84e   :  { %19740 = vst [vmem:[#allocation145_spill] sm:$0xff] %v16315_v35  ;;  %v19752_v29 = vld [vmem:[#allocation125_spill] sm:$0xff] }
 0x84f   :  { %v7129_v56 = vadd.f32 1e-05, %v7128_v44  ;;  %v19743_v44 = vld [vmem:[#allocation147_spill] sm:$0xff] }
 0x851   :  { %9691 = vrsqrt.f32 %v7129_v56  ;;  %vm7136_vm11 = vweird.f32 %v7129_v56 }
 0x857   :  { %v9692_v55 = vpop.eup %9691 }
 0x858   :  { %v7131_v43 = vmul.f32 %v9692_v55, %v7129_v56  ;;  %vm7137_vm10 = vweird.f32 %v9692_v55  ;;  %v19744_v56 = vld [vmem:[#allocation137_spill] sm:$0xff] }
 0x859   :  { %vm7138_vm12 = vmor %vm7136_vm11, %vm7137_vm10 }
 0x85a   :  { %v7132_v1 = vmul.f32 %v9692_v55, %v7131_v43 }
 0x85c   :  { %v7133_v17 = vmul.f32 0.5, %v7132_v1 }
 0x85e   :  { %v7134_v52 = vsub.f32 1.5, %v7133_v17 }
 0x860   :  { %v7135_v58 = vmul.f32 %v9692_v55, %v7134_v52  ;;  %v19745_v52 = vld [vmem:[#allocation140_spill] sm:$0xff] }
 0x862   :  { %v16310_v23 = vsel %vm7138_vm12, %v9692_v55, %v7135_v58  ;;  %v19746_v58 = vld [vmem:[#allocation130_spill] sm:$0xff] }
 0x863   :  { %v7203_v50 = vmul.f32 %v16310_v23, %v15874_v59  ;;  %v16325_v25 = vmul.f32 %v16310_v23, %v15878_v28  ;;  %v16329_v8 = vmul.f32 %v16310_v23, %v15882_v22  ;;  %v7150_v39 = vmul.f32 %v16310_v23, %v15940_v42 }
 0x864   :  { %v7151_v36 = vmul.f32 %v16310_v23, %v15947_v45  ;;  %v7152_v59 = vmul.f32 %v16310_v23, %v15954_v38  ;;  %v7153_v54 = vmul.f32 %v16310_v23, %v15961_v16  ;;  %v7154_v28 = vmul.f32 %v16310_v23, %v15968_v20 }
 0x865   :  { %v7270_v13 = vmul.f32 %v16308_v37, %v7203_v50  ;;  %v7155_v51 = vmul.f32 %v16310_v23, %v15975_v47  ;;  %v7156_v22 = vmul.f32 %v16310_v23, %v15982_v30  ;;  %v7157_v42 = vmul.f32 %v16310_v23, %v15989_v19  ;;  %v19747_v50 = vld [vmem:[#allocation82_spill] sm:$0xff] }
 0x866   :  { %v7158_v45 = vmul.f32 %v16310_v23, %v15996_v27  ;;  %v7159_v38 = vmul.f32 %v16310_v23, %v16003_v12  ;;  %v7160_v16 = vmul.f32 %v16310_v23, %v16010_v32  ;;  %v7161_v20 = vmul.f32 %v16310_v23, %v16017_v63 }
 0x867   :  { %v16321_v43 = vadd.f32 %v16315_v35, %v7270_v13  ;;  %v7162_v47 = vmul.f32 %v16310_v23, %v16024_v6  ;;  %v7163_v30 = vmul.f32 %v16310_v23, %v16031_v3  ;;  %v7164_v19 = vmul.f32 %v16310_v23, %v16038_v21  ;;  %v19748_v13 = vld [vmem:[#allocation143_spill] sm:$0xff]  ;;  %v19754_v35 = vld [vmem:[#allocation192_spill] sm:$0xff] }
 0x868   :  { %v7165_v27 = vmul.f32 %v16310_v23, %v16045_v53  ;;  %v7166_v12 = vmul.f32 %v16310_v23, %v16052_v14  ;;  %v7167_v32 = vmul.f32 %v16310_v23, %v16059_v48  ;;  %v7168_v63 = vmul.f32 %v16310_v23, %v16066_v26 }
 0x869   :  { %19741 = vst [vmem:[#allocation112_spill] sm:$0xff] %v16321_v43  ;;  %v7169_v6 = vmul.f32 %v16310_v23, %v16073_v60  ;;  %v7170_v3 = vmul.f32 %v16310_v23, %v16080_v24  ;;  %v7171_v21 = vmul.f32 %v16310_v23, %v16087_v31  ;;  %v7172_v53 = vmul.f32 %v16310_v23, %v16094_v46  ;;  %v19753_v43 = vld [vmem:[#allocation120_spill] sm:$0xff] }
 0x86a   :  { %v7173_v14 = vmul.f32 %v16310_v23, %v16101_v4  ;;  %v7174_v48 = vmul.f32 %v16310_v23, %v16108_v5  ;;  %v7175_v26 = vmul.f32 %v16310_v23, %v16115_v57  ;;  %v7176_v60 = vmul.f32 %v16310_v23, %v16122_v18 }
 0x86b   :  { %v7177_v24 = vmul.f32 %v16310_v23, %v16129_v15  ;;  %v7178_v31 = vmul.f32 %v16310_v23, %v19742_v11  ;;  %v7179_v46 = vmul.f32 %v16310_v23, %v16143_v41  ;;  %v7180_v4 = vmul.f32 %v16310_v23, %v16150_v34  ;;  %v19749_v11 = vld [vmem:[#allocation124_spill] sm:$0xff] }
 0x86c   :  { %v7181_v5 = vmul.f32 %v16310_v23, %v19743_v44  ;;  %v7182_v57 = vmul.f32 %v16310_v23, %v19744_v56  ;;  %v7183_v18 = vmul.f32 %v16310_v23, %v16171_v61  ;;  %v7184_v15 = vmul.f32 %v16310_v23, %v16178_v62  ;;  %v19750_v44 = vld [vmem:[#allocation173_spill] sm:$0xff] }
 0x86d   :  { %v7185_v55 = vmul.f32 %v16310_v23, %v16185_v2  ;;  %v7186_v41 = vmul.f32 %v16310_v23, %v16192_v7  ;;  %v7187_v34 = vmul.f32 %v16310_v23, %v16199_v9  ;;  %v7188_v1 = vmul.f32 %v16310_v23, %v16206_v33 }
 0x86e   :  { %v7189_v17 = vmul.f32 %v16310_v23, %v16213_v40  ;;  %v7190_v61 = vmul.f32 %v16310_v23, %v16220_v0  ;;  %v7191_v62 = vmul.f32 %v16310_v23, %v19745_v52  ;;  %v7192_v2 = vmul.f32 %v16310_v23, %v19746_v58  ;;  %v19751_v52 = vld [vmem:[#allocation155_spill] sm:$0xff] }
 0x86f   :  { %v7193_v7 = vmul.f32 %v16310_v23, %v19747_v50  ;;  %v7194_v9 = vmul.f32 %v16310_v23, %v19748_v13  ;;  %v7195_v33 = vmul.f32 %v16310_v23, %v16255_v10  ;;  %v7196_v40 = vmul.f32 %v16310_v23, %v19749_v11 }
 0x870   :  { %v7197_v0 = vmul.f32 %v16310_v23, %v16269_v49  ;;  %v7198_v56 = vmul.f32 %v16310_v23, %v19750_v44  ;;  %v7199_v58 = vmul.f32 %v16310_v23, %v19751_v52  ;;  %v7200_v50 = vmul.f32 %v16310_v23, %v19752_v29 }
 0x871   :  { %v7201_v13 = vmul.f32 %v16310_v23, %v19753_v43  ;;  %v7202_v10 = vmul.f32 %v16310_v23, %v19754_v35  ;;  %v16438_v11 = vmul.f32 %v16308_v37, %v7150_v39  ;;  %v16441_v49 = vmul.f32 %v16308_v37, %v7151_v36 }
 0x872   :  { %v16444_v44 = vmul.f32 %v16308_v37, %v7152_v59  ;;  %v16447_v52 = vmul.f32 %v16308_v37, %v7153_v54  ;;  %v16450_v29 = vmul.f32 %v16308_v37, %v7154_v28  ;;  %v16453_v43 = vmul.f32 %v16308_v37, %v7155_v51 }
 0x873   :  { %v16456_v35 = vmul.f32 %v16308_v37, %v7156_v22  ;;  %v16459_v39 = vmul.f32 %v16308_v37, %v7157_v42  ;;  %v16462_v36 = vmul.f32 %v16308_v37, %v7158_v45  ;;  %v16465_v59 = vmul.f32 %v16308_v37, %v7159_v38 }
 0x874   :  { %v16468_v54 = vmul.f32 %v16308_v37, %v7160_v16  ;;  %v16471_v28 = vmul.f32 %v16308_v37, %v7161_v20  ;;  %v16474_v51 = vmul.f32 %v16308_v37, %v7162_v47  ;;  %v16477_v22 = vmul.f32 %v16308_v37, %v7163_v30 }
 0x875   :  { %v16480_v42 = vmul.f32 %v16308_v37, %v7164_v19  ;;  %v16483_v45 = vmul.f32 %v16308_v37, %v7165_v27  ;;  %v16486_v38 = vmul.f32 %v16308_v37, %v7166_v12  ;;  %v16489_v16 = vmul.f32 %v16308_v37, %v7167_v32 }
 0x876   :  { %v16492_v20 = vmul.f32 %v16308_v37, %v7168_v63  ;;  %v16495_v47 = vmul.f32 %v16308_v37, %v7169_v6  ;;  %v16498_v30 = vmul.f32 %v16308_v37, %v7170_v3  ;;  %v16501_v19 = vmul.f32 %v16308_v37, %v7171_v21  ;;  %v9271_v3 = vld [vmem:[#allocation8] sm:$0xff] }
 0x877   :  { %v16504_v27 = vmul.f32 %v16308_v37, %v7172_v53  ;;  %v16507_v12 = vmul.f32 %v16308_v37, %v7173_v14  ;;  %v16510_v32 = vmul.f32 %v16308_v37, %v7174_v48  ;;  %v16513_v63 = vmul.f32 %v16308_v37, %v7175_v26  ;;  %9661 = vmatpush.bf16.msrb.mxu3 %v9271_v3 }
 0x878   :  { %19755 = vst [vmem:[#allocation127_spill] sm:$0xff] %v16498_v30  ;;  %v16516_v6 = vmul.f32 %v16308_v37, %v7176_v60  ;;  %v16519_v30 = vmul.f32 %v16308_v37, %v7177_v24  ;;  %v16522_v21 = vmul.f32 %v16308_v37, %v7178_v31  ;;  %v16525_v53 = vmul.f32 %v16308_v37, %v7179_v46 }
 0x879   :  { %v16528_v14 = vmul.f32 %v16308_v37, %v7180_v4  ;;  %v16531_v48 = vmul.f32 %v16308_v37, %v7181_v5  ;;  %v16534_v26 = vmul.f32 %v16308_v37, %v7182_v57  ;;  %v16537_v60 = vmul.f32 %v16308_v37, %v7183_v18  ;;  %7556 = vmatpush.bf16.msra.mxu1 %v9271_v3 }
 0x87a   :  { %v16540_v24 = vmul.f32 %v16308_v37, %v7184_v15  ;;  %v7252_v31 = vmul.f32 %v16308_v37, %v7185_v55  ;;  %v7253_v46 = vmul.f32 %v16308_v37, %v7186_v41  ;;  %v7254_v4 = vmul.f32 %v16308_v37, %v7187_v34  ;;  %v9723_v15 = vld [vmem:[#allocation6 + $0x8] sm:$0xff] }
 0x87b   :  { %19756 = vst [vmem:[#allocation78_spill] sm:$0xff] %v16528_v14  ;;  %v7255_v14 = vmul.f32 %v16308_v37, %v7188_v1  ;;  %v7256_v5 = vmul.f32 %v16308_v37, %v7189_v17  ;;  %v7257_v57 = vmul.f32 %v16308_v37, %v7190_v61  ;;  %v7258_v18 = vmul.f32 %v16308_v37, %v7191_v62 }
 0x87c   :  { %19757 = vst [vmem:[#allocation135_spill] sm:$0xff] %v16537_v60  ;;  %v7259_v60 = vmul.f32 %v16308_v37, %v7192_v2  ;;  %v7261_v55 = vmul.f32 %v16308_v37, %v7194_v9  ;;  %v7262_v41 = vmul.f32 %v16308_v37, %v7195_v33  ;;  %v7263_v34 = vmul.f32 %v16308_v37, %v7196_v40  ;;  %v19760_v9 = vld [vmem:[#allocation197_spill] sm:$0xff] }
 0x87d   :  { %19758 = vst [vmem:[#allocation174_spill] sm:$0xff] %v16540_v24  ;;  %9662 = vmatpush.bf16.msrb.mxu1 %v9723_v15  ;;  %v7260_v24 = vmul.f32 %v16308_v37, %v7193_v7  ;;  %v7264_v1 = vmul.f32 %v16308_v37, %v7197_v0  ;;  %v7265_v17 = vmul.f32 %v16308_v37, %v7198_v56  ;;  %v19759_v15 = vld [vmem:[#allocation117_spill] sm:$0xff] }
 0x87e   :  { %v7266_v61 = vmul.f32 %v16308_v37, %v7199_v58  ;;  %v7267_v62 = vmul.f32 %v16308_v37, %v7200_v50  ;;  %v7268_v2 = vmul.f32 %v16308_v37, %v7201_v13  ;;  %v7269_v3 = vmul.f32 %v16308_v37, %v7202_v10  ;;  %v9724_v56 = vld [vmem:[#allocation6] sm:$0xff] }
 0x87f   :  { %v7142_v7 = vmul.f32 %v16310_v23, %v19759_v15  ;;  %v7143_v33 = vmul.f32 %v16310_v23, %v19760_v9  ;;  %v7207_v40 = vmul.f32 %v16308_v37, %v16325_v25  ;;  %v7208_v0 = vmul.f32 %v16308_v37, %v16329_v8  ;;  %v19761_v58 = vld [vmem:[#allocation145_spill] sm:$0xff]  ;;  %v19762_v15 = vld [vmem:[#allocation127_spill] sm:$0xff] }
 0x880   :  { %v16570_v50 = vadd.f32 %v19761_v58, %v16438_v11  ;;  %v16574_v13 = vadd.f32 %v19761_v58, %v16441_v49  ;;  %v16578_v10 = vadd.f32 %v19761_v58, %v16444_v44  ;;  %v16582_v25 = vadd.f32 %v19761_v58, %v16447_v52 }
 0x881   :  { %9663 = vmatpush.bf16.msrb.mxu1 %v9724_v56  ;;  %v16586_v8 = vadd.f32 %v19761_v58, %v16450_v29  ;;  %v16590_v11 = vadd.f32 %v19761_v58, %v16453_v43  ;;  %v16594_v49 = vadd.f32 %v19761_v58, %v16456_v35  ;;  %v16598_v44 = vadd.f32 %v19761_v58, %v16459_v39 }
 0x882   :  { %v16602_v52 = vadd.f32 %v19761_v58, %v16462_v36  ;;  %v16606_v29 = vadd.f32 %v19761_v58, %v16465_v59  ;;  %v16610_v43 = vadd.f32 %v19761_v58, %v16468_v54  ;;  %v16614_v35 = vadd.f32 %v19761_v58, %v16471_v28  ;;  %v19765_v56 = vld [vmem:[#allocation78_spill] sm:$0xff] }
 0x883   :  { %v16618_v39 = vadd.f32 %v19761_v58, %v16474_v51  ;;  %v16622_v36 = vadd.f32 %v19761_v58, %v16477_v22  ;;  %v16626_v59 = vadd.f32 %v19761_v58, %v16480_v42  ;;  %v16630_v54 = vadd.f32 %v19761_v58, %v16483_v45 }
 0x884   :  { %v16634_v28 = vadd.f32 %v19761_v58, %v16486_v38  ;;  %v16638_v51 = vadd.f32 %v19761_v58, %v16489_v16  ;;  %v16642_v22 = vadd.f32 %v19761_v58, %v16492_v20  ;;  %v16646_v42 = vadd.f32 %v19761_v58, %v16495_v47 }
 0x885   :  { %v16650_v45 = vadd.f32 %v19761_v58, %v19762_v15  ;;  %v16654_v38 = vadd.f32 %v19761_v58, %v16501_v19  ;;  %v16658_v16 = vadd.f32 %v19761_v58, %v16504_v27  ;;  %v16662_v20 = vadd.f32 %v19761_v58, %v16507_v12  ;;  %v19767_v15 = vld [vmem:[#allocation135_spill] sm:$0xff] }
 0x886   :  { %v16666_v47 = vadd.f32 %v19761_v58, %v16510_v32  ;;  %v16670_v9 = vadd.f32 %v19761_v58, %v16513_v63  ;;  %v16674_v19 = vadd.f32 %v19761_v58, %v16516_v6  ;;  %v16678_v27 = vadd.f32 %v19761_v58, %v16519_v30 }
 0x887   :  { %v16682_v12 = vadd.f32 %v19761_v58, %v16522_v21  ;;  %v16686_v32 = vadd.f32 %v19761_v58, %v16525_v53  ;;  %v16690_v63 = vadd.f32 %v19761_v58, %v19765_v56  ;;  %v16694_v6 = vadd.f32 %v19761_v58, %v16531_v48 }
 0x888   :  { %v16698_v30 = vadd.f32 %v19761_v58, %v16534_v26  ;;  %v16702_v21 = vadd.f32 %v19761_v58, %v19767_v15  ;;  %v16712_v56 = vadd.f32 %v19761_v58, %v7253_v46  ;;  %v16715_v48 = vadd.f32 %v19761_v58, %v7254_v4 }
 0x889   :  { %19763 = vst [vmem:[#allocation98_spill] sm:$0xff] %v16682_v12  ;;  %v19769_v12 = vld [vmem:[#allocation174_spill] sm:$0xff]  ;;  %v16718_v26 = vadd.f32 %v19761_v58, %v7255_v14  ;;  %v16724_v15 = vadd.f32 %v19761_v58, %v7257_v57  ;;  %v16733_v46 = vadd.f32 %v19761_v58, %v7260_v24  ;;  %v16736_v4 = vadd.f32 %v19761_v58, %v7261_v55 }
 0x88a   :  { %19764 = vst [vmem:[#allocation110_spill] sm:$0xff] %v16686_v32  ;;  %v16706_v53 = vadd.f32 %v19761_v58, %v19769_v12  ;;  %v16709_v32 = vadd.f32 %v19761_v58, %v7252_v31  ;;  %v16727_v12 = vadd.f32 %v19761_v58, %v7258_v18  ;;  %v16730_v31 = vadd.f32 %v19761_v58, %v7259_v60 }
 0x88b   :  { %19766 = vst [vmem:[#allocation167_spill] sm:$0xff] %v16694_v6  ;;  %v16721_v6 = vadd.f32 %v19761_v58, %v7256_v5  ;;  %v16739_v14 = vadd.f32 %v19761_v58, %v7262_v41  ;;  %v16742_v5 = vadd.f32 %v19761_v58, %v7263_v34  ;;  %v16745_v57 = vadd.f32 %v19761_v58, %v7264_v1 }
 0x88c   :  { %19768 = vst [vmem:[#allocation181_spill] sm:$0xff] %v16702_v21  ;;  %v16748_v18 = vadd.f32 %v19761_v58, %v7265_v17  ;;  %v16751_v60 = vadd.f32 %v19761_v58, %v7266_v61  ;;  %v16754_v24 = vadd.f32 %v19761_v58, %v7267_v62  ;;  %v16757_v55 = vadd.f32 %v19761_v58, %v7268_v2 }
 0x88d   :  { %19770 = vst [vmem:[#allocation178_spill] sm:$0xff] %v16745_v57  ;;  %v7209_v41 = vmul.f32 %v16308_v37, %v7142_v7  ;;  %v16761_v34 = vadd.f32 %v19761_v58, %v7269_v3  ;;  %v7210_v1 = vmul.f32 %v16308_v37, %v7143_v33  ;;  %v7274_v21 = vadd.f32 %v19761_v58, %v7207_v40  ;;  %v19776_v57 = vld [vmem:[#allocation176_spill] sm:$0xff] }
 0x88e   :  { %19771 = vst [vmem:[#allocation212_spill] sm:$0xff] %v16748_v18  ;;  %v7275_v17 = vadd.f32 %v19761_v58, %v7208_v0  ;;  %v7144_v7 = vmul.f32 %v16310_v23, %v19776_v57  ;;  %v19777_v3 = vld [vmem:[#allocation104_spill] sm:$0xff] }
 0x88f   :  { %19772 = vst [vmem:[#allocation179_spill] sm:$0xff] %v16751_v60  ;;  %v7276_v61 = vadd.f32 %v19761_v58, %v7209_v41  ;;  %v7277_v60 = vadd.f32 %v19761_v58, %v7210_v1  ;;  %v7338_v62 = vmax.f32 %v7274_v21, 0.0  ;;  %v19778_v1 = vld [vmem:[#allocation191_spill] sm:$0xff] }
 0x890   :  { %19773 = vst [vmem:[#allocation215_spill] sm:$0xff] %v16754_v24  ;;  %v7339_v24 = vmax.f32 %v7275_v17, 0.0  ;;  %v7211_v40 = vmul.f32 %v16308_v37, %v7144_v7  ;;  %v7146_v57 = vmul.f32 %v16310_v23, %v19778_v1  ;;  %v19779_v17 = vld [vmem:[#allocation160_spill] sm:$0xff]  ;;  %v7350_v1 = vmax.f32 %v16578_v10, 0.0 }
 0x891   :  { %19774 = vst [vmem:[#allocation161_spill] sm:$0xff] %v16757_v55  ;;  %v7340_v18 = vmax.f32 %v7276_v61, 0.0  ;;  %v7341_v55 = vmax.f32 %v7277_v60, 0.0  ;;  %v7147_v61 = vmul.f32 %v16310_v23, %v19779_v17  ;;  %v7353_v10 = vmax.f32 %v16590_v11, 0.0 }
 0x892   :  { %19775 = vst [vmem:[#allocation128_spill] sm:$0xff] %v16761_v34  ;;  %v7406_v2 = vpack.c.bf16 %v7339_v24, %v7338_v62  ;;  %v7145_v34 = vmul.f32 %v16310_v23, %v19777_v3  ;;  %v7278_v21 = vadd.f32 %v19761_v58, %v7211_v40  ;;  %v19780_v62 = vld [vmem:[#allocation80_spill] sm:$0xff]  ;;  %v7359_v11 = vmax.f32 %v16614_v35, 0.0 }
 0x893   :  { %v7407_v33 = vpack.c.bf16 %v7341_v55, %v7340_v18  ;;  %v7348_v18 = vmax.f32 %v16570_v50, 0.0  ;;  %v7214_v7 = vmul.f32 %v16308_v37, %v7147_v61  ;;  %v19781_v50 = vld [vmem:[#allocation108_spill] sm:$0xff] }
 0x894   :  { %9182 = vmatmul.msk.bf16.vlgmr.msra.gmra.mxu1 %vm5664_vm5, %v7406_v2  ;;  %v7212_v0 = vmul.f32 %v16308_v37, %v7145_v34  ;;  %v7342_v60 = vmax.f32 %v7278_v21, 0.0  ;;  %v7349_v34 = vmax.f32 %v16574_v13, 0.0  ;;  %v7213_v2 = vmul.f32 %v16308_v37, %v7146_v57 }
 0x895   :  { %9183 = vmatmul.msk.bf16.vlgmr.msrb.gmra.mxu3 %vm5664_vm5, %v7407_v33  ;;  %v7281_v40 = vadd.f32 %v19761_v58, %v7214_v7  ;;  %v7351_v57 = vmax.f32 %v16582_v25, 0.0  ;;  %v7354_v25 = vmax.f32 %v16594_v49, 0.0 }
 0x896   :  { %v7279_v24 = vadd.f32 %v19761_v58, %v7212_v0  ;;  %v7411_v3 = vpack.c.bf16 %v7349_v34, %v7348_v18  ;;  %v7280_v33 = vadd.f32 %v19761_v58, %v7213_v2 }
 0x897   :  { %v7345_v21 = vmax.f32 %v7281_v40, 0.0  ;;  %v7412_v18 = vpack.c.bf16 %v7351_v57, %v7350_v1 }
 0x898   :  { %v7343_v41 = vmax.f32 %v7279_v24, 0.0  ;;  %v7344_v0 = vmax.f32 %v7280_v33, 0.0  ;;  %v7148_v24 = vmul.f32 %v16310_v23, %v19781_v50 }
 0x89a   :  { %v7408_v55 = vpack.c.bf16 %v7343_v41, %v7342_v60  ;;  %v19782_v60 = vld [vmem:[#allocation180_spill] sm:$0xff]  ;;  %v7409_v13 = vpack.c.bf16 %v7345_v21, %v7344_v0  ;;  %v7215_v17 = vmul.f32 %v16308_v37, %v7148_v24  ;;  %v7357_v0 = vmax.f32 %v16606_v29, 0.0 }
 0x89b   :  { %v7149_v41 = vmul.f32 %v16310_v23, %v19782_v60  ;;  %v7352_v23 = vmax.f32 %v16586_v8, 0.0  ;;  %v7358_v21 = vmax.f32 %v16610_v43, 0.0  ;;  %v7362_v24 = vmax.f32 %v16626_v59, 0.0 }
 0x89c   :  { %v7363_v43 = vmax.f32 %v16630_v54, 0.0  ;;  %v7366_v59 = vmax.f32 %v16642_v22, 0.0  ;;  %v7367_v54 = vmax.f32 %v16646_v42, 0.0  ;;  %v7370_v22 = vmax.f32 %v16658_v16, 0.0 }
 0x89d   :  { %v7216_v61 = vmul.f32 %v16308_v37, %v7149_v41  ;;  %v7413_v33 = vpack.c.bf16 %v7353_v10, %v7352_v23  ;;  %v7355_v37 = vmax.f32 %v16598_v44, 0.0  ;;  %v7416_v49 = vpack.c.bf16 %v7359_v11, %v7358_v21 }
 0x89e   :  { %v7361_v44 = vmax.f32 %v16622_v36, 0.0  ;;  %v7418_v35 = vpack.c.bf16 %v7363_v43, %v7362_v24  ;;  %v7365_v36 = vmax.f32 %v16638_v51, 0.0  ;;  %v7369_v51 = vmax.f32 %v16654_v38, 0.0  ;;  %v19786_v24 = vld [vmem:[#allocation179_spill] sm:$0xff] }
 0x89f   :  { %v7414_v40 = vpack.c.bf16 %v7355_v37, %v7354_v25  ;;  %v7371_v42 = vmax.f32 %v16662_v20, 0.0  ;;  %v7373_v38 = vmax.f32 %v16670_v9, 0.0  ;;  %v7374_v16 = vmax.f32 %v16674_v19, 0.0  ;;  %v19783_v37 = vld [vmem:[#allocation98_spill] sm:$0xff]  ;;  %v19787_v43 = vld [vmem:[#allocation215_spill] sm:$0xff] }
 0x8a0   :  { %v7375_v20 = vmax.f32 %v16678_v27, 0.0  ;;  %v7382_v9 = vmax.f32 %v16706_v53, 0.0  ;;  %v7384_v21 = vmax.f32 %v16712_v56, 0.0  ;;  %v7385_v11 = vmax.f32 %v16715_v48, 0.0 }
 0x8a1   :  { %v7386_v19 = vmax.f32 %v16718_v26, 0.0  ;;  %v7387_v27 = vmax.f32 %v16721_v6, 0.0  ;;  %v7391_v53 = vmax.f32 %v16733_v46, 0.0  ;;  %v7393_v56 = vmax.f32 %v16739_v14, 0.0 }
 0x8a2   :  { %v7394_v48 = vmax.f32 %v16742_v5, 0.0 }
 0x8a4   :  { %9253 = vmatmul.msk.bf16.vlgmr.msrb.gmra.mxu1 %vm279_vm0, %v19780_v62  ;;  %v7283_v62 = vadd.f32 %v19761_v58, %v7216_v61 }
 0x8a5   :  { %9184 = vmatmul.msk.bf16.gmra.mxu3 %vm5664_vm5, %v7408_v55  ;;  %v7282_v55 = vadd.f32 %v19761_v58, %v7215_v17  ;;  %v7356_v58 = vmax.f32 %v16602_v52, 0.0  ;;  %v7420_v17 = vpack.c.bf16 %v7367_v54, %v7366_v59  ;;  %v19791_v59 = vld [vmem:[#allocation181_spill] sm:$0xff]  ;;  %v19792_v54 = vld [vmem:[#allocation112_spill] sm:$0xff] }
 0x8a6   :  { %v7347_v2 = vmax.f32 %v7283_v62, 0.0  ;;  %v7401_v14 = vmax.f32 %v19792_v54, 0.0 }
 0x8a7   :  { %v7346_v34 = vmax.f32 %v7282_v55, 0.0  ;;  %v7415_v8 = vpack.c.bf16 %v7357_v0, %v7356_v58  ;;  %v7378_v58 = vmax.f32 %v16690_v63, 0.0  ;;  %v7424_v0 = vpack.c.bf16 %v7375_v20, %v7374_v16 }
 0x8a8   :  { %v7390_v63 = vmax.f32 %v16730_v31, 0.0 }
 0x8a9   :  { %v7410_v7 = vpack.c.bf16 %v7347_v2, %v7346_v34  ;;  %v7422_v2 = vpack.c.bf16 %v7371_v42, %v7370_v22  ;;  %v7429_v42 = vpack.c.bf16 %v7385_v11, %v7384_v21 }
 0x8b5   :  { %9185 = vmatmul.msk.bf16.gmra.mxu3 %vm5664_vm5, %v7409_v13 }
 0x8c5   :  { %9186 = vmatmul.msk.bf16.gmra.mxu3 %vm5664_vm5, %v7410_v7 }
 0x8d5   :  { %9187 = vmatmul.msk.bf16.gmra.mxu3 %vm5664_vm5, %v7411_v3  ;;  %v7360_v3 = vmax.f32 %v16618_v39, 0.0  ;;  %v7364_v39 = vmax.f32 %v16634_v28, 0.0  ;;  %v7368_v28 = vmax.f32 %v16650_v45, 0.0  ;;  %v7372_v45 = vmax.f32 %v16666_v47, 0.0 }
 0x8d6   :  { %v7380_v47 = vmax.f32 %v16698_v30, 0.0 }
 0x8d7   :  { %v7417_v50 = vpack.c.bf16 %v7361_v44, %v7360_v3  ;;  %v7419_v1 = vpack.c.bf16 %v7365_v36, %v7364_v39  ;;  %v7421_v55 = vpack.c.bf16 %v7369_v51, %v7368_v28  ;;  %v7423_v10 = vpack.c.bf16 %v7373_v38, %v7372_v45  ;;  %v19784_v44 = vld [vmem:[#allocation178_spill] sm:$0xff] }
 0x8d8   :  { %v7389_v3 = vmax.f32 %v16727_v12, 0.0  ;;  %v7395_v26 = vmax.f32 %v19784_v44, 0.0  ;;  %v7398_v12 = vmax.f32 %v19787_v43, 0.0  ;;  %v19789_v39 = vld [vmem:[#allocation110_spill] sm:$0xff]  ;;  %v7432_v38 = vpack.c.bf16 %v7391_v53, %v7390_v63  ;;  %v16937_v53 = vpop.f32.mrf.mxu0 }
 0x8d9   :  { %v7377_v36 = vmax.f32 %v19789_v39, 0.0 }
 0x8da   :  { %v7434_v20 = vpack.c.bf16 %v7395_v26, %v7394_v48 }
 0x8e5   :  { %9188 = vmatmul.msk.bf16.gmra.mxu3 %vm5664_vm5, %v7412_v18 }
 0x8f5   :  { %9189 = vmatmul.msk.bf16.gmra.mxu3 %vm5664_vm5, %v7413_v33 }
 0x905   :  { %9190 = vmatmul.msk.bf16.gmra.mxu3 %vm5664_vm5, %v7414_v40  ;;  %v7376_v40 = vmax.f32 %v19783_v37, 0.0 }
 0x907   :  { %v7425_v28 = vpack.c.bf16 %v7377_v36, %v7376_v40 }
 0x915   :  { %9191 = vmatmul.msk.bf16.gmra.mxu3 %vm5664_vm5, %v7415_v8  ;;  %v7383_v8 = vmax.f32 %v16709_v32, 0.0  ;;  %v7392_v32 = vmax.f32 %v16736_v4, 0.0  ;;  %v7381_v4 = vmax.f32 %v19791_v59, 0.0 }
 0x917   :  { %v7428_v22 = vpack.c.bf16 %v7383_v8, %v7382_v9  ;;  %v7433_v16 = vpack.c.bf16 %v7393_v56, %v7392_v32  ;;  %v16942_v56 = vpop.f32.mrf.mxu0 }
 0x918   :  { %v16818_v52 = vpop.f32.mrf.mxu3 }
 0x91f   :  { %v16947_v26 = vpop.f32.mrf.mxu0 }
 0x920   :  { %v16820_v29 = vpop.f32.mrf.mxu3 }
 0x925   :  { %9192 = vmatmul.msk.bf16.gmra.mxu3 %vm5664_vm5, %v7416_v49  ;;  %v7388_v49 = vmax.f32 %v16724_v15, 0.0  ;;  %v7397_v15 = vmax.f32 %v19786_v24, 0.0 }
 0x927   :  { %v7431_v45 = vpack.c.bf16 %v7389_v3, %v7388_v49 }
 0x928   :  { %v16825_v60 = vpop.f32.mrf.mxu3 }
 0x930   :  { %v16827_v41 = vpop.f32.mrf.mxu3 }
 0x935   :  { %9193 = vmatmul.msk.bf16.gmra.mxu3 %vm5664_vm5, %v7417_v50  ;;  %v19785_v50 = vld [vmem:[#allocation212_spill] sm:$0xff] }
 0x936   :  { %v7396_v6 = vmax.f32 %v19785_v50, 0.0 }
 0x938   :  { %v16832_v13 = vpop.f32.mrf.mxu3  ;;  %v7435_v37 = vpack.c.bf16 %v7397_v15, %v7396_v6  ;;  %v16951_v15 = vpop.f32.mrf.mxu0 }
 0x940   :  { %v16834_v57 = vpop.f32.mrf.mxu3  ;;  %v16958_v39 = vpop.f32.mrf.mxu0 }
 0x945   :  { %9194 = vmatmul.msk.bf16.gmra.mxu3 %vm5664_vm5, %v7418_v35  ;;  %v19788_v35 = vld [vmem:[#allocation161_spill] sm:$0xff] }
 0x946   :  { %v7399_v31 = vmax.f32 %v19788_v35, 0.0 }
 0x948   :  { %v16839_v61 = vpop.f32.mrf.mxu3  ;;  %v7436_v44 = vpack.c.bf16 %v7399_v31, %v7398_v12 }
 0x950   :  { %v16841_v18 = vpop.f32.mrf.mxu3 }
 0x955   :  { %9195 = vmatmul.msk.bf16.gmra.mxu3 %vm5664_vm5, %v7419_v1  ;;  %v19790_v1 = vld [vmem:[#allocation167_spill] sm:$0xff] }
 0x956   :  { %v7379_v46 = vmax.f32 %v19790_v1, 0.0  ;;  %v16962_v1 = vpop.f32.mrf.mxu0 }
 0x958   :  { %v16846_v62 = vpop.f32.mrf.mxu3  ;;  %v7426_v51 = vpack.c.bf16 %v7379_v46, %v7378_v58 }
 0x95e   :  { %v16967_v59 = vpop.f32.mrf.mxu0 }
 0x960   :  { %v16848_v34 = vpop.f32.mrf.mxu3 }
 0x965   :  { %9196 = vmatmul.msk.bf16.gmra.mxu3 %vm5664_vm5, %v7420_v17  ;;  %v19793_v17 = vld [vmem:[#allocation128_spill] sm:$0xff] }
 0x966   :  { %v7400_v5 = vmax.f32 %v19793_v17, 0.0  ;;  %v16972_v54 = vpop.f32.mrf.mxu0 }
 0x967   :  { %19794 = vst [vmem:[#allocation119_spill] sm:$0xff] %v16972_v54 }
 0x968   :  { %v16853_v23 = vpop.f32.mrf.mxu3  ;;  %v7437_v24 = vpack.c.bf16 %v7401_v14, %v7400_v5 }
 0x96e   :  { %v16978_v5 = vpop.f32.mrf.mxu0 }
 0x96f   :  { %19795 = vst [vmem:[#allocation121_spill] sm:$0xff] %v16978_v5 }
 0x970   :  { %v16855_v7 = vpop.f32.mrf.mxu3 }
 0x975   :  { %9197 = vmatmul.msk.bf16.gmra.mxu3 %vm5664_vm5, %v7421_v55  ;;  %v7427_v55 = vpack.c.bf16 %v7381_v4, %v7380_v47 }
 0x978   :  { %v16860_v33 = vpop.f32.mrf.mxu3 }
 0x980   :  { %v16862_v25 = vpop.f32.mrf.mxu3 }
 0x985   :  { %9198 = vmatmul.msk.bf16.gmra.mxu3 %vm5664_vm5, %v7422_v2  ;;  %v7430_v2 = vpack.c.bf16 %v7387_v27, %v7386_v19 }
 0x988   :  { %v16879_v30 = vpop.f32.mrf.mxu3 }
 0x990   :  { %v16895_v50 = vpop.f32.mrf.mxu3 }
 0x995   :  { %9199 = vmatmul.msk.bf16.gmra.mxu3 %vm5664_vm5, %v7423_v10 }
 0x998   :  { %v16898_v43 = vpop.f32.mrf.mxu3 }
 0x9a0   :  { %v16900_v35 = vpop.f32.mrf.mxu3 }
 0x9a5   :  { %9200 = vmatmul.msk.bf16.gmra.mxu3 %vm5664_vm5, %v7424_v0 }
 0x9a8   :  { %v16903_v40 = vpop.f32.mrf.mxu3 }
 0x9b0   :  { %v16905_v58 = vpop.f32.mrf.mxu3 }
 0x9b5   :  { %9201 = vmatmul.msk.bf16.gmra.mxu3 %vm5664_vm5, %v7425_v28 }
 0x9b8   :  { %v16908_v47 = vpop.f32.mrf.mxu3 }
 0x9c0   :  { %v16910_v9 = vpop.f32.mrf.mxu3 }
 0x9c5   :  { %9202 = vmatmul.msk.bf16.gmra.mxu3 %vm5664_vm5, %v7426_v51  ;;  %v16983_v51 = vpop.f32.mrf.mxu0 }
 0x9c6   :  { %19796 = vst [vmem:[#allocation87_spill] sm:$0xff] %v16983_v51 }
 0x9c8   :  { %v16913_v8 = vpop.f32.mrf.mxu3 }
 0x9d0   :  { %v16915_v10 = vpop.f32.mrf.mxu3 }
 0x9d5   :  { %9203 = vmatmul.msk.bf16.gmra.mxu3 %vm5664_vm5, %v7427_v55 }
 0x9d8   :  { %v16918_v21 = vpop.f32.mrf.mxu3 }
 0x9e0   :  { %v16920_v0 = vpop.f32.mrf.mxu3 }
 0x9e5   :  { %9204 = vmatmul.msk.bf16.gmra.mxu3 %vm5664_vm5, %v7428_v22  ;;  %v7558_v22 = vpop.f32.mrf.mxu1 }
 0x9e8   :  { %v16923_v11 = vpop.f32.mrf.mxu3 }
 0x9f0   :  { %v16925_v19 = vpop.f32.mrf.mxu3 }
 0x9f5   :  { %9205 = vmatmul.msk.bf16.gmra.mxu3 %vm5664_vm5, %v7429_v42  ;;  %v16988_v42 = vpop.f32.mrf.mxu0 }
 0x9f6   :  { %19797 = vst [vmem:[#allocation190_spill] sm:$0xff] %v16988_v42  ;;  %v19805_v42 = vld [vmem:[#allocation142_spill] sm:$0xff] }
 0x9f8   :  { %v16928_v27 = vpop.f32.mrf.mxu3 }
 0xa00   :  { %v16930_v49 = vpop.f32.mrf.mxu3 }
 0xa05   :  { %9206 = vmatmul.msk.bf16.gmra.mxu3 %vm5664_vm5, %v7430_v2 }
 0xa08   :  { %v16933_v3 = vpop.f32.mrf.mxu3 }
 0xa10   :  { %v16935_v63 = vpop.f32.mrf.mxu3 }
 0xa15   :  { %9207 = vmatmul.msk.bf16.gmra.mxu3 %vm5664_vm5, %v7431_v45  ;;  %v7560_v45 = vpop.f32.mrf.mxu1 }
 0xa18   :  { %v16940_v32 = vpop.f32.mrf.mxu3 }
 0xa20   :  { %v16944_v48 = vpop.f32.mrf.mxu3 }
 0xa25   :  { %9208 = vmatmul.msk.bf16.gmra.mxu3 %vm5664_vm5, %v7432_v38  ;;  %v19799_v38 = vld [vmem:[#allocation86_spill] sm:$0xff] }
 0xa28   :  { %v16949_v6 = vpop.f32.mrf.mxu3 }
 0xa30   :  { %v16953_v12 = vpop.f32.mrf.mxu3 }
 0xa35   :  { %9209 = vmatmul.msk.bf16.gmra.mxu3 %vm5664_vm5, %v7433_v16  ;;  %v16993_v16 = vadd.f32 %v19799_v38, %v7560_v45  ;;  %v19807_v45 = vld [vmem:[#allocation103_spill] sm:$0xff] }
 0xa36   :  { %v17012_v38 = vadd.f32 %v19807_v45, %v16820_v29 }
 0xa37   :  { %19800 = vst [vmem:[#allocation202_spill] sm:$0xff] %v16993_v16  ;;  %v8158_v51 = vsel %vm279_vm0, %v16993_v16, 0.0 }
 0xa38   :  { %v16956_v31 = vpop.f32.mrf.mxu3  ;;  %19808 = vst [vmem:[#allocation99_spill] sm:$0xff] %v17012_v38  ;;  %v8162_v16 = vsel %vm279_vm0, %v17012_v38, 0.0 }
 0xa40   :  { %v16960_v36 = vpop.f32.mrf.mxu3 }
 0xa45   :  { %9210 = vmatmul.msk.bf16.gmra.mxu3 %vm5664_vm5, %v7434_v20  ;;  %v16995_v20 = vpop.f32.mrf.mxu0 }
 0xa46   :  { %19801 = vst [vmem:[#allocation149_spill] sm:$0xff] %v16995_v20 }
 0xa48   :  { %v16965_v46 = vpop.f32.mrf.mxu3 }
 0xa50   :  { %v16969_v4 = vpop.f32.mrf.mxu3 }
 0xa55   :  { %9211 = vmatmul.msk.bf16.gmra.mxu3 %vm5664_vm5, %v7435_v37 }
 0xa58   :  { %v16974_v14 = vpop.f32.mrf.mxu3 }
 0xa60   :  { %v16976_v17 = vpop.f32.mrf.mxu3 }
 0xa65   :  { %9212 = vmatmul.msk.bf16.gmra.mxu3 %vm5664_vm5, %v7436_v44  ;;  %v19803_v44 = vld [vmem:[#allocation138_spill] sm:$0xff] }
 0xa66   :  { %v17000_v5 = vadd.f32 %v19803_v44, %v7558_v22 }
 0xa68   :  { %v16981_v28 = vpop.f32.mrf.mxu3  ;;  %19804 = vst [vmem:[#allocation154_spill] sm:$0xff] %v17000_v5 }
 0xa70   :  { %v16985_v55 = vpop.f32.mrf.mxu3 }
 0xa75   :  { %9213 = vmatmul.msk.bf16.gmra.mxu3 %vm5664_vm5, %v7437_v24  ;;  %v8157_v24 = vsel %vm279_vm0, %v17000_v5, 0.0  ;;  %v8120_v5 = vpop.f32.mrf.mxu0 }
 0xa76   :  { %v8159_v20 = vadd.f32 %v8158_v51, %v8157_v24 }
 0xa78   :  { %v16990_v2 = vpop.f32.mrf.mxu3 }
 0xa79   :  { %19798 = vst [vmem:[#allocation132_spill] sm:$0xff] %v16990_v2  ;;  %v17008_v2 = vadd.f32 %v19805_v42, %v16818_v52  ;;  %v19812_v52 = vld [vmem:[#allocation156_spill] sm:$0xff] }
 0xa7a   :  { %v17026_v42 = vadd.f32 %v19812_v52, %v16827_v41 }
 0xa7b   :  { %19806 = vst [vmem:[#allocation185_spill] sm:$0xff] %v17008_v2  ;;  %v8160_v44 = vsel %vm279_vm0, %v17008_v2, 0.0  ;;  %v19814_v2 = vld [vmem:[#allocation162_spill] sm:$0xff] }
 0xa7c   :  { %v8161_v29 = vadd.f32 %v8160_v44, %v8159_v20  ;;  %v8166_v45 = vsel %vm279_vm0, %v17026_v42, 0.0  ;;  %v17038_v38 = vadd.f32 %v19814_v2, %v16834_v57  ;;  %v19815_v20 = vld [vmem:[#allocation106_spill] sm:$0xff] }
 0xa7d   :  { %v17044_v44 = vadd.f32 %v19815_v20, %v16839_v61  ;;  %v17060_v61 = vpop.f32.mrf.mxu0 }
 0xa7e   :  { %v8163_v24 = vadd.f32 %v8162_v16, %v8161_v29  ;;  %v19817_v16 = vld [vmem:[#allocation166_spill] sm:$0xff] }
 0xa7f   :  { %19816 = vst [vmem:[#allocation131_spill] sm:$0xff] %v17044_v44  ;;  %v17052_v29 = vadd.f32 %v19817_v16, %v16841_v18  ;;  %v8172_v2 = vsel %vm279_vm0, %v17044_v44, 0.0 }
 0xa80   :  { %v16997_v37 = vpop.f32.mrf.mxu3 }
 0xa81   :  { %19802 = vst [vmem:[#allocation150_spill] sm:$0xff] %v16997_v37  ;;  %v19809_v37 = vld [vmem:[#allocation148_spill] sm:$0xff] }
 0xa82   :  { %v17016_v54 = vadd.f32 %v19809_v37, %v16825_v60  ;;  %v19813_v60 = vld [vmem:[#allocation159_spill] sm:$0xff]  ;;  %19818 = vst [vmem:[#allocation158_spill] sm:$0xff] %v17052_v29 }
 0xa83   :  { %v17032_v37 = vadd.f32 %v19813_v60, %v16832_v13  ;;  %v8170_v13 = vsel %vm279_vm0, %v17038_v38, 0.0 }
 0xa84   :  { %19810 = vst [vmem:[#allocation118_spill] sm:$0xff] %v17016_v54  ;;  %v8164_v51 = vsel %vm279_vm0, %v17016_v54, 0.0 }
 0xa85   :  { %v8168_v41 = vsel %vm279_vm0, %v17032_v37, 0.0 }
 0xa88   :  { %v17018_v22 = vpop.f32.mrf.mxu3 }
 0xa89   :  { %19811 = vst [vmem:[#allocation116_spill] sm:$0xff] %v17018_v22  ;;  %v8165_v22 = vadd.f32 %v8164_v51, %v8163_v24  ;;  %v19819_v51 = vld [vmem:[#allocation168_spill] sm:$0xff]  ;;  %v8174_v24 = vsel %vm279_vm0, %v17052_v29, 0.0 }
 0xa8a   :  { %v17058_v60 = vadd.f32 %v19819_v51, %v16846_v62 }
 0xa8b   :  { %v8167_v52 = vadd.f32 %v8166_v45, %v8165_v22  ;;  %v19820_v45 = vld [vmem:[#allocation109_spill] sm:$0xff] }
 0xa8c   :  { %v17066_v20 = vadd.f32 %v19820_v45, %v16848_v34 }
 0xa8d   :  { %v8169_v57 = vadd.f32 %v8168_v41, %v8167_v52  ;;  %v8176_v41 = vsel %vm279_vm0, %v17058_v60, 0.0  ;;  %v19821_v52 = vld [vmem:[#allocation170_spill] sm:$0xff] }
 0xa8e   :  { %v17072_v16 = vadd.f32 %v19821_v52, %v16853_v23 }
 0xa8f   :  { %v8171_v22 = vadd.f32 %v8170_v13, %v8169_v57  ;;  %v8178_v13 = vsel %vm279_vm0, %v17066_v20, 0.0  ;;  %v19822_v57 = vld [vmem:[#allocation111_spill] sm:$0xff] }
 0xa90   :  { %v17046_v54 = vpop.f32.mrf.mxu3  ;;  %v17078_v29 = vadd.f32 %v19822_v57, %v16855_v7  ;;  %v17094_v7 = vpop.f32.mrf.mxu0 }
 0xa91   :  { %v8173_v18 = vadd.f32 %v8172_v2, %v8171_v22  ;;  %v8180_v2 = vsel %vm279_vm0, %v17072_v16, 0.0  ;;  %v19823_v22 = vld [vmem:[#allocation172_spill] sm:$0xff] }
 0xa92   :  { %v17086_v45 = vadd.f32 %v19823_v22, %v16860_v33 }
 0xa93   :  { %v8175_v62 = vadd.f32 %v8174_v24, %v8173_v18  ;;  %v8182_v24 = vsel %vm279_vm0, %v17078_v29, 0.0  ;;  %v19824_v18 = vld [vmem:[#allocation175_spill] sm:$0xff] }
 0xa94   :  { %v17092_v52 = vadd.f32 %v19824_v18, %v16862_v25 }
 0xa95   :  { %v8177_v34 = vadd.f32 %v8176_v41, %v8175_v62  ;;  %v8184_v41 = vsel %vm279_vm0, %v17086_v45, 0.0  ;;  %v19826_v62 = vld [vmem:[#allocation115_spill] sm:$0xff] }
 0xa96   :  { %19825 = vst [vmem:[#allocation187_spill] sm:$0xff] %v17092_v52 }
 0xa97   :  { %v8179_v23 = vadd.f32 %v8178_v13, %v8177_v34  ;;  %v8186_v13 = vsel %vm279_vm0, %v17092_v52, 0.0  ;;  %v19827_v34 = vld [vmem:[#allocation186_spill] sm:$0xff] }
 0xa98   :  { %v7683_v51 = vpop.f32.mrf.mxu3  ;;  %v17108_v25 = vadd.f32 %v19827_v34, %v16895_v50  ;;  %v17128_v34 = vpop.f32.mrf.mxu0 }
 0xa99   :  { %v17080_v44 = vadd.f32 %v8120_v5, %v7683_v51  ;;  %v8181_v5 = vadd.f32 %v8180_v2, %v8179_v23  ;;  %v17100_v51 = vadd.f32 %v19826_v62, %v16879_v30  ;;  %v19828_v23 = vld [vmem:[#allocation136_spill] sm:$0xff] }
 0xa9a   :  { %v17114_v18 = vadd.f32 %v19828_v23, %v16898_v43 }
 0xa9b   :  { %v8183_v33 = vadd.f32 %v8182_v24, %v8181_v5  ;;  %v8188_v2 = vsel %vm279_vm0, %v17100_v51, 0.0  ;;  %v8190_v24 = vsel %vm279_vm0, %v17108_v25, 0.0  ;;  %v19830_v5 = vld [vmem:[#allocation94_spill] sm:$0xff] }
 0xa9c   :  { %19829 = vst [vmem:[#allocation85_spill] sm:$0xff] %v17114_v18  ;;  %v17120_v62 = vadd.f32 %v19830_v5, %v16900_v35  ;;  %v8192_v50 = vsel %vm279_vm0, %v17114_v18, 0.0  ;;  %v19835_v5 = vld [vmem:[#allocation205_spill] sm:$0xff] }
 0xa9d   :  { %v8185_v22 = vadd.f32 %v8184_v41, %v8183_v33  ;;  %v19832_v41 = vld [vmem:[#allocation195_spill] sm:$0xff] }
 0xa9e   :  { %19831 = vst [vmem:[#allocation133_spill] sm:$0xff] %v17120_v62  ;;  %v17126_v33 = vadd.f32 %v19832_v41, %v16903_v40  ;;  %v17142_v40 = vadd.f32 %v19835_v5, %v16908_v47 }
 0xa9f   :  { %v8187_v30 = vadd.f32 %v8186_v13, %v8185_v22  ;;  %v8194_v13 = vsel %vm279_vm0, %v17120_v62, 0.0  ;;  %v19834_v22 = vld [vmem:[#allocation201_spill] sm:$0xff] }
 0xaa0   :  { %v17102_v57 = vpop.f32.mrf.mxu3  ;;  %19833 = vst [vmem:[#allocation126_spill] sm:$0xff] %v17126_v33  ;;  %v17136_v35 = vadd.f32 %v19834_v22, %v16905_v58  ;;  %v8200_v58 = vsel %vm279_vm0, %v17142_v40, 0.0 }
 0xaa1   :  { %v8189_v52 = vadd.f32 %v8188_v2, %v8187_v30  ;;  %v8196_v30 = vsel %vm279_vm0, %v17126_v33, 0.0 }
 0xaa3   :  { %v8191_v43 = vadd.f32 %v8190_v24, %v8189_v52  ;;  %v8198_v52 = vsel %vm279_vm0, %v17136_v35, 0.0  ;;  %v19836_v24 = vld [vmem:[#allocation100_spill] sm:$0xff] }
 0xaa4   :  { %v17148_v18 = vadd.f32 %v19836_v24, %v16910_v9  ;;  %v17164_v9 = vpop.f32.mrf.mxu0  ;;  %v19842_v24 = vld [vmem:[#allocation77_spill] sm:$0xff] }
 0xaa5   :  { %v8193_v2 = vadd.f32 %v8192_v50, %v8191_v43  ;;  %v19838_v50 = vld [vmem:[#allocation88_spill] sm:$0xff] }
 0xaa6   :  { %19837 = vst [vmem:[#allocation151_spill] sm:$0xff] %v17148_v18  ;;  %v17154_v43 = vadd.f32 %v19838_v50, %v16913_v8  ;;  %v8202_v47 = vsel %vm279_vm0, %v17148_v18, 0.0  ;;  %v17176_v50 = vadd.f32 %v19842_v24, %v16920_v0 }
 0xaa7   :  { %v8195_v41 = vadd.f32 %v8194_v13, %v8193_v2  ;;  %v19840_v13 = vld [vmem:[#allocation207_spill] sm:$0xff] }
 0xaa8   :  { %v17130_v23 = vpop.f32.mrf.mxu3  ;;  %19839 = vst [vmem:[#allocation199_spill] sm:$0xff] %v17154_v43  ;;  %v17162_v2 = vadd.f32 %v19840_v13, %v16915_v10  ;;  %v8204_v5 = vsel %vm279_vm0, %v17154_v43, 0.0 }
 0xaa9   :  { %v8197_v62 = vadd.f32 %v8196_v30, %v8195_v41  ;;  %v19841_v41 = vld [vmem:[#allocation210_spill] sm:$0xff] }
 0xaaa   :  { %v17170_v8 = vadd.f32 %v19841_v41, %v16918_v21  ;;  %v8210_v21 = vsel %vm279_vm0, %v17176_v50, 0.0  ;;  %v19846_v41 = vld [vmem:[#allocation217_spill] sm:$0xff] }
 0xaab   :  { %v8199_v22 = vadd.f32 %v8198_v52, %v8197_v62  ;;  %v8206_v52 = vsel %vm279_vm0, %v17162_v2, 0.0 }
 0xaac   :  { %v8208_v13 = vsel %vm279_vm0, %v17170_v8, 0.0 }
 0xaad   :  { %v8201_v30 = vadd.f32 %v8200_v58, %v8199_v22  ;;  %v19843_v58 = vld [vmem:[#allocation102_spill] sm:$0xff] }
 0xaae   :  { %v17182_v22 = vadd.f32 %v19843_v58, %v16923_v11  ;;  %v17198_v11 = vpop.f32.mrf.mxu0 }
 0xaaf   :  { %v8203_v62 = vadd.f32 %v8202_v47, %v8201_v30  ;;  %v19844_v47 = vld [vmem:[#allocation213_spill] sm:$0xff] }
 0xab0   :  { %v17156_v33 = vpop.f32.mrf.mxu3  ;;  %v17190_v30 = vadd.f32 %v19844_v47, %v16925_v19 }
 0xab1   :  { %v8205_v10 = vadd.f32 %v8204_v5, %v8203_v62  ;;  %v8212_v5 = vsel %vm279_vm0, %v17182_v22, 0.0  ;;  %v17196_v62 = vadd.f32 %v19846_v41, %v16928_v27 }
 0xab2   :  { %19845 = vst [vmem:[#allocation214_spill] sm:$0xff] %v17190_v30  ;;  %v8214_v24 = vsel %vm279_vm0, %v17190_v30, 0.0 }
 0xab3   :  { %v8207_v43 = vadd.f32 %v8206_v52, %v8205_v10  ;;  %v19847_v10 = vld [vmem:[#allocation84_spill] sm:$0xff] }
 0xab4   :  { %v17204_v58 = vadd.f32 %v19847_v10, %v16930_v49 }
 0xab5   :  { %v8209_v0 = vadd.f32 %v8208_v13, %v8207_v43  ;;  %v8216_v43 = vsel %vm279_vm0, %v17196_v62, 0.0  ;;  %v19849_v13 = vld [vmem:[#allocation139_spill] sm:$0xff] }
 0xab6   :  { %19848 = vst [vmem:[#allocation194_spill] sm:$0xff] %v17204_v58  ;;  %v17210_v47 = vadd.f32 %v19849_v13, %v16933_v3 }
 0xab7   :  { %v8211_v52 = vadd.f32 %v8210_v21, %v8209_v0  ;;  %v8218_v21 = vsel %vm279_vm0, %v17204_v58, 0.0  ;;  %v19850_v0 = vld [vmem:[#allocation114_spill] sm:$0xff]  ;;  %v17232_v58 = vpop.f32.mrf.mxu0 }
 0xab8   :  { %v17184_v18 = vpop.f32.mrf.mxu3  ;;  %v17218_v30 = vadd.f32 %v19850_v0, %v16935_v63 }
 0xab9   :  { %v8213_v19 = vadd.f32 %v8212_v5, %v8211_v52  ;;  %v8220_v5 = vsel %vm279_vm0, %v17210_v47, 0.0  ;;  %v19851_v52 = vld [vmem:[#allocation171_spill] sm:$0xff] }
 0xaba   :  { %v17224_v10 = vadd.f32 %v19851_v52, %v16940_v32 }
 0xabb   :  { %v8215_v27 = vadd.f32 %v8214_v24, %v8213_v19  ;;  %v8222_v24 = vsel %vm279_vm0, %v17218_v30, 0.0  ;;  %v19852_v19 = vld [vmem:[#allocation141_spill] sm:$0xff] }
 0xabc   :  { %v17230_v13 = vadd.f32 %v19852_v19, %v16944_v48 }
 0xabd   :  { %v8217_v49 = vadd.f32 %v8216_v43, %v8215_v27  ;;  %v8224_v43 = vsel %vm279_vm0, %v17224_v10, 0.0  ;;  %v19853_v27 = vld [vmem:[#allocation129_spill] sm:$0xff] }
 0xabe   :  { %v17238_v0 = vadd.f32 %v19853_v27, %v16949_v6 }
 0xabf   :  { %v8219_v3 = vadd.f32 %v8218_v21, %v8217_v49  ;;  %v8226_v21 = vsel %vm279_vm0, %v17230_v13, 0.0  ;;  %v19854_v49 = vld [vmem:[#allocation101_spill] sm:$0xff] }
 0xac0   :  { %v17212_v41 = vpop.f32.mrf.mxu3  ;;  %v17246_v48 = vadd.f32 %v19854_v49, %v16953_v12 }
 0xac1   :  { %v8221_v63 = vadd.f32 %v8220_v5, %v8219_v3  ;;  %v8228_v5 = vsel %vm279_vm0, %v17238_v0, 0.0  ;;  %v17252_v3 = vadd.f32 %v16937_v53, %v16956_v31 }
 0xac3   :  { %v8223_v32 = vadd.f32 %v8222_v24, %v8221_v63  ;;  %v8230_v24 = vsel %vm279_vm0, %v17246_v48, 0.0  ;;  %v17258_v63 = vadd.f32 %v16942_v56, %v16960_v36  ;;  %v8232_v12 = vsel %vm279_vm0, %v17252_v3, 0.0 }
 0xac5   :  { %v8225_v19 = vadd.f32 %v8224_v43, %v8223_v32  ;;  %v17264_v43 = vadd.f32 %v16947_v26, %v16965_v46  ;;  %v8137_v32 = vpop.f32.mrf.mxu0  ;;  %v8234_v31 = vsel %vm279_vm0, %v17258_v63, 0.0 }
 0xac7   :  { %v8227_v6 = vadd.f32 %v8226_v21, %v8225_v19  ;;  %v17270_v21 = vadd.f32 %v16951_v15, %v16969_v4  ;;  %v8236_v36 = vsel %vm279_vm0, %v17264_v43, 0.0  ;;  %v17276_v19 = vadd.f32 %v16958_v39, %v16974_v14  ;;  %v19858_v14 = vld [vmem:[#allocation119_spill] sm:$0xff] }
 0xac8   :  { %v17240_v52 = vpop.f32.mrf.mxu3  ;;  %v17288_v4 = vadd.f32 %v16967_v59, %v16981_v28 }
 0xac9   :  { %v8229_v27 = vadd.f32 %v8228_v5, %v8227_v6  ;;  %19855 = vst [vmem:[#allocation216_spill] sm:$0xff] %v17276_v19  ;;  %v8238_v46 = vsel %vm279_vm0, %v17270_v21, 0.0  ;;  %v17282_v5 = vadd.f32 %v16962_v1, %v16976_v17  ;;  %v8240_v15 = vsel %vm279_vm0, %v17276_v19, 0.0 }
 0xaca   :  { %19857 = vst [vmem:[#allocation96_spill] sm:$0xff] %v17288_v4  ;;  %v8244_v17 = vsel %vm279_vm0, %v17288_v4, 0.0 }
 0xacb   :  { %v8231_v49 = vadd.f32 %v8230_v24, %v8229_v27  ;;  %19856 = vst [vmem:[#allocation97_spill] sm:$0xff] %v17282_v5  ;;  %v8242_v39 = vsel %vm279_vm0, %v17282_v5, 0.0 }
 0xacd   :  { %v8233_v56 = vadd.f32 %v8232_v12, %v8231_v49  ;;  %v17294_v12 = vadd.f32 %v19858_v14, %v16985_v55  ;;  %v8140_v49 = vpop.f32.mrf.mxu0 }
 0xacf   :  { %v8235_v26 = vadd.f32 %v8234_v31, %v8233_v56  ;;  %v19859_v31 = vld [vmem:[#allocation132_spill] sm:$0xff]  ;;  %v19860_v56 = vld [vmem:[#allocation121_spill] sm:$0xff]  ;;  %v8246_v28 = vsel %vm279_vm0, %v17294_v12, 0.0 }
 0xad0   :  { %v7700_v53 = vpop.f32.mrf.mxu3 }
 0xad1   :  { %v8237_v6 = vadd.f32 %v8236_v36, %v8235_v26  ;;  %v17300_v36 = vadd.f32 %v19860_v56, %v19859_v31  ;;  %v19861_v26 = vld [vmem:[#allocation150_spill] sm:$0xff] }
 0xad3   :  { %v8239_v24 = vadd.f32 %v8238_v46, %v8237_v6  ;;  %v19862_v46 = vld [vmem:[#allocation87_spill] sm:$0xff]  ;;  %v8248_v55 = vsel %vm279_vm0, %v17300_v36, 0.0 }
 0xad4   :  { %v17306_v6 = vadd.f32 %v19862_v46, %v19861_v26 }
 0xad5   :  { %v8241_v1 = vadd.f32 %v8240_v15, %v8239_v24  ;;  %v19863_v15 = vld [vmem:[#allocation116_spill] sm:$0xff]  ;;  %v19864_v24 = vld [vmem:[#allocation190_spill] sm:$0xff] }
 0xad6   :  { %v17312_v14 = vadd.f32 %v19864_v24, %v19863_v15  ;;  %v8256_v15 = vsel %vm279_vm0, %v17080_v44, 0.0 }
 0xad7   :  { %v8243_v59 = vadd.f32 %v8242_v39, %v8241_v1  ;;  %v8250_v39 = vsel %vm279_vm0, %v17306_v6, 0.0  ;;  %v19865_v1 = vld [vmem:[#allocation149_spill] sm:$0xff] }
 0xad8   :  { %v7703_v27 = vpop.f32.mrf.mxu3  ;;  %v17318_v31 = vadd.f32 %v19865_v1, %v17046_v54  ;;  %v17332_v54 = vadd.f32 %v17094_v7, %v17130_v23  ;;  %v17350_v23 = vadd.f32 %v17198_v11, %v17212_v41 }
 0xad9   :  { %v8245_v5 = vadd.f32 %v8244_v17, %v8243_v59  ;;  %v8252_v17 = vsel %vm279_vm0, %v17312_v14, 0.0  ;;  %v8142_v59 = vpop.f32.mrf.mxu0  ;;  %v17364_v41 = vadd.f32 %v8140_v49, %v7703_v27 }
 0xada   :  { %v8254_v46 = vsel %vm279_vm0, %v17318_v31, 0.0 }
 0xadb   :  { %v8247_v4 = vadd.f32 %v8246_v28, %v8245_v5  ;;  %v17326_v5 = vadd.f32 %v17060_v61, %v17102_v57  ;;  %v8260_v61 = vsel %vm279_vm0, %v17332_v54, 0.0  ;;  %v17344_v57 = vadd.f32 %v17164_v9, %v17184_v18  ;;  %19867 = vst [vmem:[#allocation164_spill] sm:$0xff] %v17364_v41 }
 0xadc   :  { %v8266_v9 = vsel %vm279_vm0, %v17350_v23, 0.0 }
 0xadd   :  { %v8249_v56 = vadd.f32 %v8248_v55, %v8247_v4  ;;  %v8258_v24 = vsel %vm279_vm0, %v17326_v5, 0.0 }
 0xadf   :  { %v8251_v26 = vadd.f32 %v8250_v39, %v8249_v56  ;;  %v17338_v39 = vadd.f32 %v17128_v34, %v17156_v33  ;;  %v8264_v33 = vsel %vm279_vm0, %v17344_v57, 0.0  ;;  %v17356_v34 = vadd.f32 %v17232_v58, %v17240_v52  ;;  %v8150_v58 = vpop.f32.mrf.mxu1 }
 0xae0   :  { %v7705_v19 = vpop.f32.mrf.mxu3 }
 0xae1   :  { %v8253_v28 = vadd.f32 %v8252_v17, %v8251_v26  ;;  %v8262_v7 = vsel %vm279_vm0, %v17338_v39, 0.0  ;;  %v8145_v17 = vpop.f32.mrf.mxu0  ;;  %v8268_v11 = vsel %vm279_vm0, %v17356_v34, 0.0 }
 0xae3   :  { %v8255_v4 = vadd.f32 %v8254_v46, %v8253_v28  ;;  %v17360_v28 = vadd.f32 %v8137_v32, %v7700_v53 }
 0xae5   :  { %v8257_v1 = vadd.f32 %v8256_v15, %v8255_v4  ;;  %19866 = vst [vmem:[#allocation163_spill] sm:$0xff] %v17360_v28 }
 0xae7   :  { %v8259_v56 = vadd.f32 %v8258_v24, %v8257_v1  ;;  %v8270_v24 = vsel %vm279_vm0, %v17360_v28, 0.0  ;;  %v8143_v1 = vadd.f32 %v8142_v59, %v7705_v19 }
 0xae8   :  { %v7708_v55 = vpop.f32.mrf.mxu3 }
 0xae9   :  { %v8261_v26 = vadd.f32 %v8260_v61, %v8259_v56  ;;  %v8272_v61 = vsel %vm279_vm0, %v17364_v41, 0.0  ;;  %v8146_v56 = vadd.f32 %v8145_v17, %v7708_v55 }
 0xaeb   :  { %v8263_v46 = vadd.f32 %v8262_v7, %v8261_v26  ;;  %v8147_v7 = vpop.f32.mrf.mxu0  ;;  %v8274_v26 = vsel %vm279_vm0, %v8143_v1, 0.0  ;;  %v8276_v27 = vsel %vm279_vm0, %v8146_v56, 0.0 }
 0xaed   :  { %v8265_v15 = vadd.f32 %v8264_v33, %v8263_v46 }
 0xaef   :  { %v8267_v4 = vadd.f32 %v8266_v9, %v8265_v15 }
 0xaf0   :  { %v7710_v18 = vpop.f32.mrf.mxu3 }
 0xaf1   :  { %v8269_v52 = vadd.f32 %v8268_v11, %v8267_v4  ;;  %v8148_v33 = vadd.f32 %v8147_v7, %v7710_v18  ;;  %v8152_v11 = vpop.f32.mrf.mxu1 }
 0xaf3   :  { %v8271_v32 = vadd.f32 %v8270_v24, %v8269_v52  ;;  %v8278_v15 = vsel %vm279_vm0, %v8148_v33, 0.0 }
 0xaf5   :  { %v8273_v46 = vadd.f32 %v8272_v61, %v8271_v32 }
 0xaf7   :  { %v8275_v9 = vadd.f32 %v8274_v26, %v8273_v46 }
 0xaf8   :  { %v7713_v53 = vpop.f32.mrf.mxu3 }
 0xaf9   :  { %v8151_v49 = vadd.f32 %v8150_v58, %v7713_v53  ;;  %v8277_v19 = vadd.f32 %v8276_v27, %v8275_v9  ;;  %v19868_v53 = vld [vmem:[#allocation95_spill] sm:$0xff] }
 0xafb   :  { %v8280_v59 = vsel %vm279_vm0, %v8151_v49, 0.0  ;;  %v8279_v4 = vadd.f32 %v8278_v15, %v8277_v19  ;;  %v19873_v15 = vld [vmem:[#allocation154_spill] sm:$0xff] }
 0xafd   :  { %v8281_v17 = vadd.f32 %v8280_v59, %v8279_v4  ;;  %v19875_v59 = vld [vmem:[#allocation202_spill] sm:$0xff] }
 0xb00   :  { %v7715_v41 = vpop.f32.mrf.mxu3 }
 0xb01   :  { %v8153_v55 = vadd.f32 %v8152_v11, %v7715_v41 }
 0xb03   :  { %v8282_v24 = vsel %vm279_vm0, %v8153_v55, 0.0 }
 0xb04   :  { %v8283_v52 = vadd.f32 %v8282_v24, %v8281_v17  ;;  %v19881_v17 = vld [vmem:[#allocation118_spill] sm:$0xff] }
 0xb06   :  { %v8284_v28 = vrot.slane %v8283_v52, 4 }
 0xb08   :  { %v8285_v18 = vadd.f32 %v8284_v28, %v8283_v52 }
 0xb0a   :  { %v8286_v61 = vrot.slane %v8285_v18, 2 }
 0xb0c   :  { %v8287_v7 = vadd.f32 %v8286_v61, %v8285_v18 }
 0xb0e   :  { %v8288_v32 = vrot.slane %v8287_v7, 1 }
 0xb10   :  { %v8289_v58 = vadd.f32 %v8288_v32, %v8287_v7 }
 0xb12   :  { %v17376_v26 = vmul.f32 %v8289_v58, %v19868_v53 }
 0xb14   :  { %v17379_v46 = vsub.f32 %v8143_v1, %v17376_v26  ;;  %v17382_v27 = vsub.f32 %v8146_v56, %v17376_v26  ;;  %v17385_v41 = vsub.f32 %v8148_v33, %v17376_v26  ;;  %v17388_v9 = vsub.f32 %v8151_v49, %v17376_v26  ;;  %v19877_v56 = vld [vmem:[#allocation185_spill] sm:$0xff]  ;;  %v19879_v33 = vld [vmem:[#allocation99_spill] sm:$0xff] }
 0xb15   :  { %v17391_v28 = vsub.f32 %v8153_v55, %v17376_v26  ;;  %v17395_v19 = vsub.f32 %v19873_v15, %v17376_v26  ;;  %v17399_v1 = vsub.f32 %v19875_v59, %v17376_v26  ;;  %v17403_v11 = vsub.f32 %v19877_v56, %v17376_v26 }
 0xb16   :  { %19869 = vst [vmem:[#allocation188_spill] sm:$0xff] %v17379_v46  ;;  %v17407_v4 = vsub.f32 %v19879_v33, %v17376_v26  ;;  %v17415_v24 = vsub.f32 %v19881_v17, %v17376_v26  ;;  %v17421_v18 = vsub.f32 %v17026_v42, %v17376_v26  ;;  %v17429_v15 = vsub.f32 %v17032_v37, %v17376_v26 }
 0xb17   :  { %19870 = vst [vmem:[#allocation196_spill] sm:$0xff] %v17382_v27  ;;  %v8355_v49 = vmul.f32 %v17395_v19, %v17395_v19  ;;  %v8356_v55 = vmul.f32 %v17399_v1, %v17399_v1  ;;  %v8357_v52 = vmul.f32 %v17403_v11, %v17403_v11  ;;  %v17436_v42 = vsub.f32 %v17038_v38, %v17376_v26 }
 0xb18   :  { %19871 = vst [vmem:[#allocation89_spill] sm:$0xff] %v17385_v41  ;;  %v8358_v61 = vmul.f32 %v17407_v4, %v17407_v4  ;;  %v8359_v59 = vmul.f32 %v17415_v24, %v17415_v24 }
 0xb19   :  { %19872 = vst [vmem:[#allocation200_spill] sm:$0xff] %v17388_v9  ;;  %v8419_v7 = vsel %vm279_vm0, %v8355_v49, 0.0  ;;  %v8420_v32 = vsel %vm279_vm0, %v8356_v55, 0.0  ;;  %v8422_v56 = vsel %vm279_vm0, %v8357_v52, 0.0  ;;  %v8360_v49 = vmul.f32 %v17421_v18, %v17421_v18 }
 0xb1a   :  { %19874 = vst [vmem:[#allocation105_spill] sm:$0xff] %v17395_v19  ;;  %v8421_v58 = vadd.f32 %v8420_v32, %v8419_v7  ;;  %v8424_v55 = vsel %vm279_vm0, %v8358_v61, 0.0  ;;  %v19883_v7 = vld [vmem:[#allocation131_spill] sm:$0xff]  ;;  %v8361_v32 = vmul.f32 %v17429_v15, %v17429_v15  ;;  %v8426_v52 = vsel %vm279_vm0, %v8359_v59, 0.0 }
 0xb1b   :  { %19876 = vst [vmem:[#allocation83_spill] sm:$0xff] %v17399_v1  ;;  %v17443_v37 = vsub.f32 %v19883_v7, %v17376_v26  ;;  %v8428_v61 = vsel %vm279_vm0, %v8360_v49, 0.0 }
 0xb1c   :  { %19878 = vst [vmem:[#allocation134_spill] sm:$0xff] %v17403_v11  ;;  %v8423_v33 = vadd.f32 %v8422_v56, %v8421_v58  ;;  %v19884_v56 = vld [vmem:[#allocation158_spill] sm:$0xff]  ;;  %v8430_v59 = vsel %vm279_vm0, %v8361_v32, 0.0 }
 0xb1d   :  { %19880 = vst [vmem:[#allocation203_spill] sm:$0xff] %v17407_v4  ;;  %v17450_v38 = vsub.f32 %v19884_v56, %v17376_v26  ;;  %v8363_v7 = vmul.f32 %v17443_v37, %v17443_v37 }
 0xb1e   :  { %19882 = vst [vmem:[#allocation152_spill] sm:$0xff] %v17415_v24  ;;  %v8425_v17 = vadd.f32 %v8424_v55, %v8423_v33  ;;  %v8362_v24 = vmul.f32 %v17436_v42, %v17436_v42  ;;  %v17457_v55 = vsub.f32 %v17058_v60, %v17376_v26  ;;  %v17471_v60 = vsub.f32 %v17072_v16, %v17376_v26 }
 0xb1f   :  { %v8364_v56 = vmul.f32 %v17450_v38, %v17450_v38  ;;  %v8434_v32 = vsel %vm279_vm0, %v8363_v7, 0.0  ;;  %v17485_v16 = vsub.f32 %v17086_v45, %v17376_v26  ;;  %v17499_v45 = vsub.f32 %v17100_v51, %v17376_v26 }
 0xb20   :  { %v8427_v58 = vadd.f32 %v8426_v52, %v8425_v17  ;;  %v17464_v52 = vsub.f32 %v17066_v20, %v17376_v26  ;;  %v8432_v49 = vsel %vm279_vm0, %v8362_v24, 0.0  ;;  %v17478_v20 = vsub.f32 %v17078_v29, %v17376_v26 }
 0xb21   :  { %v8436_v24 = vsel %vm279_vm0, %v8364_v56, 0.0  ;;  %v8371_v11 = vmul.f32 %v17499_v45, %v17499_v45 }
 0xb22   :  { %v8429_v33 = vadd.f32 %v8428_v61, %v8427_v58  ;;  %v8365_v61 = vmul.f32 %v17457_v55, %v17457_v55  ;;  %v8368_v4 = vmul.f32 %v17478_v20, %v17478_v20 }
 0xb24   :  { %v8431_v17 = vadd.f32 %v8430_v59, %v8429_v33  ;;  %v8366_v59 = vmul.f32 %v17464_v52, %v17464_v52  ;;  %v8438_v7 = vsel %vm279_vm0, %v8365_v61, 0.0 }
 0xb26   :  { %v8433_v58 = vadd.f32 %v8432_v49, %v8431_v17  ;;  %v8367_v49 = vmul.f32 %v17471_v60, %v17471_v60  ;;  %v8440_v56 = vsel %vm279_vm0, %v8366_v59, 0.0  ;;  %v8444_v59 = vsel %vm279_vm0, %v8368_v4, 0.0 }
 0xb28   :  { %v8435_v33 = vadd.f32 %v8434_v32, %v8433_v58  ;;  %v19885_v32 = vld [vmem:[#allocation187_spill] sm:$0xff]  ;;  %v8442_v61 = vsel %vm279_vm0, %v8367_v49, 0.0 }
 0xb29   :  { %v17492_v29 = vsub.f32 %v19885_v32, %v17376_v26 }
 0xb2a   :  { %v8437_v17 = vadd.f32 %v8436_v24, %v8435_v33  ;;  %v8369_v24 = vmul.f32 %v17485_v16, %v17485_v16 }
 0xb2b   :  { %v8370_v32 = vmul.f32 %v17492_v29, %v17492_v29 }
 0xb2c   :  { %v8439_v58 = vadd.f32 %v8438_v7, %v8437_v17  ;;  %v17506_v7 = vsub.f32 %v17108_v25, %v17376_v26  ;;  %v8446_v49 = vsel %vm279_vm0, %v8369_v24, 0.0  ;;  %v8450_v24 = vsel %vm279_vm0, %v8371_v11, 0.0 }
 0xb2d   :  { %v8448_v4 = vsel %vm279_vm0, %v8370_v32, 0.0 }
 0xb2e   :  { %v8441_v33 = vadd.f32 %v8440_v56, %v8439_v58  ;;  %19886 = vst [vmem:[#allocation113_spill] sm:$0xff] %v17506_v7  ;;  %v19887_v56 = vld [vmem:[#allocation85_spill] sm:$0xff]  ;;  %v8372_v1 = vmul.f32 %v17506_v7, %v17506_v7 }
 0xb2f   :  { %v17513_v51 = vsub.f32 %v19887_v56, %v17376_v26 }
 0xb30   :  { %v8443_v17 = vadd.f32 %v8442_v61, %v8441_v33  ;;  %v19889_v61 = vld [vmem:[#allocation133_spill] sm:$0xff]  ;;  %v8452_v32 = vsel %vm279_vm0, %v8372_v1, 0.0 }
 0xb31   :  { %19888 = vst [vmem:[#allocation91_spill] sm:$0xff] %v17513_v51  ;;  %v17520_v25 = vsub.f32 %v19889_v61, %v17376_v26  ;;  %v8373_v19 = vmul.f32 %v17513_v51, %v17513_v51 }
 0xb32   :  { %v8445_v58 = vadd.f32 %v8444_v59, %v8443_v17  ;;  %v19891_v59 = vld [vmem:[#allocation126_spill] sm:$0xff] }
 0xb33   :  { %19890 = vst [vmem:[#allocation189_spill] sm:$0xff] %v17520_v25  ;;  %v17527_v56 = vsub.f32 %v19891_v59, %v17376_v26  ;;  %v8374_v61 = vmul.f32 %v17520_v25, %v17520_v25  ;;  %v8454_v11 = vsel %vm279_vm0, %v8373_v19, 0.0 }
 0xb34   :  { %v8447_v33 = vadd.f32 %v8446_v49, %v8445_v58  ;;  %v17534_v49 = vsub.f32 %v17136_v35, %v17376_v26 }
 0xb35   :  { %19892 = vst [vmem:[#allocation177_spill] sm:$0xff] %v17527_v56  ;;  %v8375_v59 = vmul.f32 %v17527_v56, %v17527_v56  ;;  %v8456_v1 = vsel %vm279_vm0, %v8374_v61, 0.0 }
 0xb36   :  { %v8449_v17 = vadd.f32 %v8448_v4, %v8447_v33  ;;  %v17541_v4 = vsub.f32 %v17142_v40, %v17376_v26  ;;  %v8376_v25 = vmul.f32 %v17534_v49, %v17534_v49 }
 0xb37   :  { %v8458_v19 = vsel %vm279_vm0, %v8375_v59, 0.0 }
 0xb38   :  { %v8451_v58 = vadd.f32 %v8450_v24, %v8449_v17  ;;  %v19893_v24 = vld [vmem:[#allocation151_spill] sm:$0xff]  ;;  %v8377_v56 = vmul.f32 %v17541_v4, %v17541_v4  ;;  %v8460_v61 = vsel %vm279_vm0, %v8376_v25, 0.0 }
 0xb39   :  { %v17548_v35 = vsub.f32 %v19893_v24, %v17376_v26 }
 0xb3a   :  { %v8453_v33 = vadd.f32 %v8452_v32, %v8451_v58  ;;  %v19894_v32 = vld [vmem:[#allocation199_spill] sm:$0xff]  ;;  %v8462_v59 = vsel %vm279_vm0, %v8377_v56, 0.0 }
 0xb3b   :  { %v17555_v40 = vsub.f32 %v19894_v32, %v17376_v26  ;;  %v8378_v24 = vmul.f32 %v17548_v35, %v17548_v35 }
 0xb3c   :  { %v8455_v17 = vadd.f32 %v8454_v11, %v8453_v33  ;;  %v17562_v11 = vsub.f32 %v17162_v2, %v17376_v26  ;;  %v17576_v2 = vsub.f32 %v17176_v50, %v17376_v26 }
 0xb3d   :  { %v8379_v32 = vmul.f32 %v17555_v40, %v17555_v40  ;;  %v8464_v25 = vsel %vm279_vm0, %v8378_v24, 0.0 }
 0xb3e   :  { %v8457_v58 = vadd.f32 %v8456_v1, %v8455_v17  ;;  %v17569_v1 = vsub.f32 %v17170_v8, %v17376_v26  ;;  %v17583_v8 = vsub.f32 %v17182_v22, %v17376_v26  ;;  %v8382_v51 = vmul.f32 %v17576_v2, %v17576_v2 }
 0xb3f   :  { %v8466_v56 = vsel %vm279_vm0, %v8379_v32, 0.0  ;;  %v17597_v22 = vsub.f32 %v17196_v62, %v17376_v26  ;;  %v17611_v62 = vsub.f32 %v17210_v47, %v17376_v26  ;;  %v17625_v47 = vsub.f32 %v17224_v10, %v17376_v26 }
 0xb40   :  { %v8459_v33 = vadd.f32 %v8458_v19, %v8457_v58  ;;  %v8380_v19 = vmul.f32 %v17562_v11, %v17562_v11  ;;  %v17639_v10 = vsub.f32 %v17238_v0, %v17376_v26  ;;  %v17653_v0 = vsub.f32 %v17252_v3, %v17376_v26 }
 0xb41   :  { %19898 = vst [vmem:[#allocation182_spill] sm:$0xff] %v17625_v47  ;;  %v17667_v3 = vsub.f32 %v17264_v43, %v17376_v26 }
 0xb42   :  { %v8461_v17 = vadd.f32 %v8460_v61, %v8459_v33  ;;  %v8381_v61 = vmul.f32 %v17569_v1, %v17569_v1  ;;  %v8468_v24 = vsel %vm279_vm0, %v8380_v19, 0.0  ;;  %v8472_v19 = vsel %vm279_vm0, %v8382_v51, 0.0  ;;  %19900 = vst [vmem:[#allocation184_spill] sm:$0xff] %v17639_v10 }
 0xb44   :  { %v8463_v58 = vadd.f32 %v8462_v59, %v8461_v17  ;;  %v19895_v59 = vld [vmem:[#allocation214_spill] sm:$0xff]  ;;  %v8470_v32 = vsel %vm279_vm0, %v8381_v61, 0.0 }
 0xb45   :  { %v17590_v50 = vsub.f32 %v19895_v59, %v17376_v26 }
 0xb46   :  { %v8465_v33 = vadd.f32 %v8464_v25, %v8463_v58  ;;  %v8383_v25 = vmul.f32 %v17583_v8, %v17583_v8 }
 0xb47   :  { %v8384_v7 = vmul.f32 %v17590_v50, %v17590_v50 }
 0xb48   :  { %v8467_v17 = vadd.f32 %v8466_v56, %v8465_v33  ;;  %v19896_v56 = vld [vmem:[#allocation194_spill] sm:$0xff]  ;;  %v8474_v61 = vsel %vm279_vm0, %v8383_v25, 0.0 }
 0xb49   :  { %v17604_v59 = vsub.f32 %v19896_v56, %v17376_v26  ;;  %v8476_v51 = vsel %vm279_vm0, %v8384_v7, 0.0 }
 0xb4a   :  { %v8469_v58 = vadd.f32 %v8468_v24, %v8467_v17  ;;  %v8385_v24 = vmul.f32 %v17597_v22, %v17597_v22 }
 0xb4b   :  { %v8386_v56 = vmul.f32 %v17604_v59, %v17604_v59 }
 0xb4c   :  { %v8471_v33 = vadd.f32 %v8470_v32, %v8469_v58  ;;  %v17618_v32 = vsub.f32 %v17218_v30, %v17376_v26  ;;  %v8478_v25 = vsel %vm279_vm0, %v8385_v24, 0.0  ;;  %v17632_v30 = vsub.f32 %v17230_v13, %v17376_v26 }
 0xb4d   :  { %v8480_v7 = vsel %vm279_vm0, %v8386_v56, 0.0  ;;  %v17646_v13 = vsub.f32 %v17246_v48, %v17376_v26  ;;  %v17660_v48 = vsub.f32 %v17258_v63, %v17376_v26  ;;  %v17674_v63 = vsub.f32 %v17270_v21, %v17376_v26 }
 0xb4e   :  { %v8473_v17 = vadd.f32 %v8472_v19, %v8471_v33  ;;  %19897 = vst [vmem:[#allocation153_spill] sm:$0xff] %v17618_v32  ;;  %v8387_v19 = vmul.f32 %v17611_v62, %v17611_v62 }
 0xb4f   :  { %19899 = vst [vmem:[#allocation107_spill] sm:$0xff] %v17632_v30 }
 0xb50   :  { %v8475_v58 = vadd.f32 %v8474_v61, %v8473_v17  ;;  %v8388_v61 = vmul.f32 %v17618_v32, %v17618_v32  ;;  %v8482_v24 = vsel %vm279_vm0, %v8387_v19, 0.0 }
 0xb52   :  { %v8477_v33 = vadd.f32 %v8476_v51, %v8475_v58  ;;  %v8389_v51 = vmul.f32 %v17625_v47, %v17625_v47  ;;  %v8484_v56 = vsel %vm279_vm0, %v8388_v61, 0.0 }
 0xb54   :  { %v8479_v17 = vadd.f32 %v8478_v25, %v8477_v33  ;;  %v8390_v25 = vmul.f32 %v17632_v30, %v17632_v30  ;;  %v8486_v19 = vsel %vm279_vm0, %v8389_v51, 0.0  ;;  %v8396_v30 = vmul.f32 %v17674_v63, %v17674_v63 }
 0xb56   :  { %v8481_v58 = vadd.f32 %v8480_v7, %v8479_v17  ;;  %v8391_v7 = vmul.f32 %v17639_v10, %v17639_v10  ;;  %v8488_v61 = vsel %vm279_vm0, %v8390_v25, 0.0  ;;  %v8395_v10 = vmul.f32 %v17667_v3, %v17667_v3 }
 0xb58   :  { %v8483_v33 = vadd.f32 %v8482_v24, %v8481_v58  ;;  %v8392_v24 = vmul.f32 %v17646_v13, %v17646_v13  ;;  %v8490_v51 = vsel %vm279_vm0, %v8391_v7, 0.0 }
 0xb5a   :  { %v8485_v17 = vadd.f32 %v8484_v56, %v8483_v33  ;;  %v8393_v56 = vmul.f32 %v17653_v0, %v17653_v0  ;;  %v8492_v25 = vsel %vm279_vm0, %v8392_v24, 0.0 }
 0xb5c   :  { %v8487_v58 = vadd.f32 %v8486_v19, %v8485_v17  ;;  %v8394_v19 = vmul.f32 %v17660_v48, %v17660_v48  ;;  %v8494_v7 = vsel %vm279_vm0, %v8393_v56, 0.0  ;;  %v8498_v56 = vsel %vm279_vm0, %v8395_v10, 0.0 }
 0xb5e   :  { %v8489_v33 = vadd.f32 %v8488_v61, %v8487_v58  ;;  %v19901_v61 = vld [vmem:[#allocation216_spill] sm:$0xff]  ;;  %v8496_v24 = vsel %vm279_vm0, %v8394_v19, 0.0  ;;  %v8500_v19 = vsel %vm279_vm0, %v8396_v30, 0.0 }
 0xb5f   :  { %v17681_v43 = vsub.f32 %v19901_v61, %v17376_v26 }
 0xb60   :  { %v8491_v17 = vadd.f32 %v8490_v51, %v8489_v33  ;;  %v19902_v51 = vld [vmem:[#allocation97_spill] sm:$0xff] }
 0xb61   :  { %v17688_v21 = vsub.f32 %v19902_v51, %v17376_v26  ;;  %v8397_v47 = vmul.f32 %v17681_v43, %v17681_v43 }
 0xb62   :  { %v8493_v58 = vadd.f32 %v8492_v25, %v8491_v17  ;;  %v19903_v25 = vld [vmem:[#allocation96_spill] sm:$0xff] }
 0xb63   :  { %v17695_v61 = vsub.f32 %v19903_v25, %v17376_v26  ;;  %v8398_v51 = vmul.f32 %v17688_v21, %v17688_v21  ;;  %v8502_v10 = vsel %vm279_vm0, %v8397_v47, 0.0 }
 0xb64   :  { %v8495_v33 = vadd.f32 %v8494_v7, %v8493_v58  ;;  %v17702_v7 = vsub.f32 %v17294_v12, %v17376_v26  ;;  %v17716_v12 = vsub.f32 %v17306_v6, %v17376_v26  ;;  %v17730_v6 = vsub.f32 %v17318_v31, %v17376_v26 }
 0xb65   :  { %v8399_v25 = vmul.f32 %v17695_v61, %v17695_v61  ;;  %v8504_v30 = vsel %vm279_vm0, %v8398_v51, 0.0  ;;  %v17744_v31 = vsub.f32 %v17326_v5, %v17376_v26  ;;  %v17758_v5 = vsub.f32 %v17338_v39, %v17376_v26 }
 0xb66   :  { %v8497_v17 = vadd.f32 %v8496_v24, %v8495_v33  ;;  %v17709_v24 = vsub.f32 %v17300_v36, %v17376_v26  ;;  %v17723_v36 = vsub.f32 %v17312_v14, %v17376_v26  ;;  %v17737_v14 = vsub.f32 %v17080_v44, %v17376_v26 }
 0xb67   :  { %v8506_v47 = vsel %vm279_vm0, %v8399_v25, 0.0  ;;  %v17751_v44 = vsub.f32 %v17332_v54, %v17376_v26  ;;  %19904 = vst [vmem:[#allocation198_spill] sm:$0xff] %v17758_v5  ;;  %v17765_v54 = vsub.f32 %v17344_v57, %v17376_v26  ;;  %v17772_v39 = vsub.f32 %v17350_v23, %v17376_v26 }
 0xb68   :  { %v8499_v58 = vadd.f32 %v8498_v56, %v8497_v17  ;;  %v8400_v56 = vmul.f32 %v17702_v7, %v17702_v7  ;;  %v17779_v57 = vsub.f32 %v17356_v34, %v17376_v26 }
 0xb69   :  { %19905 = vst [vmem:[#allocation122_spill] sm:$0xff] %v17765_v54  ;;  %v8410_v32 = vmul.f32 %v17772_v39, %v17772_v39 }
 0xb6a   :  { %v8501_v33 = vadd.f32 %v8500_v19, %v8499_v58  ;;  %v8401_v19 = vmul.f32 %v17709_v24, %v17709_v24  ;;  %v8508_v51 = vsel %vm279_vm0, %v8400_v56, 0.0  ;;  %19906 = vst [vmem:[#allocation81_spill] sm:$0xff] %v17779_v57 }
 0xb6c   :  { %v8503_v17 = vadd.f32 %v8502_v10, %v8501_v33  ;;  %v8402_v10 = vmul.f32 %v17716_v12, %v17716_v12  ;;  %v8510_v25 = vsel %vm279_vm0, %v8401_v19, 0.0 }
 0xb6e   :  { %v8505_v58 = vadd.f32 %v8504_v30, %v8503_v17  ;;  %v8403_v30 = vmul.f32 %v17723_v36, %v17723_v36  ;;  %v8512_v56 = vsel %vm279_vm0, %v8402_v10, 0.0 }
 0xb70   :  { %v8507_v33 = vadd.f32 %v8506_v47, %v8505_v58  ;;  %v8404_v47 = vmul.f32 %v17730_v6, %v17730_v6  ;;  %v8514_v19 = vsel %vm279_vm0, %v8403_v30, 0.0 }
 0xb72   :  { %v8509_v17 = vadd.f32 %v8508_v51, %v8507_v33  ;;  %v8405_v51 = vmul.f32 %v17737_v14, %v17737_v14  ;;  %v8516_v10 = vsel %vm279_vm0, %v8404_v47, 0.0 }
 0xb74   :  { %v8511_v58 = vadd.f32 %v8510_v25, %v8509_v17  ;;  %v8406_v25 = vmul.f32 %v17744_v31, %v17744_v31  ;;  %v8518_v30 = vsel %vm279_vm0, %v8405_v51, 0.0 }
 0xb76   :  { %v8513_v33 = vadd.f32 %v8512_v56, %v8511_v58  ;;  %v8407_v56 = vmul.f32 %v17751_v44, %v17751_v44  ;;  %v8520_v47 = vsel %vm279_vm0, %v8406_v25, 0.0 }
 0xb78   :  { %v8515_v17 = vadd.f32 %v8514_v19, %v8513_v33  ;;  %v8408_v19 = vmul.f32 %v17758_v5, %v17758_v5  ;;  %v8522_v51 = vsel %vm279_vm0, %v8407_v56, 0.0 }
 0xb7a   :  { %v8517_v58 = vadd.f32 %v8516_v10, %v8515_v17  ;;  %v8409_v10 = vmul.f32 %v17765_v54, %v17765_v54  ;;  %v8524_v25 = vsel %vm279_vm0, %v8408_v19, 0.0  ;;  %v8411_v54 = vmul.f32 %v17779_v57, %v17779_v57 }
 0xb7c   :  { %v8519_v33 = vadd.f32 %v8518_v30, %v8517_v58  ;;  %v19907_v30 = vld [vmem:[#allocation163_spill] sm:$0xff]  ;;  %v8526_v56 = vsel %vm279_vm0, %v8409_v10, 0.0  ;;  %v8415_v10 = vmul.f32 %v17382_v27, %v17382_v27 }
 0xb7d   :  { %v17786_v23 = vsub.f32 %v19907_v30, %v17376_v26  ;;  %v8528_v30 = vsel %vm279_vm0, %v8410_v32, 0.0  ;;  %v8416_v32 = vmul.f32 %v17385_v41, %v17385_v41 }
 0xb7e   :  { %v8521_v17 = vadd.f32 %v8520_v47, %v8519_v33  ;;  %v19908_v47 = vld [vmem:[#allocation164_spill] sm:$0xff] }
 0xb7f   :  { %v17793_v34 = vsub.f32 %v19908_v47, %v17376_v26  ;;  %v8414_v26 = vmul.f32 %v17379_v46, %v17379_v46 }
 0xb80   :  { %v8523_v58 = vadd.f32 %v8522_v51, %v8521_v17  ;;  %v8412_v51 = vmul.f32 %v17786_v23, %v17786_v23 }
 0xb81   :  { %19909 = vst [vmem:[#allocation165_spill] sm:$0xff] %v17793_v34  ;;  %v8413_v19 = vmul.f32 %v17793_v34, %v17793_v34 }
 0xb82   :  { %v8525_v33 = vadd.f32 %v8524_v25, %v8523_v58  ;;  %v8530_v58 = vsel %vm279_vm0, %v8411_v54, 0.0  ;;  %v8532_v47 = vsel %vm279_vm0, %v8412_v51, 0.0  ;;  %v8538_v54 = vsel %vm279_vm0, %v8415_v10, 0.0 }
 0xb83   :  { %v8418_v51 = vmul.f32 %v17391_v28, %v17391_v28 }
 0xb84   :  { %v8527_v17 = vadd.f32 %v8526_v56, %v8525_v33  ;;  %v8534_v33 = vsel %vm279_vm0, %v8413_v19, 0.0 }
 0xb86   :  { %v8529_v5 = vadd.f32 %v8528_v30, %v8527_v17  ;;  %v8536_v17 = vsel %vm279_vm0, %v8414_v26, 0.0 }
 0xb88   :  { %v8531_v25 = vadd.f32 %v8530_v58, %v8529_v5  ;;  %v8417_v5 = vmul.f32 %v17388_v9, %v17388_v9 }
 0xb8a   :  { %v8533_v57 = vadd.f32 %v8532_v47, %v8531_v25  ;;  %v8540_v25 = vsel %vm279_vm0, %v8416_v32, 0.0 }
 0xb8c   :  { %v8535_v56 = vadd.f32 %v8534_v33, %v8533_v57  ;;  %v8542_v57 = vsel %vm279_vm0, %v8417_v5, 0.0  ;;  %v8544_v33 = vsel %vm279_vm0, %v8418_v51, 0.0 }
 0xb8e   :  { %v8537_v30 = vadd.f32 %v8536_v17, %v8535_v56 }
 0xb90   :  { %v8539_v58 = vadd.f32 %v8538_v54, %v8537_v30 }
 0xb92   :  { %v8541_v47 = vadd.f32 %v8540_v25, %v8539_v58 }
 0xb94   :  { %v8543_v19 = vadd.f32 %v8542_v57, %v8541_v47 }
 0xb96   :  { %v8545_v41 = vadd.f32 %v8544_v33, %v8543_v19 }
 0xb98   :  { %v8546_v26 = vrot.slane %v8545_v41, 4 }
 0xb9a   :  { %v8547_v56 = vadd.f32 %v8546_v26, %v8545_v41  ;;  %v17825_v41 = vld [vmem:[%s18317_s9] ss:$0 sm:$0xff]  ;;  %v19911_v26 = vld [vmem:[#allocation198_spill] sm:$0xff] }
 0xb9c   :  { %v8548_v17 = vrot.slane %v8547_v56, 2 }
 0xb9e   :  { %v8549_v27 = vadd.f32 %v8548_v17, %v8547_v56  ;;  %v19912_v56 = vld [vmem:[#allocation122_spill] sm:$0xff] }
 0xba0   :  { %v8550_v9 = vrot.slane %v8549_v27, 1 }
 0xba2   :  { %v8551_v46 = vadd.f32 %v8550_v9, %v8549_v27 }
 0xba4   :  { %v8552_v10 = vmul.f32 %v8551_v46, %v19868_v53 }
 0xba6   :  { %v8553_v30 = vadd.f32 1e-05, %v8552_v10 }
 0xba8   :  { %9693 = vrsqrt.f32 %v8553_v30  ;;  %vm8560_vm14 = vweird.f32 %v8553_v30 }
 0xbae   :  { %v9694_v54 = vpop.eup %9693 }
 0xbaf   :  { %v8555_v34 = vmul.f32 %v9694_v54, %v8553_v30  ;;  %vm8561_vm13 = vweird.f32 %v9694_v54 }
 0xbb0   :  { %vm8562_vm0 = vmor %vm8560_vm14, %vm8561_vm13 }
 0xbb1   :  { %v8556_v32 = vmul.f32 %v9694_v54, %v8555_v34 }
 0xbb3   :  { %v8557_v58 = vmul.f32 0.5, %v8556_v32 }
 0xbb5   :  { %v8558_v25 = vsub.f32 1.5, %v8557_v58 }
 0xbb7   :  { %v8559_v5 = vmul.f32 %v9694_v54, %v8558_v25 }
 0xbb9   :  { %v17827_v51 = vsel %vm8562_vm0, %v9694_v54, %v8559_v5 }
 0xbba   :  { %v8627_v53 = vmul.f32 %v17827_v51, %v17391_v28  ;;  %v8569_v27 = vmul.f32 %v17827_v51, %v17421_v18  ;;  %v8570_v9 = vmul.f32 %v17827_v51, %v17429_v15  ;;  %v8571_v34 = vmul.f32 %v17827_v51, %v17436_v42 }
 0xbbb   :  { %v8572_v47 = vmul.f32 %v17827_v51, %v17443_v37  ;;  %v8573_v57 = vmul.f32 %v17827_v51, %v17450_v38  ;;  %v8574_v28 = vmul.f32 %v17827_v51, %v17457_v55  ;;  %v8575_v19 = vmul.f32 %v17827_v51, %v17464_v52 }
 0xbbc   :  { %v17832_v46 = vmul.f32 %v17825_v41, %v8627_v53  ;;  %v8576_v18 = vmul.f32 %v17827_v51, %v17471_v60  ;;  %v8577_v15 = vmul.f32 %v17827_v51, %v17478_v20  ;;  %v8578_v42 = vmul.f32 %v17827_v51, %v17485_v16 }
 0xbbd   :  { %v8579_v37 = vmul.f32 %v17827_v51, %v17492_v29  ;;  %v17858_v38 = vmul.f32 %v17827_v51, %v17499_v45  ;;  %v8585_v55 = vmul.f32 %v17827_v51, %v17534_v49  ;;  %v8586_v52 = vmul.f32 %v17827_v51, %v17541_v4 }
 0xbbe   :  { %19910 = vst [vmem:[#allocation93_spill] sm:$0xff] %v17832_v46  ;;  %v8587_v60 = vmul.f32 %v17827_v51, %v17548_v35  ;;  %v8588_v20 = vmul.f32 %v17827_v51, %v17555_v40  ;;  %v8589_v16 = vmul.f32 %v17827_v51, %v17562_v11  ;;  %v8590_v29 = vmul.f32 %v17827_v51, %v17569_v1  ;;  %v19931_v46 = vld [vmem:[#allocation113_spill] sm:$0xff] }
 0xbbf   :  { %v8591_v45 = vmul.f32 %v17827_v51, %v17576_v2  ;;  %v8592_v49 = vmul.f32 %v17827_v51, %v17583_v8  ;;  %v8593_v4 = vmul.f32 %v17827_v51, %v17590_v50  ;;  %v8594_v35 = vmul.f32 %v17827_v51, %v17597_v22  ;;  %v17895_v22 = vld [vmem:[%s18318_s10] ss:$0 sm:$0xff] }
 0xbc0   :  { %v8595_v40 = vmul.f32 %v17827_v51, %v17604_v59  ;;  %v8596_v11 = vmul.f32 %v17827_v51, %v17611_v62  ;;  %v8601_v1 = vmul.f32 %v17827_v51, %v17646_v13  ;;  %v8602_v2 = vmul.f32 %v17827_v51, %v17653_v0 }
 0xbc1   :  { %v8603_v8 = vmul.f32 %v17827_v51, %v17660_v48  ;;  %v8604_v50 = vmul.f32 %v17827_v51, %v17667_v3  ;;  %v8605_v59 = vmul.f32 %v17827_v51, %v17674_v63  ;;  %v8606_v62 = vmul.f32 %v17827_v51, %v17681_v43 }
 0xbc2   :  { %v8607_v13 = vmul.f32 %v17827_v51, %v17688_v21  ;;  %v8608_v0 = vmul.f32 %v17827_v51, %v17695_v61  ;;  %v8609_v48 = vmul.f32 %v17827_v51, %v17702_v7  ;;  %v8610_v3 = vmul.f32 %v17827_v51, %v17709_v24 }
 0xbc3   :  { %v8611_v33 = vmul.f32 %v17827_v51, %v17716_v12  ;;  %v8612_v63 = vmul.f32 %v17827_v51, %v17723_v36  ;;  %v8613_v43 = vmul.f32 %v17827_v51, %v17730_v6  ;;  %v8614_v21 = vmul.f32 %v17827_v51, %v17737_v14 }
 0xbc4   :  { %v8615_v61 = vmul.f32 %v17827_v51, %v17744_v31  ;;  %v8663_v7 = vmul.f32 %v17825_v41, %v8596_v11  ;;  %v8616_v24 = vmul.f32 %v17827_v51, %v17751_v44  ;;  %v8617_v12 = vmul.f32 %v17827_v51, %v19911_v26 }
 0xbc5   :  { %v8618_v36 = vmul.f32 %v17827_v51, %v19912_v56  ;;  %v17927_v17 = vmul.f32 %v17825_v41, %v8569_v27  ;;  %v17931_v14 = vmul.f32 %v17825_v41, %v8570_v9  ;;  %v17934_v31 = vmul.f32 %v17825_v41, %v8571_v34  ;;  %v19913_v9 = vld [vmem:[#allocation81_spill] sm:$0xff] }
 0xbc6   :  { %v8730_v6 = vadd.f32 %v17895_v22, %v8663_v7  ;;  %v17937_v10 = vmul.f32 %v17825_v41, %v8572_v47  ;;  %v17940_v44 = vmul.f32 %v17825_v41, %v8573_v57  ;;  %v17943_v30 = vmul.f32 %v17825_v41, %v8574_v28  ;;  %v19914_v57 = vld [vmem:[#allocation165_spill] sm:$0xff] }
 0xbc7   :  { %v17946_v54 = vmul.f32 %v17825_v41, %v8575_v19  ;;  %v17949_v32 = vmul.f32 %v17825_v41, %v8576_v18  ;;  %v17952_v25 = vmul.f32 %v17825_v41, %v8577_v15  ;;  %v17955_v5 = vmul.f32 %v17825_v41, %v8578_v42  ;;  %v19915_v19 = vld [vmem:[#allocation188_spill] sm:$0xff]  ;;  %v19916_v15 = vld [vmem:[#allocation13_spill] sm:$0xff] }
 0xbc8   :  { %v8794_v58 = vmax.f32 %v8730_v6, 0.0  ;;  %v17958_v53 = vmul.f32 %v17825_v41, %v8579_v37  ;;  %v8619_v27 = vmul.f32 %v17827_v51, %v17772_v39  ;;  %v8620_v34 = vmul.f32 %v17827_v51, %v19913_v9  ;;  %v19918_v6 = vld [vmem:[#allocation89_spill] sm:$0xff] }
 0xbc9   :  { %v8621_v47 = vmul.f32 %v17827_v51, %v17786_v23  ;;  %v8622_v28 = vmul.f32 %v17827_v51, %v19914_v57  ;;  %v8623_v18 = vmul.f32 %v17827_v51, %v19915_v19  ;;  %v17972_v37 = vmul.f32 %v17825_v41, %v8585_v55 }
 0xbca   :  { %v8858_v42 = vadd.f32 %v8794_v58, %v19916_v15  ;;  %v17975_v11 = vmul.f32 %v17825_v41, %v8586_v52  ;;  %v17978_v39 = vmul.f32 %v17825_v41, %v8587_v60  ;;  %v17981_v7 = vmul.f32 %v17825_v41, %v8588_v20  ;;  %v19917_v20 = vld [vmem:[#allocation196_spill] sm:$0xff] }
 0xbcb   :  { %v17984_v23 = vmul.f32 %v17825_v41, %v8589_v16  ;;  %v17987_v26 = vmul.f32 %v17825_v41, %v8590_v29  ;;  %v17990_v56 = vmul.f32 %v17825_v41, %v8591_v45  ;;  %v17993_v55 = vmul.f32 %v17825_v41, %v8592_v49  ;;  %v19919_v58 = vld [vmem:[#allocation200_spill] sm:$0xff] }
 0xbcc   :  { %8954 = vxpose.xlu0.b32.start [1/16] (narrow) %v8858_v42, 32  ;;  %v17996_v52 = vmul.f32 %v17825_v41, %v8593_v4  ;;  %v17999_v60 = vmul.f32 %v17825_v41, %v8594_v35  ;;  %v8624_v16 = vmul.f32 %v17827_v51, %v19917_v20  ;;  %v8625_v29 = vmul.f32 %v17827_v51, %v19918_v6  ;;  %v19928_v42 = vld [vmem:[#allocation105_spill] sm:$0xff] }
 0xbcd   :  { %v8626_v9 = vmul.f32 %v17827_v51, %v19919_v58  ;;  %v18008_v45 = vmul.f32 %v17825_v41, %v8595_v40  ;;  %v8647_v49 = vmul.f32 %v17825_v41, %v17858_v38  ;;  %v18013_v4 = vmul.f32 %v17825_v41, %v8601_v1  ;;  %v19930_v58 = vld [vmem:[#allocation83_spill] sm:$0xff] }
 0xbce   :  { %v18016_v35 = vmul.f32 %v17825_v41, %v8602_v2  ;;  %v18019_v57 = vmul.f32 %v17825_v41, %v8603_v8  ;;  %v18022_v19 = vmul.f32 %v17825_v41, %v8604_v50  ;;  %v18025_v15 = vmul.f32 %v17825_v41, %v8605_v59 }
 0xbcf   :  { %v18028_v40 = vmul.f32 %v17825_v41, %v8606_v62  ;;  %v18031_v38 = vmul.f32 %v17825_v41, %v8607_v13  ;;  %v18034_v1 = vmul.f32 %v17825_v41, %v8608_v0  ;;  %v18037_v2 = vmul.f32 %v17825_v41, %v8609_v48 }
 0xbd0   :  { %v18040_v8 = vmul.f32 %v17825_v41, %v8610_v3  ;;  %v18043_v50 = vmul.f32 %v17825_v41, %v8611_v33  ;;  %v18046_v59 = vmul.f32 %v17825_v41, %v8612_v63  ;;  %v18049_v62 = vmul.f32 %v17825_v41, %v8613_v43 }
 0xbd1   :  { %v18052_v13 = vmul.f32 %v17825_v41, %v8614_v21  ;;  %v18055_v0 = vmul.f32 %v17825_v41, %v8615_v61  ;;  %v18058_v48 = vmul.f32 %v17825_v41, %v8616_v24  ;;  %v18061_v3 = vmul.f32 %v17825_v41, %v8617_v12 }
 0xbd2   :  { %v18064_v33 = vmul.f32 %v17825_v41, %v8618_v36  ;;  %v18067_v63 = vmul.f32 %v17825_v41, %v8619_v27  ;;  %v18070_v43 = vmul.f32 %v17825_v41, %v8620_v34  ;;  %v18073_v21 = vmul.f32 %v17825_v41, %v8621_v47 }
 0xbd3   :  { %v18076_v61 = vmul.f32 %v17825_v41, %v8622_v28  ;;  %v18079_v24 = vmul.f32 %v17825_v41, %v8623_v18  ;;  %v18082_v12 = vmul.f32 %v17825_v41, %v8624_v16  ;;  %v18085_v36 = vmul.f32 %v17825_v41, %v8625_v29  ;;  %v19929_v28 = vld [vmem:[#allocation15_spill] sm:$0xff] }
 0xbd4   :  { %19920 = vst [vmem:[#allocation169_spill] sm:$0xff] %v18067_v63  ;;  %v18088_v27 = vmul.f32 %v17825_v41, %v8626_v9  ;;  %v8714_v34 = vadd.f32 %v17895_v22, %v8647_v49  ;;  %v8564_v47 = vmul.f32 %v17827_v51, %v19928_v42  ;;  %v8565_v16 = vmul.f32 %v17827_v51, %v19930_v58 }
 0xbd5   :  { %19921 = vst [vmem:[#allocation144_spill] sm:$0xff] %v18070_v43  ;;  %v8581_v29 = vmul.f32 %v17827_v51, %v19931_v46  ;;  %v19937_v43 = vld [vmem:[#allocation189_spill] sm:$0xff] }
 0xbd6   :  { %19922 = vst [vmem:[#allocation204_spill] sm:$0xff] %v18073_v21  ;;  %v8778_v20 = vmax.f32 %v8714_v34, 0.0  ;;  %v8631_v18 = vmul.f32 %v17825_v41, %v8564_v47  ;;  %v19933_v47 = vld [vmem:[#allocation91_spill] sm:$0xff] }
 0xbd7   :  { %19923 = vst [vmem:[#allocation211_spill] sm:$0xff] %v18076_v61  ;;  %v8648_v34 = vmul.f32 %v17825_v41, %v8581_v29 }
 0xbd8   :  { %19924 = vst [vmem:[#allocation157_spill] sm:$0xff] %v18079_v24  ;;  %v8842_v6 = vadd.f32 %v8778_v20, %v19929_v28  ;;  %v8698_v49 = vadd.f32 %v17895_v22, %v8631_v18  ;;  %v8582_v28 = vmul.f32 %v17827_v51, %v19933_v47  ;;  %v19936_v24 = vld [vmem:[#allocation16_spill] sm:$0xff] }
 0xbd9   :  { %19925 = vst [vmem:[#allocation146_spill] sm:$0xff] %v18082_v12  ;;  %v19935_v12 = vld [vmem:[#allocation134_spill] sm:$0xff] }
 0xbda   :  { %19926 = vst [vmem:[#allocation193_spill] sm:$0xff] %v18085_v36  ;;  %8922 = vxpose.xlu1.b32.start [1/16] (narrow) %v8842_v6, 32  ;;  %v19932_v36 = vld [vmem:[#allocation153_spill] sm:$0xff]  ;;  %v8762_v20 = vmax.f32 %v8698_v49, 0.0  ;;  %v19934_v6 = vld [vmem:[#allocation182_spill] sm:$0xff]  ;;  %v8566_v46 = vmul.f32 %v17827_v51, %v19935_v12  ;;  %v8583_v12 = vmul.f32 %v17827_v51, %v19937_v43 }
 0xbdb   :  { %19927 = vst [vmem:[#allocation92_spill] sm:$0xff] %v18088_v27  ;;  %v8597_v9 = vmul.f32 %v17827_v51, %v19932_v36  ;;  %v8632_v27 = vmul.f32 %v17825_v41, %v8565_v16  ;;  %v8598_v58 = vmul.f32 %v17827_v51, %v19934_v6  ;;  %v8715_v16 = vadd.f32 %v17895_v22, %v8648_v34 }
 0xbdc   :  { %v8826_v18 = vadd.f32 %v8762_v20, %v19936_v24  ;;  %v8633_v47 = vmul.f32 %v17825_v41, %v8566_v46  ;;  %v19939_v20 = vld [vmem:[#allocation14_spill] sm:$0xff]  ;;  %v8650_v43 = vmul.f32 %v17825_v41, %v8583_v12  ;;  %v19946_v12 = vld [vmem:[#allocation21_spill] sm:$0xff] }
 0xbdd   :  { %v8664_v42 = vmul.f32 %v17825_v41, %v8597_v9  ;;  %v8699_v36 = vadd.f32 %v17895_v22, %v8632_v27  ;;  %v8649_v9 = vmul.f32 %v17825_v41, %v8582_v28  ;;  %v8665_v49 = vmul.f32 %v17825_v41, %v8598_v58  ;;  %v19938_v27 = vld [vmem:[#allocation107_spill] sm:$0xff]  ;;  %v19940_v28 = vld [vmem:[#allocation18_spill] sm:$0xff] }
 0xbde   :  { %8890 = vxpose.xlu2.b32.start [1/16] (narrow) %v8826_v18, 32  ;;  %v8779_v21 = vmax.f32 %v8715_v16, 0.0  ;;  %v8599_v24 = vmul.f32 %v17827_v51, %v19938_v27  ;;  %v19941_v58 = vld [vmem:[#allocation203_spill] sm:$0xff] }
 0xbdf   :  { %v8731_v29 = vadd.f32 %v17895_v22, %v8664_v42  ;;  %v8763_v61 = vmax.f32 %v8699_v36, 0.0  ;;  %v8716_v34 = vadd.f32 %v17895_v22, %v8649_v9  ;;  %v8732_v42 = vadd.f32 %v17895_v22, %v8665_v49  ;;  %v19942_v16 = vld [vmem:[#allocation19_spill] sm:$0xff] }
 0xbe0   :  { %v8843_v63 = vadd.f32 %v8779_v21, %v19940_v28  ;;  %v8567_v46 = vmul.f32 %v17827_v51, %v19941_v58  ;;  %v8700_v36 = vadd.f32 %v17895_v22, %v8633_v47  ;;  %v8666_v9 = vmul.f32 %v17825_v41, %v8599_v24  ;;  %v19943_v21 = vld [vmem:[#allocation177_spill] sm:$0xff]  ;;  %v19944_v58 = vld [vmem:[#allocation184_spill] sm:$0xff] }
 0xbe1   :  { %v8795_v6 = vmax.f32 %v8731_v29, 0.0  ;;  %v8827_v29 = vadd.f32 %v8763_v61, %v19942_v16  ;;  %v8780_v27 = vmax.f32 %v8716_v34, 0.0  ;;  %v8796_v49 = vmax.f32 %v8732_v42, 0.0  ;;  %v19947_v24 = vld [vmem:[#allocation152_spill] sm:$0xff] }
 0xbe2   :  { %8923 = vxpose.xlu1.b32.cont [2/16] (narrow) %v8843_v63, 32  ;;  %v8584_v28 = vmul.f32 %v17827_v51, %v19943_v21  ;;  %v8600_v47 = vmul.f32 %v17827_v51, %v19944_v58  ;;  %v8717_v61 = vadd.f32 %v17895_v22, %v8650_v43  ;;  %v8733_v63 = vadd.f32 %v17895_v22, %v8666_v9 }
 0xbe3   :  { %v8859_v18 = vadd.f32 %v8795_v6, %v19939_v20  ;;  %v8634_v6 = vmul.f32 %v17825_v41, %v8567_v46  ;;  %v8764_v20 = vmax.f32 %v8700_v36, 0.0  ;;  %v8568_v34 = vmul.f32 %v17827_v51, %v19947_v24  ;;  %v19948_v46 = vld [vmem:[#allocation22_spill] sm:$0xff]  ;;  %v19950_v24 = vld [vmem:[#allocation24_spill] sm:$0xff] }
 0xbe4   :  { %v8651_v21 = vmul.f32 %v17825_v41, %v8584_v28  ;;  %v8667_v43 = vmul.f32 %v17825_v41, %v8600_v47  ;;  %v8797_v58 = vmax.f32 %v8733_v63, 0.0  ;;  %v8781_v9 = vmax.f32 %v8717_v61, 0.0 }
 0xbe5   :  { %8955 = vxpose.xlu0.b32.cont [2/16] (narrow) %v8859_v18, 32  ;;  %v19945_v18 = vld [vmem:[#allocation17_spill] sm:$0xff]  ;;  %v8701_v42 = vadd.f32 %v17895_v22, %v8634_v6  ;;  %v8828_v36 = vadd.f32 %v8764_v20, %v19948_v46  ;;  %v8735_v63 = vadd.f32 %v17895_v22, %v18013_v4  ;;  %v8736_v4 = vadd.f32 %v17895_v22, %v18016_v35 }
 0xbe6   :  { %8891 = vxpose.xlu2.b32.cont [2/16] (narrow) %v8827_v29, 32  ;;  %v8860_v16 = vadd.f32 %v8796_v49, %v19945_v18  ;;  %v8844_v29 = vadd.f32 %v8780_v27, %v19946_v12  ;;  %v8635_v49 = vmul.f32 %v17825_v41, %v8568_v34  ;;  %v8718_v27 = vadd.f32 %v17895_v22, %v8651_v21  ;;  %v19949_v12 = vld [vmem:[#allocation20_spill] sm:$0xff]  ;;  %v19952_v34 = vld [vmem:[#allocation23_spill] sm:$0xff] }
 0xbe7   :  { %v8765_v18 = vmax.f32 %v8701_v42, 0.0  ;;  %v8734_v51 = vadd.f32 %v17895_v22, %v8667_v43  ;;  %v8861_v6 = vadd.f32 %v8797_v58, %v19949_v12  ;;  %v8845_v20 = vadd.f32 %v8781_v9, %v19950_v24  ;;  %v19954_v58 = vld [vmem:[#allocation28_spill] sm:$0xff] }
 0xbe8   :  { %v8782_v28 = vmax.f32 %v8718_v27, 0.0  ;;  %v8719_v41 = vadd.f32 %v17895_v22, %v17972_v37  ;;  %v8703_v43 = vadd.f32 %v17895_v22, %v17927_v17  ;;  %v8720_v37 = vadd.f32 %v17895_v22, %v17975_v11 }
 0xbe9   :  { %v8798_v47 = vmax.f32 %v8734_v51, 0.0  ;;  %v19955_v51 = vld [vmem:[#allocation26_spill] sm:$0xff]  ;;  %v8704_v17 = vadd.f32 %v17895_v22, %v17931_v14  ;;  %v8721_v11 = vadd.f32 %v17895_v22, %v17978_v39  ;;  %v8737_v35 = vadd.f32 %v17895_v22, %v18019_v57 }
 0xbea   :  { %8924 = vxpose.xlu1.b32.cont [3/16] (narrow) %v8844_v29, 32  ;;  %v19951_v29 = vld [vmem:[#allocation25_spill] sm:$0xff]  ;;  %v8767_v27 = vmax.f32 %v8703_v43, 0.0  ;;  %v8705_v14 = vadd.f32 %v17895_v22, %v17934_v31  ;;  %v8722_v39 = vadd.f32 %v17895_v22, %v17981_v7  ;;  %v8738_v57 = vadd.f32 %v17895_v22, %v18022_v19 }
 0xbeb   :  { %v8829_v46 = vadd.f32 %v8765_v18, %v19951_v29  ;;  %v8862_v42 = vadd.f32 %v8798_v47, %v19952_v34  ;;  %v8783_v18 = vmax.f32 %v8719_v41, 0.0  ;;  %v8784_v29 = vmax.f32 %v8720_v37, 0.0  ;;  %v19958_v47 = vld [vmem:[#allocation29_spill] sm:$0xff]  ;;  %v19960_v34 = vld [vmem:[#allocation34_spill] sm:$0xff] }
 0xbec   :  { %v19959_v41 = vld [vmem:[#allocation33_spill] sm:$0xff]  ;;  %v8769_v43 = vmax.f32 %v8705_v14, 0.0  ;;  %v8706_v31 = vadd.f32 %v17895_v22, %v17937_v10  ;;  %v8723_v7 = vadd.f32 %v17895_v22, %v17984_v23  ;;  %v8739_v19 = vadd.f32 %v17895_v22, %v18025_v15 }
 0xbed   :  { %8956 = vxpose.xlu0.b32.cont [3/16] (narrow) %v8860_v16, 32  ;;  %v8702_v16 = vadd.f32 %v17895_v22, %v8635_v49  ;;  %v8799_v49 = vmax.f32 %v8735_v63, 0.0  ;;  %v8848_v63 = vadd.f32 %v8784_v29, %v19959_v41  ;;  %v8707_v10 = vadd.f32 %v17895_v22, %v17940_v44 }
 0xbee   :  { %8892 = vxpose.xlu2.b32.cont [3/16] (narrow) %v8828_v36, 32  ;;  %v19953_v36 = vld [vmem:[#allocation27_spill] sm:$0xff]  ;;  %v8724_v23 = vadd.f32 %v17895_v22, %v17987_v26  ;;  %v8740_v15 = vadd.f32 %v17895_v22, %v18028_v40  ;;  %v8708_v44 = vadd.f32 %v17895_v22, %v17943_v30  ;;  %v8725_v26 = vadd.f32 %v17895_v22, %v17990_v56 }
 0xbef   :  { %v8766_v61 = vmax.f32 %v8702_v16, 0.0  ;;  %v8846_v21 = vadd.f32 %v8782_v28, %v19953_v36  ;;  %v8863_v12 = vadd.f32 %v8799_v49, %v19955_v51  ;;  %v8768_v28 = vmax.f32 %v8704_v17, 0.0  ;;  %v19962_v49 = vld [vmem:[#allocation36_spill] sm:$0xff]  ;;  %v19965_v17 = vld [vmem:[#allocation39_spill] sm:$0xff] }
 0xbf0   :  { %v8801_v36 = vmax.f32 %v8737_v35, 0.0  ;;  %v8802_v51 = vmax.f32 %v8738_v57, 0.0  ;;  %v19967_v35 = vld [vmem:[#allocation38_spill] sm:$0xff]  ;;  %v8741_v40 = vadd.f32 %v17895_v22, %v18031_v38  ;;  %v8709_v30 = vadd.f32 %v17895_v22, %v17946_v54 }
 0xbf1   :  { %v8830_v9 = vadd.f32 %v8766_v61, %v19954_v58  ;;  %v19961_v58 = vld [vmem:[#allocation32_spill] sm:$0xff]  ;;  %v8726_v56 = vadd.f32 %v17895_v22, %v17993_v55  ;;  %v8742_v38 = vadd.f32 %v17895_v22, %v18034_v1  ;;  %v8710_v54 = vadd.f32 %v17895_v22, %v17949_v32 }
 0xbf2   :  { %8925 = vxpose.xlu1.b32.cont [4/16] (narrow) %v8845_v20, 32  ;;  %v19957_v20 = vld [vmem:[#allocation31_spill] sm:$0xff]  ;;  %v8727_v55 = vadd.f32 %v17895_v22, %v17996_v52  ;;  %v8743_v1 = vadd.f32 %v17895_v22, %v18037_v2  ;;  %v8711_v32 = vadd.f32 %v17895_v22, %v17952_v25  ;;  %v8728_v52 = vadd.f32 %v17895_v22, %v17999_v60 }
 0xbf3   :  { %v8831_v16 = vadd.f32 %v8767_v27, %v19957_v20  ;;  %v19963_v27 = vld [vmem:[#allocation37_spill] sm:$0xff]  ;;  %v8744_v2 = vadd.f32 %v17895_v22, %v18040_v8  ;;  %v8712_v25 = vadd.f32 %v17895_v22, %v17955_v5  ;;  %v8729_v60 = vadd.f32 %v17895_v22, %v18008_v45 }
 0xbf4   :  { %v8833_v37 = vadd.f32 %v8769_v43, %v19963_v27  ;;  %v19973_v27 = vld [vmem:[#allocation44_spill] sm:$0xff]  ;;  %v8745_v8 = vadd.f32 %v17895_v22, %v18043_v50  ;;  %v8713_v5 = vadd.f32 %v17895_v22, %v17958_v53 }
 0xbf5   :  { %8957 = vxpose.xlu0.b32.cont [4/16] (narrow) %v8861_v6, 32  ;;  %v19956_v6 = vld [vmem:[#allocation30_spill] sm:$0xff]  ;;  %v19987_v50 = vld [vmem:[#allocation60_spill] sm:$0xff] }
 0xbf6   :  { %8893 = vxpose.xlu2.b32.cont [4/16] (narrow) %v8829_v46, 32  ;;  %v8847_v24 = vadd.f32 %v8783_v18, %v19956_v6  ;;  %v8800_v46 = vmax.f32 %v8736_v4, 0.0  ;;  %v8786_v4 = vmax.f32 %v8722_v39, 0.0  ;;  %v19964_v6 = vld [vmem:[#allocation35_spill] sm:$0xff]  ;;  %v19971_v39 = vld [vmem:[#allocation45_spill] sm:$0xff] }
 0xbf8   :  { %v8864_v61 = vadd.f32 %v8800_v46, %v19958_v47  ;;  %v8850_v20 = vadd.f32 %v8786_v4, %v19965_v17  ;;  %v8803_v46 = vmax.f32 %v8739_v19, 0.0  ;;  %v19974_v4 = vld [vmem:[#allocation48_spill] sm:$0xff]  ;;  %v8790_v19 = vmax.f32 %v8726_v56, 0.0  ;;  %v19976_v17 = vld [vmem:[#allocation47_spill] sm:$0xff]  ;;  %v19988_v56 = vld [vmem:[#allocation61_spill] sm:$0xff] }
 0xbfa   :  { %8926 = vxpose.xlu1.b32.cont [5/16] (narrow) %v8846_v21, 32  ;;  %v8785_v21 = vmax.f32 %v8721_v11, 0.0  ;;  %v8771_v11 = vmax.f32 %v8707_v10, 0.0  ;;  %v8867_v47 = vadd.f32 %v8803_v46, %v19967_v35  ;;  %v19977_v10 = vld [vmem:[#allocation51_spill] sm:$0xff] }
 0xbfc   :  { %v8849_v18 = vadd.f32 %v8785_v21, %v19962_v49  ;;  %v19970_v21 = vld [vmem:[#allocation41_spill] sm:$0xff]  ;;  %v8805_v49 = vmax.f32 %v8741_v40, 0.0 }
 0xbfd   :  { %8958 = vxpose.xlu0.b32.cont [5/16] (narrow) %v8862_v42, 32  ;;  %v8832_v42 = vadd.f32 %v8768_v28, %v19960_v34  ;;  %v8787_v28 = vmax.f32 %v8723_v7, 0.0  ;;  %v8788_v34 = vmax.f32 %v8724_v23, 0.0  ;;  %v8775_v23 = vmax.f32 %v8711_v32, 0.0 }
 0xbfe   :  { %8894 = vxpose.xlu2.b32.cont [5/16] (narrow) %v8830_v9, 32  ;;  %v8865_v9 = vadd.f32 %v8801_v36, %v19961_v58  ;;  %v8772_v36 = vmax.f32 %v8708_v44, 0.0  ;;  %v19972_v58 = vld [vmem:[#allocation46_spill] sm:$0xff] }
 0xbff   :  { %v8852_v57 = vadd.f32 %v8788_v34, %v19971_v39  ;;  %v8776_v34 = vmax.f32 %v8712_v25, 0.0  ;;  %v8809_v39 = vmax.f32 %v8745_v8, 0.0  ;;  %v19999_v25 = vld [vmem:[#allocation204_spill] sm:$0xff]  ;;  %v20002_v8 = vld [vmem:[#allocation71_spill] sm:$0xff] }
 0xc02   :  { %8927 = vxpose.xlu1.b32.cont [6/16] (narrow) %v8847_v24, 32  ;;  %v8866_v24 = vadd.f32 %v8802_v51, %v19964_v6  ;;  %v8806_v6 = vmax.f32 %v8742_v38, 0.0 }
 0xc05   :  { %8959 = vxpose.xlu0.b32.cont [6/16] (narrow) %v8863_v12, 32  ;;  %v8770_v12 = vmax.f32 %v8706_v31, 0.0  ;;  %v8773_v31 = vmax.f32 %v8709_v30, 0.0  ;;  %v8777_v30 = vmax.f32 %v8713_v5, 0.0  ;;  %v20004_v5 = vld [vmem:[#allocation72_spill] sm:$0xff] }
 0xc06   :  { %8895 = vxpose.xlu2.b32.cont [6/16] (narrow) %v8831_v16, 32  ;;  %v19966_v16 = vld [vmem:[#allocation40_spill] sm:$0xff] }
 0xc07   :  { %v8834_v29 = vadd.f32 %v8770_v12, %v19966_v16  ;;  %v19975_v12 = vld [vmem:[#allocation49_spill] sm:$0xff]  ;;  %v8854_v16 = vadd.f32 %v8790_v19, %v19977_v10  ;;  %v8749_v19 = vadd.f32 %v17895_v22, %v18055_v0  ;;  %v8752_v0 = vadd.f32 %v17895_v22, %v18064_v33 }
 0xc08   :  { %v8837_v7 = vadd.f32 %v8773_v31, %v19975_v12  ;;  %v8746_v31 = vadd.f32 %v17895_v22, %v18046_v59  ;;  %v8755_v33 = vadd.f32 %v17895_v22, %v19999_v25 }
 0xc0a   :  { %8928 = vxpose.xlu1.b32.cont [7/16] (narrow) %v8848_v63, 32  ;;  %v19969_v63 = vld [vmem:[#allocation43_spill] sm:$0xff]  ;;  %v8810_v53 = vmax.f32 %v8746_v31, 0.0 }
 0xc0b   :  { %v8835_v14 = vadd.f32 %v8771_v11, %v19969_v63  ;;  %v8791_v11 = vmax.f32 %v8727_v55, 0.0  ;;  %v8792_v63 = vmax.f32 %v8728_v52, 0.0  ;;  %v19996_v52 = vld [vmem:[#allocation68_spill] sm:$0xff] }
 0xc0c   :  { %v8874_v38 = vadd.f32 %v8810_v53, %v19988_v56  ;;  %v20008_v56 = vld [vmem:[#allocation74_spill] sm:$0xff] }
 0xc0d   :  { %8960 = vxpose.xlu0.b32.cont [7/16] (narrow) %v8864_v61, 32  ;;  %v19968_v61 = vld [vmem:[#allocation42_spill] sm:$0xff] }
 0xc0e   :  { %8896 = vxpose.xlu2.b32.cont [7/16] (narrow) %v8832_v42, 32  ;;  %v8851_v41 = vadd.f32 %v8787_v28, %v19968_v61  ;;  %v8804_v42 = vmax.f32 %v8740_v15, 0.0  ;;  %v8807_v28 = vmax.f32 %v8743_v1, 0.0  ;;  %v19979_v15 = vld [vmem:[#allocation50_spill] sm:$0xff] }
 0xc10   :  { %v8868_v43 = vadd.f32 %v8804_v42, %v19970_v21  ;;  %v8871_v35 = vadd.f32 %v8807_v28, %v19979_v15  ;;  %v19982_v42 = vld [vmem:[#allocation53_spill] sm:$0xff]  ;;  %v19984_v21 = vld [vmem:[#allocation58_spill] sm:$0xff]  ;;  %v19997_v15 = vld [vmem:[#allocation144_spill] sm:$0xff] }
 0xc12   :  { %8929 = vxpose.xlu1.b32.cont [8/16] (narrow) %v8849_v18, 32  ;;  %v8789_v18 = vmax.f32 %v8725_v26, 0.0  ;;  %v19983_v26 = vld [vmem:[#allocation57_spill] sm:$0xff] }
 0xc13   :  { %v8856_v40 = vadd.f32 %v8792_v63, %v19983_v26 }
 0xc14   :  { %v8853_v51 = vadd.f32 %v8789_v18, %v19974_v4  ;;  %v8841_v18 = vadd.f32 %v8777_v30, %v19987_v50  ;;  %v19989_v4 = vld [vmem:[#allocation62_spill] sm:$0xff]  ;;  %v20007_v50 = vld [vmem:[#allocation193_spill] sm:$0xff] }
 0xc15   :  { %8961 = vxpose.xlu0.b32.cont [8/16] (narrow) %v8865_v9, 32  ;;  %v8836_v9 = vadd.f32 %v8772_v36, %v19972_v58  ;;  %v19985_v58 = vld [vmem:[#allocation56_spill] sm:$0xff] }
 0xc16   :  { %8897 = vxpose.xlu2.b32.cont [8/16] (narrow) %v8833_v37, 32  ;;  %v8869_v37 = vadd.f32 %v8805_v49, %v19973_v27  ;;  %v8873_v45 = vadd.f32 %v8809_v39, %v19985_v58  ;;  %v8747_v27 = vadd.f32 %v17895_v22, %v18049_v62  ;;  %v8750_v62 = vadd.f32 %v17895_v22, %v18058_v48 }
 0xc18   :  { %v8814_v1 = vmax.f32 %v8750_v62, 0.0 }
 0xc1a   :  { %8930 = vxpose.xlu1.b32.cont [9/16] (narrow) %v8850_v20, 32  ;;  %v8870_v20 = vadd.f32 %v8806_v6, %v19976_v17  ;;  %v8813_v6 = vmax.f32 %v8749_v19, 0.0  ;;  %v19992_v17 = vld [vmem:[#allocation65_spill] sm:$0xff] }
 0xc1d   :  { %8962 = vxpose.xlu0.b32.cont [9/16] (narrow) %v8866_v24, 32  ;;  %v8774_v24 = vmax.f32 %v8710_v54, 0.0  ;;  %v8748_v54 = vadd.f32 %v17895_v22, %v18052_v13  ;;  %v8751_v13 = vadd.f32 %v17895_v22, %v18061_v3  ;;  %v8754_v3 = vadd.f32 %v17895_v22, %v19997_v15 }
 0xc1e   :  { %8898 = vxpose.xlu2.b32.cont [9/16] (narrow) %v8834_v29, 32  ;;  %v19978_v29 = vld [vmem:[#allocation52_spill] sm:$0xff] }
 0xc1f   :  { %v8838_v46 = vadd.f32 %v8774_v24, %v19978_v29  ;;  %v8812_v12 = vmax.f32 %v8748_v54, 0.0  ;;  %v19991_v24 = vld [vmem:[#allocation64_spill] sm:$0xff]  ;;  %v8815_v10 = vmax.f32 %v8751_v13, 0.0  ;;  %v8816_v29 = vmax.f32 %v8752_v0, 0.0  ;;  %v20010_v54 = vld [vmem:[#allocation75_spill] sm:$0xff] }
 0xc20   :  { %v8877_v55 = vadd.f32 %v8813_v6, %v19991_v24  ;;  %v20012_v24 = vld [vmem:[#allocation76_spill] sm:$0xff] }
 0xc22   :  { %8931 = vxpose.xlu1.b32.cont [10/16] (narrow) %v8851_v41, 32  ;;  %v19981_v41 = vld [vmem:[#allocation55_spill] sm:$0xff] }
 0xc23   :  { %v8839_v44 = vadd.f32 %v8775_v23, %v19981_v41  ;;  %v8819_v41 = vmax.f32 %v8755_v33, 0.0 }
 0xc25   :  { %8963 = vxpose.xlu0.b32.cont [10/16] (narrow) %v8867_v47, 32  ;;  %v19980_v47 = vld [vmem:[#allocation54_spill] sm:$0xff] }
 0xc26   :  { %8899 = vxpose.xlu2.b32.cont [10/16] (narrow) %v8835_v14, 32  ;;  %v8855_v61 = vadd.f32 %v8791_v11, %v19980_v47  ;;  %v8808_v14 = vmax.f32 %v8744_v2, 0.0  ;;  %v19995_v11 = vld [vmem:[#allocation169_spill] sm:$0xff] }
 0xc27   :  { %v8753_v48 = vadd.f32 %v17895_v22, %v19995_v11  ;;  %v19998_v47 = vld [vmem:[#allocation69_spill] sm:$0xff] }
 0xc28   :  { %v8872_v36 = vadd.f32 %v8808_v14, %v19982_v42  ;;  %v20001_v14 = vld [vmem:[#allocation211_spill] sm:$0xff] }
 0xc29   :  { %v8817_v23 = vmax.f32 %v8753_v48, 0.0 }
 0xc2a   :  { %8932 = vxpose.xlu1.b32.cont [11/16] (narrow) %v8852_v57, 32  ;;  %v8793_v57 = vmax.f32 %v8729_v60, 0.0 }
 0xc2b   :  { %v8881_v2 = vadd.f32 %v8817_v23, %v19996_v52 }
 0xc2d   :  { %8964 = vxpose.xlu0.b32.cont [11/16] (narrow) %v8868_v43, 32  ;;  %v8840_v43 = vadd.f32 %v8776_v34, %v19984_v21  ;;  %v8756_v34 = vadd.f32 %v17895_v22, %v20001_v14 }
 0xc2e   :  { %8900 = vxpose.xlu2.b32.cont [11/16] (narrow) %v8836_v9, 32  ;;  %v19986_v9 = vld [vmem:[#allocation59_spill] sm:$0xff] }
 0xc2f   :  { %v8857_v49 = vadd.f32 %v8793_v57, %v19986_v9  ;;  %v8820_v60 = vmax.f32 %v8756_v34, 0.0  ;;  %v20006_v9 = vld [vmem:[#allocation73_spill] sm:$0xff] }
 0xc31   :  { %v8884_v42 = vadd.f32 %v8820_v60, %v20002_v8 }
 0xc32   :  { %8933 = vxpose.xlu1.b32.cont [12/16] (narrow) %v8853_v51, 32 }
 0xc35   :  { %8965 = vxpose.xlu0.b32.cont [12/16] (narrow) %v8869_v37, 32  ;;  %v8811_v37 = vmax.f32 %v8747_v27, 0.0  ;;  %v20009_v27 = vld [vmem:[#allocation92_spill] sm:$0xff] }
 0xc36   :  { %8901 = vxpose.xlu2.b32.cont [12/16] (narrow) %v8837_v7, 32  ;;  %v19990_v7 = vld [vmem:[#allocation63_spill] sm:$0xff] }
 0xc37   :  { %v8875_v51 = vadd.f32 %v8811_v37, %v19989_v4  ;;  %v8876_v59 = vadd.f32 %v8812_v12, %v19990_v7  ;;  %v8760_v37 = vadd.f32 %v17895_v22, %v20009_v27  ;;  %v20011_v7 = vld [vmem:[#allocation93_spill] sm:$0xff] }
 0xc3a   :  { %8934 = vxpose.xlu1.b32.cont [13/16] (narrow) %v8854_v16, 32  ;;  %v19993_v16 = vld [vmem:[#allocation66_spill] sm:$0xff] }
 0xc3b   :  { %v8879_v32 = vadd.f32 %v8815_v10, %v19993_v16 }
 0xc3d   :  { %8966 = vxpose.xlu0.b32.cont [13/16] (narrow) %v8870_v20, 32  ;;  %v8878_v20 = vadd.f32 %v8814_v1, %v19992_v17 }
 0xc3e   :  { %8902 = vxpose.xlu2.b32.cont [13/16] (narrow) %v8838_v46, 32  ;;  %v19994_v46 = vld [vmem:[#allocation67_spill] sm:$0xff] }
 0xc3f   :  { %v8880_v28 = vadd.f32 %v8816_v29, %v19994_v46 }
 0xc42   :  { %8935 = vxpose.xlu1.b32.cont [14/16] (narrow) %v8855_v61, 32 }
 0xc45   :  { %8967 = vxpose.xlu0.b32.cont [14/16] (narrow) %v8871_v35, 32  ;;  %v8818_v35 = vmax.f32 %v8754_v3, 0.0 }
 0xc46   :  { %8903 = vxpose.xlu2.b32.cont [14/16] (narrow) %v8839_v44, 32  ;;  %v20000_v44 = vld [vmem:[#allocation70_spill] sm:$0xff] }
 0xc47   :  { %v8882_v61 = vadd.f32 %v8818_v35, %v19998_v47  ;;  %v8883_v63 = vadd.f32 %v8819_v41, %v20000_v44 }
 0xc4a   :  { %8936 = vxpose.xlu1.b32.cont [15/16] (narrow) %v8856_v40, 32 }
 0xc4d   :  { %8968 = vxpose.xlu0.b32.cont [15/16] (narrow) %v8872_v36, 32  ;;  %v20003_v36 = vld [vmem:[#allocation157_spill] sm:$0xff] }
 0xc4e   :  { %8904 = vxpose.xlu2.b32.cont [15/16] (narrow) %v8840_v43, 32  ;;  %v8757_v26 = vadd.f32 %v17895_v22, %v20003_v36  ;;  %v20005_v43 = vld [vmem:[#allocation146_spill] sm:$0xff] }
 0xc4f   :  { %v8758_v39 = vadd.f32 %v17895_v22, %v20005_v43 }
 0xc50   :  { %v8821_v40 = vmax.f32 %v8757_v26, 0.0 }
 0xc52   :  { %8937 = vxpose.xlu1.b32.end [16/16] (narrow) %v8857_v49, 32  ;;  %v8885_v21 = vadd.f32 %v8821_v40, %v20004_v5 }
 0xc55   :  { %8969 = vxpose.xlu0.b32.end [16/16] (narrow) %v8873_v45, 32  ;;  %v8822_v45 = vmax.f32 %v8758_v39, 0.0 }
 0xc56   :  { %8905 = vxpose.xlu2.b32.end [16/16] (narrow) %v8841_v18, 32  ;;  %v8759_v18 = vadd.f32 %v17895_v22, %v20007_v50 }
 0xc57   :  { %v8886_v49 = vadd.f32 %v8822_v45, %v20006_v9 }
 0xc58   :  { %v8823_v53 = vmax.f32 %v8759_v18, 0.0 }
 0xc5e   :  { %8986 = vxpose.xlu2.b32.start [1/16] (narrow) %v8874_v38, 32  ;;  %v8887_v38 = vadd.f32 %v8823_v53, %v20008_v56 }
 0xc66   :  { %8987 = vxpose.xlu2.b32.cont [2/16] (narrow) %v8875_v51, 32  ;;  %v8824_v51 = vmax.f32 %v8760_v37, 0.0 }
 0xc68   :  { %v8888_v12 = vadd.f32 %v8824_v51, %v20010_v54 }
 0xc6e   :  { %8988 = vxpose.xlu2.b32.cont [3/16] (narrow) %v8876_v59, 32  ;;  %v8761_v59 = vadd.f32 %v17895_v22, %v20011_v7 }
 0xc70   :  { %v8825_v6 = vmax.f32 %v8761_v59, 0.0 }
 0xc76   :  { %8989 = vxpose.xlu2.b32.cont [4/16] (narrow) %v8877_v55, 32  ;;  %v8889_v55 = vadd.f32 %v8825_v6, %v20012_v24 }
 0xc77   :  { %v8906_v57 = vpop.trf.xlu2 }
 0xc78   :  { %9018 = vst [vmem:[#allocation9] sm:$0xff] %v8906_v57 }
 0xc7e   :  { %8990 = vxpose.xlu2.b32.cont [5/16] (narrow) %v8878_v20, 32  ;;  %v8938_v58 = vpop.trf.xlu1 }
 0xc7f   :  { %9019 = vst [vmem:[#allocation9 + $0x8] sm:$0xff] %v8938_v58  ;;  %v8907_v31 = vpop.trf.xlu2 }
 0xc80   :  { %9020 = vst [vmem:[#allocation9 + $0x10] sm:$0xff] %v8907_v31 }
 0xc81   :  { %v8970_v30 = vpop.trf.xlu0 }
 0xc82   :  { %9026 = vst [vmem:[#allocation9 + $0x40] sm:$0xff] %v8970_v30 }
 0xc86   :  { %8991 = vxpose.xlu2.b32.cont [6/16] (narrow) %v8879_v32, 32  ;;  %v8939_v1 = vpop.trf.xlu1 }
 0xc87   :  { %v8908_v4 = vpop.trf.xlu2  ;;  %9021 = vst [vmem:[#allocation9 + $0x18] sm:$0xff] %v8939_v1 }
 0xc88   :  { %9022 = vst [vmem:[#allocation9 + $0x20] sm:$0xff] %v8908_v4 }
 0xc89   :  { %v8971_v62 = vpop.trf.xlu0 }
 0xc8a   :  { %9028 = vst [vmem:[#allocation9 + $0x50] sm:$0xff] %v8971_v62 }
 0xc8e   :  { %8992 = vxpose.xlu2.b32.cont [7/16] (narrow) %v8880_v28, 32  ;;  %v8940_v20 = vpop.trf.xlu1 }
 0xc8f   :  { %v8909_v19 = vpop.trf.xlu2  ;;  %9023 = vst [vmem:[#allocation9 + $0x28] sm:$0xff] %v8940_v20 }
 0xc90   :  { %9024 = vst [vmem:[#allocation9 + $0x30] sm:$0xff] %v8909_v19 }
 0xc91   :  { %v8972_v17 = vpop.trf.xlu0 }
 0xc92   :  { %9030 = vst [vmem:[#allocation9 + $0x60] sm:$0xff] %v8972_v17 }
 0xc96   :  { %8993 = vxpose.xlu2.b32.cont [8/16] (narrow) %v8881_v2, 32  ;;  %v8941_v10 = vpop.trf.xlu1 }
 0xc97   :  { %9025 = vst [vmem:[#allocation9 + $0x38] sm:$0xff] %v8941_v10 }
 0xc99   :  { %v8973_v13 = vpop.trf.xlu0 }
 0xc9a   :  { %9032 = vst [vmem:[#allocation9 + $0x70] sm:$0xff] %v8973_v13 }
 0xc9e   :  { %8994 = vxpose.xlu2.b32.cont [9/16] (narrow) %v8882_v61, 32 }
 0xca6   :  { %8995 = vxpose.xlu2.b32.cont [10/16] (narrow) %v8883_v63, 32 }
 0xcae   :  { %8996 = vxpose.xlu2.b32.cont [11/16] (narrow) %v8884_v42, 32 }
 0xcb6   :  { %8997 = vxpose.xlu2.b32.cont [12/16] (narrow) %v8885_v21, 32 }
 0xcbe   :  { %8998 = vxpose.xlu2.b32.cont [13/16] (narrow) %v8886_v49, 32 }
 0xcc6   :  { %8999 = vxpose.xlu2.b32.cont [14/16] (narrow) %v8887_v38, 32 }
 0xcce   :  { %9000 = vxpose.xlu2.b32.cont [15/16] (narrow) %v8888_v12, 32 }
 0xcd6   :  { %9001 = vxpose.xlu2.b32.end [16/16] (narrow) %v8889_v55, 32 }
 0xcf7   :  { %v9002_v22 = vpop.trf.xlu2 }
 0xcf8   :  { %9027 = vst [vmem:[#allocation9 + $0x48] sm:$0xff] %v9002_v22 }
 0xcff   :  { %v9003_v16 = vpop.trf.xlu2 }
 0xd00   :  { %9029 = vst [vmem:[#allocation9 + $0x58] sm:$0xff] %v9003_v16 }
 0xd07   :  { %v9004_v32 = vpop.trf.xlu2 }
 0xd08   :  { %9031 = vst [vmem:[#allocation9 + $0x68] sm:$0xff] %v9004_v32 }
 0xd0f   :  { %v9005_v0 = vpop.trf.xlu2 }
 0xd10   :  { %9033 = vst [vmem:[#allocation9 + $0x78] sm:$0xff] %v9005_v0 }
 0xd11   :  { %9046 = dma.vmem_to_hbm [thread:$0]  %s9039_s21, 2048, %s9041_s30, [#allocation5], %s9956_s22, %s9956_s22, %s9951_s28  }
 0xd12   :  { %9909 = dma.done.wait [#allocation5], 2048  }
 0xd13   :  { %9910 = vsyncadd [#allocation5], 4294965248 }
 0xd14   :  { %9051 = vsyncpa [#allocation4], 1 }
 0xd15   :  { %9052 = vsyncpa [#allocation7], 1 }
 0xd16   :  { %9053 = vsyncpa [#allocation5], 1 }

</bundles_post_ra>
